<compile_context>
chip_gen: v5e
topology: v5e:2x2
jax: 0.10.0
libtpu: 0.0.40
codegen_flags: <defaults>
</compile_context>

<pallas_src>
import functools

import jax
import jax.numpy as jnp
from jax.experimental import pallas as pl
from jax.experimental.pallas import tpu as pltpu


def _round_up(x, m):
    return (x + m - 1) // m * m


# ----------------------------- tiled GEMM -----------------------------------

def _gemm_kernel(a_ref, b_ref, bias_ref, o_ref, acc_ref, *, act_a, act_out):
    k = pl.program_id(2)

    @pl.when(k == 0)
    def _():
        acc_ref[...] = jnp.zeros_like(acc_ref)

    a = a_ref[...]
    if act_a == "lrelu":                 # LeakyReLU(0.2) fused on the A tile
        a = jnp.where(a >= 0, a, a * 0.2)
    elif act_a == "relu":
        a = jnp.maximum(a, 0)

    acc_ref[...] += jnp.dot(a, b_ref[...], preferred_element_type=jnp.float32)

    @pl.when(k == pl.num_programs(2) - 1)
    def _():
        out = acc_ref[...] + bias_ref[...]
        if act_out == "tanh":
            out = jnp.tanh(out)
        o_ref[...] = out.astype(o_ref.dtype)


def matmul_bias(a, b, bias, act_a=None, act_out=None):
    """(M,K)@(K,N)+bias with optional fused input/output activation.

    A and B are fed to the MXU as bf16, accumulation is f32 in VMEM scratch."""
    M, K = a.shape
    N = b.shape[1]
    tm = min(512, _round_up(M, 16))
    tn = min(256, _round_up(N, 128))
    tk = min(512, _round_up(K, 128))
    Mp, Kp, Np = _round_up(M, tm), _round_up(K, tk), _round_up(N, tn)
    ap = jnp.pad(a, ((0, Mp - M), (0, Kp - K))).astype(jnp.bfloat16)
    bp = jnp.pad(b, ((0, Kp - K), (0, Np - N))).astype(jnp.bfloat16)
    biasp = jnp.pad(bias.astype(jnp.float32), (0, Np - N)).reshape(1, Np)
    grid = (Mp // tm, Np // tn, Kp // tk)
    cost = pl.CostEstimate(
        flops=2 * M * N * K,
        transcendentals=M * N if act_out == "tanh" else 0,
        bytes_accessed=2 * (M * K + K * N) + 4 * (M * N + N))
    out = pl.pallas_call(
        functools.partial(_gemm_kernel, act_a=act_a, act_out=act_out),
        out_shape=jax.ShapeDtypeStruct((Mp, Np), jnp.float32),
        grid=grid,
        in_specs=[
            pl.BlockSpec((tm, tk), lambda i, j, k: (i, k)),
            pl.BlockSpec((tk, tn), lambda i, j, k: (k, j)),
            pl.BlockSpec((1, tn), lambda i, j, k: (0, j)),
        ],
        out_specs=pl.BlockSpec((tm, tn), lambda i, j, k: (i, j)),
        scratch_shapes=[pltpu.VMEM((tm, tn), jnp.float32)],
        compiler_params=pltpu.CompilerParams(
            dimension_semantics=("parallel", "parallel", "arbitrary"),
            vmem_limit_bytes=32 * 1024 * 1024),
        cost_estimate=cost,
    )(ap, bp, biasp)
    return out[:M, :N]


# ------------------------------ BatchNorm ------------------------------------

def _bn_stats_kernel(x_ref, sum_ref, sq_ref):
    @pl.when(pl.program_id(0) == 0)
    def _():
        sum_ref[...] = jnp.zeros_like(sum_ref)
        sq_ref[...] = jnp.zeros_like(sq_ref)
    x = x_ref[...]
    # padded rows are zeros -> sums are exact; broadcast result across 8 sublanes
    sum_ref[...] += jnp.sum(x, axis=0, keepdims=True)
    sq_ref[...] += jnp.sum(x * x, axis=0, keepdims=True)


def _bn_apply_kernel(x_ref, scale_ref, shift_ref, o_ref):
    o_ref[...] = x_ref[...] * scale_ref[...] + shift_ref[...]


def batchnorm2d(x, w, b, eps=1e-5):
    # training-mode BatchNorm2d (batch statistics), NHWC input.
    # TODO(synk): eval-mode (running stats) variant is not implemented.
    N, H, W, C = x.shape
    L = N * H * W
    Cp = _round_up(C, 128)
    tl = min(1024, _round_up(L, 8))
    Lp = _round_up(L, tl)
    xr = jnp.pad(x.reshape(L, C), ((0, Lp - L), (0, Cp - C)))
    s, sq = pl.pallas_call(
        _bn_stats_kernel,
        out_shape=(jax.ShapeDtypeStruct((8, Cp), jnp.float32),
                   jax.ShapeDtypeStruct((8, Cp), jnp.float32)),
        grid=(Lp // tl,),
        in_specs=[pl.BlockSpec((tl, Cp), lambda i: (i, 0))],
        out_specs=(pl.BlockSpec((8, Cp), lambda i: (0, 0)),
                   pl.BlockSpec((8, Cp), lambda i: (0, 0))),
        compiler_params=pltpu.CompilerParams(dimension_semantics=("arbitrary",)),
    )(xr)
    mean = s[0] / L
    var = jnp.maximum(sq[0] / L - mean * mean, 0.0)      # biased var, like torch BN
    scale = jnp.pad(w, (0, Cp - C)) * jax.lax.rsqrt(var + eps)
    shift = jnp.pad(b, (0, Cp - C)) - mean * scale
    out = pl.pallas_call(
        _bn_apply_kernel,
        out_shape=jax.ShapeDtypeStruct((Lp, Cp), jnp.float32),
        grid=(Lp // tl,),
        in_specs=[pl.BlockSpec((tl, Cp), lambda i: (i, 0)),
                  pl.BlockSpec((1, Cp), lambda i: (0, 0)),
                  pl.BlockSpec((1, Cp), lambda i: (0, 0))],
        out_specs=pl.BlockSpec((tl, Cp), lambda i: (i, 0)),
        compiler_params=pltpu.CompilerParams(dimension_semantics=("parallel",)),
    )(xr, scale.reshape(1, Cp), shift.reshape(1, Cp))
    return out[:L, :C].reshape(N, H, W, C)


# ------------------------------ SBA attention ---------------------------------

def _sba_kernel(x_ref, wq_ref, bq_ref, wk_ref, bk_ref, wv_ref, bv_ref,
                g_ref, o_ref):
    x = x_ref[0]                                                    # (HW, C)
    q = jnp.dot(x, wq_ref[...], preferred_element_type=jnp.float32) + bq_ref[...]
    k = jnp.dot(x, wk_ref[...], preferred_element_type=jnp.float32) + bk_ref[...]
    v = jnp.dot(x, wv_ref[...], preferred_element_type=jnp.float32) + bv_ref[...]
    # energy[i, j] = sum_c q[i, c] * k[j, c]    (== torch bmm(q^T, k))
    energy = jax.lax.dot_general(q, k, (((1,), (1,)), ((), ())),
                                 preferred_element_type=jnp.float32)
    energy = energy - jnp.max(energy, axis=-1, keepdims=True)
    p = jnp.exp(energy)
    att = p * pl.reciprocal(jnp.sum(p, axis=-1, keepdims=True), approx=True)
    out = jnp.dot(att, v, preferred_element_type=jnp.float32)       # (HW, C)
    o_ref[0] = g_ref[0] * out + x


def sba_block(x, p):
    # TODO(synk): for large HW (e.g. 256x256 inputs) tile the softmax flash-style
    # over the key axis instead of holding the full (HW, HW) energy block in VMEM.
    N, H, W, C = x.shape
    HW = H * W
    xf = x.reshape(N, HW, C)
    Cr = p["wq"].shape[0]
    out = pl.pallas_call(
        _sba_kernel,
        out_shape=jax.ShapeDtypeStruct((N, HW, C), jnp.float32),
        grid=(N,),
        in_specs=[
            pl.BlockSpec((1, HW, C), lambda b: (b, 0, 0)),
            pl.BlockSpec((C, Cr), lambda b: (0, 0)),
            pl.BlockSpec((1, Cr), lambda b: (0, 0)),
            pl.BlockSpec((C, Cr), lambda b: (0, 0)),
            pl.BlockSpec((1, Cr), lambda b: (0, 0)),
            pl.BlockSpec((C, C), lambda b: (0, 0)),
            pl.BlockSpec((1, C), lambda b: (0, 0)),
            pl.BlockSpec(memory_space=pltpu.MemorySpace.SMEM),      # gamma scalar
        ],
        out_specs=pl.BlockSpec((1, HW, C), lambda b: (b, 0, 0)),
        compiler_params=pltpu.CompilerParams(dimension_semantics=("parallel",)),
    )(xf, p["wq"].T, p["bq"].reshape(1, Cr), p["wk"].T, p["bk"].reshape(1, Cr),
      p["wv"].T, p["bv"].reshape(1, C), p["gamma"])
    return out.reshape(N, H, W, C)


# ------------------------------ conv wrappers ---------------------------------

def _im2col_nhwc(x, k, s, pad):
    # TODO(synk): patches are still materialized in HBM; an in-kernel gather
    # (memory_space=pl.ANY + manual DMA) would remove this extra traffic.
    N, H, W, C = x.shape
    if pad:
        x = jnp.pad(x, ((0, 0), (pad, pad), (pad, pad), (0, 0)))
    OH = (H + 2 * pad - k) // s + 1
    OW = (W + 2 * pad - k) // s + 1
    cols = []
    for ki in range(k):
        for kj in range(k):
            cols.append(x[:, ki:ki + s * OH:s, kj:kj + s * OW:s, :])
    patches = jnp.stack(cols, axis=3)                  # (N, OH, OW, k*k, C)
    return patches.reshape(N * OH * OW, k * k * C), OH, OW


def conv4x4_s2(x, w, b=None, act_in=None):
    # Conv2d(Cin, Cout, kernel_size=4, stride=2, padding=1); w: (Cout, Cin, 4, 4)
    # act_in (LeakyReLU/ReLU of the preceding layer) is fused inside the GEMM.
    Cout, Cin = w.shape[0], w.shape[1]
    if b is None:
        b = jnp.zeros((Cout,), jnp.float32)
    A, OH, OW = _im2col_nhwc(x, 4, 2, 1)
    Wm = w.transpose(2, 3, 1, 0).reshape(16 * Cin, Cout)   # rows = (kh, kw, ci)
    out = matmul_bias(A, Wm, b, act_a=act_in)
    return out.reshape(x.shape[0], OH, OW, Cout)


def convT4x4_s2(x, w, b=None, act_in=None, act_out=None):
    # ConvTranspose2d(Cin, Cout, kernel_size=4, stride=2, padding=1);
    # w: (Cin, Cout, 4, 4).  Sub-pixel decomposition: each output parity (a, c)
    # is a stride-1 2x2 conv of the pad-1 input with a 2x2 sub-kernel -> one GEMM
    # with no dilation zeros (4x fewer MXU FLOPs than the dilated-input form).
    Cin, Cout = w.shape[0], w.shape[1]
    if b is None:
        b = jnp.zeros((Cout,), jnp.float32)
    N, H, W, _ = x.shape
    wf = jnp.flip(w, axis=(2, 3)).transpose(1, 0, 2, 3)       # (Cout, Cin, 4, 4)
    cols = []
    for a in range(2):
        for c in range(2):
            sub = wf[:, :, a::2, c::2]                        # (Cout, Cin, 2, 2)
            cols.append(sub.transpose(2, 3, 1, 0).reshape(4 * Cin, Cout))
    Wc = jnp.concatenate(cols, axis=1)                         # (4*Cin, 4*Cout)
    bias4 = jnp.tile(b, 4)
    xp = jnp.pad(x, ((0, 0), (1, 1), (1, 1), (0, 0)))
    A, _, _ = _im2col_nhwc(xp, 2, 1, 0)                        # anchors (H+1, W+1)
    res = matmul_bias(A, Wc, bias4, act_a=act_in, act_out=act_out)
    res = res.reshape(N, H + 1, W + 1, 4, Cout)
    ee = res[:, 0:H, 0:W, 0]                                   # even rows, even cols
    eo = res[:, 0:H, 1:W + 1, 1]                               # even rows, odd cols
    oe = res[:, 1:H + 1, 0:W, 2]                               # odd rows, even cols
    oo = res[:, 1:H + 1, 1:W + 1, 3]                           # odd rows, odd cols
    top = jnp.stack([ee, eo], axis=3).reshape(N, H, 2 * W, Cout)
    bot = jnp.stack([oe, oo], axis=3).reshape(N, H, 2 * W, Cout)
    return jnp.stack([top, bot], axis=2).reshape(N, 2 * H, 2 * W, Cout)


# ------------------------------ parameters ------------------------------------

def init_params(key, input_nc, output_nc, ngf):
    keys = iter(jax.random.split(key, 64))

    def rnd(shape, scale=0.05):
        return scale * jax.random.normal(next(keys), shape, jnp.float32)

    def bn(c):
        return jnp.ones((c,), jnp.float32), jnp.zeros((c,), jnp.float32)

    P = {}
    # down path (downconvs bias=False because norm_layer is BatchNorm2d)
    P["d5_w"] = rnd((ngf, input_nc, 4, 4))                  # outermost downconv
    P["d4_w"] = rnd((2 * ngf, ngf, 4, 4)); P["d4_bn_w"], P["d4_bn_b"] = bn(2 * ngf)
    P["d3_w"] = rnd((4 * ngf, 2 * ngf, 4, 4)); P["d3_bn_w"], P["d3_bn_b"] = bn(4 * ngf)
    P["d2_w"] = rnd((8 * ngf, 4 * ngf, 4, 4)); P["d2_bn_w"], P["d2_bn_b"] = bn(8 * ngf)
    P["d1_w"] = rnd((8 * ngf, 8 * ngf, 4, 4))               # innermost downconv
    # up path (ConvTranspose2d weights are (Cin, Cout, 4, 4))
    P["u1_w"] = rnd((8 * ngf, 8 * ngf, 4, 4)); P["u1_bn_w"], P["u1_bn_b"] = bn(8 * ngf)
    P["u2_w"] = rnd((16 * ngf, 4 * ngf, 4, 4)); P["u2_bn_w"], P["u2_bn_b"] = bn(4 * ngf)
    P["u3_w"] = rnd((8 * ngf, 2 * ngf, 4, 4)); P["u3_bn_w"], P["u3_bn_b"] = bn(2 * ngf)
    P["u4_w"] = rnd((4 * ngf, ngf, 4, 4)); P["u4_bn_w"], P["u4_bn_b"] = bn(ngf)
    P["u5_w"] = rnd((2 * ngf, output_nc, 4, 4)); P["u5_b"] = rnd((output_nc,))

    def sba_params(C, r):
        Cr = C // r
        return {
            "wq": rnd((Cr, C)), "bq": rnd((Cr,)),
            "wk": rnd((Cr, C)), "bk": rnd((Cr,)),
            "wv": rnd((C, C)), "bv": rnd((C,)),
            "gamma": jnp.zeros((1,), jnp.float32),    # matches PyTorch zeros init
        }

    P["att1"] = sba_params(4 * ngf, 8)
    P["att2"] = sba_params(4 * ngf, 8)
    return P


# ------------------------------ full forward ----------------------------------

def unet_forward(x_nchw, P):
    x = x_nchw.transpose(0, 2, 3, 1)                                 # NCHW -> NHWC
    # ---- encoder ----
    d5 = conv4x4_s2(x, P["d5_w"])                                    # H/2
    d4 = batchnorm2d(conv4x4_s2(d5, P["d4_w"], act_in="lrelu"),
                     P["d4_bn_w"], P["d4_bn_b"])                     # H/4
    d3 = batchnorm2d(conv4x4_s2(d4, P["d3_w"], act_in="lrelu"),
                     P["d3_bn_w"], P["d3_bn_b"])                     # H/8
    a1 = sba_block(d3, P["att1"])                                    # SBA before down
    d2 = batchnorm2d(conv4x4_s2(a1, P["d2_w"], act_in="lrelu"),
                     P["d2_bn_w"], P["d2_bn_b"])                     # H/16
    d1 = conv4x4_s2(d2, P["d1_w"], act_in="lrelu")                   # H/32 (innermost)
    # ---- innermost up ----
    u1 = batchnorm2d(convT4x4_s2(d1, P["u1_w"], act_in="relu"),
                     P["u1_bn_w"], P["u1_bn_b"])
    c1 = jnp.concatenate([d2, u1], axis=-1)
    # ---- block2 up (with attention after upnorm) ----
    u2 = batchnorm2d(convT4x4_s2(c1, P["u2_w"], act_in="relu"),
                     P["u2_bn_w"], P["u2_bn_b"])
    a2 = sba_block(u2, P["att2"])
    c2 = jnp.concatenate([d3, a2], axis=-1)
    # ---- block3 up ----
    u3 = batchnorm2d(convT4x4_s2(c2, P["u3_w"], act_in="relu"),
                     P["u3_bn_w"], P["u3_bn_b"])
    c3 = jnp.concatenate([d4, u3], axis=-1)
    # ---- block4 up ----
    u4 = batchnorm2d(convT4x4_s2(c3, P["u4_w"], act_in="relu"),
                     P["u4_bn_w"], P["u4_bn_b"])
    c4 = jnp.concatenate([d5, u4], axis=-1)
    # ---- outermost up (ReLU fused on input, Tanh fused in GEMM epilogue) ----
    u5 = convT4x4_s2(c4, P["u5_w"], P["u5_b"], act_in="relu", act_out="tanh")
    return u5.transpose(0, 3, 1, 2)                                  # back to NCHW


if __name__ == "__main__":
    key = jax.random.PRNGKey(0)
    k_in, k_p = jax.random.split(key)
    input_nc, output_nc, ngf = 4, 4, 8
    N, H, W = 2, 32, 32          # 5 stride-2 downsamples -> spatial must be >= 32
    x = jax.random.normal(k_in, (N, input_nc, H, W), jnp.float32)
    params = init_params(k_p, input_nc, output_nc, ngf)

    fwd = jax.jit(unet_forward)
    y = fwd(x, params)
    jax.block_until_ready(y)
    assert y.shape == (N, output_nc, H, W)
    assert bool(jnp.all(jnp.isfinite(y)))
    print("KERNEL_OK")
</pallas_src>

<mosaic_0001>
module attributes {stable_mosaic.version = 11 : i64} {
  func.func @_gemm_kernel(%arg0: i32, %arg1: i32, %arg2: i32, %arg3: memref<512x128xbf16, #tpu.memory_space<vmem>>, %arg4: memref<128x128xbf16, #tpu.memory_space<vmem>>, %arg5: memref<1x128xf32, #tpu.memory_space<vmem>>, %arg6: memref<512x128xf32, #tpu.memory_space<vmem>>, %arg7: memref<512x128xf32, #tpu.memory_space<vmem>>) attributes {dimension_semantics = [#tpu.dimension_semantics<parallel>, #tpu.dimension_semantics<parallel>, #tpu.dimension_semantics<arbitrary>], iteration_bounds = array<i64: 1, 1, 1>, scalar_prefetch = 0 : i64, scratch_operands = 1 : i64, tpu.core_type = #tpu.core_type<tc>, window_params = [{transform_indices = @transform_0, window_bounds = array<i64: 512, 128>}, {transform_indices = @transform_1, window_bounds = array<i64: 128, 128>}, {transform_indices = @transform_2, window_bounds = array<i64: 1, 128>}, {transform_indices = @transform_3, window_bounds = array<i64: 512, 128>}]} {
    %c0_i32 = arith.constant 0 : i32
    %0 = arith.cmpi eq, %arg2, %c0_i32 : i32
    %1 = arith.extui %0 : i1 to i32
    %c0_i32_0 = arith.constant 0 : i32
    %2 = arith.cmpi ne, %1, %c0_i32_0 : i32
    scf.if %2 {
      %cst_10 = arith.constant 0.000000e+00 : f32
      %12 = vector.broadcast %cst_10 : f32 to vector<512x128xf32>
      %c0_11 = arith.constant 0 : index
      %c0_12 = arith.constant 0 : index
      %13 = vector.load %arg7[%c0_11, %c0_12] : memref<512x128xf32, #tpu.memory_space<vmem>>, vector<512x128xf32>
      tpu.vector_store %arg7[%c0_11, %c0_12], %12 {strides = array<i32>} : memref<512x128xf32, #tpu.memory_space<vmem>>, vector<512x128xf32>,
    } else {
    }
    %c0 = arith.constant 0 : index
    %c0_1 = arith.constant 0 : index
    %3 = vector.load %arg3[%c0, %c0_1] : memref<512x128xbf16, #tpu.memory_space<vmem>>, vector<512x128xbf16>
    %c0_2 = arith.constant 0 : index
    %c0_3 = arith.constant 0 : index
    %4 = vector.load %arg7[%c0_2, %c0_3] : memref<512x128xf32, #tpu.memory_space<vmem>>, vector<512x128xf32>
    %c0_4 = arith.constant 0 : index
    %c0_5 = arith.constant 0 : index
    %5 = vector.load %arg4[%c0_4, %c0_5] : memref<128x128xbf16, #tpu.memory_space<vmem>>, vector<128x128xbf16>
    %cst = arith.constant dense<0.000000e+00> : vector<512x128xf32>
    %6 = tpu.matmul %3, %5, %cst {dimension_numbers = #tpu.dot_dimension_numbers<[1], [0], [0], [1], [0, 0, 1, 1], [], []>} : vector<512x128xbf16>, vector<128x128xbf16>, vector<512x128xf32> -> vector<512x128xf32>
    %7 = arith.addf %4, %6 : vector<512x128xf32>
    %c0_6 = arith.constant 0 : index
    %c0_7 = arith.constant 0 : index
    %8 = vector.load %arg7[%c0_6, %c0_7] : memref<512x128xf32, #tpu.memory_space<vmem>>, vector<512x128xf32>
    tpu.vector_store %arg7[%c0_6, %c0_7], %7 {strides = array<i32>} : memref<512x128xf32, #tpu.memory_space<vmem>>, vector<512x128xf32>,
    %c0_i32_8 = arith.constant 0 : i32
    %9 = arith.cmpi eq, %arg2, %c0_i32_8 : i32
    %10 = arith.extui %9 : i1 to i32
    %c0_i32_9 = arith.constant 0 : i32
    %11 = arith.cmpi ne, %10, %c0_i32_9 : i32
    scf.if %11 {
      %c0_10 = arith.constant 0 : index
      %c0_11 = arith.constant 0 : index
      %12 = vector.load %arg7[%c0_10, %c0_11] : memref<512x128xf32, #tpu.memory_space<vmem>>, vector<512x128xf32>
      %c0_12 = arith.constant 0 : index
      %c0_13 = arith.constant 0 : index
      %13 = vector.load %arg5[%c0_12, %c0_13] : memref<1x128xf32, #tpu.memory_space<vmem>>, vector<1x128xf32>
      %14 = vector.broadcast %13 : vector<1x128xf32> to vector<512x128xf32>
      %15 = arith.addf %12, %14 : vector<512x128xf32>
      %c0_14 = arith.constant 0 : index
      %c0_15 = arith.constant 0 : index
      %16 = vector.load %arg6[%c0_14, %c0_15] : memref<512x128xf32, #tpu.memory_space<vmem>>, vector<512x128xf32>
      tpu.vector_store %arg6[%c0_14, %c0_15], %15 {strides = array<i32>} : memref<512x128xf32, #tpu.memory_space<vmem>>, vector<512x128xf32>,
    } else {
    }
    return
  }
  func.func @transform_0(%arg0: i32, %arg1: i32, %arg2: i32) -> (i32, i32) {
    %c0_i32 = arith.constant 0 : i32
    return %arg0, %arg2 : i32, i32
  }
  func.func @transform_1(%arg0: i32, %arg1: i32, %arg2: i32) -> (i32, i32) {
    %c0_i32 = arith.constant 0 : i32
    return %arg2, %arg1 : i32, i32
  }
  func.func @transform_2(%arg0: i32, %arg1: i32, %arg2: i32) -> (i32, i32) {
    %c0_i32 = arith.constant 0 : i32
    %c0_i32_0 = arith.constant 0 : i32
    return %c0_i32, %arg1 : i32, i32
  }
  func.func @transform_3(%arg0: i32, %arg1: i32, %arg2: i32) -> (i32, i32) {
    %c0_i32 = arith.constant 0 : i32
    return %arg0, %arg1 : i32, i32
  }
}

module attributes {stable_mosaic.version = 11 : i64} {
  func.func @_gemm_kernel(%arg0: i32, %arg1: i32, %arg2: i32, %arg3: memref<128x128xbf16, #tpu.memory_space<vmem>>, %arg4: memref<128x128xbf16, #tpu.memory_space<vmem>>, %arg5: memref<1x128xf32, #tpu.memory_space<vmem>>, %arg6: memref<128x128xf32, #tpu.memory_space<vmem>>, %arg7: memref<128x128xf32, #tpu.memory_space<vmem>>) attributes {dimension_semantics = [#tpu.dimension_semantics<parallel>, #tpu.dimension_semantics<parallel>, #tpu.dimension_semantics<arbitrary>], iteration_bounds = array<i64: 1, 1, 1>, scalar_prefetch = 0 : i64, scratch_operands = 1 : i64, tpu.core_type = #tpu.core_type<tc>, window_params = [{transform_indices = @transform_0, window_bounds = array<i64: 128, 128>}, {transform_indices = @transform_1, window_bounds = array<i64: 128, 128>}, {transform_indices = @transform_2, window_bounds = array<i64: 1, 128>}, {transform_indices = @transform_3, window_bounds = array<i64: 128, 128>}]} {
    %c0_i32 = arith.constant 0 : i32
    %0 = arith.cmpi eq, %arg2, %c0_i32 : i32
    %1 = arith.extui %0 : i1 to i32
    %c0_i32_0 = arith.constant 0 : i32
    %2 = arith.cmpi ne, %1, %c0_i32_0 : i32
    scf.if %2 {
      %cst_12 = arith.constant 0.000000e+00 : f32
      %17 = vector.broadcast %cst_12 : f32 to vector<128x128xf32>
      %c0_13 = arith.constant 0 : index
      %c0_14 = arith.constant 0 : index
      %18 = vector.load %arg7[%c0_13, %c0_14] : memref<128x128xf32, #tpu.memory_space<vmem>>, vector<128x128xf32>
      tpu.vector_store %arg7[%c0_13, %c0_14], %17 {strides = array<i32>} : memref<128x128xf32, #tpu.memory_space<vmem>>, vector<128x128xf32>,
    } else {
    }
    %c0 = arith.constant 0 : index
    %c0_1 = arith.constant 0 : index
    %3 = vector.load %arg3[%c0, %c0_1] : memref<128x128xbf16, #tpu.memory_space<vmem>>, vector<128x128xbf16>
    %cst = arith.constant 0.000000e+00 : bf16
    %4 = vector.broadcast %cst : bf16 to vector<128x128xbf16>
    %5 = arith.cmpf oge, %3, %4 : vector<128x128xbf16>
    %cst_2 = arith.constant 2.001950e-01 : bf16
    %6 = vector.broadcast %cst_2 : bf16 to vector<128x128xbf16>
    %7 = arith.mulf %3, %6 : vector<128x128xbf16>
    %8 = arith.select %5, %3, %7 : vector<128x128xi1>, vector<128x128xbf16>
    %c0_3 = arith.constant 0 : index
    %c0_4 = arith.constant 0 : index
    %9 = vector.load %arg7[%c0_3, %c0_4] : memref<128x128xf32, #tpu.memory_space<vmem>>, vector<128x128xf32>
    %c0_5 = arith.constant 0 : index
    %c0_6 = arith.constant 0 : index
    %10 = vector.load %arg4[%c0_5, %c0_6] : memref<128x128xbf16, #tpu.memory_space<vmem>>, vector<128x128xbf16>
    %cst_7 = arith.constant dense<0.000000e+00> : vector<128x128xf32>
    %11 = tpu.matmul %8, %10, %cst_7 {dimension_numbers = #tpu.dot_dimension_numbers<[1], [0], [0], [1], [0, 0, 1, 1], [], []>} : vector<128x128xbf16>, vector<128x128xbf16>, vector<128x128xf32> -> vector<128x128xf32>
    %12 = arith.addf %9, %11 : vector<128x128xf32>
    %c0_8 = arith.constant 0 : index
    %c0_9 = arith.constant 0 : index
    %13 = vector.load %arg7[%c0_8, %c0_9] : memref<128x128xf32, #tpu.memory_space<vmem>>, vector<128x128xf32>
    tpu.vector_store %arg7[%c0_8, %c0_9], %12 {strides = array<i32>} : memref<128x128xf32, #tpu.memory_space<vmem>>, vector<128x128xf32>,
    %c0_i32_10 = arith.constant 0 : i32
    %14 = arith.cmpi eq, %arg2, %c0_i32_10 : i32
    %15 = arith.extui %14 : i1 to i32
    %c0_i32_11 = arith.constant 0 : i32
    %16 = arith.cmpi ne, %15, %c0_i32_11 : i32
    scf.if %16 {
      %c0_12 = arith.constant 0 : index
      %c0_13 = arith.constant 0 : index
      %17 = vector.load %arg7[%c0_12, %c0_13] : memref<128x128xf32, #tpu.memory_space<vmem>>, vector<128x128xf32>
      %c0_14 = arith.constant 0 : index
      %c0_15 = arith.constant 0 : index
      %18 = vector.load %arg5[%c0_14, %c0_15] : memref<1x128xf32, #tpu.memory_space<vmem>>, vector<1x128xf32>
      %19 = vector.broadcast %18 : vector<1x128xf32> to vector<128x128xf32>
      %20 = arith.addf %17, %19 : vector<128x128xf32>
      %c0_16 = arith.constant 0 : index
      %c0_17 = arith.constant 0 : index
      %21 = vector.load %arg6[%c0_16, %c0_17] : memref<128x128xf32, #tpu.memory_space<vmem>>, vector<128x128xf32>
      tpu.vector_store %arg6[%c0_16, %c0_17], %20 {strides = array<i32>} : memref<128x128xf32, #tpu.memory_space<vmem>>, vector<128x128xf32>,
    } else {
    }
    return
  }
  func.func @transform_0(%arg0: i32, %arg1: i32, %arg2: i32) -> (i32, i32) {
    %c0_i32 = arith.constant 0 : i32
    return %arg0, %arg2 : i32, i32
  }
  func.func @transform_1(%arg0: i32, %arg1: i32, %arg2: i32) -> (i32, i32) {
    %c0_i32 = arith.constant 0 : i32
    return %arg2, %arg1 : i32, i32
  }
  func.func @transform_2(%arg0: i32, %arg1: i32, %arg2: i32) -> (i32, i32) {
    %c0_i32 = arith.constant 0 : i32
    %c0_i32_0 = arith.constant 0 : i32
    return %c0_i32, %arg1 : i32, i32
  }
  func.func @transform_3(%arg0: i32, %arg1: i32, %arg2: i32) -> (i32, i32) {
    %c0_i32 = arith.constant 0 : i32
    return %arg0, %arg1 : i32, i32
  }
}

module attributes {stable_mosaic.version = 11 : i64} {
  func.func @_bn_stats_kernel(%arg0: i32, %arg1: memref<128x128xf32, #tpu.memory_space<vmem>>, %arg2: memref<8x128xf32, #tpu.memory_space<vmem>>, %arg3: memref<8x128xf32, #tpu.memory_space<vmem>>) attributes {dimension_semantics = [#tpu.dimension_semantics<arbitrary>], iteration_bounds = array<i64: 1>, scalar_prefetch = 0 : i64, scratch_operands = 0 : i64, tpu.core_type = #tpu.core_type<tc>, window_params = [{transform_indices = @transform_0, window_bounds = array<i64: 128, 128>}, {pipeline_mode = #tpu.pipeline_mode<synchronous>, transform_indices = @transform_1, window_bounds = array<i64: 8, 128>}, {pipeline_mode = #tpu.pipeline_mode<synchronous>, transform_indices = @transform_2, window_bounds = array<i64: 8, 128>}]} {
    %c0_i32 = arith.constant 0 : i32
    %0 = arith.cmpi eq, %arg0, %c0_i32 : i32
    %1 = arith.extui %0 : i1 to i32
    %c0_i32_0 = arith.constant 0 : i32
    %2 = arith.cmpi ne, %1, %c0_i32_0 : i32
    scf.if %2 {
      %cst_11 = arith.constant 0.000000e+00 : f32
      %17 = vector.broadcast %cst_11 : f32 to vector<8x128xf32>
      %c0_12 = arith.constant 0 : index
      %c0_13 = arith.constant 0 : index
      %18 = vector.load %arg2[%c0_12, %c0_13] : memref<8x128xf32, #tpu.memory_space<vmem>>, vector<8x128xf32>
      tpu.vector_store %arg2[%c0_12, %c0_13], %17 {strides = array<i32>} : memref<8x128xf32, #tpu.memory_space<vmem>>, vector<8x128xf32>,
      %cst_14 = arith.constant 0.000000e+00 : f32
      %19 = vector.broadcast %cst_14 : f32 to vector<8x128xf32>
      %c0_15 = arith.constant 0 : index
      %c0_16 = arith.constant 0 : index
      %20 = vector.load %arg3[%c0_15, %c0_16] : memref<8x128xf32, #tpu.memory_space<vmem>>, vector<8x128xf32>
      tpu.vector_store %arg3[%c0_15, %c0_16], %19 {strides = array<i32>} : memref<8x128xf32, #tpu.memory_space<vmem>>, vector<8x128xf32>,
    } else {
    }
    %c0 = arith.constant 0 : index
    %c0_1 = arith.constant 0 : index
    %3 = vector.load %arg1[%c0, %c0_1] : memref<128x128xf32, #tpu.memory_space<vmem>>, vector<128x128xf32>
    %c0_2 = arith.constant 0 : index
    %c0_3 = arith.constant 0 : index
    %4 = vector.load %arg2[%c0_2, %c0_3] : memref<8x128xf32, #tpu.memory_space<vmem>>, vector<8x128xf32>
    %cst = arith.constant dense<0.000000e+00> : vector<128xf32>
    %5 = vector.multi_reduction <add>, %3, %cst [0] : vector<128x128xf32> to vector<128xf32>
    %6 = vector.shape_cast %5 : vector<128xf32> to vector<1x128xf32>
    %7 = vector.broadcast %6 : vector<1x128xf32> to vector<8x128xf32>
    %8 = arith.addf %4, %7 : vector<8x128xf32>
    %c0_4 = arith.constant 0 : index
    %c0_5 = arith.constant 0 : index
    %9 = vector.load %arg2[%c0_4, %c0_5] : memref<8x128xf32, #tpu.memory_space<vmem>>, vector<8x128xf32>
    tpu.vector_store %arg2[%c0_4, %c0_5], %8 {strides = array<i32>} : memref<8x128xf32, #tpu.memory_space<vmem>>, vector<8x128xf32>,
    %c0_6 = arith.constant 0 : index
    %c0_7 = arith.constant 0 : index
    %10 = vector.load %arg3[%c0_6, %c0_7] : memref<8x128xf32, #tpu.memory_space<vmem>>, vector<8x128xf32>
    %11 = arith.mulf %3, %3 : vector<128x128xf32>
    %cst_8 = arith.constant dense<0.000000e+00> : vector<128xf32>
    %12 = vector.multi_reduction <add>, %11, %cst_8 [0] : vector<128x128xf32> to vector<128xf32>
    %13 = vector.shape_cast %12 : vector<128xf32> to vector<1x128xf32>
    %14 = vector.broadcast %13 : vector<1x128xf32> to vector<8x128xf32>
    %15 = arith.addf %10, %14 : vector<8x128xf32>
    %c0_9 = arith.constant 0 : index
    %c0_10 = arith.constant 0 : index
    %16 = vector.load %arg3[%c0_9, %c0_10] : memref<8x128xf32, #tpu.memory_space<vmem>>, vector<8x128xf32>
    tpu.vector_store %arg3[%c0_9, %c0_10], %15 {strides = array<i32>} : memref<8x128xf32, #tpu.memory_space<vmem>>, vector<8x128xf32>,
    return
  }
  func.func @transform_0(%arg0: i32) -> (i32, i32) {
    %c0_i32 = arith.constant 0 : i32
    %c0_i32_0 = arith.constant 0 : i32
    return %arg0, %c0_i32 : i32, i32
  }
  func.func @transform_1(%arg0: i32) -> (i32, i32) {
    %c0_i32 = arith.constant 0 : i32
    %c0_i32_0 = arith.constant 0 : i32
    %c0_i32_1 = arith.constant 0 : i32
    return %c0_i32, %c0_i32_0 : i32, i32
  }
  func.func @transform_2(%arg0: i32) -> (i32, i32) {
    %c0_i32 = arith.constant 0 : i32
    %c0_i32_0 = arith.constant 0 : i32
    %c0_i32_1 = arith.constant 0 : i32
    return %c0_i32, %c0_i32_0 : i32, i32
  }
}

module attributes {stable_mosaic.version = 11 : i64} {
  func.func @_bn_apply_kernel(%arg0: i32, %arg1: memref<128x128xf32, #tpu.memory_space<vmem>>, %arg2: memref<1x128xf32, #tpu.memory_space<vmem>>, %arg3: memref<1x128xf32, #tpu.memory_space<vmem>>, %arg4: memref<128x128xf32, #tpu.memory_space<vmem>>) attributes {dimension_semantics = [#tpu.dimension_semantics<parallel>], iteration_bounds = array<i64: 1>, scalar_prefetch = 0 : i64, scratch_operands = 0 : i64, tpu.core_type = #tpu.core_type<tc>, window_params = [{transform_indices = @transform_0, window_bounds = array<i64: 128, 128>}, {pipeline_mode = #tpu.pipeline_mode<synchronous>, transform_indices = @transform_1, window_bounds = array<i64: 1, 128>}, {pipeline_mode = #tpu.pipeline_mode<synchronous>, transform_indices = @transform_2, window_bounds = array<i64: 1, 128>}, {transform_indices = @transform_3, window_bounds = array<i64: 128, 128>}]} {
    %c0 = arith.constant 0 : index
    %c0_0 = arith.constant 0 : index
    %0 = vector.load %arg1[%c0, %c0_0] : memref<128x128xf32, #tpu.memory_space<vmem>>, vector<128x128xf32>
    %c0_1 = arith.constant 0 : index
    %c0_2 = arith.constant 0 : index
    %1 = vector.load %arg2[%c0_1, %c0_2] : memref<1x128xf32, #tpu.memory_space<vmem>>, vector<1x128xf32>
    %2 = vector.broadcast %1 : vector<1x128xf32> to vector<128x128xf32>
    %3 = arith.mulf %0, %2 : vector<128x128xf32>
    %c0_3 = arith.constant 0 : index
    %c0_4 = arith.constant 0 : index
    %4 = vector.load %arg3[%c0_3, %c0_4] : memref<1x128xf32, #tpu.memory_space<vmem>>, vector<1x128xf32>
    %5 = vector.broadcast %4 : vector<1x128xf32> to vector<128x128xf32>
    %6 = arith.addf %3, %5 : vector<128x128xf32>
    %c0_5 = arith.constant 0 : index
    %c0_6 = arith.constant 0 : index
    %7 = vector.load %arg4[%c0_5, %c0_6] : memref<128x128xf32, #tpu.memory_space<vmem>>, vector<128x128xf32>
    tpu.vector_store %arg4[%c0_5, %c0_6], %6 {strides = array<i32>} : memref<128x128xf32, #tpu.memory_space<vmem>>, vector<128x128xf32>,
    return
  }
  func.func @transform_0(%arg0: i32) -> (i32, i32) {
    %c0_i32 = arith.constant 0 : i32
    %c0_i32_0 = arith.constant 0 : i32
    return %arg0, %c0_i32 : i32, i32
  }
  func.func @transform_1(%arg0: i32) -> (i32, i32) {
    %c0_i32 = arith.constant 0 : i32
    %c0_i32_0 = arith.constant 0 : i32
    %c0_i32_1 = arith.constant 0 : i32
    return %c0_i32, %c0_i32_0 : i32, i32
  }
  func.func @transform_2(%arg0: i32) -> (i32, i32) {
    %c0_i32 = arith.constant 0 : i32
    %c0_i32_0 = arith.constant 0 : i32
    %c0_i32_1 = arith.constant 0 : i32
    return %c0_i32, %c0_i32_0 : i32, i32
  }
  func.func @transform_3(%arg0: i32) -> (i32, i32) {
    %c0_i32 = arith.constant 0 : i32
    %c0_i32_0 = arith.constant 0 : i32
    return %arg0, %c0_i32 : i32, i32
  }
}

module attributes {stable_mosaic.version = 11 : i64} {
  func.func @_bn_stats_kernel(%arg0: i32, %arg1: memref<32x128xf32, #tpu.memory_space<vmem>>, %arg2: memref<8x128xf32, #tpu.memory_space<vmem>>, %arg3: memref<8x128xf32, #tpu.memory_space<vmem>>) attributes {dimension_semantics = [#tpu.dimension_semantics<arbitrary>], iteration_bounds = array<i64: 1>, scalar_prefetch = 0 : i64, scratch_operands = 0 : i64, tpu.core_type = #tpu.core_type<tc>, window_params = [{transform_indices = @transform_0, window_bounds = array<i64: 32, 128>}, {pipeline_mode = #tpu.pipeline_mode<synchronous>, transform_indices = @transform_1, window_bounds = array<i64: 8, 128>}, {pipeline_mode = #tpu.pipeline_mode<synchronous>, transform_indices = @transform_2, window_bounds = array<i64: 8, 128>}]} {
    %c0_i32 = arith.constant 0 : i32
    %0 = arith.cmpi eq, %arg0, %c0_i32 : i32
    %1 = arith.extui %0 : i1 to i32
    %c0_i32_0 = arith.constant 0 : i32
    %2 = arith.cmpi ne, %1, %c0_i32_0 : i32
    scf.if %2 {
      %cst_11 = arith.constant 0.000000e+00 : f32
      %17 = vector.broadcast %cst_11 : f32 to vector<8x128xf32>
      %c0_12 = arith.constant 0 : index
      %c0_13 = arith.constant 0 : index
      %18 = vector.load %arg2[%c0_12, %c0_13] : memref<8x128xf32, #tpu.memory_space<vmem>>, vector<8x128xf32>
      tpu.vector_store %arg2[%c0_12, %c0_13], %17 {strides = array<i32>} : memref<8x128xf32, #tpu.memory_space<vmem>>, vector<8x128xf32>,
      %cst_14 = arith.constant 0.000000e+00 : f32
      %19 = vector.broadcast %cst_14 : f32 to vector<8x128xf32>
      %c0_15 = arith.constant 0 : index
      %c0_16 = arith.constant 0 : index
      %20 = vector.load %arg3[%c0_15, %c0_16] : memref<8x128xf32, #tpu.memory_space<vmem>>, vector<8x128xf32>
      tpu.vector_store %arg3[%c0_15, %c0_16], %19 {strides = array<i32>} : memref<8x128xf32, #tpu.memory_space<vmem>>, vector<8x128xf32>,
    } else {
    }
    %c0 = arith.constant 0 : index
    %c0_1 = arith.constant 0 : index
    %3 = vector.load %arg1[%c0, %c0_1] : memref<32x128xf32, #tpu.memory_space<vmem>>, vector<32x128xf32>
    %c0_2 = arith.constant 0 : index
    %c0_3 = arith.constant 0 : index
    %4 = vector.load %arg2[%c0_2, %c0_3] : memref<8x128xf32, #tpu.memory_space<vmem>>, vector<8x128xf32>
    %cst = arith.constant dense<0.000000e+00> : vector<128xf32>
    %5 = vector.multi_reduction <add>, %3, %cst [0] : vector<32x128xf32> to vector<128xf32>
    %6 = vector.shape_cast %5 : vector<128xf32> to vector<1x128xf32>
    %7 = vector.broadcast %6 : vector<1x128xf32> to vector<8x128xf32>
    %8 = arith.addf %4, %7 : vector<8x128xf32>
    %c0_4 = arith.constant 0 : index
    %c0_5 = arith.constant 0 : index
    %9 = vector.load %arg2[%c0_4, %c0_5] : memref<8x128xf32, #tpu.memory_space<vmem>>, vector<8x128xf32>
    tpu.vector_store %arg2[%c0_4, %c0_5], %8 {strides = array<i32>} : memref<8x128xf32, #tpu.memory_space<vmem>>, vector<8x128xf32>,
    %c0_6 = arith.constant 0 : index
    %c0_7 = arith.constant 0 : index
    %10 = vector.load %arg3[%c0_6, %c0_7] : memref<8x128xf32, #tpu.memory_space<vmem>>, vector<8x128xf32>
    %11 = arith.mulf %3, %3 : vector<32x128xf32>
    %cst_8 = arith.constant dense<0.000000e+00> : vector<128xf32>
    %12 = vector.multi_reduction <add>, %11, %cst_8 [0] : vector<32x128xf32> to vector<128xf32>
    %13 = vector.shape_cast %12 : vector<128xf32> to vector<1x128xf32>
    %14 = vector.broadcast %13 : vector<1x128xf32> to vector<8x128xf32>
    %15 = arith.addf %10, %14 : vector<8x128xf32>
    %c0_9 = arith.constant 0 : index
    %c0_10 = arith.constant 0 : index
    %16 = vector.load %arg3[%c0_9, %c0_10] : memref<8x128xf32, #tpu.memory_space<vmem>>, vector<8x128xf32>
    tpu.vector_store %arg3[%c0_9, %c0_10], %15 {strides = array<i32>} : memref<8x128xf32, #tpu.memory_space<vmem>>, vector<8x128xf32>,
    return
  }
  func.func @transform_0(%arg0: i32) -> (i32, i32) {
    %c0_i32 = arith.constant 0 : i32
    %c0_i32_0 = arith.constant 0 : i32
    return %arg0, %c0_i32 : i32, i32
  }
  func.func @transform_1(%arg0: i32) -> (i32, i32) {
    %c0_i32 = arith.constant 0 : i32
    %c0_i32_0 = arith.constant 0 : i32
    %c0_i32_1 = arith.constant 0 : i32
    return %c0_i32, %c0_i32_0 : i32, i32
  }
  func.func @transform_2(%arg0: i32) -> (i32, i32) {
    %c0_i32 = arith.constant 0 : i32
    %c0_i32_0 = arith.constant 0 : i32
    %c0_i32_1 = arith.constant 0 : i32
    return %c0_i32, %c0_i32_0 : i32, i32
  }
}

module attributes {stable_mosaic.version = 11 : i64} {
  func.func @_bn_apply_kernel(%arg0: i32, %arg1: memref<32x128xf32, #tpu.memory_space<vmem>>, %arg2: memref<1x128xf32, #tpu.memory_space<vmem>>, %arg3: memref<1x128xf32, #tpu.memory_space<vmem>>, %arg4: memref<32x128xf32, #tpu.memory_space<vmem>>) attributes {dimension_semantics = [#tpu.dimension_semantics<parallel>], iteration_bounds = array<i64: 1>, scalar_prefetch = 0 : i64, scratch_operands = 0 : i64, tpu.core_type = #tpu.core_type<tc>, window_params = [{transform_indices = @transform_0, window_bounds = array<i64: 32, 128>}, {pipeline_mode = #tpu.pipeline_mode<synchronous>, transform_indices = @transform_1, window_bounds = array<i64: 1, 128>}, {pipeline_mode = #tpu.pipeline_mode<synchronous>, transform_indices = @transform_2, window_bounds = array<i64: 1, 128>}, {transform_indices = @transform_3, window_bounds = array<i64: 32, 128>}]} {
    %c0 = arith.constant 0 : index
    %c0_0 = arith.constant 0 : index
    %0 = vector.load %arg1[%c0, %c0_0] : memref<32x128xf32, #tpu.memory_space<vmem>>, vector<32x128xf32>
    %c0_1 = arith.constant 0 : index
    %c0_2 = arith.constant 0 : index
    %1 = vector.load %arg2[%c0_1, %c0_2] : memref<1x128xf32, #tpu.memory_space<vmem>>, vector<1x128xf32>
    %2 = vector.broadcast %1 : vector<1x128xf32> to vector<32x128xf32>
    %3 = arith.mulf %0, %2 : vector<32x128xf32>
    %c0_3 = arith.constant 0 : index
    %c0_4 = arith.constant 0 : index
    %4 = vector.load %arg3[%c0_3, %c0_4] : memref<1x128xf32, #tpu.memory_space<vmem>>, vector<1x128xf32>
    %5 = vector.broadcast %4 : vector<1x128xf32> to vector<32x128xf32>
    %6 = arith.addf %3, %5 : vector<32x128xf32>
    %c0_5 = arith.constant 0 : index
    %c0_6 = arith.constant 0 : index
    %7 = vector.load %arg4[%c0_5, %c0_6] : memref<32x128xf32, #tpu.memory_space<vmem>>, vector<32x128xf32>
    tpu.vector_store %arg4[%c0_5, %c0_6], %6 {strides = array<i32>} : memref<32x128xf32, #tpu.memory_space<vmem>>, vector<32x128xf32>,
    return
  }
  func.func @transform_0(%arg0: i32) -> (i32, i32) {
    %c0_i32 = arith.constant 0 : i32
    %c0_i32_0 = arith.constant 0 : i32
    return %arg0, %c0_i32 : i32, i32
  }
  func.func @transform_1(%arg0: i32) -> (i32, i32) {
    %c0_i32 = arith.constant 0 : i32
    %c0_i32_0 = arith.constant 0 : i32
    %c0_i32_1 = arith.constant 0 : i32
    return %c0_i32, %c0_i32_0 : i32, i32
  }
  func.func @transform_2(%arg0: i32) -> (i32, i32) {
    %c0_i32 = arith.constant 0 : i32
    %c0_i32_0 = arith.constant 0 : i32
    %c0_i32_1 = arith.constant 0 : i32
    return %c0_i32, %c0_i32_0 : i32, i32
  }
  func.func @transform_3(%arg0: i32) -> (i32, i32) {
    %c0_i32 = arith.constant 0 : i32
    %c0_i32_0 = arith.constant 0 : i32
    return %arg0, %c0_i32 : i32, i32
  }
}

module attributes {stable_mosaic.version = 11 : i64} {
  func.func @_gemm_kernel(%arg0: i32, %arg1: i32, %arg2: i32, %arg3: memref<32x256xbf16, #tpu.memory_space<vmem>>, %arg4: memref<256x128xbf16, #tpu.memory_space<vmem>>, %arg5: memref<1x128xf32, #tpu.memory_space<vmem>>, %arg6: memref<32x128xf32, #tpu.memory_space<vmem>>, %arg7: memref<32x128xf32, #tpu.memory_space<vmem>>) attributes {dimension_semantics = [#tpu.dimension_semantics<parallel>, #tpu.dimension_semantics<parallel>, #tpu.dimension_semantics<arbitrary>], iteration_bounds = array<i64: 1, 1, 1>, scalar_prefetch = 0 : i64, scratch_operands = 1 : i64, tpu.core_type = #tpu.core_type<tc>, window_params = [{transform_indices = @transform_0, window_bounds = array<i64: 32, 256>}, {transform_indices = @transform_1, window_bounds = array<i64: 256, 128>}, {transform_indices = @transform_2, window_bounds = array<i64: 1, 128>}, {transform_indices = @transform_3, window_bounds = array<i64: 32, 128>}]} {
    %c0_i32 = arith.constant 0 : i32
    %0 = arith.cmpi eq, %arg2, %c0_i32 : i32
    %1 = arith.extui %0 : i1 to i32
    %c0_i32_0 = arith.constant 0 : i32
    %2 = arith.cmpi ne, %1, %c0_i32_0 : i32
    scf.if %2 {
      %cst_12 = arith.constant 0.000000e+00 : f32
      %17 = vector.broadcast %cst_12 : f32 to vector<32x128xf32>
      %c0_13 = arith.constant 0 : index
      %c0_14 = arith.constant 0 : index
      %18 = vector.load %arg7[%c0_13, %c0_14] : memref<32x128xf32, #tpu.memory_space<vmem>>, vector<32x128xf32>
      tpu.vector_store %arg7[%c0_13, %c0_14], %17 {strides = array<i32>} : memref<32x128xf32, #tpu.memory_space<vmem>>, vector<32x128xf32>,
    } else {
    }
    %c0 = arith.constant 0 : index
    %c0_1 = arith.constant 0 : index
    %3 = vector.load %arg3[%c0, %c0_1] : memref<32x256xbf16, #tpu.memory_space<vmem>>, vector<32x256xbf16>
    %cst = arith.constant 0.000000e+00 : bf16
    %4 = vector.broadcast %cst : bf16 to vector<32x256xbf16>
    %5 = arith.cmpf oge, %3, %4 : vector<32x256xbf16>
    %cst_2 = arith.constant 2.001950e-01 : bf16
    %6 = vector.broadcast %cst_2 : bf16 to vector<32x256xbf16>
    %7 = arith.mulf %3, %6 : vector<32x256xbf16>
    %8 = arith.select %5, %3, %7 : vector<32x256xi1>, vector<32x256xbf16>
    %c0_3 = arith.constant 0 : index
    %c0_4 = arith.constant 0 : index
    %9 = vector.load %arg7[%c0_3, %c0_4] : memref<32x128xf32, #tpu.memory_space<vmem>>, vector<32x128xf32>
    %c0_5 = arith.constant 0 : index
    %c0_6 = arith.constant 0 : index
    %10 = vector.load %arg4[%c0_5, %c0_6] : memref<256x128xbf16, #tpu.memory_space<vmem>>, vector<256x128xbf16>
    %cst_7 = arith.constant dense<0.000000e+00> : vector<32x128xf32>
    %11 = tpu.matmul %8, %10, %cst_7 {dimension_numbers = #tpu.dot_dimension_numbers<[1], [0], [0], [1], [0, 0, 1, 1], [], []>} : vector<32x256xbf16>, vector<256x128xbf16>, vector<32x128xf32> -> vector<32x128xf32>
    %12 = arith.addf %9, %11 : vector<32x128xf32>
    %c0_8 = arith.constant 0 : index
    %c0_9 = arith.constant 0 : index
    %13 = vector.load %arg7[%c0_8, %c0_9] : memref<32x128xf32, #tpu.memory_space<vmem>>, vector<32x128xf32>
    tpu.vector_store %arg7[%c0_8, %c0_9], %12 {strides = array<i32>} : memref<32x128xf32, #tpu.memory_space<vmem>>, vector<32x128xf32>,
    %c0_i32_10 = arith.constant 0 : i32
    %14 = arith.cmpi eq, %arg2, %c0_i32_10 : i32
    %15 = arith.extui %14 : i1 to i32
    %c0_i32_11 = arith.constant 0 : i32
    %16 = arith.cmpi ne, %15, %c0_i32_11 : i32
    scf.if %16 {
      %c0_12 = arith.constant 0 : index
      %c0_13 = arith.constant 0 : index
      %17 = vector.load %arg7[%c0_12, %c0_13] : memref<32x128xf32, #tpu.memory_space<vmem>>, vector<32x128xf32>
      %c0_14 = arith.constant 0 : index
      %c0_15 = arith.constant 0 : index
      %18 = vector.load %arg5[%c0_14, %c0_15] : memref<1x128xf32, #tpu.memory_space<vmem>>, vector<1x128xf32>
      %19 = vector.broadcast %18 : vector<1x128xf32> to vector<32x128xf32>
      %20 = arith.addf %17, %19 : vector<32x128xf32>
      %c0_16 = arith.constant 0 : index
      %c0_17 = arith.constant 0 : index
      %21 = vector.load %arg6[%c0_16, %c0_17] : memref<32x128xf32, #tpu.memory_space<vmem>>, vector<32x128xf32>
      tpu.vector_store %arg6[%c0_16, %c0_17], %20 {strides = array<i32>} : memref<32x128xf32, #tpu.memory_space<vmem>>, vector<32x128xf32>,
    } else {
    }
    return
  }
  func.func @transform_0(%arg0: i32, %arg1: i32, %arg2: i32) -> (i32, i32) {
    %c0_i32 = arith.constant 0 : i32
    return %arg0, %arg2 : i32, i32
  }
  func.func @transform_1(%arg0: i32, %arg1: i32, %arg2: i32) -> (i32, i32) {
    %c0_i32 = arith.constant 0 : i32
    return %arg2, %arg1 : i32, i32
  }
  func.func @transform_2(%arg0: i32, %arg1: i32, %arg2: i32) -> (i32, i32) {
    %c0_i32 = arith.constant 0 : i32
    %c0_i32_0 = arith.constant 0 : i32
    return %c0_i32, %arg1 : i32, i32
  }
  func.func @transform_3(%arg0: i32, %arg1: i32, %arg2: i32) -> (i32, i32) {
    %c0_i32 = arith.constant 0 : i32
    return %arg0, %arg1 : i32, i32
  }
}

module attributes {stable_mosaic.version = 11 : i64} {
  func.func @_sba_kernel(%arg0: i32, %arg1: memref<1x16x32xf32, #tpu.memory_space<vmem>>, %arg2: memref<32x4xf32, #tpu.memory_space<vmem>>, %arg3: memref<1x4xf32, #tpu.memory_space<vmem>>, %arg4: memref<32x4xf32, #tpu.memory_space<vmem>>, %arg5: memref<1x4xf32, #tpu.memory_space<vmem>>, %arg6: memref<32x32xf32, #tpu.memory_space<vmem>>, %arg7: memref<1x32xf32, #tpu.memory_space<vmem>>, %arg8: memref<1xf32, #tpu.memory_space<smem>>, %arg9: memref<1x16x32xf32, #tpu.memory_space<vmem>>) attributes {dimension_semantics = [#tpu.dimension_semantics<parallel>], iteration_bounds = array<i64: 2>, scalar_prefetch = 0 : i64, scratch_operands = 0 : i64, tpu.core_type = #tpu.core_type<tc>, window_params = [{transform_indices = @transform_0, window_bounds = array<i64: 1, 16, 32>}, {pipeline_mode = #tpu.pipeline_mode<synchronous>, transform_indices = @transform_1, window_bounds = array<i64: 32, 4>}, {pipeline_mode = #tpu.pipeline_mode<synchronous>, transform_indices = @transform_2, window_bounds = array<i64: 1, 4>}, {pipeline_mode = #tpu.pipeline_mode<synchronous>, transform_indices = @transform_3, window_bounds = array<i64: 32, 4>}, {pipeline_mode = #tpu.pipeline_mode<synchronous>, transform_indices = @transform_4, window_bounds = array<i64: 1, 4>}, {pipeline_mode = #tpu.pipeline_mode<synchronous>, transform_indices = @transform_5, window_bounds = array<i64: 32, 32>}, {pipeline_mode = #tpu.pipeline_mode<synchronous>, transform_indices = @transform_6, window_bounds = array<i64: 1, 32>}, {transform_indices = @transform_7, window_bounds = array<i64: 1>}, {transform_indices = @transform_8, window_bounds = array<i64: 1, 16, 32>}]} {
    %c0 = arith.constant 0 : index
    %c0_0 = arith.constant 0 : index
    %c0_1 = arith.constant 0 : index
    %0 = vector.load %arg1[%c0, %c0_0, %c0_1] : memref<1x16x32xf32, #tpu.memory_space<vmem>>, vector<1x16x32xf32>
    %1 = vector.shape_cast %0 : vector<1x16x32xf32> to vector<16x32xf32>
    %c0_2 = arith.constant 0 : index
    %c0_3 = arith.constant 0 : index
    %2 = vector.load %arg2[%c0_2, %c0_3] : memref<32x4xf32, #tpu.memory_space<vmem>>, vector<32x4xf32>
    %cst = arith.constant dense<0.000000e+00> : vector<16x4xf32>
    %3 = tpu.matmul %1, %2, %cst {dimension_numbers = #tpu.dot_dimension_numbers<[1], [0], [0], [1], [0, 0, 1, 1], [], []>} : vector<16x32xf32>, vector<32x4xf32>, vector<16x4xf32> -> vector<16x4xf32>
    %c0_4 = arith.constant 0 : index
    %c0_5 = arith.constant 0 : index
    %4 = vector.load %arg3[%c0_4, %c0_5] : memref<1x4xf32, #tpu.memory_space<vmem>>, vector<1x4xf32>
    %5 = vector.broadcast %4 : vector<1x4xf32> to vector<16x4xf32>
    %6 = arith.addf %3, %5 : vector<16x4xf32>
    %c0_6 = arith.constant 0 : index
    %c0_7 = arith.constant 0 : index
    %7 = vector.load %arg4[%c0_6, %c0_7] : memref<32x4xf32, #tpu.memory_space<vmem>>, vector<32x4xf32>
    %cst_8 = arith.constant dense<0.000000e+00> : vector<16x4xf32>
    %8 = tpu.matmul %1, %7, %cst_8 {dimension_numbers = #tpu.dot_dimension_numbers<[1], [0], [0], [1], [0, 0, 1, 1], [], []>} : vector<16x32xf32>, vector<32x4xf32>, vector<16x4xf32> -> vector<16x4xf32>
    %c0_9 = arith.constant 0 : index
    %c0_10 = arith.constant 0 : index
    %9 = vector.load %arg5[%c0_9, %c0_10] : memref<1x4xf32, #tpu.memory_space<vmem>>, vector<1x4xf32>
    %10 = vector.broadcast %9 : vector<1x4xf32> to vector<16x4xf32>
    %11 = arith.addf %8, %10 : vector<16x4xf32>
    %c0_11 = arith.constant 0 : index
    %c0_12 = arith.constant 0 : index
    %12 = vector.load %arg6[%c0_11, %c0_12] : memref<32x32xf32, #tpu.memory_space<vmem>>, vector<32x32xf32>
    %cst_13 = arith.constant dense<0.000000e+00> : vector<16x32xf32>
    %13 = tpu.matmul %1, %12, %cst_13 {dimension_numbers = #tpu.dot_dimension_numbers<[1], [0], [0], [1], [0, 0, 1, 1], [], []>} : vector<16x32xf32>, vector<32x32xf32>, vector<16x32xf32> -> vector<16x32xf32>
    %c0_14 = arith.constant 0 : index
    %c0_15 = arith.constant 0 : index
    %14 = vector.load %arg7[%c0_14, %c0_15] : memref<1x32xf32, #tpu.memory_space<vmem>>, vector<1x32xf32>
    %15 = vector.broadcast %14 : vector<1x32xf32> to vector<16x32xf32>
    %16 = arith.addf %13, %15 : vector<16x32xf32>
    %cst_16 = arith.constant dense<0.000000e+00> : vector<16x16xf32>
    %17 = tpu.matmul %6, %11, %cst_16 {dimension_numbers = #tpu.dot_dimension_numbers<[1], [1], [0], [0], [0, 0, 1, 0], [], []>} : vector<16x4xf32>, vector<16x4xf32>, vector<16x16xf32> -> vector<16x16xf32>
    %cst_17 = arith.constant dense<0xFF800000> : vector<16xf32>
    %18 = vector.multi_reduction <maximumf>, %17, %cst_17 [1] : vector<16x16xf32> to vector<16xf32>
    %19 = vector.shape_cast %18 : vector<16xf32> to vector<16x1xf32>
    %20 = vector.broadcast %19 : vector<16x1xf32> to vector<16x16xf32>
    %21 = arith.subf %17, %20 : vector<16x16xf32>
    %22 = math.exp %21 : vector<16x16xf32>
    %cst_18 = arith.constant dense<0.000000e+00> : vector<16xf32>
    %23 = vector.multi_reduction <add>, %22, %cst_18 [1] : vector<16x16xf32> to vector<16xf32>
    %24 = vector.shape_cast %23 : vector<16xf32> to vector<16x1xf32>
    %25 = tpu.reciprocal %24 {approx = true} : vector<16x1xf32> -> vector<16x1xf32>
    %26 = vector.broadcast %25 : vector<16x1xf32> to vector<16x16xf32>
    %27 = arith.mulf %22, %26 : vector<16x16xf32>
    %cst_19 = arith.constant dense<0.000000e+00> : vector<16x32xf32>
    %28 = tpu.matmul %27, %16, %cst_19 {dimension_numbers = #tpu.dot_dimension_numbers<[1], [0], [0], [1], [0, 0, 1, 1], [], []>} : vector<16x16xf32>, vector<16x32xf32>, vector<16x32xf32> -> vector<16x32xf32>
    %c0_20 = arith.constant 0 : index
    %29 = memref.load %arg8[%c0_20] : memref<1xf32, #tpu.memory_space<smem>>
    %30 = vector.broadcast %29 : f32 to vector<16x32xf32>
    %31 = arith.mulf %30, %28 : vector<16x32xf32>
    %32 = arith.addf %31, %1 : vector<16x32xf32>
    %c0_21 = arith.constant 0 : index
    %c0_22 = arith.constant 0 : index
    %c0_23 = arith.constant 0 : index
    %33 = vector.load %arg9[%c0_21, %c0_22, %c0_23] : memref<1x16x32xf32, #tpu.memory_space<vmem>>, vector<1x16x32xf32>
    %34 = vector.shape_cast %33 : vector<1x16x32xf32> to vector<16x32xf32>
    %35 = vector.shape_cast %32 : vector<16x32xf32> to vector<1x16x32xf32>
    tpu.vector_store %arg9[%c0_21, %c0_22, %c0_23], %35 {strides = array<i32>} : memref<1x16x32xf32, #tpu.memory_space<vmem>>, vector<1x16x32xf32>,
    return
  }
  func.func @transform_0(%arg0: i32) -> (i32, i32, i32) {
    %c0_i32 = arith.constant 0 : i32
    %c0_i32_0 = arith.constant 0 : i32
    %c0_i32_1 = arith.constant 0 : i32
    return %arg0, %c0_i32, %c0_i32_0 : i32, i32, i32
  }
  func.func @transform_1(%arg0: i32) -> (i32, i32) {
    %c0_i32 = arith.constant 0 : i32
    %c0_i32_0 = arith.constant 0 : i32
    %c0_i32_1 = arith.constant 0 : i32
    return %c0_i32, %c0_i32_0 : i32, i32
  }
  func.func @transform_2(%arg0: i32) -> (i32, i32) {
    %c0_i32 = arith.constant 0 : i32
    %c0_i32_0 = arith.constant 0 : i32
    %c0_i32_1 = arith.constant 0 : i32
    return %c0_i32, %c0_i32_0 : i32, i32
  }
  func.func @transform_3(%arg0: i32) -> (i32, i32) {
    %c0_i32 = arith.constant 0 : i32
    %c0_i32_0 = arith.constant 0 : i32
    %c0_i32_1 = arith.constant 0 : i32
    return %c0_i32, %c0_i32_0 : i32, i32
  }
  func.func @transform_4(%arg0: i32) -> (i32, i32) {
    %c0_i32 = arith.constant 0 : i32
    %c0_i32_0 = arith.constant 0 : i32
    %c0_i32_1 = arith.constant 0 : i32
    return %c0_i32, %c0_i32_0 : i32, i32
  }
  func.func @transform_5(%arg0: i32) -> (i32, i32) {
    %c0_i32 = arith.constant 0 : i32
    %c0_i32_0 = arith.constant 0 : i32
    %c0_i32_1 = arith.constant 0 : i32
    return %c0_i32, %c0_i32_0 : i32, i32
  }
  func.func @transform_6(%arg0: i32) -> (i32, i32) {
    %c0_i32 = arith.constant 0 : i32
    %c0_i32_0 = arith.constant 0 : i32
    %c0_i32_1 = arith.constant 0 : i32
    return %c0_i32, %c0_i32_0 : i32, i32
  }
  func.func @transform_7(%arg0: i32) -> i32 {
    %c0_i32 = arith.constant 0 : i32
    %c0_i32_0 = arith.constant 0 : i32
    return %c0_i32 : i32
  }
  func.func @transform_8(%arg0: i32) -> (i32, i32, i32) {
    %c0_i32 = arith.constant 0 : i32
    %c0_i32_0 = arith.constant 0 : i32
    %c0_i32_1 = arith.constant 0 : i32
    return %arg0, %c0_i32, %c0_i32_0 : i32, i32, i32
  }
}

module attributes {stable_mosaic.version = 11 : i64} {
  func.func @_gemm_kernel(%arg0: i32, %arg1: i32, %arg2: i32, %arg3: memref<16x512xbf16, #tpu.memory_space<vmem>>, %arg4: memref<512x128xbf16, #tpu.memory_space<vmem>>, %arg5: memref<1x128xf32, #tpu.memory_space<vmem>>, %arg6: memref<16x128xf32, #tpu.memory_space<vmem>>, %arg7: memref<16x128xf32, #tpu.memory_space<vmem>>) attributes {dimension_semantics = [#tpu.dimension_semantics<parallel>, #tpu.dimension_semantics<parallel>, #tpu.dimension_semantics<arbitrary>], iteration_bounds = array<i64: 1, 1, 1>, scalar_prefetch = 0 : i64, scratch_operands = 1 : i64, tpu.core_type = #tpu.core_type<tc>, window_params = [{transform_indices = @transform_0, window_bounds = array<i64: 16, 512>}, {transform_indices = @transform_1, window_bounds = array<i64: 512, 128>}, {transform_indices = @transform_2, window_bounds = array<i64: 1, 128>}, {transform_indices = @transform_3, window_bounds = array<i64: 16, 128>}]} {
    %c0_i32 = arith.constant 0 : i32
    %0 = arith.cmpi eq, %arg2, %c0_i32 : i32
    %1 = arith.extui %0 : i1 to i32
    %c0_i32_0 = arith.constant 0 : i32
    %2 = arith.cmpi ne, %1, %c0_i32_0 : i32
    scf.if %2 {
      %cst_12 = arith.constant 0.000000e+00 : f32
      %17 = vector.broadcast %cst_12 : f32 to vector<16x128xf32>
      %c0_13 = arith.constant 0 : index
      %c0_14 = arith.constant 0 : index
      %18 = vector.load %arg7[%c0_13, %c0_14] : memref<16x128xf32, #tpu.memory_space<vmem>>, vector<16x128xf32>
      tpu.vector_store %arg7[%c0_13, %c0_14], %17 {strides = array<i32>} : memref<16x128xf32, #tpu.memory_space<vmem>>, vector<16x128xf32>,
    } else {
    }
    %c0 = arith.constant 0 : index
    %c0_1 = arith.constant 0 : index
    %3 = vector.load %arg3[%c0, %c0_1] : memref<16x512xbf16, #tpu.memory_space<vmem>>, vector<16x512xbf16>
    %cst = arith.constant 0.000000e+00 : bf16
    %4 = vector.broadcast %cst : bf16 to vector<16x512xbf16>
    %5 = arith.cmpf oge, %3, %4 : vector<16x512xbf16>
    %cst_2 = arith.constant 2.001950e-01 : bf16
    %6 = vector.broadcast %cst_2 : bf16 to vector<16x512xbf16>
    %7 = arith.mulf %3, %6 : vector<16x512xbf16>
    %8 = arith.select %5, %3, %7 : vector<16x512xi1>, vector<16x512xbf16>
    %c0_3 = arith.constant 0 : index
    %c0_4 = arith.constant 0 : index
    %9 = vector.load %arg7[%c0_3, %c0_4] : memref<16x128xf32, #tpu.memory_space<vmem>>, vector<16x128xf32>
    %c0_5 = arith.constant 0 : index
    %c0_6 = arith.constant 0 : index
    %10 = vector.load %arg4[%c0_5, %c0_6] : memref<512x128xbf16, #tpu.memory_space<vmem>>, vector<512x128xbf16>
    %cst_7 = arith.constant dense<0.000000e+00> : vector<16x128xf32>
    %11 = tpu.matmul %8, %10, %cst_7 {dimension_numbers = #tpu.dot_dimension_numbers<[1], [0], [0], [1], [0, 0, 1, 1], [], []>} : vector<16x512xbf16>, vector<512x128xbf16>, vector<16x128xf32> -> vector<16x128xf32>
    %12 = arith.addf %9, %11 : vector<16x128xf32>
    %c0_8 = arith.constant 0 : index
    %c0_9 = arith.constant 0 : index
    %13 = vector.load %arg7[%c0_8, %c0_9] : memref<16x128xf32, #tpu.memory_space<vmem>>, vector<16x128xf32>
    tpu.vector_store %arg7[%c0_8, %c0_9], %12 {strides = array<i32>} : memref<16x128xf32, #tpu.memory_space<vmem>>, vector<16x128xf32>,
    %c0_i32_10 = arith.constant 0 : i32
    %14 = arith.cmpi eq, %arg2, %c0_i32_10 : i32
    %15 = arith.extui %14 : i1 to i32
    %c0_i32_11 = arith.constant 0 : i32
    %16 = arith.cmpi ne, %15, %c0_i32_11 : i32
    scf.if %16 {
      %c0_12 = arith.constant 0 : index
      %c0_13 = arith.constant 0 : index
      %17 = vector.load %arg7[%c0_12, %c0_13] : memref<16x128xf32, #tpu.memory_space<vmem>>, vector<16x128xf32>
      %c0_14 = arith.constant 0 : index
      %c0_15 = arith.constant 0 : index
      %18 = vector.load %arg5[%c0_14, %c0_15] : memref<1x128xf32, #tpu.memory_space<vmem>>, vector<1x128xf32>
      %19 = vector.broadcast %18 : vector<1x128xf32> to vector<16x128xf32>
      %20 = arith.addf %17, %19 : vector<16x128xf32>
      %c0_16 = arith.constant 0 : index
      %c0_17 = arith.constant 0 : index
      %21 = vector.load %arg6[%c0_16, %c0_17] : memref<16x128xf32, #tpu.memory_space<vmem>>, vector<16x128xf32>
      tpu.vector_store %arg6[%c0_16, %c0_17], %20 {strides = array<i32>} : memref<16x128xf32, #tpu.memory_space<vmem>>, vector<16x128xf32>,
    } else {
    }
    return
  }
  func.func @transform_0(%arg0: i32, %arg1: i32, %arg2: i32) -> (i32, i32) {
    %c0_i32 = arith.constant 0 : i32
    return %arg0, %arg2 : i32, i32
  }
  func.func @transform_1(%arg0: i32, %arg1: i32, %arg2: i32) -> (i32, i32) {
    %c0_i32 = arith.constant 0 : i32
    return %arg2, %arg1 : i32, i32
  }
  func.func @transform_2(%arg0: i32, %arg1: i32, %arg2: i32) -> (i32, i32) {
    %c0_i32 = arith.constant 0 : i32
    %c0_i32_0 = arith.constant 0 : i32
    return %c0_i32, %arg1 : i32, i32
  }
  func.func @transform_3(%arg0: i32, %arg1: i32, %arg2: i32) -> (i32, i32) {
    %c0_i32 = arith.constant 0 : i32
    return %arg0, %arg1 : i32, i32
  }
}

module attributes {stable_mosaic.version = 11 : i64} {
  func.func @_bn_stats_kernel(%arg0: i32, %arg1: memref<8x128xf32, #tpu.memory_space<vmem>>, %arg2: memref<8x128xf32, #tpu.memory_space<vmem>>, %arg3: memref<8x128xf32, #tpu.memory_space<vmem>>) attributes {dimension_semantics = [#tpu.dimension_semantics<arbitrary>], iteration_bounds = array<i64: 1>, scalar_prefetch = 0 : i64, scratch_operands = 0 : i64, tpu.core_type = #tpu.core_type<tc>, window_params = [{transform_indices = @transform_0, window_bounds = array<i64: 8, 128>}, {pipeline_mode = #tpu.pipeline_mode<synchronous>, transform_indices = @transform_1, window_bounds = array<i64: 8, 128>}, {pipeline_mode = #tpu.pipeline_mode<synchronous>, transform_indices = @transform_2, window_bounds = array<i64: 8, 128>}]} {
    %c0_i32 = arith.constant 0 : i32
    %0 = arith.cmpi eq, %arg0, %c0_i32 : i32
    %1 = arith.extui %0 : i1 to i32
    %c0_i32_0 = arith.constant 0 : i32
    %2 = arith.cmpi ne, %1, %c0_i32_0 : i32
    scf.if %2 {
      %cst_11 = arith.constant 0.000000e+00 : f32
      %17 = vector.broadcast %cst_11 : f32 to vector<8x128xf32>
      %c0_12 = arith.constant 0 : index
      %c0_13 = arith.constant 0 : index
      %18 = vector.load %arg2[%c0_12, %c0_13] : memref<8x128xf32, #tpu.memory_space<vmem>>, vector<8x128xf32>
      tpu.vector_store %arg2[%c0_12, %c0_13], %17 {strides = array<i32>} : memref<8x128xf32, #tpu.memory_space<vmem>>, vector<8x128xf32>,
      %cst_14 = arith.constant 0.000000e+00 : f32
      %19 = vector.broadcast %cst_14 : f32 to vector<8x128xf32>
      %c0_15 = arith.constant 0 : index
      %c0_16 = arith.constant 0 : index
      %20 = vector.load %arg3[%c0_15, %c0_16] : memref<8x128xf32, #tpu.memory_space<vmem>>, vector<8x128xf32>
      tpu.vector_store %arg3[%c0_15, %c0_16], %19 {strides = array<i32>} : memref<8x128xf32, #tpu.memory_space<vmem>>, vector<8x128xf32>,
    } else {
    }
    %c0 = arith.constant 0 : index
    %c0_1 = arith.constant 0 : index
    %3 = vector.load %arg1[%c0, %c0_1] : memref<8x128xf32, #tpu.memory_space<vmem>>, vector<8x128xf32>
    %c0_2 = arith.constant 0 : index
    %c0_3 = arith.constant 0 : index
    %4 = vector.load %arg2[%c0_2, %c0_3] : memref<8x128xf32, #tpu.memory_space<vmem>>, vector<8x128xf32>
    %cst = arith.constant dense<0.000000e+00> : vector<128xf32>
    %5 = vector.multi_reduction <add>, %3, %cst [0] : vector<8x128xf32> to vector<128xf32>
    %6 = vector.shape_cast %5 : vector<128xf32> to vector<1x128xf32>
    %7 = vector.broadcast %6 : vector<1x128xf32> to vector<8x128xf32>
    %8 = arith.addf %4, %7 : vector<8x128xf32>
    %c0_4 = arith.constant 0 : index
    %c0_5 = arith.constant 0 : index
    %9 = vector.load %arg2[%c0_4, %c0_5] : memref<8x128xf32, #tpu.memory_space<vmem>>, vector<8x128xf32>
    tpu.vector_store %arg2[%c0_4, %c0_5], %8 {strides = array<i32>} : memref<8x128xf32, #tpu.memory_space<vmem>>, vector<8x128xf32>,
    %c0_6 = arith.constant 0 : index
    %c0_7 = arith.constant 0 : index
    %10 = vector.load %arg3[%c0_6, %c0_7] : memref<8x128xf32, #tpu.memory_space<vmem>>, vector<8x128xf32>
    %11 = arith.mulf %3, %3 : vector<8x128xf32>
    %cst_8 = arith.constant dense<0.000000e+00> : vector<128xf32>
    %12 = vector.multi_reduction <add>, %11, %cst_8 [0] : vector<8x128xf32> to vector<128xf32>
    %13 = vector.shape_cast %12 : vector<128xf32> to vector<1x128xf32>
    %14 = vector.broadcast %13 : vector<1x128xf32> to vector<8x128xf32>
    %15 = arith.addf %10, %14 : vector<8x128xf32>
    %c0_9 = arith.constant 0 : index
    %c0_10 = arith.constant 0 : index
    %16 = vector.load %arg3[%c0_9, %c0_10] : memref<8x128xf32, #tpu.memory_space<vmem>>, vector<8x128xf32>
    tpu.vector_store %arg3[%c0_9, %c0_10], %15 {strides = array<i32>} : memref<8x128xf32, #tpu.memory_space<vmem>>, vector<8x128xf32>,
    return
  }
  func.func @transform_0(%arg0: i32) -> (i32, i32) {
    %c0_i32 = arith.constant 0 : i32
    %c0_i32_0 = arith.constant 0 : i32
    return %arg0, %c0_i32 : i32, i32
  }
  func.func @transform_1(%arg0: i32) -> (i32, i32) {
    %c0_i32 = arith.constant 0 : i32
    %c0_i32_0 = arith.constant 0 : i32
    %c0_i32_1 = arith.constant 0 : i32
    return %c0_i32, %c0_i32_0 : i32, i32
  }
  func.func @transform_2(%arg0: i32) -> (i32, i32) {
    %c0_i32 = arith.constant 0 : i32
    %c0_i32_0 = arith.constant 0 : i32
    %c0_i32_1 = arith.constant 0 : i32
    return %c0_i32, %c0_i32_0 : i32, i32
  }
}

module attributes {stable_mosaic.version = 11 : i64} {
  func.func @_bn_apply_kernel(%arg0: i32, %arg1: memref<8x128xf32, #tpu.memory_space<vmem>>, %arg2: memref<1x128xf32, #tpu.memory_space<vmem>>, %arg3: memref<1x128xf32, #tpu.memory_space<vmem>>, %arg4: memref<8x128xf32, #tpu.memory_space<vmem>>) attributes {dimension_semantics = [#tpu.dimension_semantics<parallel>], iteration_bounds = array<i64: 1>, scalar_prefetch = 0 : i64, scratch_operands = 0 : i64, tpu.core_type = #tpu.core_type<tc>, window_params = [{transform_indices = @transform_0, window_bounds = array<i64: 8, 128>}, {pipeline_mode = #tpu.pipeline_mode<synchronous>, transform_indices = @transform_1, window_bounds = array<i64: 1, 128>}, {pipeline_mode = #tpu.pipeline_mode<synchronous>, transform_indices = @transform_2, window_bounds = array<i64: 1, 128>}, {transform_indices = @transform_3, window_bounds = array<i64: 8, 128>}]} {
    %c0 = arith.constant 0 : index
    %c0_0 = arith.constant 0 : index
    %0 = vector.load %arg1[%c0, %c0_0] : memref<8x128xf32, #tpu.memory_space<vmem>>, vector<8x128xf32>
    %c0_1 = arith.constant 0 : index
    %c0_2 = arith.constant 0 : index
    %1 = vector.load %arg2[%c0_1, %c0_2] : memref<1x128xf32, #tpu.memory_space<vmem>>, vector<1x128xf32>
    %2 = vector.broadcast %1 : vector<1x128xf32> to vector<8x128xf32>
    %3 = arith.mulf %0, %2 : vector<8x128xf32>
    %c0_3 = arith.constant 0 : index
    %c0_4 = arith.constant 0 : index
    %4 = vector.load %arg3[%c0_3, %c0_4] : memref<1x128xf32, #tpu.memory_space<vmem>>, vector<1x128xf32>
    %5 = vector.broadcast %4 : vector<1x128xf32> to vector<8x128xf32>
    %6 = arith.addf %3, %5 : vector<8x128xf32>
    %c0_5 = arith.constant 0 : index
    %c0_6 = arith.constant 0 : index
    %7 = vector.load %arg4[%c0_5, %c0_6] : memref<8x128xf32, #tpu.memory_space<vmem>>, vector<8x128xf32>
    tpu.vector_store %arg4[%c0_5, %c0_6], %6 {strides = array<i32>} : memref<8x128xf32, #tpu.memory_space<vmem>>, vector<8x128xf32>,
    return
  }
  func.func @transform_0(%arg0: i32) -> (i32, i32) {
    %c0_i32 = arith.constant 0 : i32
    %c0_i32_0 = arith.constant 0 : i32
    return %arg0, %c0_i32 : i32, i32
  }
  func.func @transform_1(%arg0: i32) -> (i32, i32) {
    %c0_i32 = arith.constant 0 : i32
    %c0_i32_0 = arith.constant 0 : i32
    %c0_i32_1 = arith.constant 0 : i32
    return %c0_i32, %c0_i32_0 : i32, i32
  }
  func.func @transform_2(%arg0: i32) -> (i32, i32) {
    %c0_i32 = arith.constant 0 : i32
    %c0_i32_0 = arith.constant 0 : i32
    %c0_i32_1 = arith.constant 0 : i32
    return %c0_i32, %c0_i32_0 : i32, i32
  }
  func.func @transform_3(%arg0: i32) -> (i32, i32) {
    %c0_i32 = arith.constant 0 : i32
    %c0_i32_0 = arith.constant 0 : i32
    return %arg0, %c0_i32 : i32, i32
  }
}

module attributes {stable_mosaic.version = 11 : i64} {
  func.func @_gemm_kernel(%arg0: i32, %arg1: i32, %arg2: i32, %arg3: memref<16x512xbf16, #tpu.memory_space<vmem>>, %arg4: memref<512x128xbf16, #tpu.memory_space<vmem>>, %arg5: memref<1x128xf32, #tpu.memory_space<vmem>>, %arg6: memref<16x128xf32, #tpu.memory_space<vmem>>, %arg7: memref<16x128xf32, #tpu.memory_space<vmem>>) attributes {dimension_semantics = [#tpu.dimension_semantics<parallel>, #tpu.dimension_semantics<parallel>, #tpu.dimension_semantics<arbitrary>], iteration_bounds = array<i64: 1, 1, 2>, scalar_prefetch = 0 : i64, scratch_operands = 1 : i64, tpu.core_type = #tpu.core_type<tc>, window_params = [{transform_indices = @transform_0, window_bounds = array<i64: 16, 512>}, {transform_indices = @transform_1, window_bounds = array<i64: 512, 128>}, {transform_indices = @transform_2, window_bounds = array<i64: 1, 128>}, {transform_indices = @transform_3, window_bounds = array<i64: 16, 128>}]} {
    %c0_i32 = arith.constant 0 : i32
    %0 = arith.cmpi eq, %arg2, %c0_i32 : i32
    %1 = arith.extui %0 : i1 to i32
    %c0_i32_0 = arith.constant 0 : i32
    %2 = arith.cmpi ne, %1, %c0_i32_0 : i32
    scf.if %2 {
      %cst_11 = arith.constant 0.000000e+00 : f32
      %17 = vector.broadcast %cst_11 : f32 to vector<16x128xf32>
      %c0_12 = arith.constant 0 : index
      %c0_13 = arith.constant 0 : index
      %18 = vector.load %arg7[%c0_12, %c0_13] : memref<16x128xf32, #tpu.memory_space<vmem>>, vector<16x128xf32>
      tpu.vector_store %arg7[%c0_12, %c0_13], %17 {strides = array<i32>} : memref<16x128xf32, #tpu.memory_space<vmem>>, vector<16x128xf32>,
    } else {
    }
    %c0 = arith.constant 0 : index
    %c0_1 = arith.constant 0 : index
    %3 = vector.load %arg3[%c0, %c0_1] : memref<16x512xbf16, #tpu.memory_space<vmem>>, vector<16x512xbf16>
    %cst = arith.constant 0.000000e+00 : bf16
    %4 = vector.broadcast %cst : bf16 to vector<16x512xbf16>
    %5 = arith.cmpf oge, %3, %4 : vector<16x512xbf16>
    %cst_2 = arith.constant 2.001950e-01 : bf16
    %6 = vector.broadcast %cst_2 : bf16 to vector<16x512xbf16>
    %7 = arith.mulf %3, %6 : vector<16x512xbf16>
    %8 = arith.select %5, %3, %7 : vector<16x512xi1>, vector<16x512xbf16>
    %c0_3 = arith.constant 0 : index
    %c0_4 = arith.constant 0 : index
    %9 = vector.load %arg7[%c0_3, %c0_4] : memref<16x128xf32, #tpu.memory_space<vmem>>, vector<16x128xf32>
    %c0_5 = arith.constant 0 : index
    %c0_6 = arith.constant 0 : index
    %10 = vector.load %arg4[%c0_5, %c0_6] : memref<512x128xbf16, #tpu.memory_space<vmem>>, vector<512x128xbf16>
    %cst_7 = arith.constant dense<0.000000e+00> : vector<16x128xf32>
    %11 = tpu.matmul %8, %10, %cst_7 {dimension_numbers = #tpu.dot_dimension_numbers<[1], [0], [0], [1], [0, 0, 1, 1], [], []>} : vector<16x512xbf16>, vector<512x128xbf16>, vector<16x128xf32> -> vector<16x128xf32>
    %12 = arith.addf %9, %11 : vector<16x128xf32>
    %c0_8 = arith.constant 0 : index
    %c0_9 = arith.constant 0 : index
    %13 = vector.load %arg7[%c0_8, %c0_9] : memref<16x128xf32, #tpu.memory_space<vmem>>, vector<16x128xf32>
    tpu.vector_store %arg7[%c0_8, %c0_9], %12 {strides = array<i32>} : memref<16x128xf32, #tpu.memory_space<vmem>>, vector<16x128xf32>,
    %c1_i32 = arith.constant 1 : i32
    %14 = arith.cmpi eq, %arg2, %c1_i32 : i32
    %15 = arith.extui %14 : i1 to i32
    %c0_i32_10 = arith.constant 0 : i32
    %16 = arith.cmpi ne, %15, %c0_i32_10 : i32
    scf.if %16 {
      %c0_11 = arith.constant 0 : index
      %c0_12 = arith.constant 0 : index
      %17 = vector.load %arg7[%c0_11, %c0_12] : memref<16x128xf32, #tpu.memory_space<vmem>>, vector<16x128xf32>
      %c0_13 = arith.constant 0 : index
      %c0_14 = arith.constant 0 : index
      %18 = vector.load %arg5[%c0_13, %c0_14] : memref<1x128xf32, #tpu.memory_space<vmem>>, vector<1x128xf32>
      %19 = vector.broadcast %18 : vector<1x128xf32> to vector<16x128xf32>
      %20 = arith.addf %17, %19 : vector<16x128xf32>
      %c0_15 = arith.constant 0 : index
      %c0_16 = arith.constant 0 : index
      %21 = vector.load %arg6[%c0_15, %c0_16] : memref<16x128xf32, #tpu.memory_space<vmem>>, vector<16x128xf32>
      tpu.vector_store %arg6[%c0_15, %c0_16], %20 {strides = array<i32>} : memref<16x128xf32, #tpu.memory_space<vmem>>, vector<16x128xf32>,
    } else {
    }
    return
  }
  func.func @transform_0(%arg0: i32, %arg1: i32, %arg2: i32) -> (i32, i32) {
    %c0_i32 = arith.constant 0 : i32
    return %arg0, %arg2 : i32, i32
  }
  func.func @transform_1(%arg0: i32, %arg1: i32, %arg2: i32) -> (i32, i32) {
    %c0_i32 = arith.constant 0 : i32
    return %arg2, %arg1 : i32, i32
  }
  func.func @transform_2(%arg0: i32, %arg1: i32, %arg2: i32) -> (i32, i32) {
    %c0_i32 = arith.constant 0 : i32
    %c0_i32_0 = arith.constant 0 : i32
    return %c0_i32, %arg1 : i32, i32
  }
  func.func @transform_3(%arg0: i32, %arg1: i32, %arg2: i32) -> (i32, i32) {
    %c0_i32 = arith.constant 0 : i32
    return %arg0, %arg1 : i32, i32
  }
}

module attributes {stable_mosaic.version = 11 : i64} {
  func.func @_gemm_kernel(%arg0: i32, %arg1: i32, %arg2: i32, %arg3: memref<16x256xbf16, #tpu.memory_space<vmem>>, %arg4: memref<256x256xbf16, #tpu.memory_space<vmem>>, %arg5: memref<1x256xf32, #tpu.memory_space<vmem>>, %arg6: memref<16x256xf32, #tpu.memory_space<vmem>>, %arg7: memref<16x256xf32, #tpu.memory_space<vmem>>) attributes {dimension_semantics = [#tpu.dimension_semantics<parallel>, #tpu.dimension_semantics<parallel>, #tpu.dimension_semantics<arbitrary>], iteration_bounds = array<i64: 1, 1, 1>, scalar_prefetch = 0 : i64, scratch_operands = 1 : i64, tpu.core_type = #tpu.core_type<tc>, window_params = [{transform_indices = @transform_0, window_bounds = array<i64: 16, 256>}, {transform_indices = @transform_1, window_bounds = array<i64: 256, 256>}, {transform_indices = @transform_2, window_bounds = array<i64: 1, 256>}, {transform_indices = @transform_3, window_bounds = array<i64: 16, 256>}]} {
    %c0_i32 = arith.constant 0 : i32
    %0 = arith.cmpi eq, %arg2, %c0_i32 : i32
    %1 = arith.extui %0 : i1 to i32
    %c0_i32_0 = arith.constant 0 : i32
    %2 = arith.cmpi ne, %1, %c0_i32_0 : i32
    scf.if %2 {
      %cst_11 = arith.constant 0.000000e+00 : f32
      %14 = vector.broadcast %cst_11 : f32 to vector<16x256xf32>
      %c0_12 = arith.constant 0 : index
      %c0_13 = arith.constant 0 : index
      %15 = vector.load %arg7[%c0_12, %c0_13] : memref<16x256xf32, #tpu.memory_space<vmem>>, vector<16x256xf32>
      tpu.vector_store %arg7[%c0_12, %c0_13], %14 {strides = array<i32>} : memref<16x256xf32, #tpu.memory_space<vmem>>, vector<16x256xf32>,
    } else {
    }
    %c0 = arith.constant 0 : index
    %c0_1 = arith.constant 0 : index
    %3 = vector.load %arg3[%c0, %c0_1] : memref<16x256xbf16, #tpu.memory_space<vmem>>, vector<16x256xbf16>
    %cst = arith.constant 0.000000e+00 : bf16
    %4 = vector.broadcast %cst : bf16 to vector<16x256xbf16>
    %5 = arith.maximumf %3, %4 : vector<16x256xbf16>
    %c0_2 = arith.constant 0 : index
    %c0_3 = arith.constant 0 : index
    %6 = vector.load %arg7[%c0_2, %c0_3] : memref<16x256xf32, #tpu.memory_space<vmem>>, vector<16x256xf32>
    %c0_4 = arith.constant 0 : index
    %c0_5 = arith.constant 0 : index
    %7 = vector.load %arg4[%c0_4, %c0_5] : memref<256x256xbf16, #tpu.memory_space<vmem>>, vector<256x256xbf16>
    %cst_6 = arith.constant dense<0.000000e+00> : vector<16x256xf32>
    %8 = tpu.matmul %5, %7, %cst_6 {dimension_numbers = #tpu.dot_dimension_numbers<[1], [0], [0], [1], [0, 0, 1, 1], [], []>} : vector<16x256xbf16>, vector<256x256xbf16>, vector<16x256xf32> -> vector<16x256xf32>
    %9 = arith.addf %6, %8 : vector<16x256xf32>
    %c0_7 = arith.constant 0 : index
    %c0_8 = arith.constant 0 : index
    %10 = vector.load %arg7[%c0_7, %c0_8] : memref<16x256xf32, #tpu.memory_space<vmem>>, vector<16x256xf32>
    tpu.vector_store %arg7[%c0_7, %c0_8], %9 {strides = array<i32>} : memref<16x256xf32, #tpu.memory_space<vmem>>, vector<16x256xf32>,
    %c0_i32_9 = arith.constant 0 : i32
    %11 = arith.cmpi eq, %arg2, %c0_i32_9 : i32
    %12 = arith.extui %11 : i1 to i32
    %c0_i32_10 = arith.constant 0 : i32
    %13 = arith.cmpi ne, %12, %c0_i32_10 : i32
    scf.if %13 {
      %c0_11 = arith.constant 0 : index
      %c0_12 = arith.constant 0 : index
      %14 = vector.load %arg7[%c0_11, %c0_12] : memref<16x256xf32, #tpu.memory_space<vmem>>, vector<16x256xf32>
      %c0_13 = arith.constant 0 : index
      %c0_14 = arith.constant 0 : index
      %15 = vector.load %arg5[%c0_13, %c0_14] : memref<1x256xf32, #tpu.memory_space<vmem>>, vector<1x256xf32>
      %16 = vector.broadcast %15 : vector<1x256xf32> to vector<16x256xf32>
      %17 = arith.addf %14, %16 : vector<16x256xf32>
      %c0_15 = arith.constant 0 : index
      %c0_16 = arith.constant 0 : index
      %18 = vector.load %arg6[%c0_15, %c0_16] : memref<16x256xf32, #tpu.memory_space<vmem>>, vector<16x256xf32>
      tpu.vector_store %arg6[%c0_15, %c0_16], %17 {strides = array<i32>} : memref<16x256xf32, #tpu.memory_space<vmem>>, vector<16x256xf32>,
    } else {
    }
    return
  }
  func.func @transform_0(%arg0: i32, %arg1: i32, %arg2: i32) -> (i32, i32) {
    %c0_i32 = arith.constant 0 : i32
    return %arg0, %arg2 : i32, i32
  }
  func.func @transform_1(%arg0: i32, %arg1: i32, %arg2: i32) -> (i32, i32) {
    %c0_i32 = arith.constant 0 : i32
    return %arg2, %arg1 : i32, i32
  }
  func.func @transform_2(%arg0: i32, %arg1: i32, %arg2: i32) -> (i32, i32) {
    %c0_i32 = arith.constant 0 : i32
    %c0_i32_0 = arith.constant 0 : i32
    return %c0_i32, %arg1 : i32, i32
  }
  func.func @transform_3(%arg0: i32, %arg1: i32, %arg2: i32) -> (i32, i32) {
    %c0_i32 = arith.constant 0 : i32
    return %arg0, %arg1 : i32, i32
  }
}

module attributes {stable_mosaic.version = 11 : i64} {
  func.func @_gemm_kernel(%arg0: i32, %arg1: i32, %arg2: i32, %arg3: memref<32x512xbf16, #tpu.memory_space<vmem>>, %arg4: memref<512x128xbf16, #tpu.memory_space<vmem>>, %arg5: memref<1x128xf32, #tpu.memory_space<vmem>>, %arg6: memref<32x128xf32, #tpu.memory_space<vmem>>, %arg7: memref<32x128xf32, #tpu.memory_space<vmem>>) attributes {dimension_semantics = [#tpu.dimension_semantics<parallel>, #tpu.dimension_semantics<parallel>, #tpu.dimension_semantics<arbitrary>], iteration_bounds = array<i64: 1, 1, 1>, scalar_prefetch = 0 : i64, scratch_operands = 1 : i64, tpu.core_type = #tpu.core_type<tc>, window_params = [{transform_indices = @transform_0, window_bounds = array<i64: 32, 512>}, {transform_indices = @transform_1, window_bounds = array<i64: 512, 128>}, {transform_indices = @transform_2, window_bounds = array<i64: 1, 128>}, {transform_indices = @transform_3, window_bounds = array<i64: 32, 128>}]} {
    %c0_i32 = arith.constant 0 : i32
    %0 = arith.cmpi eq, %arg2, %c0_i32 : i32
    %1 = arith.extui %0 : i1 to i32
    %c0_i32_0 = arith.constant 0 : i32
    %2 = arith.cmpi ne, %1, %c0_i32_0 : i32
    scf.if %2 {
      %cst_11 = arith.constant 0.000000e+00 : f32
      %14 = vector.broadcast %cst_11 : f32 to vector<32x128xf32>
      %c0_12 = arith.constant 0 : index
      %c0_13 = arith.constant 0 : index
      %15 = vector.load %arg7[%c0_12, %c0_13] : memref<32x128xf32, #tpu.memory_space<vmem>>, vector<32x128xf32>
      tpu.vector_store %arg7[%c0_12, %c0_13], %14 {strides = array<i32>} : memref<32x128xf32, #tpu.memory_space<vmem>>, vector<32x128xf32>,
    } else {
    }
    %c0 = arith.constant 0 : index
    %c0_1 = arith.constant 0 : index
    %3 = vector.load %arg3[%c0, %c0_1] : memref<32x512xbf16, #tpu.memory_space<vmem>>, vector<32x512xbf16>
    %cst = arith.constant 0.000000e+00 : bf16
    %4 = vector.broadcast %cst : bf16 to vector<32x512xbf16>
    %5 = arith.maximumf %3, %4 : vector<32x512xbf16>
    %c0_2 = arith.constant 0 : index
    %c0_3 = arith.constant 0 : index
    %6 = vector.load %arg7[%c0_2, %c0_3] : memref<32x128xf32, #tpu.memory_space<vmem>>, vector<32x128xf32>
    %c0_4 = arith.constant 0 : index
    %c0_5 = arith.constant 0 : index
    %7 = vector.load %arg4[%c0_4, %c0_5] : memref<512x128xbf16, #tpu.memory_space<vmem>>, vector<512x128xbf16>
    %cst_6 = arith.constant dense<0.000000e+00> : vector<32x128xf32>
    %8 = tpu.matmul %5, %7, %cst_6 {dimension_numbers = #tpu.dot_dimension_numbers<[1], [0], [0], [1], [0, 0, 1, 1], [], []>} : vector<32x512xbf16>, vector<512x128xbf16>, vector<32x128xf32> -> vector<32x128xf32>
    %9 = arith.addf %6, %8 : vector<32x128xf32>
    %c0_7 = arith.constant 0 : index
    %c0_8 = arith.constant 0 : index
    %10 = vector.load %arg7[%c0_7, %c0_8] : memref<32x128xf32, #tpu.memory_space<vmem>>, vector<32x128xf32>
    tpu.vector_store %arg7[%c0_7, %c0_8], %9 {strides = array<i32>} : memref<32x128xf32, #tpu.memory_space<vmem>>, vector<32x128xf32>,
    %c0_i32_9 = arith.constant 0 : i32
    %11 = arith.cmpi eq, %arg2, %c0_i32_9 : i32
    %12 = arith.extui %11 : i1 to i32
    %c0_i32_10 = arith.constant 0 : i32
    %13 = arith.cmpi ne, %12, %c0_i32_10 : i32
    scf.if %13 {
      %c0_11 = arith.constant 0 : index
      %c0_12 = arith.constant 0 : index
      %14 = vector.load %arg7[%c0_11, %c0_12] : memref<32x128xf32, #tpu.memory_space<vmem>>, vector<32x128xf32>
      %c0_13 = arith.constant 0 : index
      %c0_14 = arith.constant 0 : index
      %15 = vector.load %arg5[%c0_13, %c0_14] : memref<1x128xf32, #tpu.memory_space<vmem>>, vector<1x128xf32>
      %16 = vector.broadcast %15 : vector<1x128xf32> to vector<32x128xf32>
      %17 = arith.addf %14, %16 : vector<32x128xf32>
      %c0_15 = arith.constant 0 : index
      %c0_16 = arith.constant 0 : index
      %18 = vector.load %arg6[%c0_15, %c0_16] : memref<32x128xf32, #tpu.memory_space<vmem>>, vector<32x128xf32>
      tpu.vector_store %arg6[%c0_15, %c0_16], %17 {strides = array<i32>} : memref<32x128xf32, #tpu.memory_space<vmem>>, vector<32x128xf32>,
    } else {
    }
    return
  }
  func.func @transform_0(%arg0: i32, %arg1: i32, %arg2: i32) -> (i32, i32) {
    %c0_i32 = arith.constant 0 : i32
    return %arg0, %arg2 : i32, i32
  }
  func.func @transform_1(%arg0: i32, %arg1: i32, %arg2: i32) -> (i32, i32) {
    %c0_i32 = arith.constant 0 : i32
    return %arg2, %arg1 : i32, i32
  }
  func.func @transform_2(%arg0: i32, %arg1: i32, %arg2: i32) -> (i32, i32) {
    %c0_i32 = arith.constant 0 : i32
    %c0_i32_0 = arith.constant 0 : i32
    return %c0_i32, %arg1 : i32, i32
  }
  func.func @transform_3(%arg0: i32, %arg1: i32, %arg2: i32) -> (i32, i32) {
    %c0_i32 = arith.constant 0 : i32
    return %arg0, %arg1 : i32, i32
  }
}

module attributes {stable_mosaic.version = 11 : i64} {
  func.func @_gemm_kernel(%arg0: i32, %arg1: i32, %arg2: i32, %arg3: memref<64x256xbf16, #tpu.memory_space<vmem>>, %arg4: memref<256x128xbf16, #tpu.memory_space<vmem>>, %arg5: memref<1x128xf32, #tpu.memory_space<vmem>>, %arg6: memref<64x128xf32, #tpu.memory_space<vmem>>, %arg7: memref<64x128xf32, #tpu.memory_space<vmem>>) attributes {dimension_semantics = [#tpu.dimension_semantics<parallel>, #tpu.dimension_semantics<parallel>, #tpu.dimension_semantics<arbitrary>], iteration_bounds = array<i64: 1, 1, 1>, scalar_prefetch = 0 : i64, scratch_operands = 1 : i64, tpu.core_type = #tpu.core_type<tc>, window_params = [{transform_indices = @transform_0, window_bounds = array<i64: 64, 256>}, {transform_indices = @transform_1, window_bounds = array<i64: 256, 128>}, {transform_indices = @transform_2, window_bounds = array<i64: 1, 128>}, {transform_indices = @transform_3, window_bounds = array<i64: 64, 128>}]} {
    %c0_i32 = arith.constant 0 : i32
    %0 = arith.cmpi eq, %arg2, %c0_i32 : i32
    %1 = arith.extui %0 : i1 to i32
    %c0_i32_0 = arith.constant 0 : i32
    %2 = arith.cmpi ne, %1, %c0_i32_0 : i32
    scf.if %2 {
      %cst_11 = arith.constant 0.000000e+00 : f32
      %14 = vector.broadcast %cst_11 : f32 to vector<64x128xf32>
      %c0_12 = arith.constant 0 : index
      %c0_13 = arith.constant 0 : index
      %15 = vector.load %arg7[%c0_12, %c0_13] : memref<64x128xf32, #tpu.memory_space<vmem>>, vector<64x128xf32>
      tpu.vector_store %arg7[%c0_12, %c0_13], %14 {strides = array<i32>} : memref<64x128xf32, #tpu.memory_space<vmem>>, vector<64x128xf32>,
    } else {
    }
    %c0 = arith.constant 0 : index
    %c0_1 = arith.constant 0 : index
    %3 = vector.load %arg3[%c0, %c0_1] : memref<64x256xbf16, #tpu.memory_space<vmem>>, vector<64x256xbf16>
    %cst = arith.constant 0.000000e+00 : bf16
    %4 = vector.broadcast %cst : bf16 to vector<64x256xbf16>
    %5 = arith.maximumf %3, %4 : vector<64x256xbf16>
    %c0_2 = arith.constant 0 : index
    %c0_3 = arith.constant 0 : index
    %6 = vector.load %arg7[%c0_2, %c0_3] : memref<64x128xf32, #tpu.memory_space<vmem>>, vector<64x128xf32>
    %c0_4 = arith.constant 0 : index
    %c0_5 = arith.constant 0 : index
    %7 = vector.load %arg4[%c0_4, %c0_5] : memref<256x128xbf16, #tpu.memory_space<vmem>>, vector<256x128xbf16>
    %cst_6 = arith.constant dense<0.000000e+00> : vector<64x128xf32>
    %8 = tpu.matmul %5, %7, %cst_6 {dimension_numbers = #tpu.dot_dimension_numbers<[1], [0], [0], [1], [0, 0, 1, 1], [], []>} : vector<64x256xbf16>, vector<256x128xbf16>, vector<64x128xf32> -> vector<64x128xf32>
    %9 = arith.addf %6, %8 : vector<64x128xf32>
    %c0_7 = arith.constant 0 : index
    %c0_8 = arith.constant 0 : index
    %10 = vector.load %arg7[%c0_7, %c0_8] : memref<64x128xf32, #tpu.memory_space<vmem>>, vector<64x128xf32>
    tpu.vector_store %arg7[%c0_7, %c0_8], %9 {strides = array<i32>} : memref<64x128xf32, #tpu.memory_space<vmem>>, vector<64x128xf32>,
    %c0_i32_9 = arith.constant 0 : i32
    %11 = arith.cmpi eq, %arg2, %c0_i32_9 : i32
    %12 = arith.extui %11 : i1 to i32
    %c0_i32_10 = arith.constant 0 : i32
    %13 = arith.cmpi ne, %12, %c0_i32_10 : i32
    scf.if %13 {
      %c0_11 = arith.constant 0 : index
      %c0_12 = arith.constant 0 : index
      %14 = vector.load %arg7[%c0_11, %c0_12] : memref<64x128xf32, #tpu.memory_space<vmem>>, vector<64x128xf32>
      %c0_13 = arith.constant 0 : index
      %c0_14 = arith.constant 0 : index
      %15 = vector.load %arg5[%c0_13, %c0_14] : memref<1x128xf32, #tpu.memory_space<vmem>>, vector<1x128xf32>
      %16 = vector.broadcast %15 : vector<1x128xf32> to vector<64x128xf32>
      %17 = arith.addf %14, %16 : vector<64x128xf32>
      %c0_15 = arith.constant 0 : index
      %c0_16 = arith.constant 0 : index
      %18 = vector.load %arg6[%c0_15, %c0_16] : memref<64x128xf32, #tpu.memory_space<vmem>>, vector<64x128xf32>
      tpu.vector_store %arg6[%c0_15, %c0_16], %17 {strides = array<i32>} : memref<64x128xf32, #tpu.memory_space<vmem>>, vector<64x128xf32>,
    } else {
    }
    return
  }
  func.func @transform_0(%arg0: i32, %arg1: i32, %arg2: i32) -> (i32, i32) {
    %c0_i32 = arith.constant 0 : i32
    return %arg0, %arg2 : i32, i32
  }
  func.func @transform_1(%arg0: i32, %arg1: i32, %arg2: i32) -> (i32, i32) {
    %c0_i32 = arith.constant 0 : i32
    return %arg2, %arg1 : i32, i32
  }
  func.func @transform_2(%arg0: i32, %arg1: i32, %arg2: i32) -> (i32, i32) {
    %c0_i32 = arith.constant 0 : i32
    %c0_i32_0 = arith.constant 0 : i32
    return %c0_i32, %arg1 : i32, i32
  }
  func.func @transform_3(%arg0: i32, %arg1: i32, %arg2: i32) -> (i32, i32) {
    %c0_i32 = arith.constant 0 : i32
    return %arg0, %arg1 : i32, i32
  }
}

module attributes {stable_mosaic.version = 11 : i64} {
  func.func @_gemm_kernel(%arg0: i32, %arg1: i32, %arg2: i32, %arg3: memref<176x128xbf16, #tpu.memory_space<vmem>>, %arg4: memref<128x128xbf16, #tpu.memory_space<vmem>>, %arg5: memref<1x128xf32, #tpu.memory_space<vmem>>, %arg6: memref<176x128xf32, #tpu.memory_space<vmem>>, %arg7: memref<176x128xf32, #tpu.memory_space<vmem>>) attributes {dimension_semantics = [#tpu.dimension_semantics<parallel>, #tpu.dimension_semantics<parallel>, #tpu.dimension_semantics<arbitrary>], iteration_bounds = array<i64: 1, 1, 1>, scalar_prefetch = 0 : i64, scratch_operands = 1 : i64, tpu.core_type = #tpu.core_type<tc>, window_params = [{transform_indices = @transform_0, window_bounds = array<i64: 176, 128>}, {transform_indices = @transform_1, window_bounds = array<i64: 128, 128>}, {transform_indices = @transform_2, window_bounds = array<i64: 1, 128>}, {transform_indices = @transform_3, window_bounds = array<i64: 176, 128>}]} {
    %c0_i32 = arith.constant 0 : i32
    %0 = arith.cmpi eq, %arg2, %c0_i32 : i32
    %1 = arith.extui %0 : i1 to i32
    %c0_i32_0 = arith.constant 0 : i32
    %2 = arith.cmpi ne, %1, %c0_i32_0 : i32
    scf.if %2 {
      %cst_11 = arith.constant 0.000000e+00 : f32
      %14 = vector.broadcast %cst_11 : f32 to vector<176x128xf32>
      %c0_12 = arith.constant 0 : index
      %c0_13 = arith.constant 0 : index
      %15 = vector.load %arg7[%c0_12, %c0_13] : memref<176x128xf32, #tpu.memory_space<vmem>>, vector<176x128xf32>
      tpu.vector_store %arg7[%c0_12, %c0_13], %14 {strides = array<i32>} : memref<176x128xf32, #tpu.memory_space<vmem>>, vector<176x128xf32>,
    } else {
    }
    %c0 = arith.constant 0 : index
    %c0_1 = arith.constant 0 : index
    %3 = vector.load %arg3[%c0, %c0_1] : memref<176x128xbf16, #tpu.memory_space<vmem>>, vector<176x128xbf16>
    %cst = arith.constant 0.000000e+00 : bf16
    %4 = vector.broadcast %cst : bf16 to vector<176x128xbf16>
    %5 = arith.maximumf %3, %4 : vector<176x128xbf16>
    %c0_2 = arith.constant 0 : index
    %c0_3 = arith.constant 0 : index
    %6 = vector.load %arg7[%c0_2, %c0_3] : memref<176x128xf32, #tpu.memory_space<vmem>>, vector<176x128xf32>
    %c0_4 = arith.constant 0 : index
    %c0_5 = arith.constant 0 : index
    %7 = vector.load %arg4[%c0_4, %c0_5] : memref<128x128xbf16, #tpu.memory_space<vmem>>, vector<128x128xbf16>
    %cst_6 = arith.constant dense<0.000000e+00> : vector<176x128xf32>
    %8 = tpu.matmul %5, %7, %cst_6 {dimension_numbers = #tpu.dot_dimension_numbers<[1], [0], [0], [1], [0, 0, 1, 1], [], []>} : vector<176x128xbf16>, vector<128x128xbf16>, vector<176x128xf32> -> vector<176x128xf32>
    %9 = arith.addf %6, %8 : vector<176x128xf32>
    %c0_7 = arith.constant 0 : index
    %c0_8 = arith.constant 0 : index
    %10 = vector.load %arg7[%c0_7, %c0_8] : memref<176x128xf32, #tpu.memory_space<vmem>>, vector<176x128xf32>
    tpu.vector_store %arg7[%c0_7, %c0_8], %9 {strides = array<i32>} : memref<176x128xf32, #tpu.memory_space<vmem>>, vector<176x128xf32>,
    %c0_i32_9 = arith.constant 0 : i32
    %11 = arith.cmpi eq, %arg2, %c0_i32_9 : i32
    %12 = arith.extui %11 : i1 to i32
    %c0_i32_10 = arith.constant 0 : i32
    %13 = arith.cmpi ne, %12, %c0_i32_10 : i32
    scf.if %13 {
      %c0_11 = arith.constant 0 : index
      %c0_12 = arith.constant 0 : index
      %14 = vector.load %arg7[%c0_11, %c0_12] : memref<176x128xf32, #tpu.memory_space<vmem>>, vector<176x128xf32>
      %c0_13 = arith.constant 0 : index
      %c0_14 = arith.constant 0 : index
      %15 = vector.load %arg5[%c0_13, %c0_14] : memref<1x128xf32, #tpu.memory_space<vmem>>, vector<1x128xf32>
      %16 = vector.broadcast %15 : vector<1x128xf32> to vector<176x128xf32>
      %17 = arith.addf %14, %16 : vector<176x128xf32>
      %c0_15 = arith.constant 0 : index
      %c0_16 = arith.constant 0 : index
      %18 = vector.load %arg6[%c0_15, %c0_16] : memref<176x128xf32, #tpu.memory_space<vmem>>, vector<176x128xf32>
      tpu.vector_store %arg6[%c0_15, %c0_16], %17 {strides = array<i32>} : memref<176x128xf32, #tpu.memory_space<vmem>>, vector<176x128xf32>,
    } else {
    }
    return
  }
  func.func @transform_0(%arg0: i32, %arg1: i32, %arg2: i32) -> (i32, i32) {
    %c0_i32 = arith.constant 0 : i32
    return %arg0, %arg2 : i32, i32
  }
  func.func @transform_1(%arg0: i32, %arg1: i32, %arg2: i32) -> (i32, i32) {
    %c0_i32 = arith.constant 0 : i32
    return %arg2, %arg1 : i32, i32
  }
  func.func @transform_2(%arg0: i32, %arg1: i32, %arg2: i32) -> (i32, i32) {
    %c0_i32 = arith.constant 0 : i32
    %c0_i32_0 = arith.constant 0 : i32
    return %c0_i32, %arg1 : i32, i32
  }
  func.func @transform_3(%arg0: i32, %arg1: i32, %arg2: i32) -> (i32, i32) {
    %c0_i32 = arith.constant 0 : i32
    return %arg0, %arg1 : i32, i32
  }
}

module attributes {stable_mosaic.version = 11 : i64} {
  func.func @_bn_stats_kernel(%arg0: i32, %arg1: memref<512x128xf32, #tpu.memory_space<vmem>>, %arg2: memref<8x128xf32, #tpu.memory_space<vmem>>, %arg3: memref<8x128xf32, #tpu.memory_space<vmem>>) attributes {dimension_semantics = [#tpu.dimension_semantics<arbitrary>], iteration_bounds = array<i64: 1>, scalar_prefetch = 0 : i64, scratch_operands = 0 : i64, tpu.core_type = #tpu.core_type<tc>, window_params = [{transform_indices = @transform_0, window_bounds = array<i64: 512, 128>}, {pipeline_mode = #tpu.pipeline_mode<synchronous>, transform_indices = @transform_1, window_bounds = array<i64: 8, 128>}, {pipeline_mode = #tpu.pipeline_mode<synchronous>, transform_indices = @transform_2, window_bounds = array<i64: 8, 128>}]} {
    %c0_i32 = arith.constant 0 : i32
    %0 = arith.cmpi eq, %arg0, %c0_i32 : i32
    %1 = arith.extui %0 : i1 to i32
    %c0_i32_0 = arith.constant 0 : i32
    %2 = arith.cmpi ne, %1, %c0_i32_0 : i32
    scf.if %2 {
      %cst_11 = arith.constant 0.000000e+00 : f32
      %17 = vector.broadcast %cst_11 : f32 to vector<8x128xf32>
      %c0_12 = arith.constant 0 : index
      %c0_13 = arith.constant 0 : index
      %18 = vector.load %arg2[%c0_12, %c0_13] : memref<8x128xf32, #tpu.memory_space<vmem>>, vector<8x128xf32>
      tpu.vector_store %arg2[%c0_12, %c0_13], %17 {strides = array<i32>} : memref<8x128xf32, #tpu.memory_space<vmem>>, vector<8x128xf32>,
      %cst_14 = arith.constant 0.000000e+00 : f32
      %19 = vector.broadcast %cst_14 : f32 to vector<8x128xf32>
      %c0_15 = arith.constant 0 : index
      %c0_16 = arith.constant 0 : index
      %20 = vector.load %arg3[%c0_15, %c0_16] : memref<8x128xf32, #tpu.memory_space<vmem>>, vector<8x128xf32>
      tpu.vector_store %arg3[%c0_15, %c0_16], %19 {strides = array<i32>} : memref<8x128xf32, #tpu.memory_space<vmem>>, vector<8x128xf32>,
    } else {
    }
    %c0 = arith.constant 0 : index
    %c0_1 = arith.constant 0 : index
    %3 = vector.load %arg1[%c0, %c0_1] : memref<512x128xf32, #tpu.memory_space<vmem>>, vector<512x128xf32>
    %c0_2 = arith.constant 0 : index
    %c0_3 = arith.constant 0 : index
    %4 = vector.load %arg2[%c0_2, %c0_3] : memref<8x128xf32, #tpu.memory_space<vmem>>, vector<8x128xf32>
    %cst = arith.constant dense<0.000000e+00> : vector<128xf32>
    %5 = vector.multi_reduction <add>, %3, %cst [0] : vector<512x128xf32> to vector<128xf32>
    %6 = vector.shape_cast %5 : vector<128xf32> to vector<1x128xf32>
    %7 = vector.broadcast %6 : vector<1x128xf32> to vector<8x128xf32>
    %8 = arith.addf %4, %7 : vector<8x128xf32>
    %c0_4 = arith.constant 0 : index
    %c0_5 = arith.constant 0 : index
    %9 = vector.load %arg2[%c0_4, %c0_5] : memref<8x128xf32, #tpu.memory_space<vmem>>, vector<8x128xf32>
    tpu.vector_store %arg2[%c0_4, %c0_5], %8 {strides = array<i32>} : memref<8x128xf32, #tpu.memory_space<vmem>>, vector<8x128xf32>,
    %c0_6 = arith.constant 0 : index
    %c0_7 = arith.constant 0 : index
    %10 = vector.load %arg3[%c0_6, %c0_7] : memref<8x128xf32, #tpu.memory_space<vmem>>, vector<8x128xf32>
    %11 = arith.mulf %3, %3 : vector<512x128xf32>
    %cst_8 = arith.constant dense<0.000000e+00> : vector<128xf32>
    %12 = vector.multi_reduction <add>, %11, %cst_8 [0] : vector<512x128xf32> to vector<128xf32>
    %13 = vector.shape_cast %12 : vector<128xf32> to vector<1x128xf32>
    %14 = vector.broadcast %13 : vector<1x128xf32> to vector<8x128xf32>
    %15 = arith.addf %10, %14 : vector<8x128xf32>
    %c0_9 = arith.constant 0 : index
    %c0_10 = arith.constant 0 : index
    %16 = vector.load %arg3[%c0_9, %c0_10] : memref<8x128xf32, #tpu.memory_space<vmem>>, vector<8x128xf32>
    tpu.vector_store %arg3[%c0_9, %c0_10], %15 {strides = array<i32>} : memref<8x128xf32, #tpu.memory_space<vmem>>, vector<8x128xf32>,
    return
  }
  func.func @transform_0(%arg0: i32) -> (i32, i32) {
    %c0_i32 = arith.constant 0 : i32
    %c0_i32_0 = arith.constant 0 : i32
    return %arg0, %c0_i32 : i32, i32
  }
  func.func @transform_1(%arg0: i32) -> (i32, i32) {
    %c0_i32 = arith.constant 0 : i32
    %c0_i32_0 = arith.constant 0 : i32
    %c0_i32_1 = arith.constant 0 : i32
    return %c0_i32, %c0_i32_0 : i32, i32
  }
  func.func @transform_2(%arg0: i32) -> (i32, i32) {
    %c0_i32 = arith.constant 0 : i32
    %c0_i32_0 = arith.constant 0 : i32
    %c0_i32_1 = arith.constant 0 : i32
    return %c0_i32, %c0_i32_0 : i32, i32
  }
}

module attributes {stable_mosaic.version = 11 : i64} {
  func.func @_bn_apply_kernel(%arg0: i32, %arg1: memref<512x128xf32, #tpu.memory_space<vmem>>, %arg2: memref<1x128xf32, #tpu.memory_space<vmem>>, %arg3: memref<1x128xf32, #tpu.memory_space<vmem>>, %arg4: memref<512x128xf32, #tpu.memory_space<vmem>>) attributes {dimension_semantics = [#tpu.dimension_semantics<parallel>], iteration_bounds = array<i64: 1>, scalar_prefetch = 0 : i64, scratch_operands = 0 : i64, tpu.core_type = #tpu.core_type<tc>, window_params = [{transform_indices = @transform_0, window_bounds = array<i64: 512, 128>}, {pipeline_mode = #tpu.pipeline_mode<synchronous>, transform_indices = @transform_1, window_bounds = array<i64: 1, 128>}, {pipeline_mode = #tpu.pipeline_mode<synchronous>, transform_indices = @transform_2, window_bounds = array<i64: 1, 128>}, {transform_indices = @transform_3, window_bounds = array<i64: 512, 128>}]} {
    %c0 = arith.constant 0 : index
    %c0_0 = arith.constant 0 : index
    %0 = vector.load %arg1[%c0, %c0_0] : memref<512x128xf32, #tpu.memory_space<vmem>>, vector<512x128xf32>
    %c0_1 = arith.constant 0 : index
    %c0_2 = arith.constant 0 : index
    %1 = vector.load %arg2[%c0_1, %c0_2] : memref<1x128xf32, #tpu.memory_space<vmem>>, vector<1x128xf32>
    %2 = vector.broadcast %1 : vector<1x128xf32> to vector<512x128xf32>
    %3 = arith.mulf %0, %2 : vector<512x128xf32>
    %c0_3 = arith.constant 0 : index
    %c0_4 = arith.constant 0 : index
    %4 = vector.load %arg3[%c0_3, %c0_4] : memref<1x128xf32, #tpu.memory_space<vmem>>, vector<1x128xf32>
    %5 = vector.broadcast %4 : vector<1x128xf32> to vector<512x128xf32>
    %6 = arith.addf %3, %5 : vector<512x128xf32>
    %c0_5 = arith.constant 0 : index
    %c0_6 = arith.constant 0 : index
    %7 = vector.load %arg4[%c0_5, %c0_6] : memref<512x128xf32, #tpu.memory_space<vmem>>, vector<512x128xf32>
    tpu.vector_store %arg4[%c0_5, %c0_6], %6 {strides = array<i32>} : memref<512x128xf32, #tpu.memory_space<vmem>>, vector<512x128xf32>,
    return
  }
  func.func @transform_0(%arg0: i32) -> (i32, i32) {
    %c0_i32 = arith.constant 0 : i32
    %c0_i32_0 = arith.constant 0 : i32
    return %arg0, %c0_i32 : i32, i32
  }
  func.func @transform_1(%arg0: i32) -> (i32, i32) {
    %c0_i32 = arith.constant 0 : i32
    %c0_i32_0 = arith.constant 0 : i32
    %c0_i32_1 = arith.constant 0 : i32
    return %c0_i32, %c0_i32_0 : i32, i32
  }
  func.func @transform_2(%arg0: i32) -> (i32, i32) {
    %c0_i32 = arith.constant 0 : i32
    %c0_i32_0 = arith.constant 0 : i32
    %c0_i32_1 = arith.constant 0 : i32
    return %c0_i32, %c0_i32_0 : i32, i32
  }
  func.func @transform_3(%arg0: i32) -> (i32, i32) {
    %c0_i32 = arith.constant 0 : i32
    %c0_i32_0 = arith.constant 0 : i32
    return %arg0, %c0_i32 : i32, i32
  }
}

module attributes {stable_mosaic.version = 11 : i64} {
  func.func @_gemm_kernel(%arg0: i32, %arg1: i32, %arg2: i32, %arg3: memref<512x128xbf16, #tpu.memory_space<vmem>>, %arg4: memref<128x128xbf16, #tpu.memory_space<vmem>>, %arg5: memref<1x128xf32, #tpu.memory_space<vmem>>, %arg6: memref<512x128xf32, #tpu.memory_space<vmem>>, %arg7: memref<512x128xf32, #tpu.memory_space<vmem>>) attributes {dimension_semantics = [#tpu.dimension_semantics<parallel>, #tpu.dimension_semantics<parallel>, #tpu.dimension_semantics<arbitrary>], iteration_bounds = array<i64: 2, 1, 1>, scalar_prefetch = 0 : i64, scratch_operands = 1 : i64, tpu.core_type = #tpu.core_type<tc>, window_params = [{transform_indices = @transform_0, window_bounds = array<i64: 512, 128>}, {transform_indices = @transform_1, window_bounds = array<i64: 128, 128>}, {transform_indices = @transform_2, window_bounds = array<i64: 1, 128>}, {transform_indices = @transform_3, window_bounds = array<i64: 512, 128>}]} {
    %c0_i32 = arith.constant 0 : i32
    %0 = arith.cmpi eq, %arg2, %c0_i32 : i32
    %1 = arith.extui %0 : i1 to i32
    %c0_i32_0 = arith.constant 0 : i32
    %2 = arith.cmpi ne, %1, %c0_i32_0 : i32
    scf.if %2 {
      %cst_11 = arith.constant 0.000000e+00 : f32
      %14 = vector.broadcast %cst_11 : f32 to vector<512x128xf32>
      %c0_12 = arith.constant 0 : index
      %c0_13 = arith.constant 0 : index
      %15 = vector.load %arg7[%c0_12, %c0_13] : memref<512x128xf32, #tpu.memory_space<vmem>>, vector<512x128xf32>
      tpu.vector_store %arg7[%c0_12, %c0_13], %14 {strides = array<i32>} : memref<512x128xf32, #tpu.memory_space<vmem>>, vector<512x128xf32>,
    } else {
    }
    %c0 = arith.constant 0 : index
    %c0_1 = arith.constant 0 : index
    %3 = vector.load %arg3[%c0, %c0_1] : memref<512x128xbf16, #tpu.memory_space<vmem>>, vector<512x128xbf16>
    %cst = arith.constant 0.000000e+00 : bf16
    %4 = vector.broadcast %cst : bf16 to vector<512x128xbf16>
    %5 = arith.maximumf %3, %4 : vector<512x128xbf16>
    %c0_2 = arith.constant 0 : index
    %c0_3 = arith.constant 0 : index
    %6 = vector.load %arg7[%c0_2, %c0_3] : memref<512x128xf32, #tpu.memory_space<vmem>>, vector<512x128xf32>
    %c0_4 = arith.constant 0 : index
    %c0_5 = arith.constant 0 : index
    %7 = vector.load %arg4[%c0_4, %c0_5] : memref<128x128xbf16, #tpu.memory_space<vmem>>, vector<128x128xbf16>
    %cst_6 = arith.constant dense<0.000000e+00> : vector<512x128xf32>
    %8 = tpu.matmul %5, %7, %cst_6 {dimension_numbers = #tpu.dot_dimension_numbers<[1], [0], [0], [1], [0, 0, 1, 1], [], []>} : vector<512x128xbf16>, vector<128x128xbf16>, vector<512x128xf32> -> vector<512x128xf32>
    %9 = arith.addf %6, %8 : vector<512x128xf32>
    %c0_7 = arith.constant 0 : index
    %c0_8 = arith.constant 0 : index
    %10 = vector.load %arg7[%c0_7, %c0_8] : memref<512x128xf32, #tpu.memory_space<vmem>>, vector<512x128xf32>
    tpu.vector_store %arg7[%c0_7, %c0_8], %9 {strides = array<i32>} : memref<512x128xf32, #tpu.memory_space<vmem>>, vector<512x128xf32>,
    %c0_i32_9 = arith.constant 0 : i32
    %11 = arith.cmpi eq, %arg2, %c0_i32_9 : i32
    %12 = arith.extui %11 : i1 to i32
    %c0_i32_10 = arith.constant 0 : i32
    %13 = arith.cmpi ne, %12, %c0_i32_10 : i32
    scf.if %13 {
      %c0_11 = arith.constant 0 : index
      %c0_12 = arith.constant 0 : index
      %14 = vector.load %arg7[%c0_11, %c0_12] : memref<512x128xf32, #tpu.memory_space<vmem>>, vector<512x128xf32>
      %c0_13 = arith.constant 0 : index
      %c0_14 = arith.constant 0 : index
      %15 = vector.load %arg5[%c0_13, %c0_14] : memref<1x128xf32, #tpu.memory_space<vmem>>, vector<1x128xf32>
      %16 = vector.broadcast %15 : vector<1x128xf32> to vector<512x128xf32>
      %17 = arith.addf %14, %16 : vector<512x128xf32>
      %18 = math.tanh %17 : vector<512x128xf32>
      %c0_15 = arith.constant 0 : index
      %c0_16 = arith.constant 0 : index
      %19 = vector.load %arg6[%c0_15, %c0_16] : memref<512x128xf32, #tpu.memory_space<vmem>>, vector<512x128xf32>
      tpu.vector_store %arg6[%c0_15, %c0_16], %18 {strides = array<i32>} : memref<512x128xf32, #tpu.memory_space<vmem>>, vector<512x128xf32>,
    } else {
    }
    return
  }
  func.func @transform_0(%arg0: i32, %arg1: i32, %arg2: i32) -> (i32, i32) {
    %c0_i32 = arith.constant 0 : i32
    return %arg0, %arg2 : i32, i32
  }
  func.func @transform_1(%arg0: i32, %arg1: i32, %arg2: i32) -> (i32, i32) {
    %c0_i32 = arith.constant 0 : i32
    return %arg2, %arg1 : i32, i32
  }
  func.func @transform_2(%arg0: i32, %arg1: i32, %arg2: i32) -> (i32, i32) {
    %c0_i32 = arith.constant 0 : i32
    %c0_i32_0 = arith.constant 0 : i32
    return %c0_i32, %arg1 : i32, i32
  }
  func.func @transform_3(%arg0: i32, %arg1: i32, %arg2: i32) -> (i32, i32) {
    %c0_i32 = arith.constant 0 : i32
    return %arg0, %arg1 : i32, i32
  }
}

</mosaic_0001>

<bundles_post_ra>
// kernel: unet_forward.26
= control target key start
LH: loop header
LB: loop body
LE: loop exit
PB: predicated region body
PF: predicated region fallthrough
CT: control target
= control target key end

     0   :  { %s1592_s1 = inlined_call_operand.vmem [shape: bf16[128,128], index: 1, kind: input, shape index: {}]   ;;  %s1593_s2 = inlined_call_operand.vmem [shape: f32[1,128], index: 2, kind: input, shape index: {}]   ;;  %s1594_s0 = inlined_call_operand.vmem [shape: bf16[512,128], index: 0, kind: input, shape index: {}]   ;;  %s1595_s3 = inlined_call_operand.vmem [shape: f32[512,128], index: 3, kind: output, shape index: {}]  }
   0x1   :  { %v1165_v0 = vld [vmem:[%s1592_s1 + $0x38] sm:$0xff]  ;;  %v1164_v1 = vld [vmem:[%s1592_s1 + $0x30] sm:$0xff]  ;;  %v1163_v2 = vld [vmem:[%s1592_s1 + $0x28] sm:$0xff] }
   0x2   :  { %466 = vmatpush.bf16.msra.mxu0 %v1165_v0  ;;  %1166 = vmatpush.bf16.msra.mxu1 %v1165_v0  ;;  %v1162_v3 = vld [vmem:[%s1592_s1 + $0x20] sm:$0xff]  ;;  %v1161_v4 = vld [vmem:[%s1592_s1 + $0x18] sm:$0xff]  ;;  %v1160_v5 = vld [vmem:[%s1592_s1 + $0x10] sm:$0xff] }
   0x3   :  { %1167 = vmatpush.bf16.msra.mxu2 %v1165_v0  ;;  %1168 = vmatpush.bf16.msra.mxu3 %v1165_v0  ;;  %v1159_v6 = vld [vmem:[%s1592_s1 + $0x8] sm:$0xff]  ;;  %v1158_v7 = vld [vmem:[%s1592_s1] sm:$0xff]  ;;  %v1128_v16 = vld [vmem:[%s1594_s0 + $0x10] sm:$0xff] }
   0x4   :  { %v1126_v8 = vld [vmem:[%s1594_s0] sm:$0xff]  ;;  %v1127_v12 = vld [vmem:[%s1594_s0 + $0x8] sm:$0xff]  ;;  %v1136_v17 = vld [vmem:[%s1594_s0 + $0x50] sm:$0xff] }
   0x5   :  { %v1134_v9 = vld [vmem:[%s1594_s0 + $0x40] sm:$0xff]  ;;  %v1135_v13 = vld [vmem:[%s1594_s0 + $0x48] sm:$0xff]  ;;  %v1144_v18 = vld [vmem:[%s1594_s0 + $0x90] sm:$0xff] }
   0x6   :  { %467 = vmatpush.bf16.msra.mxu0 %v1164_v1  ;;  %1169 = vmatpush.bf16.msra.mxu1 %v1164_v1  ;;  %v1142_v10 = vld [vmem:[%s1594_s0 + $0x80] sm:$0xff]  ;;  %v1143_v14 = vld [vmem:[%s1594_s0 + $0x88] sm:$0xff]  ;;  %v1152_v19 = vld [vmem:[%s1594_s0 + $0xd0] sm:$0xff] }
   0x7   :  { %1170 = vmatpush.bf16.msra.mxu2 %v1164_v1  ;;  %1171 = vmatpush.bf16.msra.mxu3 %v1164_v1  ;;  %v1150_v11 = vld [vmem:[%s1594_s0 + $0xc0] sm:$0xff]  ;;  %v1151_v15 = vld [vmem:[%s1594_s0 + $0xc8] sm:$0xff]  ;;  %v1129_v20 = vld [vmem:[%s1594_s0 + $0x18] sm:$0xff] }
   0x8   :  { %v1137_v21 = vld [vmem:[%s1594_s0 + $0x58] sm:$0xff]  ;;  %v1130_v24 = vld [vmem:[%s1594_s0 + $0x20] sm:$0xff]  ;;  %v1131_v28 = vld [vmem:[%s1594_s0 + $0x28] sm:$0xff] }
   0x9   :  { %v1145_v22 = vld [vmem:[%s1594_s0 + $0x98] sm:$0xff]  ;;  %v1138_v25 = vld [vmem:[%s1594_s0 + $0x60] sm:$0xff]  ;;  %v1139_v29 = vld [vmem:[%s1594_s0 + $0x68] sm:$0xff] }
   0xa   :  { %468 = vmatpush.bf16.msra.mxu0 %v1163_v2  ;;  %1172 = vmatpush.bf16.msra.mxu1 %v1163_v2  ;;  %v1153_v23 = vld [vmem:[%s1594_s0 + $0xd8] sm:$0xff]  ;;  %v1146_v26 = vld [vmem:[%s1594_s0 + $0xa0] sm:$0xff]  ;;  %v1147_v30 = vld [vmem:[%s1594_s0 + $0xa8] sm:$0xff] }
   0xb   :  { %1173 = vmatpush.bf16.msra.mxu2 %v1163_v2  ;;  %1174 = vmatpush.bf16.msra.mxu3 %v1163_v2  ;;  %v1154_v27 = vld [vmem:[%s1594_s0 + $0xe0] sm:$0xff]  ;;  %v1155_v31 = vld [vmem:[%s1594_s0 + $0xe8] sm:$0xff]  ;;  %v1132_v32 = vld [vmem:[%s1594_s0 + $0x30] sm:$0xff] }
   0xc   :  { %v1140_v33 = vld [vmem:[%s1594_s0 + $0x70] sm:$0xff]  ;;  %v1133_v36 = vld [vmem:[%s1594_s0 + $0x38] sm:$0xff]  ;;  %v1334_v40 = vld [vmem:[%s1593_s2] ss:$0 sm:$0xff] }
   0xd   :  { %v1148_v34 = vld [vmem:[%s1594_s0 + $0xb0] sm:$0xff]  ;;  %v1141_v37 = vld [vmem:[%s1594_s0 + $0x78] sm:$0xff] }
   0xe   :  { %469 = vmatpush.bf16.msra.mxu0 %v1162_v3  ;;  %1175 = vmatpush.bf16.msra.mxu1 %v1162_v3  ;;  %v1156_v35 = vld [vmem:[%s1594_s0 + $0xf0] sm:$0xff]  ;;  %v1149_v38 = vld [vmem:[%s1594_s0 + $0xb8] sm:$0xff] }
   0xf   :  { %1176 = vmatpush.bf16.msra.mxu2 %v1162_v3  ;;  %1177 = vmatpush.bf16.msra.mxu3 %v1162_v3  ;;  %v1157_v39 = vld [vmem:[%s1594_s0 + $0xf8] sm:$0xff] }
  0x12   :  { %470 = vmatpush.bf16.msra.mxu0 %v1161_v4  ;;  %1178 = vmatpush.bf16.msra.mxu1 %v1161_v4 }
  0x13   :  { %1179 = vmatpush.bf16.msra.mxu2 %v1161_v4  ;;  %1180 = vmatpush.bf16.msra.mxu3 %v1161_v4 }
  0x16   :  { %471 = vmatpush.bf16.msra.mxu0 %v1160_v5  ;;  %1181 = vmatpush.bf16.msra.mxu1 %v1160_v5 }
  0x17   :  { %1182 = vmatpush.bf16.msra.mxu2 %v1160_v5  ;;  %1183 = vmatpush.bf16.msra.mxu3 %v1160_v5 }
  0x1a   :  { %472 = vmatpush.bf16.msra.mxu0 %v1159_v6  ;;  %1184 = vmatpush.bf16.msra.mxu1 %v1159_v6 }
  0x1b   :  { %1185 = vmatpush.bf16.msra.mxu2 %v1159_v6  ;;  %1186 = vmatpush.bf16.msra.mxu3 %v1159_v6 }
  0x1e   :  { %473 = vmatpush.bf16.msra.mxu0 %v1158_v7  ;;  %1187 = vmatpush.bf16.msra.mxu1 %v1158_v7 }
  0x1f   :  { %1188 = vmatpush.bf16.msra.mxu2 %v1158_v7  ;;  %1189 = vmatpush.bf16.msra.mxu3 %v1158_v7 }
  0x21   :  { %474 = vmatmul.bf16.vlgmr.msra.gmra.mxu0 %v1126_v8  ;;  %514 = vmatmul.bf16.vlgmr.msra.gmra.mxu1 %v1134_v9 }
  0x22   :  { %554 = vmatmul.bf16.vlgmr.msra.gmra.mxu2 %v1142_v10  ;;  %594 = vmatmul.bf16.vlgmr.msra.gmra.mxu3 %v1150_v11 }
  0x31   :  { %479 = vmatmul.bf16.gmra.mxu0 %v1127_v12  ;;  %519 = vmatmul.bf16.gmra.mxu1 %v1135_v13 }
  0x32   :  { %559 = vmatmul.bf16.gmra.mxu2 %v1143_v14  ;;  %599 = vmatmul.bf16.gmra.mxu3 %v1151_v15 }
  0x41   :  { %484 = vmatmul.bf16.gmra.mxu0 %v1128_v16  ;;  %524 = vmatmul.bf16.gmra.mxu1 %v1136_v17 }
  0x42   :  { %564 = vmatmul.bf16.gmra.mxu2 %v1144_v18  ;;  %604 = vmatmul.bf16.gmra.mxu3 %v1152_v19 }
  0x51   :  { %489 = vmatmul.bf16.gmra.mxu0 %v1129_v20  ;;  %529 = vmatmul.bf16.gmra.mxu1 %v1137_v21 }
  0x52   :  { %569 = vmatmul.bf16.gmra.mxu2 %v1145_v22  ;;  %609 = vmatmul.bf16.gmra.mxu3 %v1153_v23 }
  0x61   :  { %494 = vmatmul.bf16.gmra.mxu0 %v1130_v24  ;;  %534 = vmatmul.bf16.gmra.mxu1 %v1138_v25 }
  0x62   :  { %574 = vmatmul.bf16.gmra.mxu2 %v1146_v26  ;;  %614 = vmatmul.bf16.gmra.mxu3 %v1154_v27 }
  0x71   :  { %499 = vmatmul.bf16.gmra.mxu0 %v1131_v28  ;;  %539 = vmatmul.bf16.gmra.mxu1 %v1139_v29 }
  0x72   :  { %579 = vmatmul.bf16.gmra.mxu2 %v1147_v30  ;;  %619 = vmatmul.bf16.gmra.mxu3 %v1155_v31 }
  0x81   :  { %504 = vmatmul.bf16.gmra.mxu0 %v1132_v32  ;;  %544 = vmatmul.bf16.gmra.mxu1 %v1140_v33 }
  0x82   :  { %584 = vmatmul.bf16.gmra.mxu2 %v1148_v34  ;;  %624 = vmatmul.bf16.gmra.mxu3 %v1156_v35 }
  0x91   :  { %509 = vmatmul.bf16.gmra.mxu0 %v1133_v36  ;;  %549 = vmatmul.bf16.gmra.mxu1 %v1141_v37 }
  0x92   :  { %589 = vmatmul.bf16.gmra.mxu2 %v1149_v38  ;;  %629 = vmatmul.bf16.gmra.mxu3 %v1157_v39 }
  0x9e   :  { %v475_v41 = vpop.f32.mrf.mxu0  ;;  %v515_v42 = vpop.f32.mrf.mxu1 }
  0x9f   :  { %v834_v43 = vadd.f32 %v1334_v40, %v475_v41  ;;  %v850_v44 = vadd.f32 %v1334_v40, %v515_v42 }
  0xa1   :  { %898 = vst [vmem:[%s1595_s3] sm:$0xff] %v834_v43 }
  0xa2   :  { %914 = vst [vmem:[%s1595_s3 + $0x80] sm:$0xff] %v850_v44 }
  0xa5   :  { %v555_v45 = vpop.f32.mrf.mxu2  ;;  %v595_v46 = vpop.f32.mrf.mxu3 }
  0xa6   :  { %v866_v47 = vadd.f32 %v1334_v40, %v555_v45  ;;  %v882_v48 = vadd.f32 %v1334_v40, %v595_v46  ;;  %v477_v49 = vpop.f32.mrf.mxu0  ;;  %v517_v50 = vpop.f32.mrf.mxu1 }
  0xa7   :  { %v835_v51 = vadd.f32 %v1334_v40, %v477_v49  ;;  %v851_v52 = vadd.f32 %v1334_v40, %v517_v50 }
  0xa8   :  { %930 = vst [vmem:[%s1595_s3 + $0x100] sm:$0xff] %v866_v47 }
  0xa9   :  { %946 = vst [vmem:[%s1595_s3 + $0x180] sm:$0xff] %v882_v48 }
  0xaa   :  { %899 = vst [vmem:[%s1595_s3 + $0x8] sm:$0xff] %v835_v51 }
  0xab   :  { %915 = vst [vmem:[%s1595_s3 + $0x88] sm:$0xff] %v851_v52 }
  0xad   :  { %v557_v53 = vpop.f32.mrf.mxu2  ;;  %v597_v54 = vpop.f32.mrf.mxu3 }
  0xae   :  { %v867_v55 = vadd.f32 %v1334_v40, %v557_v53  ;;  %v883_v56 = vadd.f32 %v1334_v40, %v597_v54  ;;  %v480_v57 = vpop.f32.mrf.mxu0  ;;  %v520_v58 = vpop.f32.mrf.mxu1 }
  0xaf   :  { %v836_v59 = vadd.f32 %v1334_v40, %v480_v57  ;;  %v852_v60 = vadd.f32 %v1334_v40, %v520_v58 }
  0xb0   :  { %931 = vst [vmem:[%s1595_s3 + $0x108] sm:$0xff] %v867_v55 }
  0xb1   :  { %947 = vst [vmem:[%s1595_s3 + $0x188] sm:$0xff] %v883_v56 }
  0xb2   :  { %900 = vst [vmem:[%s1595_s3 + $0x10] sm:$0xff] %v836_v59 }
  0xb3   :  { %916 = vst [vmem:[%s1595_s3 + $0x90] sm:$0xff] %v852_v60 }
  0xb5   :  { %v560_v61 = vpop.f32.mrf.mxu2  ;;  %v600_v62 = vpop.f32.mrf.mxu3 }
  0xb6   :  { %v868_v63 = vadd.f32 %v1334_v40, %v560_v61  ;;  %v884_v0 = vadd.f32 %v1334_v40, %v600_v62  ;;  %v482_v1 = vpop.f32.mrf.mxu0  ;;  %v522_v2 = vpop.f32.mrf.mxu1 }
  0xb7   :  { %v837_v3 = vadd.f32 %v1334_v40, %v482_v1  ;;  %v853_v4 = vadd.f32 %v1334_v40, %v522_v2 }
  0xb8   :  { %932 = vst [vmem:[%s1595_s3 + $0x110] sm:$0xff] %v868_v63 }
  0xb9   :  { %948 = vst [vmem:[%s1595_s3 + $0x190] sm:$0xff] %v884_v0 }
  0xba   :  { %901 = vst [vmem:[%s1595_s3 + $0x18] sm:$0xff] %v837_v3 }
  0xbb   :  { %917 = vst [vmem:[%s1595_s3 + $0x98] sm:$0xff] %v853_v4 }
  0xbd   :  { %v562_v5 = vpop.f32.mrf.mxu2  ;;  %v602_v6 = vpop.f32.mrf.mxu3 }
  0xbe   :  { %v869_v7 = vadd.f32 %v1334_v40, %v562_v5  ;;  %v885_v8 = vadd.f32 %v1334_v40, %v602_v6  ;;  %v485_v9 = vpop.f32.mrf.mxu0  ;;  %v525_v10 = vpop.f32.mrf.mxu1 }
  0xbf   :  { %v838_v11 = vadd.f32 %v1334_v40, %v485_v9  ;;  %v854_v12 = vadd.f32 %v1334_v40, %v525_v10 }
  0xc0   :  { %933 = vst [vmem:[%s1595_s3 + $0x118] sm:$0xff] %v869_v7 }
  0xc1   :  { %949 = vst [vmem:[%s1595_s3 + $0x198] sm:$0xff] %v885_v8 }
  0xc2   :  { %902 = vst [vmem:[%s1595_s3 + $0x20] sm:$0xff] %v838_v11 }
  0xc3   :  { %918 = vst [vmem:[%s1595_s3 + $0xa0] sm:$0xff] %v854_v12 }
  0xc5   :  { %v565_v13 = vpop.f32.mrf.mxu2  ;;  %v605_v14 = vpop.f32.mrf.mxu3 }
  0xc6   :  { %v870_v15 = vadd.f32 %v1334_v40, %v565_v13  ;;  %v886_v16 = vadd.f32 %v1334_v40, %v605_v14  ;;  %v487_v17 = vpop.f32.mrf.mxu0  ;;  %v527_v18 = vpop.f32.mrf.mxu1 }
  0xc7   :  { %v839_v19 = vadd.f32 %v1334_v40, %v487_v17  ;;  %v855_v20 = vadd.f32 %v1334_v40, %v527_v18 }
  0xc8   :  { %934 = vst [vmem:[%s1595_s3 + $0x120] sm:$0xff] %v870_v15 }
  0xc9   :  { %950 = vst [vmem:[%s1595_s3 + $0x1a0] sm:$0xff] %v886_v16 }
  0xca   :  { %903 = vst [vmem:[%s1595_s3 + $0x28] sm:$0xff] %v839_v19 }
  0xcb   :  { %919 = vst [vmem:[%s1595_s3 + $0xa8] sm:$0xff] %v855_v20 }
  0xcd   :  { %v567_v21 = vpop.f32.mrf.mxu2  ;;  %v607_v22 = vpop.f32.mrf.mxu3 }
  0xce   :  { %v871_v23 = vadd.f32 %v1334_v40, %v567_v21  ;;  %v887_v24 = vadd.f32 %v1334_v40, %v607_v22  ;;  %v490_v25 = vpop.f32.mrf.mxu0  ;;  %v530_v26 = vpop.f32.mrf.mxu1 }
  0xcf   :  { %v840_v27 = vadd.f32 %v1334_v40, %v490_v25  ;;  %v856_v28 = vadd.f32 %v1334_v40, %v530_v26 }
  0xd0   :  { %935 = vst [vmem:[%s1595_s3 + $0x128] sm:$0xff] %v871_v23 }
  0xd1   :  { %951 = vst [vmem:[%s1595_s3 + $0x1a8] sm:$0xff] %v887_v24 }
  0xd2   :  { %904 = vst [vmem:[%s1595_s3 + $0x30] sm:$0xff] %v840_v27 }
  0xd3   :  { %920 = vst [vmem:[%s1595_s3 + $0xb0] sm:$0xff] %v856_v28 }
  0xd5   :  { %v570_v29 = vpop.f32.mrf.mxu2  ;;  %v610_v30 = vpop.f32.mrf.mxu3 }
  0xd6   :  { %v872_v31 = vadd.f32 %v1334_v40, %v570_v29  ;;  %v888_v32 = vadd.f32 %v1334_v40, %v610_v30  ;;  %v492_v33 = vpop.f32.mrf.mxu0  ;;  %v532_v34 = vpop.f32.mrf.mxu1 }
  0xd7   :  { %v841_v35 = vadd.f32 %v1334_v40, %v492_v33  ;;  %v857_v36 = vadd.f32 %v1334_v40, %v532_v34 }
  0xd8   :  { %936 = vst [vmem:[%s1595_s3 + $0x130] sm:$0xff] %v872_v31 }
  0xd9   :  { %952 = vst [vmem:[%s1595_s3 + $0x1b0] sm:$0xff] %v888_v32 }
  0xda   :  { %905 = vst [vmem:[%s1595_s3 + $0x38] sm:$0xff] %v841_v35 }
  0xdb   :  { %921 = vst [vmem:[%s1595_s3 + $0xb8] sm:$0xff] %v857_v36 }
  0xdd   :  { %v572_v37 = vpop.f32.mrf.mxu2  ;;  %v612_v38 = vpop.f32.mrf.mxu3 }
  0xde   :  { %v873_v39 = vadd.f32 %v1334_v40, %v572_v37  ;;  %v889_v41 = vadd.f32 %v1334_v40, %v612_v38  ;;  %v495_v42 = vpop.f32.mrf.mxu0  ;;  %v535_v43 = vpop.f32.mrf.mxu1 }
  0xdf   :  { %v842_v44 = vadd.f32 %v1334_v40, %v495_v42  ;;  %v858_v45 = vadd.f32 %v1334_v40, %v535_v43 }
  0xe0   :  { %937 = vst [vmem:[%s1595_s3 + $0x138] sm:$0xff] %v873_v39 }
  0xe1   :  { %953 = vst [vmem:[%s1595_s3 + $0x1b8] sm:$0xff] %v889_v41 }
  0xe2   :  { %906 = vst [vmem:[%s1595_s3 + $0x40] sm:$0xff] %v842_v44 }
  0xe3   :  { %922 = vst [vmem:[%s1595_s3 + $0xc0] sm:$0xff] %v858_v45 }
  0xe5   :  { %v575_v46 = vpop.f32.mrf.mxu2  ;;  %v615_v47 = vpop.f32.mrf.mxu3 }
  0xe6   :  { %v874_v48 = vadd.f32 %v1334_v40, %v575_v46  ;;  %v890_v49 = vadd.f32 %v1334_v40, %v615_v47  ;;  %v497_v50 = vpop.f32.mrf.mxu0  ;;  %v537_v51 = vpop.f32.mrf.mxu1 }
  0xe7   :  { %v843_v52 = vadd.f32 %v1334_v40, %v497_v50  ;;  %v859_v53 = vadd.f32 %v1334_v40, %v537_v51 }
  0xe8   :  { %938 = vst [vmem:[%s1595_s3 + $0x140] sm:$0xff] %v874_v48 }
  0xe9   :  { %954 = vst [vmem:[%s1595_s3 + $0x1c0] sm:$0xff] %v890_v49 }
  0xea   :  { %907 = vst [vmem:[%s1595_s3 + $0x48] sm:$0xff] %v843_v52 }
  0xeb   :  { %923 = vst [vmem:[%s1595_s3 + $0xc8] sm:$0xff] %v859_v53 }
  0xed   :  { %v577_v54 = vpop.f32.mrf.mxu2  ;;  %v617_v55 = vpop.f32.mrf.mxu3 }
  0xee   :  { %v875_v56 = vadd.f32 %v1334_v40, %v577_v54  ;;  %v891_v57 = vadd.f32 %v1334_v40, %v617_v55  ;;  %v500_v58 = vpop.f32.mrf.mxu0  ;;  %v540_v59 = vpop.f32.mrf.mxu1 }
  0xef   :  { %v844_v60 = vadd.f32 %v1334_v40, %v500_v58  ;;  %v860_v61 = vadd.f32 %v1334_v40, %v540_v59 }
  0xf0   :  { %939 = vst [vmem:[%s1595_s3 + $0x148] sm:$0xff] %v875_v56 }
  0xf1   :  { %955 = vst [vmem:[%s1595_s3 + $0x1c8] sm:$0xff] %v891_v57 }
  0xf2   :  { %908 = vst [vmem:[%s1595_s3 + $0x50] sm:$0xff] %v844_v60 }
  0xf3   :  { %924 = vst [vmem:[%s1595_s3 + $0xd0] sm:$0xff] %v860_v61 }
  0xf5   :  { %v580_v62 = vpop.f32.mrf.mxu2  ;;  %v620_v63 = vpop.f32.mrf.mxu3 }
  0xf6   :  { %v876_v0 = vadd.f32 %v1334_v40, %v580_v62  ;;  %v892_v1 = vadd.f32 %v1334_v40, %v620_v63  ;;  %v502_v2 = vpop.f32.mrf.mxu0  ;;  %v542_v3 = vpop.f32.mrf.mxu1 }
  0xf7   :  { %v845_v4 = vadd.f32 %v1334_v40, %v502_v2  ;;  %v861_v5 = vadd.f32 %v1334_v40, %v542_v3 }
  0xf8   :  { %940 = vst [vmem:[%s1595_s3 + $0x150] sm:$0xff] %v876_v0 }
  0xf9   :  { %956 = vst [vmem:[%s1595_s3 + $0x1d0] sm:$0xff] %v892_v1 }
  0xfa   :  { %909 = vst [vmem:[%s1595_s3 + $0x58] sm:$0xff] %v845_v4 }
  0xfb   :  { %925 = vst [vmem:[%s1595_s3 + $0xd8] sm:$0xff] %v861_v5 }
  0xfd   :  { %v582_v6 = vpop.f32.mrf.mxu2  ;;  %v622_v7 = vpop.f32.mrf.mxu3 }
  0xfe   :  { %v877_v8 = vadd.f32 %v1334_v40, %v582_v6  ;;  %v893_v9 = vadd.f32 %v1334_v40, %v622_v7  ;;  %v505_v10 = vpop.f32.mrf.mxu0  ;;  %v545_v11 = vpop.f32.mrf.mxu1 }
  0xff   :  { %v846_v12 = vadd.f32 %v1334_v40, %v505_v10  ;;  %v862_v13 = vadd.f32 %v1334_v40, %v545_v11 }
 0x100   :  { %941 = vst [vmem:[%s1595_s3 + $0x158] sm:$0xff] %v877_v8 }
 0x101   :  { %957 = vst [vmem:[%s1595_s3 + $0x1d8] sm:$0xff] %v893_v9 }
 0x102   :  { %910 = vst [vmem:[%s1595_s3 + $0x60] sm:$0xff] %v846_v12 }
 0x103   :  { %926 = vst [vmem:[%s1595_s3 + $0xe0] sm:$0xff] %v862_v13 }
 0x105   :  { %v585_v14 = vpop.f32.mrf.mxu2  ;;  %v625_v15 = vpop.f32.mrf.mxu3 }
 0x106   :  { %v878_v16 = vadd.f32 %v1334_v40, %v585_v14  ;;  %v894_v17 = vadd.f32 %v1334_v40, %v625_v15  ;;  %v507_v18 = vpop.f32.mrf.mxu0  ;;  %v547_v19 = vpop.f32.mrf.mxu1 }
 0x107   :  { %v847_v20 = vadd.f32 %v1334_v40, %v507_v18  ;;  %v863_v21 = vadd.f32 %v1334_v40, %v547_v19 }
 0x108   :  { %942 = vst [vmem:[%s1595_s3 + $0x160] sm:$0xff] %v878_v16 }
 0x109   :  { %958 = vst [vmem:[%s1595_s3 + $0x1e0] sm:$0xff] %v894_v17 }
 0x10a   :  { %911 = vst [vmem:[%s1595_s3 + $0x68] sm:$0xff] %v847_v20 }
 0x10b   :  { %927 = vst [vmem:[%s1595_s3 + $0xe8] sm:$0xff] %v863_v21 }
 0x10d   :  { %v587_v22 = vpop.f32.mrf.mxu2  ;;  %v627_v23 = vpop.f32.mrf.mxu3 }
 0x10e   :  { %v879_v24 = vadd.f32 %v1334_v40, %v587_v22  ;;  %v895_v25 = vadd.f32 %v1334_v40, %v627_v23  ;;  %v510_v26 = vpop.f32.mrf.mxu0  ;;  %v550_v27 = vpop.f32.mrf.mxu1 }
 0x10f   :  { %v848_v28 = vadd.f32 %v1334_v40, %v510_v26  ;;  %v864_v29 = vadd.f32 %v1334_v40, %v550_v27 }
 0x110   :  { %943 = vst [vmem:[%s1595_s3 + $0x168] sm:$0xff] %v879_v24 }
 0x111   :  { %959 = vst [vmem:[%s1595_s3 + $0x1e8] sm:$0xff] %v895_v25 }
 0x112   :  { %912 = vst [vmem:[%s1595_s3 + $0x70] sm:$0xff] %v848_v28 }
 0x113   :  { %928 = vst [vmem:[%s1595_s3 + $0xf0] sm:$0xff] %v864_v29 }
 0x115   :  { %v590_v30 = vpop.f32.mrf.mxu2  ;;  %v630_v31 = vpop.f32.mrf.mxu3 }
 0x116   :  { %v880_v32 = vadd.f32 %v1334_v40, %v590_v30  ;;  %v896_v33 = vadd.f32 %v1334_v40, %v630_v31  ;;  %v512_v34 = vpop.f32.mrf.mxu0  ;;  %v552_v35 = vpop.f32.mrf.mxu1 }
 0x117   :  { %v849_v36 = vadd.f32 %v1334_v40, %v512_v34  ;;  %v865_v37 = vadd.f32 %v1334_v40, %v552_v35 }
 0x118   :  { %944 = vst [vmem:[%s1595_s3 + $0x170] sm:$0xff] %v880_v32 }
 0x119   :  { %960 = vst [vmem:[%s1595_s3 + $0x1f0] sm:$0xff] %v896_v33 }
 0x11a   :  { %913 = vst [vmem:[%s1595_s3 + $0x78] sm:$0xff] %v849_v36 }
 0x11b   :  { %929 = vst [vmem:[%s1595_s3 + $0xf8] sm:$0xff] %v865_v37 }
 0x11d   :  { %v592_v38 = vpop.f32.mrf.mxu2  ;;  %v632_v39 = vpop.f32.mrf.mxu3 }
 0x11e   :  { %v881_v41 = vadd.f32 %v1334_v40, %v592_v38  ;;  %v897_v42 = vadd.f32 %v1334_v40, %v632_v39 }
 0x120   :  { %945 = vst [vmem:[%s1595_s3 + $0x178] sm:$0xff] %v881_v41 }
 0x121   :  { %961 = vst [vmem:[%s1595_s3 + $0x1f8] sm:$0xff] %v897_v42 }

// kernel: unet_forward.27
= control target key start
LH: loop header
LB: loop body
LE: loop exit
PB: predicated region body
PF: predicated region fallthrough
CT: control target
= control target key end

     0   :  { %s858_s1 = inlined_call_operand.vmem [shape: bf16[128,128], index: 1, kind: input, shape index: {}]   ;;  %s859_s0 = inlined_call_operand.vmem [shape: bf16[128,128], index: 0, kind: input, shape index: {}]   ;;  %s860_s2 = inlined_call_operand.vmem [shape: f32[1,128], index: 2, kind: input, shape index: {}]   ;;  %s861_s3 = inlined_call_operand.vmem [shape: f32[128,128], index: 3, kind: output, shape index: {}]  }
   0x1   :  { %v453_v0 = vld [vmem:[%s858_s1 + $0x38] sm:$0xff]  ;;  %v452_v1 = vld [vmem:[%s858_s1 + $0x30] sm:$0xff]  ;;  %v508_v2 = vld [vmem:[%s859_s0] sm:$0xf] }
   0x2   :  { %274 = vmatpush.bf16.msra.mxu0 %v453_v0  ;;  %454 = vmatpush.bf16.msra.mxu1 %v453_v0  ;;  %v451_v3 = vld [vmem:[%s858_s1 + $0x28] sm:$0xff]  ;;  %v516_v4 = vld [vmem:[%s859_s0 + $0x4] sm:$0xf]  ;;  %v521_v5 = vld [vmem:[%s859_s0 + $0x10] sm:$0xf]  ;;  %v50_v9 = vunpack.c.l.bf16 %v508_v2 }
   0x3   :  { %455 = vmatpush.bf16.msra.mxu2 %v453_v0  ;;  %456 = vmatpush.bf16.msra.mxu3 %v453_v0  ;;  %v526_v6 = vld [vmem:[%s859_s0 + $0x14] sm:$0xf]  ;;  %v531_v7 = vld [vmem:[%s859_s0 + $0x20] sm:$0xf]  ;;  %v536_v8 = vld [vmem:[%s859_s0 + $0x24] sm:$0xf]  ;;  %v51_v10 = vunpack.c.l.bf16 %v516_v4  ;;  %v54_v11 = vunpack.c.l.bf16 %v521_v5 }
   0x4   :  { %v544_v12 = vld [vmem:[%s859_s0 + $0x30] sm:$0xf]  ;;  %v549_v13 = vld [vmem:[%s859_s0 + $0x34] sm:$0xf]  ;;  %v55_v14 = vunpack.c.l.bf16 %v526_v6  ;;  %v58_v15 = vunpack.c.l.bf16 %v531_v7  ;;  %v59_v16 = vunpack.c.l.bf16 %v536_v8  ;;  %v450_v17 = vld [vmem:[%s858_s1 + $0x20] sm:$0xff]  ;;  %vm557_vm0 = vcmp.ge.f32.partialorder %v50_v9, 0.0 }
   0x5   :  { %vm561_vm1 = vcmp.ge.f32.partialorder %v51_v10, 0.0  ;;  %v82_v20 = vmul.f32 0.20019531, %v50_v9  ;;  %v62_v21 = vunpack.c.l.bf16 %v544_v12  ;;  %v63_v22 = vunpack.c.l.bf16 %v549_v13  ;;  %vm114_vm3 = vmpackc.low %vm557_vm0, %vm557_vm0  ;;  %v449_v30 = vld [vmem:[%s858_s1 + $0x18] sm:$0xff]  ;;  %v448_v43 = vld [vmem:[%s858_s1 + $0x10] sm:$0xff] }
   0x6   :  { %275 = vmatpush.bf16.msra.mxu0 %v452_v1  ;;  %457 = vmatpush.bf16.msra.mxu1 %v452_v1  ;;  %v83_v23 = vmul.f32 0.20019531, %v51_v10  ;;  %vm567_vm2 = vcmp.ge.f32.partialorder %v54_v11, 0.0  ;;  %v86_v25 = vmul.f32 0.20019531, %v54_v11  ;;  %vm574_vm4 = vcmp.ge.f32.partialorder %v55_v14, 0.0  ;;  %vm115_vm5 = vmpackc.low %vm561_vm1, %vm561_vm1  ;;  %v447_v49 = vld [vmem:[%s858_s1 + $0x8] sm:$0xff]  ;;  %v446_v9 = vld [vmem:[%s858_s1] sm:$0xff] }
   0x7   :  { %458 = vmatpush.bf16.msra.mxu2 %v452_v1  ;;  %459 = vmatpush.bf16.msra.mxu3 %v452_v1  ;;  %v87_v27 = vmul.f32 0.20019531, %v55_v14  ;;  %v90_v28 = vmul.f32 0.20019531, %v58_v15  ;;  %v91_v29 = vmul.f32 0.20019531, %v59_v16  ;;  %vm584_vm6 = vcmp.ge.f32.partialorder %v58_v15, 0.0  ;;  %vm118_vm7 = vmpackc.low %vm567_vm2, %vm567_vm2  ;;  %v658_v53 = vld [vmem:[%s859_s0 + $0x8] sm:$0xf] }
   0x8   :  { %v98_v32 = vpack.c.bf16 %v82_v20, %v82_v20  ;;  %vm591_vm8 = vcmp.ge.f32.partialorder %v59_v16, 0.0  ;;  %v94_v34 = vmul.f32 0.20019531, %v62_v21  ;;  %v95_v35 = vmul.f32 0.20019531, %v63_v22  ;;  %vm119_vm9 = vmpackc.low %vm574_vm4, %vm574_vm4  ;;  %v663_v55 = vld [vmem:[%s859_s0 + $0xc] sm:$0xf] }
   0x9   :  { %v99_v36 = vpack.c.bf16 %v83_v23, %v83_v23  ;;  %v102_v37 = vpack.c.bf16 %v86_v25, %v86_v25  ;;  %vm598_vm10 = vcmp.ge.f32.partialorder %v62_v21, 0.0  ;;  %v103_v39 = vpack.c.bf16 %v87_v27, %v87_v27  ;;  %vm122_vm11 = vmpackc.low %vm584_vm6, %vm584_vm6  ;;  %v668_v56 = vld [vmem:[%s859_s0 + $0x18] sm:$0xf]  ;;  %v673_v57 = vld [vmem:[%s859_s0 + $0x1c] sm:$0xf] }
   0xa   :  { %276 = vmatpush.bf16.msra.mxu0 %v451_v3  ;;  %460 = vmatpush.bf16.msra.mxu1 %v451_v3  ;;  %v106_v40 = vpack.c.bf16 %v90_v28, %v90_v28  ;;  %v107_v41 = vpack.c.bf16 %v91_v29, %v91_v29  ;;  %vm605_vm12 = vcmp.ge.f32.partialorder %v63_v22, 0.0  ;;  %vm123_vm13 = vmpackc.low %vm591_vm8, %vm591_vm8  ;;  %v130_v44 = vsel %vm114_vm3, %v508_v2, %v98_v32  ;;  %v690_v62 = vld [vmem:[%s859_s0 + $0x28] sm:$0xf] }
   0xb   :  { %461 = vmatpush.bf16.msra.mxu2 %v451_v3  ;;  %462 = vmatpush.bf16.msra.mxu3 %v451_v3  ;;  %v110_v45 = vpack.c.bf16 %v94_v34, %v94_v34  ;;  %v111_v46 = vpack.c.bf16 %v95_v35, %v95_v35  ;;  %vm126_vm14 = vmpackc.low %vm598_vm10, %vm598_vm10  ;;  %v131_v47 = vsel %vm115_vm5, %v516_v4, %v99_v36  ;;  %v194_v54 = vunpack.c.l.b16 %v130_v44  ;;  %v696_v3 = vld [vmem:[%s859_s0 + $0x2c] sm:$0xf]  ;;  %v701_v4 = vld [vmem:[%s859_s0 + $0x38] sm:$0xf] }
   0xc   :  { %v134_v48 = vsel %vm118_vm7, %v521_v5, %v102_v37  ;;  %vm127_vm15 = vmpackc.low %vm605_vm12, %vm605_vm12  ;;  %v135_v50 = vsel %vm119_vm9, %v526_v6, %v103_v39  ;;  %v138_v51 = vsel %vm122_vm11, %v531_v7, %v106_v40  ;;  %v139_v52 = vsel %vm123_vm13, %v536_v8, %v107_v41  ;;  %v706_v5 = vld [vmem:[%s859_s0 + $0x3c] sm:$0xf] }
   0xd   :  { %v195_v58 = vunpack.c.l.b16 %v131_v47  ;;  %v198_v59 = vunpack.c.l.b16 %v134_v48  ;;  %v142_v60 = vsel %vm126_vm14, %v544_v12, %v110_v45  ;;  %v143_v61 = vsel %vm127_vm15, %v549_v13, %v111_v46 }
   0xe   :  { %277 = vmatpush.bf16.msra.mxu0 %v450_v17  ;;  %463 = vmatpush.bf16.msra.mxu1 %v450_v17  ;;  %v199_v63 = vunpack.c.l.b16 %v135_v50  ;;  %v202_v0 = vunpack.c.l.b16 %v138_v51  ;;  %v203_v1 = vunpack.c.l.b16 %v139_v52  ;;  %v52_v2 = vunpack.c.l.bf16 %v658_v53 }
   0xf   :  { %464 = vmatpush.bf16.msra.mxu2 %v450_v17  ;;  %465 = vmatpush.bf16.msra.mxu3 %v450_v17  ;;  %v53_v6 = vunpack.c.l.bf16 %v663_v55  ;;  %v56_v7 = vunpack.c.l.bf16 %v668_v56  ;;  %v57_v8 = vunpack.c.l.bf16 %v673_v57  ;;  %v206_v10 = vunpack.c.l.b16 %v142_v60 }
  0x10   :  { %v207_v11 = vunpack.c.l.b16 %v143_v61  ;;  %vm714_vm0 = vcmp.ge.f32.partialorder %v52_v2, 0.0  ;;  %v60_v13 = vunpack.c.l.bf16 %v690_v62  ;;  %v61_v15 = vunpack.c.l.bf16 %v696_v3 }
  0x11   :  { %vm719_vm1 = vcmp.ge.f32.partialorder %v53_v6, 0.0  ;;  %v64_v16 = vunpack.c.l.bf16 %v701_v4  ;;  %v65_v17 = vunpack.c.l.bf16 %v706_v5  ;;  %v210_v18 = vpack.c.b16 %v195_v58, %v194_v54  ;;  %vm116_vm3 = vmpackc.low %vm714_vm0, %vm714_vm0 }
  0x12   :  { %278 = vmatpush.bf16.msra.mxu0 %v449_v30  ;;  %466 = vmatpush.bf16.msra.mxu1 %v449_v30  ;;  %v212_v19 = vpack.c.b16 %v199_v63, %v198_v59  ;;  %v214_v20 = vpack.c.b16 %v203_v1, %v202_v0  ;;  %vm726_vm2 = vcmp.ge.f32.partialorder %v56_v7, 0.0  ;;  %v84_v22 = vmul.f32 0.20019531, %v52_v2  ;;  %vm117_vm5 = vmpackc.low %vm719_vm1, %vm719_vm1 }
  0x13   :  { %467 = vmatpush.bf16.msra.mxu2 %v449_v30  ;;  %468 = vmatpush.bf16.msra.mxu3 %v449_v30  ;;  %v85_v23 = vmul.f32 0.20019531, %v53_v6  ;;  %vm733_vm4 = vcmp.ge.f32.partialorder %v57_v8, 0.0  ;;  %v88_v25 = vmul.f32 0.20019531, %v56_v7  ;;  %v216_v26 = vpack.c.b16 %v207_v11, %v206_v10  ;;  %vm120_vm7 = vmpackc.low %vm726_vm2, %vm726_vm2 }
  0x14   :  { %v89_v27 = vmul.f32 0.20019531, %v57_v8  ;;  %vm740_vm6 = vcmp.ge.f32.partialorder %v60_v13, 0.0  ;;  %v92_v29 = vmul.f32 0.20019531, %v60_v13  ;;  %vm747_vm8 = vcmp.ge.f32.partialorder %v61_v15, 0.0  ;;  %vm121_vm9 = vmpackc.low %vm733_vm4, %vm733_vm4 }
  0x15   :  { %v93_v31 = vmul.f32 0.20019531, %v61_v15  ;;  %v96_v32 = vmul.f32 0.20019531, %v64_v16  ;;  %v97_v33 = vmul.f32 0.20019531, %v65_v17  ;;  %vm754_vm10 = vcmp.ge.f32.partialorder %v64_v16, 0.0  ;;  %vm124_vm11 = vmpackc.low %vm740_vm6, %vm740_vm6 }
  0x16   :  { %279 = vmatpush.bf16.msra.mxu0 %v448_v43  ;;  %469 = vmatpush.bf16.msra.mxu1 %v448_v43  ;;  %v100_v35 = vpack.c.bf16 %v84_v22, %v84_v22  ;;  %vm761_vm12 = vcmp.ge.f32.partialorder %v65_v17, 0.0  ;;  %v101_v37 = vpack.c.bf16 %v85_v23, %v85_v23  ;;  %v104_v38 = vpack.c.bf16 %v88_v25, %v88_v25  ;;  %vm125_vm13 = vmpackc.low %vm747_vm8, %vm747_vm8 }
  0x17   :  { %470 = vmatpush.bf16.msra.mxu2 %v448_v43  ;;  %471 = vmatpush.bf16.msra.mxu3 %v448_v43  ;;  %v105_v39 = vpack.c.bf16 %v89_v27, %v89_v27  ;;  %v108_v40 = vpack.c.bf16 %v92_v29, %v92_v29  ;;  %v109_v41 = vpack.c.bf16 %v93_v31, %v93_v31  ;;  %vm128_vm14 = vmpackc.low %vm754_vm10, %vm754_vm10 }
  0x18   :  { %v112_v42 = vpack.c.bf16 %v96_v32, %v96_v32  ;;  %v113_v43 = vpack.c.bf16 %v97_v33, %v97_v33  ;;  %vm129_vm15 = vmpackc.low %vm761_vm12, %vm761_vm12  ;;  %v132_v44 = vsel %vm116_vm3, %v658_v53, %v100_v35  ;;  %v133_v45 = vsel %vm117_vm5, %v663_v55, %v101_v37 }
  0x19   :  { %v136_v46 = vsel %vm120_vm7, %v668_v56, %v104_v38  ;;  %v137_v47 = vsel %vm121_vm9, %v673_v57, %v105_v39  ;;  %v140_v48 = vsel %vm124_vm11, %v690_v62, %v108_v40  ;;  %v196_v52 = vunpack.c.l.b16 %v132_v44  ;;  %v478_v62 = vld [vmem:[%s860_s2] ss:$0 sm:$0xff] }
  0x1a   :  { %280 = vmatpush.bf16.msra.mxu0 %v447_v49  ;;  %472 = vmatpush.bf16.msra.mxu1 %v447_v49  ;;  %v144_v50 = vsel %vm128_vm14, %v701_v4, %v112_v42  ;;  %v145_v51 = vsel %vm129_vm15, %v706_v5, %v113_v43  ;;  %v197_v53 = vunpack.c.l.b16 %v133_v45  ;;  %v200_v54 = vunpack.c.l.b16 %v136_v46 }
  0x1b   :  { %473 = vmatpush.bf16.msra.mxu2 %v447_v49  ;;  %474 = vmatpush.bf16.msra.mxu3 %v447_v49  ;;  %v141_v49 = vsel %vm125_vm13, %v696_v3, %v109_v41  ;;  %v201_v55 = vunpack.c.l.b16 %v137_v47  ;;  %v204_v56 = vunpack.c.l.b16 %v140_v48  ;;  %v208_v57 = vunpack.c.l.b16 %v144_v50 }
  0x1c   :  { %v205_v58 = vunpack.c.l.b16 %v141_v49  ;;  %v209_v59 = vunpack.c.l.b16 %v145_v51  ;;  %v211_v60 = vpack.c.b16 %v197_v53, %v196_v52 }
  0x1d   :  { %v213_v61 = vpack.c.b16 %v201_v55, %v200_v54 }
  0x1e   :  { %281 = vmatpush.bf16.msra.mxu0 %v446_v9  ;;  %475 = vmatpush.bf16.msra.mxu1 %v446_v9  ;;  %v215_v63 = vpack.c.b16 %v205_v58, %v204_v56  ;;  %v217_v0 = vpack.c.b16 %v209_v59, %v208_v57 }
  0x1f   :  { %476 = vmatpush.bf16.msra.mxu2 %v446_v9  ;;  %477 = vmatpush.bf16.msra.mxu3 %v446_v9 }
  0x21   :  { %282 = vmatmul.bf16.vlgmr.msra.gmra.mxu0 %v210_v18  ;;  %292 = vmatmul.bf16.vlgmr.msra.gmra.mxu1 %v212_v19 }
  0x22   :  { %302 = vmatmul.bf16.vlgmr.msra.gmra.mxu2 %v214_v20  ;;  %312 = vmatmul.bf16.vlgmr.msra.gmra.mxu3 %v216_v26 }
  0x31   :  { %287 = vmatmul.bf16.gmra.mxu0 %v211_v60  ;;  %297 = vmatmul.bf16.gmra.mxu1 %v213_v61 }
  0x32   :  { %307 = vmatmul.bf16.gmra.mxu2 %v215_v63  ;;  %317 = vmatmul.bf16.gmra.mxu3 %v217_v0 }
  0x9e   :  { %v283_v1 = vpop.f32.mrf.mxu0  ;;  %v293_v2 = vpop.f32.mrf.mxu1 }
  0x9f   :  { %v378_v3 = vadd.f32 %v478_v62, %v283_v1  ;;  %v382_v4 = vadd.f32 %v478_v62, %v293_v2 }
  0xa1   :  { %394 = vst [vmem:[%s861_s3] sm:$0xff] %v378_v3 }
  0xa2   :  { %398 = vst [vmem:[%s861_s3 + $0x20] sm:$0xff] %v382_v4 }
  0xa5   :  { %v303_v5 = vpop.f32.mrf.mxu2  ;;  %v313_v6 = vpop.f32.mrf.mxu3 }
  0xa6   :  { %v386_v7 = vadd.f32 %v478_v62, %v303_v5  ;;  %v390_v8 = vadd.f32 %v478_v62, %v313_v6  ;;  %v285_v9 = vpop.f32.mrf.mxu0  ;;  %v295_v10 = vpop.f32.mrf.mxu1 }
  0xa7   :  { %v379_v11 = vadd.f32 %v478_v62, %v285_v9  ;;  %v383_v12 = vadd.f32 %v478_v62, %v295_v10 }
  0xa8   :  { %402 = vst [vmem:[%s861_s3 + $0x40] sm:$0xff] %v386_v7 }
  0xa9   :  { %406 = vst [vmem:[%s861_s3 + $0x60] sm:$0xff] %v390_v8 }
  0xaa   :  { %395 = vst [vmem:[%s861_s3 + $0x8] sm:$0xff] %v379_v11 }
  0xab   :  { %399 = vst [vmem:[%s861_s3 + $0x28] sm:$0xff] %v383_v12 }
  0xad   :  { %v305_v13 = vpop.f32.mrf.mxu2  ;;  %v315_v14 = vpop.f32.mrf.mxu3 }
  0xae   :  { %v387_v15 = vadd.f32 %v478_v62, %v305_v13  ;;  %v391_v16 = vadd.f32 %v478_v62, %v315_v14  ;;  %v288_v17 = vpop.f32.mrf.mxu0  ;;  %v298_v18 = vpop.f32.mrf.mxu1 }
  0xaf   :  { %v380_v19 = vadd.f32 %v478_v62, %v288_v17  ;;  %v384_v20 = vadd.f32 %v478_v62, %v298_v18 }
  0xb0   :  { %403 = vst [vmem:[%s861_s3 + $0x48] sm:$0xff] %v387_v15 }
  0xb1   :  { %407 = vst [vmem:[%s861_s3 + $0x68] sm:$0xff] %v391_v16 }
  0xb2   :  { %396 = vst [vmem:[%s861_s3 + $0x10] sm:$0xff] %v380_v19 }
  0xb3   :  { %400 = vst [vmem:[%s861_s3 + $0x30] sm:$0xff] %v384_v20 }
  0xb5   :  { %v308_v21 = vpop.f32.mrf.mxu2  ;;  %v318_v22 = vpop.f32.mrf.mxu3 }
  0xb6   :  { %v388_v23 = vadd.f32 %v478_v62, %v308_v21  ;;  %v392_v24 = vadd.f32 %v478_v62, %v318_v22  ;;  %v290_v25 = vpop.f32.mrf.mxu0  ;;  %v300_v26 = vpop.f32.mrf.mxu1 }
  0xb7   :  { %v381_v27 = vadd.f32 %v478_v62, %v290_v25  ;;  %v385_v28 = vadd.f32 %v478_v62, %v300_v26 }
  0xb8   :  { %404 = vst [vmem:[%s861_s3 + $0x50] sm:$0xff] %v388_v23 }
  0xb9   :  { %408 = vst [vmem:[%s861_s3 + $0x70] sm:$0xff] %v392_v24 }
  0xba   :  { %397 = vst [vmem:[%s861_s3 + $0x18] sm:$0xff] %v381_v27 }
  0xbb   :  { %401 = vst [vmem:[%s861_s3 + $0x38] sm:$0xff] %v385_v28 }
  0xbd   :  { %v310_v29 = vpop.f32.mrf.mxu2  ;;  %v320_v30 = vpop.f32.mrf.mxu3 }
  0xbe   :  { %v389_v31 = vadd.f32 %v478_v62, %v310_v29  ;;  %v393_v32 = vadd.f32 %v478_v62, %v320_v30 }
  0xc0   :  { %405 = vst [vmem:[%s861_s3 + $0x58] sm:$0xff] %v389_v31 }
  0xc1   :  { %409 = vst [vmem:[%s861_s3 + $0x78] sm:$0xff] %v393_v32 }

// kernel: unet_forward.28
= control target key start
LH: loop header
LB: loop body
LE: loop exit
PB: predicated region body
PF: predicated region fallthrough
CT: control target
= control target key end

     0   :  { %s174_s0 = inlined_call_operand.vmem [shape: f32[128,128], index: 0, kind: input, shape index: {}]   ;;  %s175_s1 = inlined_call_operand.vmem [shape: f32[8,128], index: 1, kind: output, shape index: {0}]   ;;  %s176_s2 = inlined_call_operand.vmem [shape: f32[8,128], index: 2, kind: output, shape index: {1}]  }
   0x1   :  { %v16_v0 = vld [vmem:[%s174_s0] sm:$0xff]  ;;  %v17_v1 = vld [vmem:[%s174_s0 + $0x8] sm:$0xff]  ;;  %v18_v2 = vld [vmem:[%s174_s0 + $0x10] sm:$0xff] }
   0x2   :  { %v19_v3 = vld [vmem:[%s174_s0 + $0x18] sm:$0xff]  ;;  %v33_v4 = vadd.f32 %v17_v1, %v16_v0  ;;  %v57_v5 = vmul.f32 %v16_v0, %v16_v0  ;;  %v58_v6 = vmul.f32 %v17_v1, %v17_v1  ;;  %v59_v7 = vmul.f32 %v18_v2, %v18_v2  ;;  %v20_v8 = vld [vmem:[%s174_s0 + $0x20] sm:$0xff]  ;;  %v21_v12 = vld [vmem:[%s174_s0 + $0x28] sm:$0xff] }
   0x3   :  { %v60_v10 = vmul.f32 %v19_v3, %v19_v3  ;;  %v61_v14 = vmul.f32 %v20_v8, %v20_v8  ;;  %v22_v16 = vld [vmem:[%s174_s0 + $0x30] sm:$0xff]  ;;  %v62_v18 = vmul.f32 %v21_v12, %v21_v12  ;;  %v23_v20 = vld [vmem:[%s174_s0 + $0x38] sm:$0xff]  ;;  %v24_v24 = vld [vmem:[%s174_s0 + $0x40] sm:$0xff] }
   0x4   :  { %v34_v9 = vadd.f32 %v33_v4, %v18_v2  ;;  %v73_v11 = vadd.f32 %v58_v6, %v57_v5  ;;  %v63_v22 = vmul.f32 %v22_v16, %v22_v16  ;;  %v64_v26 = vmul.f32 %v23_v20, %v23_v20  ;;  %v25_v28 = vld [vmem:[%s174_s0 + $0x48] sm:$0xff]  ;;  %v26_v32 = vld [vmem:[%s174_s0 + $0x50] sm:$0xff]  ;;  %v27_v36 = vld [vmem:[%s174_s0 + $0x58] sm:$0xff] }
   0x5   :  { %v65_v30 = vmul.f32 %v24_v24, %v24_v24  ;;  %v66_v34 = vmul.f32 %v25_v28, %v25_v28  ;;  %v67_v38 = vmul.f32 %v26_v32, %v26_v32  ;;  %v28_v40 = vld [vmem:[%s174_s0 + $0x60] sm:$0xff]  ;;  %v68_v42 = vmul.f32 %v27_v36, %v27_v36  ;;  %v29_v44 = vld [vmem:[%s174_s0 + $0x68] sm:$0xff]  ;;  %v30_v48 = vld [vmem:[%s174_s0 + $0x70] sm:$0xff] }
   0x6   :  { %v35_v13 = vadd.f32 %v34_v9, %v19_v3  ;;  %v74_v15 = vadd.f32 %v73_v11, %v59_v7  ;;  %v69_v46 = vmul.f32 %v28_v40, %v28_v40  ;;  %v70_v50 = vmul.f32 %v29_v44, %v29_v44  ;;  %v31_v52 = vld [vmem:[%s174_s0 + $0x78] sm:$0xff] }
   0x7   :  { %v71_v54 = vmul.f32 %v30_v48, %v30_v48  ;;  %v72_v57 = vmul.f32 %v31_v52, %v31_v52 }
   0x8   :  { %v36_v17 = vadd.f32 %v35_v13, %v20_v8  ;;  %v75_v19 = vadd.f32 %v74_v15, %v60_v10 }
   0xa   :  { %v37_v21 = vadd.f32 %v36_v17, %v21_v12  ;;  %v76_v23 = vadd.f32 %v75_v19, %v61_v14 }
   0xc   :  { %v38_v25 = vadd.f32 %v37_v21, %v22_v16  ;;  %v77_v27 = vadd.f32 %v76_v23, %v62_v18 }
   0xe   :  { %v39_v29 = vadd.f32 %v38_v25, %v23_v20  ;;  %v78_v31 = vadd.f32 %v77_v27, %v63_v22 }
  0x10   :  { %v40_v33 = vadd.f32 %v39_v29, %v24_v24  ;;  %v79_v35 = vadd.f32 %v78_v31, %v64_v26 }
  0x12   :  { %v41_v37 = vadd.f32 %v40_v33, %v25_v28  ;;  %v80_v39 = vadd.f32 %v79_v35, %v65_v30 }
  0x14   :  { %v42_v41 = vadd.f32 %v41_v37, %v26_v32  ;;  %v81_v43 = vadd.f32 %v80_v39, %v66_v34 }
  0x16   :  { %v43_v45 = vadd.f32 %v42_v41, %v27_v36  ;;  %v82_v47 = vadd.f32 %v81_v43, %v67_v38 }
  0x18   :  { %v44_v49 = vadd.f32 %v43_v45, %v28_v40  ;;  %v83_v51 = vadd.f32 %v82_v47, %v68_v42 }
  0x1a   :  { %v45_v53 = vadd.f32 %v44_v49, %v29_v44  ;;  %v84_v55 = vadd.f32 %v83_v51, %v69_v46 }
  0x1c   :  { %v46_v56 = vadd.f32 %v45_v53, %v30_v48  ;;  %v85_v58 = vadd.f32 %v84_v55, %v70_v50 }
  0x1e   :  { %v47_v59 = vadd.f32 %v46_v56, %v31_v52  ;;  %v86_v60 = vadd.f32 %v85_v58, %v71_v54 }
  0x20   :  { %v48_v61 = vrot.slane %v47_v59, 4  ;;  %v87_v62 = vadd.f32 %v86_v60, %v72_v57 }
  0x22   :  { %v49_v63 = vadd.f32 %v48_v61, %v47_v59  ;;  %v88_v0 = vrot.slane %v87_v62, 4 }
  0x24   :  { %v50_v1 = vrot.slane %v49_v63, 2  ;;  %v89_v2 = vadd.f32 %v88_v0, %v87_v62 }
  0x26   :  { %v51_v3 = vadd.f32 %v50_v1, %v49_v63  ;;  %v90_v4 = vrot.slane %v89_v2, 2 }
  0x28   :  { %v52_v5 = vrot.slane %v51_v3, 1  ;;  %v91_v6 = vadd.f32 %v90_v4, %v89_v2 }
  0x2a   :  { %v53_v7 = vadd.f32 %v52_v5, %v51_v3  ;;  %v92_v8 = vrot.slane %v91_v6, 1 }
  0x2c   :  { %v93_v9 = vadd.f32 %v92_v8, %v91_v6  ;;  %55 = vst [vmem:[%s175_s1] sm:$0xff] %v53_v7 }
  0x2e   :  { %95 = vst [vmem:[%s176_s2] sm:$0xff] %v93_v9 }

// kernel: unet_forward.29
= control target key start
LH: loop header
LB: loop body
LE: loop exit
PB: predicated region body
PF: predicated region fallthrough
CT: control target
= control target key end

     0   :  { %s214_s0 = inlined_call_operand.vmem [shape: f32[128,128], index: 0, kind: input, shape index: {}]   ;;  %s215_s1 = inlined_call_operand.vmem [shape: f32[1,128], index: 1, kind: input, shape index: {}]   ;;  %s216_s2 = inlined_call_operand.vmem [shape: f32[1,128], index: 2, kind: input, shape index: {}]   ;;  %s217_s3 = inlined_call_operand.vmem [shape: f32[128,128], index: 3, kind: output, shape index: {}]  }
   0x1   :  { %v14_v0 = vld [vmem:[%s214_s0] sm:$0xff]  ;;  %v15_v3 = vld [vmem:[%s214_s0 + $0x8] sm:$0xff]  ;;  %v16_v6 = vld [vmem:[%s214_s0 + $0x10] sm:$0xff] }
   0x2   :  { %v90_v1 = vld [vmem:[%s215_s1] ss:$0 sm:$0xff]  ;;  %v17_v7 = vld [vmem:[%s214_s0 + $0x18] sm:$0xff]  ;;  %v19_v12 = vld [vmem:[%s214_s0 + $0x28] sm:$0xff] }
   0x3   :  { %v91_v2 = vld [vmem:[%s216_s2] ss:$0 sm:$0xff]  ;;  %v34_v4 = vmul.f32 %v90_v1, %v14_v0  ;;  %v35_v5 = vmul.f32 %v90_v1, %v15_v3  ;;  %v36_v9 = vmul.f32 %v90_v1, %v16_v6  ;;  %v37_v10 = vmul.f32 %v90_v1, %v17_v7  ;;  %v20_v13 = vld [vmem:[%s214_s0 + $0x30] sm:$0xff]  ;;  %v21_v14 = vld [vmem:[%s214_s0 + $0x38] sm:$0xff] }
   0x4   :  { %v18_v8 = vld [vmem:[%s214_s0 + $0x20] sm:$0xff]  ;;  %v39_v17 = vmul.f32 %v90_v1, %v19_v12  ;;  %v40_v18 = vmul.f32 %v90_v1, %v20_v13  ;;  %v23_v20 = vld [vmem:[%s214_s0 + $0x48] sm:$0xff]  ;;  %v41_v23 = vmul.f32 %v90_v1, %v21_v14  ;;  %v24_v24 = vld [vmem:[%s214_s0 + $0x50] sm:$0xff] }
   0x5   :  { %v38_v11 = vmul.f32 %v90_v1, %v18_v8  ;;  %v54_v15 = vadd.f32 %v91_v2, %v34_v4  ;;  %v55_v16 = vadd.f32 %v91_v2, %v35_v5  ;;  %v22_v19 = vld [vmem:[%s214_s0 + $0x40] sm:$0xff]  ;;  %v56_v21 = vadd.f32 %v91_v2, %v36_v9  ;;  %v25_v27 = vld [vmem:[%s214_s0 + $0x58] sm:$0xff]  ;;  %v27_v33 = vld [vmem:[%s214_s0 + $0x68] sm:$0xff] }
   0x6   :  { %v57_v22 = vadd.f32 %v91_v2, %v37_v10  ;;  %v42_v26 = vmul.f32 %v90_v1, %v22_v19  ;;  %v59_v28 = vadd.f32 %v91_v2, %v39_v17  ;;  %v43_v29 = vmul.f32 %v90_v1, %v23_v20  ;;  %v26_v30 = vld [vmem:[%s214_s0 + $0x60] sm:$0xff]  ;;  %v28_v36 = vld [vmem:[%s214_s0 + $0x70] sm:$0xff]  ;;  %v29_v39 = vld [vmem:[%s214_s0 + $0x78] sm:$0xff] }
   0x7   :  { %70 = vst [vmem:[%s217_s3] sm:$0xff] %v54_v15  ;;  %v58_v25 = vadd.f32 %v91_v2, %v38_v11  ;;  %v60_v31 = vadd.f32 %v91_v2, %v40_v18  ;;  %v44_v32 = vmul.f32 %v90_v1, %v24_v24  ;;  %v61_v34 = vadd.f32 %v91_v2, %v41_v23 }
   0x8   :  { %71 = vst [vmem:[%s217_s3 + $0x8] sm:$0xff] %v55_v16  ;;  %v45_v35 = vmul.f32 %v90_v1, %v25_v27  ;;  %v62_v37 = vadd.f32 %v91_v2, %v42_v26  ;;  %v46_v38 = vmul.f32 %v90_v1, %v26_v30  ;;  %v63_v40 = vadd.f32 %v91_v2, %v43_v29 }
   0x9   :  { %72 = vst [vmem:[%s217_s3 + $0x10] sm:$0xff] %v56_v21  ;;  %v47_v41 = vmul.f32 %v90_v1, %v27_v33  ;;  %v64_v42 = vadd.f32 %v91_v2, %v44_v32  ;;  %v48_v43 = vmul.f32 %v90_v1, %v28_v36  ;;  %v49_v45 = vmul.f32 %v90_v1, %v29_v39 }
   0xa   :  { %73 = vst [vmem:[%s217_s3 + $0x18] sm:$0xff] %v57_v22  ;;  %v65_v44 = vadd.f32 %v91_v2, %v45_v35  ;;  %v66_v46 = vadd.f32 %v91_v2, %v46_v38 }
   0xb   :  { %74 = vst [vmem:[%s217_s3 + $0x20] sm:$0xff] %v58_v25  ;;  %v67_v47 = vadd.f32 %v91_v2, %v47_v41  ;;  %v68_v48 = vadd.f32 %v91_v2, %v48_v43  ;;  %v69_v49 = vadd.f32 %v91_v2, %v49_v45 }
   0xc   :  { %75 = vst [vmem:[%s217_s3 + $0x28] sm:$0xff] %v59_v28 }
   0xd   :  { %76 = vst [vmem:[%s217_s3 + $0x30] sm:$0xff] %v60_v31 }
   0xe   :  { %77 = vst [vmem:[%s217_s3 + $0x38] sm:$0xff] %v61_v34 }
   0xf   :  { %78 = vst [vmem:[%s217_s3 + $0x40] sm:$0xff] %v62_v37 }
  0x10   :  { %79 = vst [vmem:[%s217_s3 + $0x48] sm:$0xff] %v63_v40 }
  0x11   :  { %80 = vst [vmem:[%s217_s3 + $0x50] sm:$0xff] %v64_v42 }
  0x12   :  { %81 = vst [vmem:[%s217_s3 + $0x58] sm:$0xff] %v65_v44 }
  0x13   :  { %82 = vst [vmem:[%s217_s3 + $0x60] sm:$0xff] %v66_v46 }
  0x14   :  { %83 = vst [vmem:[%s217_s3 + $0x68] sm:$0xff] %v67_v47 }
  0x15   :  { %84 = vst [vmem:[%s217_s3 + $0x70] sm:$0xff] %v68_v48 }
  0x16   :  { %85 = vst [vmem:[%s217_s3 + $0x78] sm:$0xff] %v69_v49 }

// kernel: unet_forward.31
= control target key start
LH: loop header
LB: loop body
LE: loop exit
PB: predicated region body
PF: predicated region fallthrough
CT: control target
= control target key end

     0   :  { %s90_s0 = inlined_call_operand.vmem [shape: f32[32,128], index: 0, kind: input, shape index: {}]   ;;  %s91_s1 = inlined_call_operand.vmem [shape: f32[8,128], index: 1, kind: output, shape index: {0}]   ;;  %s92_s2 = inlined_call_operand.vmem [shape: f32[8,128], index: 2, kind: output, shape index: {1}]  }
   0x1   :  { %v16_v0 = vld [vmem:[%s90_s0] sm:$0xff]  ;;  %v17_v1 = vld [vmem:[%s90_s0 + $0x8] sm:$0xff]  ;;  %v18_v2 = vld [vmem:[%s90_s0 + $0x10] sm:$0xff] }
   0x2   :  { %v19_v3 = vld [vmem:[%s90_s0 + $0x18] sm:$0xff]  ;;  %v21_v4 = vadd.f32 %v17_v1, %v16_v0  ;;  %v33_v5 = vmul.f32 %v16_v0, %v16_v0  ;;  %v34_v6 = vmul.f32 %v17_v1, %v17_v1  ;;  %v35_v7 = vmul.f32 %v18_v2, %v18_v2 }
   0x3   :  { %v36_v9 = vmul.f32 %v19_v3, %v19_v3 }
   0x4   :  { %v22_v8 = vadd.f32 %v21_v4, %v18_v2  ;;  %v37_v10 = vadd.f32 %v34_v6, %v33_v5 }
   0x6   :  { %v23_v11 = vadd.f32 %v22_v8, %v19_v3  ;;  %v38_v12 = vadd.f32 %v37_v10, %v35_v7 }
   0x8   :  { %v24_v13 = vrot.slane %v23_v11, 4  ;;  %v39_v14 = vadd.f32 %v38_v12, %v36_v9 }
   0xa   :  { %v25_v15 = vadd.f32 %v24_v13, %v23_v11  ;;  %v40_v16 = vrot.slane %v39_v14, 4 }
   0xc   :  { %v26_v17 = vrot.slane %v25_v15, 2  ;;  %v41_v18 = vadd.f32 %v40_v16, %v39_v14 }
   0xe   :  { %v27_v19 = vadd.f32 %v26_v17, %v25_v15  ;;  %v42_v20 = vrot.slane %v41_v18, 2 }
  0x10   :  { %v28_v21 = vrot.slane %v27_v19, 1  ;;  %v43_v22 = vadd.f32 %v42_v20, %v41_v18 }
  0x12   :  { %v29_v23 = vadd.f32 %v28_v21, %v27_v19  ;;  %v44_v24 = vrot.slane %v43_v22, 1 }
  0x14   :  { %v45_v25 = vadd.f32 %v44_v24, %v43_v22  ;;  %31 = vst [vmem:[%s91_s1] sm:$0xff] %v29_v23 }
  0x16   :  { %47 = vst [vmem:[%s92_s2] sm:$0xff] %v45_v25 }

// kernel: unet_forward.32
= control target key start
LH: loop header
LB: loop body
LE: loop exit
PB: predicated region body
PF: predicated region fallthrough
CT: control target
= control target key end

     0   :  { %s94_s0 = inlined_call_operand.vmem [shape: f32[32,128], index: 0, kind: input, shape index: {}]   ;;  %s95_s1 = inlined_call_operand.vmem [shape: f32[1,128], index: 1, kind: input, shape index: {}]   ;;  %s96_s2 = inlined_call_operand.vmem [shape: f32[1,128], index: 2, kind: input, shape index: {}]   ;;  %s97_s3 = inlined_call_operand.vmem [shape: f32[32,128], index: 3, kind: output, shape index: {}]  }
   0x1   :  { %v14_v0 = vld [vmem:[%s94_s0] sm:$0xff]  ;;  %v15_v3 = vld [vmem:[%s94_s0 + $0x8] sm:$0xff]  ;;  %v16_v6 = vld [vmem:[%s94_s0 + $0x10] sm:$0xff] }
   0x2   :  { %v42_v1 = vld [vmem:[%s95_s1] ss:$0 sm:$0xff]  ;;  %v17_v7 = vld [vmem:[%s94_s0 + $0x18] sm:$0xff] }
   0x3   :  { %v43_v2 = vld [vmem:[%s96_s2] ss:$0 sm:$0xff]  ;;  %v22_v4 = vmul.f32 %v42_v1, %v14_v0  ;;  %v23_v5 = vmul.f32 %v42_v1, %v15_v3  ;;  %v24_v8 = vmul.f32 %v42_v1, %v16_v6  ;;  %v25_v9 = vmul.f32 %v42_v1, %v17_v7 }
   0x5   :  { %v30_v10 = vadd.f32 %v43_v2, %v22_v4  ;;  %v31_v11 = vadd.f32 %v43_v2, %v23_v5  ;;  %v32_v12 = vadd.f32 %v43_v2, %v24_v8  ;;  %v33_v13 = vadd.f32 %v43_v2, %v25_v9 }
   0x7   :  { %34 = vst [vmem:[%s97_s3] sm:$0xff] %v30_v10 }
   0x8   :  { %35 = vst [vmem:[%s97_s3 + $0x8] sm:$0xff] %v31_v11 }
   0x9   :  { %36 = vst [vmem:[%s97_s3 + $0x10] sm:$0xff] %v32_v12 }
   0xa   :  { %37 = vst [vmem:[%s97_s3 + $0x18] sm:$0xff] %v33_v13 }

// kernel: unet_forward.30
= control target key start
LH: loop header
LB: loop body
LE: loop exit
PB: predicated region body
PF: predicated region fallthrough
CT: control target
= control target key end

     0   :  { %s533_s1 = inlined_call_operand.vmem [shape: bf16[256,128], index: 1, kind: input, shape index: {}]   ;;  %s534_s0 = inlined_call_operand.vmem [shape: bf16[32,256], index: 0, kind: input, shape index: {}]   ;;  %s535_s2 = inlined_call_operand.vmem [shape: f32[1,128], index: 2, kind: input, shape index: {}]   ;;  %s536_s3 = inlined_call_operand.vmem [shape: f32[32,128], index: 3, kind: output, shape index: {}]  }
   0x1   :  { %v354_v0 = vld [vmem:[%s533_s1 + $0x38] sm:$0xff]  ;;  %v353_v2 = vld [vmem:[%s533_s1 + $0x30] sm:$0xff]  ;;  %v352_v4 = vld [vmem:[%s533_s1 + $0x28] sm:$0xff] }
   0x2   :  { %v362_v1 = vld [vmem:[%s533_s1 + $0x78] sm:$0xff]  ;;  %214 = vmatpush.bf16.msra.mxu0 %v354_v0  ;;  %363 = vmatpush.bf16.msra.mxu2 %v354_v0  ;;  %v361_v3 = vld [vmem:[%s533_s1 + $0x70] sm:$0xff]  ;;  %v22_v5 = vld [vmem:[%s534_s0] sm:$0xff] }
   0x3   :  { %233 = vmatpush.bf16.msra.mxu1 %v362_v1  ;;  %371 = vmatpush.bf16.msra.mxu3 %v362_v1  ;;  %v23_v6 = vld [vmem:[%s534_s0 + $0x8] sm:$0xff]  ;;  %v24_v8 = vld [vmem:[%s534_s0 + $0x10] sm:$0xff]  ;;  %v25_v9 = vld [vmem:[%s534_s0 + $0x18] sm:$0xff]  ;;  %v26_v10 = vunpack.c.l.bf16 %v22_v5  ;;  %v27_v11 = vunpack.c.h.bf16 %v22_v5 }
   0x4   :  { %v360_v7 = vld [vmem:[%s533_s1 + $0x68] sm:$0xff]  ;;  %v28_v12 = vunpack.c.l.bf16 %v23_v6  ;;  %v29_v13 = vunpack.c.h.bf16 %v23_v6  ;;  %v351_v14 = vld [vmem:[%s533_s1 + $0x20] sm:$0xff]  ;;  %v30_v15 = vunpack.c.l.bf16 %v24_v8  ;;  %v31_v16 = vunpack.c.h.bf16 %v24_v8  ;;  %v350_v28 = vld [vmem:[%s533_s1 + $0x18] sm:$0xff] }
   0x5   :  { %v32_v17 = vunpack.c.l.bf16 %v25_v9  ;;  %v33_v18 = vunpack.c.h.bf16 %v25_v9  ;;  %v359_v19 = vld [vmem:[%s533_s1 + $0x60] sm:$0xff]  ;;  %vm436_vm0 = vcmp.ge.f32.partialorder %v26_v10, 0.0  ;;  %vm440_vm1 = vcmp.ge.f32.partialorder %v27_v11, 0.0  ;;  %v358_v33 = vld [vmem:[%s533_s1 + $0x58] sm:$0xff]  ;;  %v349_v39 = vld [vmem:[%s533_s1 + $0x10] sm:$0xff] }
   0x6   :  { %215 = vmatpush.bf16.msra.mxu0 %v353_v2  ;;  %364 = vmatpush.bf16.msra.mxu2 %v353_v2  ;;  %vm444_vm2 = vcmp.ge.f32.partialorder %v28_v12, 0.0  ;;  %vm448_vm3 = vcmp.ge.f32.partialorder %v29_v13, 0.0  ;;  %v42_v24 = vmul.f32 0.20019531, %v26_v10  ;;  %v43_v25 = vmul.f32 0.20019531, %v27_v11  ;;  %vm54_vm6 = vmpackc.low %vm440_vm1, %vm436_vm0  ;;  %v357_v43 = vld [vmem:[%s533_s1 + $0x50] sm:$0xff]  ;;  %v348_v45 = vld [vmem:[%s533_s1 + $0x8] sm:$0xff] }
   0x7   :  { %234 = vmatpush.bf16.msra.mxu1 %v361_v3  ;;  %372 = vmatpush.bf16.msra.mxu3 %v361_v3  ;;  %v44_v26 = vmul.f32 0.20019531, %v28_v12  ;;  %v45_v27 = vmul.f32 0.20019531, %v29_v13  ;;  %v46_v29 = vmul.f32 0.20019531, %v30_v15  ;;  %v47_v30 = vmul.f32 0.20019531, %v31_v16  ;;  %vm55_vm9 = vmpackc.low %vm448_vm3, %vm444_vm2  ;;  %v356_v49 = vld [vmem:[%s533_s1 + $0x48] sm:$0xff]  ;;  %v347_v54 = vld [vmem:[%s533_s1] sm:$0xff] }
   0x8   :  { %v48_v31 = vmul.f32 0.20019531, %v32_v17  ;;  %v49_v32 = vmul.f32 0.20019531, %v33_v18  ;;  %vm458_vm4 = vcmp.ge.f32.partialorder %v30_v15, 0.0  ;;  %vm462_vm5 = vcmp.ge.f32.partialorder %v31_v16, 0.0  ;;  %v355_v59 = vld [vmem:[%s533_s1 + $0x40] sm:$0xff] }
   0x9   :  { %vm470_vm7 = vcmp.ge.f32.partialorder %v32_v17, 0.0  ;;  %vm474_vm8 = vcmp.ge.f32.partialorder %v33_v18, 0.0  ;;  %v50_v38 = vpack.c.bf16 %v43_v25, %v42_v24  ;;  %v51_v40 = vpack.c.bf16 %v45_v27, %v44_v26  ;;  %vm56_vm10 = vmpackc.low %vm462_vm5, %vm458_vm4  ;;  %v379_v1 = vld [vmem:[%s535_s2] ss:$0 sm:$0xff] }
   0xa   :  { %216 = vmatpush.bf16.msra.mxu0 %v352_v4  ;;  %365 = vmatpush.bf16.msra.mxu2 %v352_v4  ;;  %v52_v41 = vpack.c.bf16 %v47_v30, %v46_v29  ;;  %v53_v42 = vpack.c.bf16 %v49_v32, %v48_v31  ;;  %vm57_vm11 = vmpackc.low %vm474_vm8, %vm470_vm7 }
   0xb   :  { %235 = vmatpush.bf16.msra.mxu1 %v360_v7  ;;  %373 = vmatpush.bf16.msra.mxu3 %v360_v7  ;;  %v58_v44 = vsel %vm54_vm6, %v22_v5, %v50_v38  ;;  %v59_v46 = vsel %vm55_vm9, %v23_v6, %v51_v40 }
   0xc   :  { %v60_v47 = vsel %vm56_vm10, %v24_v8, %v52_v41  ;;  %v61_v48 = vsel %vm57_vm11, %v25_v9, %v53_v42  ;;  %v102_v50 = vunpack.c.l.b16 %v58_v44  ;;  %v104_v51 = vunpack.c.l.b16 %v59_v46 }
   0xd   :  { %v106_v52 = vunpack.c.l.b16 %v60_v47  ;;  %v108_v53 = vunpack.c.l.b16 %v61_v48  ;;  %v103_v55 = vunpack.c.h.b16 %v58_v44  ;;  %v105_v56 = vunpack.c.h.b16 %v59_v46 }
   0xe   :  { %217 = vmatpush.bf16.msra.mxu0 %v351_v14  ;;  %366 = vmatpush.bf16.msra.mxu2 %v351_v14  ;;  %v107_v57 = vunpack.c.h.b16 %v60_v47  ;;  %v109_v58 = vunpack.c.h.b16 %v61_v48  ;;  %v110_v60 = vpack.c.b16 %v104_v51, %v102_v50 }
   0xf   :  { %236 = vmatpush.bf16.msra.mxu1 %v359_v19  ;;  %374 = vmatpush.bf16.msra.mxu3 %v359_v19  ;;  %v112_v61 = vpack.c.b16 %v108_v53, %v106_v52  ;;  %v111_v62 = vpack.c.b16 %v105_v56, %v103_v55 }
  0x10   :  { %v113_v63 = vpack.c.b16 %v109_v58, %v107_v57 }
  0x12   :  { %218 = vmatpush.bf16.msra.mxu0 %v350_v28  ;;  %367 = vmatpush.bf16.msra.mxu2 %v350_v28 }
  0x13   :  { %237 = vmatpush.bf16.msra.mxu1 %v358_v33  ;;  %375 = vmatpush.bf16.msra.mxu3 %v358_v33 }
  0x16   :  { %219 = vmatpush.bf16.msra.mxu0 %v349_v39  ;;  %368 = vmatpush.bf16.msra.mxu2 %v349_v39 }
  0x17   :  { %238 = vmatpush.bf16.msra.mxu1 %v357_v43  ;;  %376 = vmatpush.bf16.msra.mxu3 %v357_v43 }
  0x1a   :  { %220 = vmatpush.bf16.msra.mxu0 %v348_v45  ;;  %369 = vmatpush.bf16.msra.mxu2 %v348_v45 }
  0x1b   :  { %239 = vmatpush.bf16.msra.mxu1 %v356_v49  ;;  %377 = vmatpush.bf16.msra.mxu3 %v356_v49 }
  0x1e   :  { %221 = vmatpush.bf16.msra.mxu0 %v347_v54  ;;  %370 = vmatpush.bf16.msra.mxu2 %v347_v54 }
  0x1f   :  { %240 = vmatpush.bf16.msra.mxu1 %v355_v59  ;;  %378 = vmatpush.bf16.msra.mxu3 %v355_v59 }
  0x21   :  { %222 = vmatmul.bf16.vlgmr.msra.gmra.mxu0 %v110_v60  ;;  %227 = vmatmul.bf16.vlgmr.msra.gmra.mxu2 %v112_v61 }
  0x22   :  { %241 = vmatmul.bf16.vlgmr.msra.gmra.mxu1 %v111_v62  ;;  %246 = vmatmul.bf16.vlgmr.msra.gmra.mxu3 %v113_v63 }
  0x9e   :  { %v223_v0 = vpop.f32.mrf.mxu0 }
  0x9f   :  { %v242_v2 = vpop.f32.mrf.mxu1 }
  0xa0   :  { %v243_v3 = vadd.f32 %v242_v2, %v223_v0 }
  0xa2   :  { %v271_v4 = vadd.f32 %v379_v1, %v243_v3 }
  0xa4   :  { %275 = vst [vmem:[%s536_s3] sm:$0xff] %v271_v4  ;;  %v228_v5 = vpop.f32.mrf.mxu2 }
  0xa5   :  { %v247_v6 = vpop.f32.mrf.mxu3 }
  0xa6   :  { %v248_v7 = vadd.f32 %v247_v6, %v228_v5  ;;  %v225_v8 = vpop.f32.mrf.mxu0 }
  0xa7   :  { %v244_v9 = vpop.f32.mrf.mxu1 }
  0xa8   :  { %v273_v10 = vadd.f32 %v379_v1, %v248_v7  ;;  %v245_v11 = vadd.f32 %v244_v9, %v225_v8 }
  0xaa   :  { %277 = vst [vmem:[%s536_s3 + $0x10] sm:$0xff] %v273_v10  ;;  %v272_v12 = vadd.f32 %v379_v1, %v245_v11 }
  0xac   :  { %276 = vst [vmem:[%s536_s3 + $0x8] sm:$0xff] %v272_v12  ;;  %v230_v13 = vpop.f32.mrf.mxu2 }
  0xad   :  { %v249_v14 = vpop.f32.mrf.mxu3 }
  0xae   :  { %v250_v15 = vadd.f32 %v249_v14, %v230_v13 }
  0xb0   :  { %v274_v16 = vadd.f32 %v379_v1, %v250_v15 }
  0xb2   :  { %278 = vst [vmem:[%s536_s3 + $0x18] sm:$0xff] %v274_v16 }

// kernel: unet_forward.33
= control target key start
LH: loop header
LB: loop body
LE: loop exit
PB: predicated region body
PF: predicated region fallthrough
CT: control target
= control target key end

     0   :  { %s664_s29 = smov 0   ;;  %s759_s0 = inlined_call_operand.vmem [shape: f32[2,16,32], index: 0, kind: input, shape index: {}]   ;;  %s760_s1 = inlined_call_operand.vmem [shape: f32[32,4], index: 1, kind: input, shape index: {}]   ;;  %s761_s2 = inlined_call_operand.vmem [shape: f32[1,4], index: 2, kind: input, shape index: {}]   ;;  %s762_s3 = inlined_call_operand.vmem [shape: f32[32,4], index: 3, kind: input, shape index: {}]   ;;  %s763_s4 = inlined_call_operand.vmem [shape: f32[1,4], index: 4, kind: input, shape index: {}]   ;;  %s764_s5 = inlined_call_operand.vmem [shape: f32[32,32], index: 5, kind: input, shape index: {}]   ;;  %s765_s6 = inlined_call_operand.vmem [shape: f32[1,32], index: 6, kind: input, shape index: {}]   ;;  %s766_s7 = inlined_call_operand.<no memory space> [shape: f32[1], index: 7, kind: input, shape index: {}]   ;;  %s767_s8 = inlined_call_operand.vmem [shape: f32[2,16,32], index: 8, kind: output, shape index: {}]  }
   0x1   :  { %13 = sst [smem:[#allocation2]] %s766_s7 }
   0x2 LB: > { %s560_s30 = sadd.s32 4294967295, %s614_s29   ;;  %p564_p0 = scmp.ge.s32.totalorder %s614_s29, 1  ;;  %s614_s29 = sphi %s664_s29, %s19_s29  }
   0x3   : > { %p263_p1 = scmp.lt.s32.totalorder %s614_s29, 3 }
   0x5   : > { %p264_p2 = pnand %p564_p0, %p263_p1 }
   0x6   : > { %p297_p3 = scmp.lt.s32.totalorder (!%p264_p2), %s560_s30, 1  ;;  %s497_s22 = sld [smem:[#allocation2]] (!%p264_p2) }
   0x7   : > { %267 = sbr.rel (%p264_p2) target bundleno = 696 (0x2b8), region = 52 }
   0xc   : > { %v312_v0 = vld [vmem:[%s760_s1 + $0x18] sm:$0xff]  ;;  %v311_v1 = vld [vmem:[%s760_s1 + $0x10] sm:$0xff]  ;;  %v310_v2 = vld [vmem:[%s760_s1 + $0x8] sm:$0xff]  ;;  %s769_s30 = smov (!%p297_p3, %s560_s30), 1  ;;  %vm317_vm0 = vcmask 261120   ;;  %vm409_vm1 = vcmask 31744   ;;  %v498_v49 = vstv %s497_s22 }
   0xd   : > { %585 = vmatpush.msra.mxu1 %v312_v0  ;;  %336 = vmatpush.msra.mxu0 %v312_v0  ;;  %v309_v3 = vld [vmem:[%s760_s1] sm:$0xff]  ;;  %s583_s16 = sshll.u32 %s769_s30, 4  ;;  %v350_v5 = vld [vmem:[%s762_s3 + $0x18] sm:$0xff]  ;;  %v349_v7 = vld [vmem:[%s762_s3 + $0x10] sm:$0xff]  ;;  %vm445_vm2 = vcmask 130048  }
   0xe   : > { %s301_s19 = scalar_lea.vmem %s759_s0, %s583_s16  ;;  %v348_v8 = vld [vmem:[%s762_s3 + $0x8] sm:$0xff]  ;;  %v347_v9 = vld [vmem:[%s762_s3] sm:$0xff]  ;;  %v381_v20 = vld [vmem:[%s764_s5 + $0x18] sm:$0xff]  ;;  %s306_s25 = scalar_lea.vmem %s767_s8, %s583_s16 }
   0xf   : > { %586 = vmatpush.msra.mxu1 %v311_v1  ;;  %337 = vmatpush.msra.mxu0 %v311_v1  ;;  %v692_v4 = vld [vmem:[%s301_s19 + $0x8] sm:$0xff]  ;;  %v697_v6 = vld [vmem:[%s301_s19] sm:$0xff]  ;;  %v380_v21 = vld [vmem:[%s764_s5 + $0x10] sm:$0xff] }
  0x10   : > { %v598_v12 = vld [vmem:[%s763_s4] ss:$0 sm:$0xff]  ;;  %398 = vmatpush.msra.mxu2 %v381_v20  ;;  %v379_v22 = vld [vmem:[%s764_s5 + $0x8] sm:$0xff] }
  0x11   : > { %587 = vmatpush.msra.mxu1 %v310_v2  ;;  %338 = vmatpush.msra.mxu0 %v310_v2  ;;  %v597_v16 = vld [vmem:[%s761_s2] ss:$0 sm:$0xff] }
  0x12   : > { %399 = vmatpush.msra.mxu2 %v380_v21  ;;  %v378_v23 = vld [vmem:[%s764_s5] sm:$0xff] }
  0x13   : > { %588 = vmatpush.msra.mxu1 %v309_v3  ;;  %339 = vmatpush.msra.mxu0 %v309_v3  ;;  %v599_v32 = vld [vmem:[%s765_s6] ss:$0 sm:$0xff] }
  0x14   : > { %570 = vmatmul.msk.f32.vlgmr.msra.gmra.mxu1 %vm317_vm0, %v692_v4  ;;  %569 = vmatmul.msk.f32.vlgmr.msra.gmra.mxu0 %vm317_vm0, %v697_v6 }
  0x15   : > { %367 = vmatpush.msrb.mxu1 %v350_v5  ;;  %400 = vmatpush.msra.mxu2 %v379_v22 }
  0x17   : > { %368 = vmatpush.msrb.mxu1 %v349_v7  ;;  %401 = vmatpush.msra.mxu2 %v378_v23 }
  0x18   : > { %573 = vmatmul.msk.f32.vlgmr.msra.gmra.mxu2 %vm317_vm0, %v697_v6 }
  0x19   : > { %369 = vmatpush.msrb.mxu1 %v348_v8 }
  0x1b   : > { %370 = vmatpush.msrb.mxu1 %v347_v9 }
  0x1c   : > { %571 = vmatmul.msk.f32.vlgmr.msrb.gmra.mxu1 %vm317_vm0, %v697_v6 }
  0x20   : > { %574 = vmatmul.msk.f32.gmra.mxu2 %vm317_vm0, %v692_v4 }
  0x24   : > { %572 = vmatmul.msk.f32.gmra.mxu1 %vm317_vm0, %v692_v4 }
  0x91   : > { %v344_v10 = vpop.f32.mrf.mxu1  ;;  %v341_v15 = vpop.f32.mrf.mxu0 }
  0x92   : > { %v342_v18 = vadd.f32 %v597_v16, %v341_v15  ;;  %v345_v19 = vadd.f32 %v597_v16, %v344_v10 }
  0x99   : > { %v372_v11 = vpop.f32.mrf.mxu1 }
  0x9a   : > { %v373_v17 = vadd.f32 %v598_v12, %v372_v11 }
  0x9b   : > { %v403_v29 = vpop.f32.mrf.mxu2 }
  0x9c   : > { %v404_v36 = vadd.f32 %v599_v32, %v403_v29 }
  0xa1   : > { %v375_v13 = vpop.f32.mrf.mxu1 }
  0xa2   : > { %v376_v14 = vadd.f32 %v598_v12, %v375_v13 }
  0xa3   : > { %v406_v34 = vpop.f32.mrf.mxu2 }
  0xa4   : > { %575 = vmatpush.xpose.msk.msra.mxu3 %vm409_vm1, %v376_v14  ;;  %v407_v37 = vadd.f32 %v599_v32, %v406_v34 }
  0xa6   : > { %488 = vmatpush.msrb.mxu0 %v407_v37 }
  0xa8   : > { %576 = vmatpush.xpose.msk.msra.mxu3 %vm409_vm1, %v373_v17  ;;  %489 = vmatpush.msrb.mxu0 %v404_v36 }
  0xab   : > { %577 = vmatmul.msk.f32.vlgmr.msra.gmra.mxu3 %vm409_vm1, %v342_v18 }
  0xb3   : > { %578 = vmatmul.msk.f32.gmra.mxu3 %vm409_vm1, %v345_v19 }
 0x12e   : > { %v439_v24 = vpop.f32.mrf.mxu3 }
 0x12f   : > { %v446_v25 = vsel %vm445_vm2, %v439_v24, -inf }
 0x130   : > { %447 = vmax.xlane.f32.xlu0 %v446_v25 }
 0x136   : > { %v442_v26 = vpop.f32.mrf.mxu3 }
 0x137   : > { %v449_v27 = vsel %vm445_vm2, %v442_v26, -inf }
 0x138   : > { %450 = vmax.xlane.f32.xlu0 %v449_v27 }
 0x1a3   : > { %v448_v28 = vpop.xlane.xlu0 %447 }
 0x1a4   : > { %v452_v30 = vsub.f32 %v439_v24, %v448_v28 }
 0x1a6   : > { %v454_v31 = vmul.f32 1.442695, %v452_v30 }
 0x1a8   : > { %600 = vpow2.f32 %v454_v31 }
 0x1ab   : > { %v451_v33 = vpop.xlane.xlu0 %450 }
 0x1ac   : > { %v453_v35 = vsub.f32 %v442_v26, %v451_v33 }
 0x1ae   : > { %v601_v38 = vpop.eup %600  ;;  %v456_v39 = vmul.f32 1.442695, %v453_v35 }
 0x1af   : > { %v458_v40 = vsel %vm445_vm2, %v601_v38, 0.0 }
 0x1b0   : > { %602 = vpow2.f32 %v456_v39  ;;  %459 = vadd.xlane.f32.xlu1 %v458_v40 }
 0x1b6   : > { %v603_v41 = vpop.eup %602 }
 0x1b7   : > { %v461_v42 = vsel %vm445_vm2, %v603_v41, 0.0 }
 0x1b8   : > { %462 = vadd.xlane.f32.xlu1 %v461_v42 }
 0x223   : > { %v460_v43 = vpop.xlane.xlu1 %459 }
 0x224   : > { %604 = vrcp.f32 %v460_v43 }
 0x22a   : > { %v605_v44 = vpop.eup %604 }
 0x22b   : > { %v463_v45 = vpop.xlane.xlu1 %462  ;;  %v466_v46 = vmul.f32 %v605_v44, %v601_v38 }
 0x22c   : > { %606 = vrcp.f32 %v463_v45 }
 0x22d   : > { %579 = vmatmul.msk.f32.vlgmr.msrb.gmra.mxu0 %vm445_vm2, %v466_v46 }
 0x232   : > { %v607_v47 = vpop.eup %606 }
 0x233   : > { %v467_v48 = vmul.f32 %v607_v47, %v603_v41 }
 0x235   : > { %580 = vmatmul.msk.f32.gmra.mxu0 %vm445_vm2, %v467_v48 }
 0x2aa   : > { %v491_v50 = vpop.f32.mrf.mxu0 }
 0x2ab   : > { %v499_v51 = vmul.f32 %v498_v49, %v491_v50 }
 0x2ad   : > { %v501_v52 = vadd.f32 %v499_v51, %v697_v6 }
 0x2af   : > { %503 = vst.msk [vmem:[%s306_s25] sm:$0xff] %vm317_vm0, %v501_v52 }
 0x2b2   : > { %v494_v53 = vpop.f32.mrf.mxu0 }
 0x2b3   : > { %v500_v54 = vmul.f32 %v498_v49, %v494_v53 }
 0x2b5   : > { %v502_v55 = vadd.f32 %v500_v54, %v692_v4 }
 0x2b7   : > { %504 = vst.msk [vmem:[%s306_s25 + $0x8] sm:$0xff] %vm317_vm0, %v502_v55 }
 0x2b8 PF: > { %s19_s29 = sadd.s32 1, %s614_s29  }
 0x2b9   : > { %p16_p4 = scmp.ge.s32.totalorder %s19_s29, 4  }
 0x2bb   :  { %18 = sbr.rel (!%p16_p4) target bundleno = 2 (0x2), region = 82 }

// kernel: unet_forward.35
= control target key start
LH: loop header
LB: loop body
LE: loop exit
PB: predicated region body
PF: predicated region fallthrough
CT: control target
= control target key end

     0   :  { %s69_s0 = inlined_call_operand.vmem [shape: f32[8,128], index: 0, kind: input, shape index: {}]   ;;  %s70_s1 = inlined_call_operand.vmem [shape: f32[8,128], index: 1, kind: output, shape index: {0}]   ;;  %s71_s2 = inlined_call_operand.vmem [shape: f32[8,128], index: 2, kind: output, shape index: {1}]  }
   0x1   :  { %v16_v0 = vld [vmem:[%s69_s0] sm:$0xff] }
   0x2   :  { %v18_v1 = vrot.slane %v16_v0, 4  ;;  %v27_v2 = vmul.f32 %v16_v0, %v16_v0 }
   0x4   :  { %v19_v3 = vadd.f32 %v18_v1, %v16_v0  ;;  %v28_v4 = vrot.slane %v27_v2, 4 }
   0x6   :  { %v20_v5 = vrot.slane %v19_v3, 2  ;;  %v29_v6 = vadd.f32 %v28_v4, %v27_v2 }
   0x8   :  { %v21_v7 = vadd.f32 %v20_v5, %v19_v3  ;;  %v30_v8 = vrot.slane %v29_v6, 2 }
   0xa   :  { %v22_v9 = vrot.slane %v21_v7, 1  ;;  %v31_v10 = vadd.f32 %v30_v8, %v29_v6 }
   0xc   :  { %v23_v11 = vadd.f32 %v22_v9, %v21_v7  ;;  %v32_v12 = vrot.slane %v31_v10, 1 }
   0xe   :  { %v33_v13 = vadd.f32 %v32_v12, %v31_v10  ;;  %25 = vst [vmem:[%s70_s1] sm:$0xff] %v23_v11 }
  0x10   :  { %35 = vst [vmem:[%s71_s2] sm:$0xff] %v33_v13 }

// kernel: unet_forward.36
= control target key start
LH: loop header
LB: loop body
LE: loop exit
PB: predicated region body
PF: predicated region fallthrough
CT: control target
= control target key end

     0   :  { %s64_s0 = inlined_call_operand.vmem [shape: f32[8,128], index: 0, kind: input, shape index: {}]   ;;  %s65_s1 = inlined_call_operand.vmem [shape: f32[1,128], index: 1, kind: input, shape index: {}]   ;;  %s66_s2 = inlined_call_operand.vmem [shape: f32[1,128], index: 2, kind: input, shape index: {}]   ;;  %s67_s3 = inlined_call_operand.vmem [shape: f32[8,128], index: 3, kind: output, shape index: {}]  }
   0x1   :  { %v14_v0 = vld [vmem:[%s64_s0] sm:$0xff] }
   0x2   :  { %v30_v1 = vld [vmem:[%s65_s1] ss:$0 sm:$0xff] }
   0x3   :  { %v31_v2 = vld [vmem:[%s66_s2] ss:$0 sm:$0xff]  ;;  %v19_v3 = vmul.f32 %v30_v1, %v14_v0 }
   0x5   :  { %v24_v4 = vadd.f32 %v31_v2, %v19_v3 }
   0x7   :  { %25 = vst [vmem:[%s67_s3] sm:$0xff] %v24_v4 }

// kernel: unet_forward.34
= control target key start
LH: loop header
LB: loop body
LE: loop exit
PB: predicated region body
PF: predicated region fallthrough
CT: control target
= control target key end

     0   :  { %s766_s1 = inlined_call_operand.vmem [shape: bf16[512,128], index: 1, kind: input, shape index: {}]   ;;  %s767_s0 = inlined_call_operand.vmem [shape: bf16[16,512], index: 0, kind: input, shape index: {}]   ;;  %s768_s2 = inlined_call_operand.vmem [shape: f32[1,128], index: 2, kind: input, shape index: {}]   ;;  %s769_s3 = inlined_call_operand.vmem [shape: f32[16,128], index: 3, kind: output, shape index: {}]  }
   0x1   :  { %v550_v0 = vld [vmem:[%s766_s1 + $0x38] sm:$0xff]  ;;  %v549_v4 = vld [vmem:[%s766_s1 + $0x30] sm:$0xff]  ;;  %v548_v8 = vld [vmem:[%s766_s1 + $0x28] sm:$0xff] }
   0x2   :  { %v558_v1 = vld [vmem:[%s766_s1 + $0x78] sm:$0xff]  ;;  %338 = vmatpush.bf16.msra.mxu0 %v550_v0  ;;  %v557_v5 = vld [vmem:[%s766_s1 + $0x70] sm:$0xff]  ;;  %v556_v9 = vld [vmem:[%s766_s1 + $0x68] sm:$0xff] }
   0x3   :  { %v566_v2 = vld [vmem:[%s766_s1 + $0xb8] sm:$0xff]  ;;  %352 = vmatpush.bf16.msra.mxu1 %v558_v1  ;;  %v565_v6 = vld [vmem:[%s766_s1 + $0xb0] sm:$0xff]  ;;  %v564_v10 = vld [vmem:[%s766_s1 + $0xa8] sm:$0xff] }
   0x4   :  { %v574_v3 = vld [vmem:[%s766_s1 + $0xf8] sm:$0xff]  ;;  %366 = vmatpush.bf16.msra.mxu2 %v566_v2  ;;  %v573_v7 = vld [vmem:[%s766_s1 + $0xf0] sm:$0xff]  ;;  %v572_v11 = vld [vmem:[%s766_s1 + $0xe8] sm:$0xff] }
   0x5   :  { %380 = vmatpush.bf16.msra.mxu3 %v574_v3  ;;  %v547_v12 = vld [vmem:[%s766_s1 + $0x20] sm:$0xff]  ;;  %v22_v17 = vld [vmem:[%s767_s0 + $0x10] sm:$0xff]  ;;  %v21_v20 = vld [vmem:[%s767_s0 + $0x8] sm:$0xff] }
   0x6   :  { %339 = vmatpush.bf16.msra.mxu0 %v549_v4  ;;  %v555_v13 = vld [vmem:[%s766_s1 + $0x60] sm:$0xff]  ;;  %v28_v21 = vunpack.c.l.bf16 %v22_v17  ;;  %v29_v22 = vunpack.c.h.bf16 %v22_v17  ;;  %v23_v23 = vld [vmem:[%s767_s0 + $0x18] sm:$0xff]  ;;  %v26_v24 = vunpack.c.l.bf16 %v21_v20  ;;  %v27_v25 = vunpack.c.h.bf16 %v21_v20  ;;  %v545_v47 = vld [vmem:[%s766_s1 + $0x10] sm:$0xff] }
   0x7   :  { %353 = vmatpush.bf16.msra.mxu1 %v557_v5  ;;  %v563_v14 = vld [vmem:[%s766_s1 + $0xa0] sm:$0xff]  ;;  %v546_v28 = vld [vmem:[%s766_s1 + $0x18] sm:$0xff]  ;;  %v30_v38 = vunpack.c.l.bf16 %v23_v23  ;;  %v31_v39 = vunpack.c.h.bf16 %v23_v23  ;;  %v553_v48 = vld [vmem:[%s766_s1 + $0x50] sm:$0xff] }
   0x8   :  { %367 = vmatpush.bf16.msra.mxu2 %v565_v6  ;;  %v20_v15 = vld [vmem:[%s767_s0] sm:$0xff]  ;;  %v554_v29 = vld [vmem:[%s766_s1 + $0x58] sm:$0xff]  ;;  %v44_v32 = vmul.f32 0.20019531, %v28_v21  ;;  %v45_v33 = vmul.f32 0.20019531, %v29_v22  ;;  %vm676_vm2 = vcmp.ge.f32.partialorder %v28_v21, 0.0  ;;  %vm680_vm3 = vcmp.ge.f32.partialorder %v29_v22, 0.0 }
   0x9   :  { %381 = vmatpush.bf16.msra.mxu3 %v573_v7  ;;  %v571_v16 = vld [vmem:[%s766_s1 + $0xe0] sm:$0xff]  ;;  %v24_v18 = vunpack.c.l.bf16 %v20_v15  ;;  %v25_v19 = vunpack.c.h.bf16 %v20_v15  ;;  %v562_v34 = vld [vmem:[%s766_s1 + $0x98] sm:$0xff]  ;;  %vm684_vm4 = vcmp.ge.f32.partialorder %v26_v24, 0.0  ;;  %vm688_vm5 = vcmp.ge.f32.partialorder %v27_v25, 0.0  ;;  %vm54_vm9 = vmpackc.low %vm680_vm3, %vm676_vm2 }
   0xa   :  { %340 = vmatpush.bf16.msra.mxu0 %v548_v8  ;;  %v570_v35 = vld [vmem:[%s766_s1 + $0xd8] sm:$0xff]  ;;  %v42_v42 = vmul.f32 0.20019531, %v26_v24  ;;  %v43_v43 = vmul.f32 0.20019531, %v27_v25  ;;  %vm696_vm7 = vcmp.ge.f32.partialorder %v30_v38, 0.0  ;;  %vm700_vm8 = vcmp.ge.f32.partialorder %v31_v39, 0.0  ;;  %v561_v52 = vld [vmem:[%s766_s1 + $0x90] sm:$0xff]  ;;  %vm53_vm10 = vmpackc.low %vm688_vm5, %vm684_vm4 }
   0xb   :  { %354 = vmatpush.bf16.msra.mxu1 %v556_v9  ;;  %vm656_vm0 = vcmp.ge.f32.partialorder %v24_v18, 0.0  ;;  %vm660_vm1 = vcmp.ge.f32.partialorder %v25_v19, 0.0  ;;  %v40_v30 = vmul.f32 0.20019531, %v24_v18  ;;  %v41_v31 = vmul.f32 0.20019531, %v25_v19  ;;  %v569_v53 = vld [vmem:[%s766_s1 + $0xd0] sm:$0xff]  ;;  %vm55_vm11 = vmpackc.low %vm700_vm8, %vm696_vm7  ;;  %v544_v56 = vld [vmem:[%s766_s1 + $0x8] sm:$0xff] }
   0xc   :  { %368 = vmatpush.bf16.msra.mxu2 %v564_v10  ;;  %vm52_vm6 = vmpackc.low %vm660_vm1, %vm656_vm0  ;;  %v46_v46 = vmul.f32 0.20019531, %v30_v38  ;;  %v50_v50 = vpack.c.bf16 %v45_v33, %v44_v32  ;;  %v47_v51 = vmul.f32 0.20019531, %v31_v39  ;;  %v49_v54 = vpack.c.bf16 %v43_v43, %v42_v42  ;;  %v552_v57 = vld [vmem:[%s766_s1 + $0x48] sm:$0xff]  ;;  %v543_v4 = vld [vmem:[%s766_s1] sm:$0xff] }
   0xd   :  { %382 = vmatpush.bf16.msra.mxu3 %v572_v11  ;;  %v48_v49 = vpack.c.bf16 %v41_v31, %v40_v30  ;;  %v560_v60 = vld [vmem:[%s766_s1 + $0x88] sm:$0xff]  ;;  %v551_v5 = vld [vmem:[%s766_s1 + $0x40] sm:$0xff] }
   0xe   :  { %341 = vmatpush.bf16.msra.mxu0 %v547_v12  ;;  %v51_v55 = vpack.c.bf16 %v47_v51, %v46_v46  ;;  %v58_v59 = vsel %vm54_vm9, %v22_v17, %v50_v50  ;;  %v568_v61 = vld [vmem:[%s766_s1 + $0xc8] sm:$0xff]  ;;  %v57_v62 = vsel %vm53_vm10, %v21_v20, %v49_v54  ;;  %v559_v10 = vld [vmem:[%s766_s1 + $0x80] sm:$0xff] }
   0xf   :  { %355 = vmatpush.bf16.msra.mxu1 %v555_v13  ;;  %v56_v58 = vsel %vm52_vm6, %v20_v15, %v48_v49  ;;  %v134_v1 = vunpack.c.l.b16 %v58_v59  ;;  %v135_v3 = vunpack.c.h.b16 %v58_v59  ;;  %v132_v6 = vunpack.c.l.b16 %v57_v62  ;;  %v567_v11 = vld [vmem:[%s766_s1 + $0xc0] sm:$0xff] }
  0x10   :  { %369 = vmatpush.bf16.msra.mxu2 %v563_v14  ;;  %v59_v63 = vsel %vm55_vm11, %v23_v23, %v51_v55  ;;  %v130_v0 = vunpack.c.l.b16 %v56_v58  ;;  %v131_v2 = vunpack.c.h.b16 %v56_v58  ;;  %v133_v8 = vunpack.c.h.b16 %v57_v62  ;;  %v575_v22 = vld [vmem:[%s768_s2] ss:$0 sm:$0xff] }
  0x11   :  { %383 = vmatpush.bf16.msra.mxu3 %v571_v16  ;;  %v136_v7 = vunpack.c.l.b16 %v59_v63  ;;  %v137_v9 = vunpack.c.h.b16 %v59_v63 }
  0x12   :  { %342 = vmatpush.bf16.msra.mxu0 %v546_v28  ;;  %v138_v12 = vpack.c.b16 %v134_v1, %v130_v0  ;;  %v139_v13 = vpack.c.b16 %v135_v3, %v131_v2 }
  0x13   :  { %356 = vmatpush.bf16.msra.mxu1 %v554_v29  ;;  %v140_v14 = vpack.c.b16 %v136_v7, %v132_v6  ;;  %v141_v15 = vpack.c.b16 %v137_v9, %v133_v8 }
  0x14   :  { %370 = vmatpush.bf16.msra.mxu2 %v562_v34 }
  0x15   :  { %384 = vmatpush.bf16.msra.mxu3 %v570_v35 }
  0x16   :  { %343 = vmatpush.bf16.msra.mxu0 %v545_v47 }
  0x17   :  { %357 = vmatpush.bf16.msra.mxu1 %v553_v48 }
  0x18   :  { %371 = vmatpush.bf16.msra.mxu2 %v561_v52 }
  0x19   :  { %385 = vmatpush.bf16.msra.mxu3 %v569_v53 }
  0x1a   :  { %344 = vmatpush.bf16.msra.mxu0 %v544_v56 }
  0x1b   :  { %358 = vmatpush.bf16.msra.mxu1 %v552_v57 }
  0x1c   :  { %372 = vmatpush.bf16.msra.mxu2 %v560_v60 }
  0x1d   :  { %386 = vmatpush.bf16.msra.mxu3 %v568_v61 }
  0x1e   :  { %345 = vmatpush.bf16.msra.mxu0 %v543_v4 }
  0x1f   :  { %359 = vmatpush.bf16.msra.mxu1 %v551_v5 }
  0x20   :  { %373 = vmatpush.bf16.msra.mxu2 %v559_v10 }
  0x21   :  { %387 = vmatpush.bf16.msra.mxu3 %v567_v11  ;;  %346 = vmatmul.bf16.vlgmr.msra.gmra.mxu0 %v138_v12 }
  0x22   :  { %360 = vmatmul.bf16.vlgmr.msra.gmra.mxu1 %v139_v13 }
  0x23   :  { %374 = vmatmul.bf16.vlgmr.msra.gmra.mxu2 %v140_v14 }
  0x24   :  { %388 = vmatmul.bf16.vlgmr.msra.gmra.mxu3 %v141_v15 }
  0x9e   :  { %v347_v16 = vpop.f32.mrf.mxu0 }
  0x9f   :  { %v361_v17 = vpop.f32.mrf.mxu1 }
  0xa0   :  { %v362_v18 = vadd.f32 %v361_v17, %v347_v16 }
  0xa6   :  { %v375_v19 = vpop.f32.mrf.mxu2  ;;  %v349_v24 = vpop.f32.mrf.mxu0 }
  0xa7   :  { %v389_v20 = vpop.f32.mrf.mxu3  ;;  %v376_v21 = vadd.f32 %v375_v19, %v362_v18  ;;  %v363_v25 = vpop.f32.mrf.mxu1 }
  0xa8   :  { %v364_v27 = vadd.f32 %v363_v25, %v349_v24 }
  0xa9   :  { %v390_v23 = vadd.f32 %v389_v20, %v376_v21 }
  0xab   :  { %v407_v26 = vadd.f32 %v575_v22, %v390_v23 }
  0xad   :  { %409 = vst [vmem:[%s769_s3] sm:$0xff] %v407_v26 }
  0xae   :  { %v377_v28 = vpop.f32.mrf.mxu2 }
  0xaf   :  { %v378_v29 = vadd.f32 %v377_v28, %v364_v27  ;;  %v391_v30 = vpop.f32.mrf.mxu3 }
  0xb1   :  { %v392_v31 = vadd.f32 %v391_v30, %v378_v29 }
  0xb3   :  { %v408_v32 = vadd.f32 %v575_v22, %v392_v31 }
  0xb5   :  { %410 = vst [vmem:[%s769_s3 + $0x8] sm:$0xff] %v408_v32 }

// kernel: unet_forward.37
= control target key start
LH: loop header
LB: loop body
LE: loop exit
PB: predicated region body
PF: predicated region fallthrough
CT: control target
= control target key end

     0   :  { %s1069_s12 = smov 0   ;;  %s1071_s13 = smov 0   ;;  %s1238_s0 = inlined_call_operand.vmem [shape: bf16[16,1024], index: 0, kind: input, shape index: {}]   ;;  %s1239_s1 = inlined_call_operand.vmem [shape: bf16[1024,128], index: 1, kind: input, shape index: {}]   ;;  %s1240_s2 = inlined_call_operand.vmem [shape: f32[1,128], index: 2, kind: input, shape index: {}]   ;;  %s1241_s3 = inlined_call_operand.vmem [shape: f32[16,128], index: 3, kind: output, shape index: {}]  }
   0x1   :  { %s1073_s14 = smov 0   ;;  %s1075_s15 = smov 0  }
   0x2   :  { %s1077_s16 = smov 0  }
   0x3 LB: > { %s25_s17 = sadd.s32 1, %s1042_s15  ;;  %p48_p1 = scmp.ne.s32.totalorder %s1034_s13, %s1030_s12  ;;  %s1046_s16 = sphi %s1077_s16, %s13_s16   ;;  %s1042_s15 = sphi %s1075_s15, %s1261_s15   ;;  %s1038_s14 = sphi %s1073_s14, %s1260_s14   ;;  %s1034_s13 = sphi %s1071_s13, %s1259_s13   ;;  %s1030_s12 = sphi %s1069_s12, %s1258_s12  }
   0x4   : > { %p26_p0 = scmp.ge.s32.totalorder %s25_s17, 2  ;;  %p49_p2 = scmp.eq.s32.totalorder %s1046_s16, 0 }
   0x5   : > { %s41_s19 = sadd.s32 1, %s1034_s13  ;;  %p791_p5 = scmp.ge.s32.totalorder %s1046_s16, 2 }
   0x6   : > { %s1263_s17 = smov (%p26_p0, %s25_s17), 0  ;;  %p50_p3 = por %p49_p2, %p48_p1 }
   0x7   : > { %s37_s18 = ssub.s32 %s1042_s15, %s1263_s17  ;;  %162 = sbr.rel (%p791_p5) target bundleno = 20 (0x14), region = 20 }
   0x8   : > { %p39_p4 = scmp.eq.s32.totalorder %s37_s18, 0 }
   0xa   : > { %s1104_s20 = scalar_select %p39_p4, %s1034_s13, %s41_s19  }
   0xc   : > { %165 = sbr.rel (!%p50_p3) target bundleno = 20 (0x14), region = 24  ;;  %s167_s21 = sand.u32 (%p50_p3), 1, %s1034_s13  }
   0xd   : > { %s933_s22 = sshll.u32 (%p50_p3), %s1042_s15, 4  ;;  %s792_s23 = sshll.u32 (%p50_p3), %s167_s21, 5 }
   0xe   : > { %s175_s26 = scalar_lea.vmem (%p50_p3), %s1238_s0, %s933_s22  ;;  %s169_s27 = scalar_lea.vmem (%p50_p3), [#allocation3], %s792_s23 }
   0xf   : > { %v188_v0 = vld [vmem:[%s175_s26] sm:$0xff] (%p50_p3)  ;;  %v190_v1 = vld [vmem:[%s175_s26 + $0x8] sm:$0xff] (%p50_p3) }
  0x10   : > { %v192_v2 = vld [vmem:[%s175_s26 + $0x20] sm:$0xff] (%p50_p3)  ;;  %189 = vst [vmem:[%s169_s27] sm:$0xff] (%p50_p3), %v188_v0  ;;  %v194_v3 = vld [vmem:[%s175_s26 + $0x28] sm:$0xff] (%p50_p3) }
  0x11   : > { %191 = vst [vmem:[%s169_s27 + $0x8] sm:$0xff] %v190_v1 }
  0x12   : > { %193 = vst [vmem:[%s169_s27 + $0x10] sm:$0xff] %v192_v2 }
  0x13   : > { %195 = vst [vmem:[%s169_s27 + $0x18] sm:$0xff] %v194_v3 }
  0x14 PF: > { %p795_p6 = scmp.ge.s32.totalorder %s1046_s16, 1  ;;  %p212_p7 = scmp.lt.s32.totalorder %s1046_s16, 3 }
  0x16   : > { %p213_p8 = pnand %p795_p6, %p212_p7 }
  0x17   : > { %s219_s28 = sand.u32 (!%p213_p8), 1, %s1030_s12   ;;  %s797_s29 = sshll.u32 (!%p213_p8), %s1038_s14, 6 }
  0x18   : > { %216 = sbr.rel (%p213_p8) target bundleno = 228 (0xe4), region = 51  ;;  %s796_s30 = sshll.u32 (!%p213_p8), %s219_s28, 5 }
  0x19   : > { %p259_p9 = scmp.lt.s32.totalorder (!%p213_p8), %s797_s29, 127  ;;  %s1121_s8 = scalar_lea.vmem (!%p213_p8), [#allocation3], %s796_s30 }
  0x1a   : > { %p799_p10 = scmp.ne.s32.totalorder (!%p213_p8), %s1038_s14, 0 }
  0x1d   : > { %s1265_s29 = smov (!%p259_p9, %s797_s29), 127  ;;  %282 = sbr.rel (%p799_p10) target bundleno = 37 (0x25), region = 59 }
  0x1e   : > { %s798_s4 = sshll.u32 %s1265_s29, 2 }
  0x1f   : > { %s1119_s7 = scalar_lea.vmem %s1239_s1, %s798_s4 }
  0x22   : > { %v1048_v4 = vmov 0.0  }
  0x23   : > { %283 = vst [vmem:[#allocation2] sm:$0xff] %v1048_v4 }
  0x24   : > { %284 = vst [vmem:[#allocation2 + $0x8] sm:$0xff] %v1048_v4 }
  0x25 PF: > { %v941_v5 = vld [vmem:[%s1119_s7 + $0x38] sm:$0xff]  ;;  %v940_v9 = vld [vmem:[%s1119_s7 + $0x30] sm:$0xff]  ;;  %v939_v13 = vld [vmem:[%s1119_s7 + $0x28] sm:$0xff]  ;;  %p928_p11 = scmp.ne.s32.totalorder %s1038_s14, 1 }
  0x26   : > { %v949_v6 = vld [vmem:[%s1119_s7 + $0x78] sm:$0xff]  ;;  %603 = vmatpush.bf16.msra.mxu0 %v941_v5  ;;  %v948_v10 = vld [vmem:[%s1119_s7 + $0x70] sm:$0xff]  ;;  %v947_v14 = vld [vmem:[%s1119_s7 + $0x68] sm:$0xff] }
  0x27   : > { %v957_v7 = vld [vmem:[%s1119_s7 + $0xb8] sm:$0xff]  ;;  %617 = vmatpush.bf16.msra.mxu1 %v949_v6  ;;  %v956_v11 = vld [vmem:[%s1119_s7 + $0xb0] sm:$0xff]  ;;  %v955_v15 = vld [vmem:[%s1119_s7 + $0xa8] sm:$0xff] }
  0x28   : > { %v965_v8 = vld [vmem:[%s1119_s7 + $0xf8] sm:$0xff]  ;;  %631 = vmatpush.bf16.msra.mxu2 %v957_v7  ;;  %v964_v12 = vld [vmem:[%s1119_s7 + $0xf0] sm:$0xff]  ;;  %v963_v16 = vld [vmem:[%s1119_s7 + $0xe8] sm:$0xff] }
  0x29   : > { %645 = vmatpush.bf16.msra.mxu3 %v965_v8  ;;  %v938_v17 = vld [vmem:[%s1119_s7 + $0x20] sm:$0xff]  ;;  %v285_v20 = vld [vmem:[%s1121_s8] sm:$0xff]  ;;  %v286_v25 = vld [vmem:[%s1121_s8 + $0x8] sm:$0xff] }
  0x2a   : > { %604 = vmatpush.bf16.msra.mxu0 %v940_v9  ;;  %v946_v18 = vld [vmem:[%s1119_s7 + $0x60] sm:$0xff]  ;;  %v289_v23 = vunpack.c.l.bf16 %v285_v20  ;;  %v290_v24 = vunpack.c.h.bf16 %v285_v20  ;;  %v288_v28 = vld [vmem:[%s1121_s8 + $0x18] sm:$0xff]  ;;  %v291_v29 = vunpack.c.l.bf16 %v286_v25  ;;  %v292_v30 = vunpack.c.h.bf16 %v286_v25  ;;  %v937_v33 = vld [vmem:[%s1119_s7 + $0x18] sm:$0xff] }
  0x2b   : > { %618 = vmatpush.bf16.msra.mxu1 %v948_v10  ;;  %v954_v19 = vld [vmem:[%s1119_s7 + $0xa0] sm:$0xff]  ;;  %v945_v34 = vld [vmem:[%s1119_s7 + $0x58] sm:$0xff]  ;;  %v295_v43 = vunpack.c.l.bf16 %v288_v28  ;;  %v296_v44 = vunpack.c.h.bf16 %v288_v28  ;;  %v936_v52 = vld [vmem:[%s1119_s7 + $0x10] sm:$0xff] }
  0x2c   : > { %632 = vmatpush.bf16.msra.mxu2 %v956_v11  ;;  %v962_v21 = vld [vmem:[%s1119_s7 + $0xe0] sm:$0xff]  ;;  %vm1144_vm0 = vcmp.ge.f32.partialorder %v289_v23, 0.0  ;;  %vm1148_vm1 = vcmp.ge.f32.partialorder %v290_v24, 0.0  ;;  %v305_v35 = vmul.f32 0.20019531, %v289_v23  ;;  %v306_v36 = vmul.f32 0.20019531, %v290_v24  ;;  %v953_v39 = vld [vmem:[%s1119_s7 + $0x98] sm:$0xff] }
  0x2d   : > { %646 = vmatpush.bf16.msra.mxu3 %v964_v12  ;;  %v287_v22 = vld [vmem:[%s1121_s8 + $0x10] sm:$0xff]  ;;  %v961_v40 = vld [vmem:[%s1119_s7 + $0xd8] sm:$0xff]  ;;  %vm1164_vm4 = vcmp.ge.f32.partialorder %v291_v29, 0.0  ;;  %vm1168_vm5 = vcmp.ge.f32.partialorder %v292_v30, 0.0  ;;  %v307_v47 = vmul.f32 0.20019531, %v291_v29  ;;  %v308_v48 = vmul.f32 0.20019531, %v292_v30  ;;  %vm317_vm6 = vmpackc.low %vm1148_vm1, %vm1144_vm0 }
  0x2e   : > { %605 = vmatpush.bf16.msra.mxu0 %v939_v13  ;;  %v293_v26 = vunpack.c.l.bf16 %v287_v22  ;;  %v294_v27 = vunpack.c.h.bf16 %v287_v22  ;;  %vm1176_vm7 = vcmp.ge.f32.partialorder %v295_v43, 0.0  ;;  %vm1180_vm8 = vcmp.ge.f32.partialorder %v296_v44, 0.0  ;;  %v944_v53 = vld [vmem:[%s1119_s7 + $0x50] sm:$0xff]  ;;  %vm318_vm10 = vmpackc.low %vm1168_vm5, %vm1164_vm4  ;;  %v935_v61 = vld [vmem:[%s1119_s7 + $0x8] sm:$0xff] }
  0x2f   : > { %619 = vmatpush.bf16.msra.mxu1 %v947_v14  ;;  %v311_v51 = vmul.f32 0.20019531, %v295_v43  ;;  %v313_v54 = vpack.c.bf16 %v306_v36, %v305_v35  ;;  %v312_v56 = vmul.f32 0.20019531, %v296_v44  ;;  %v952_v57 = vld [vmem:[%s1119_s7 + $0x90] sm:$0xff]  ;;  %v314_v59 = vpack.c.bf16 %v308_v48, %v307_v47  ;;  %vm320_vm11 = vmpackc.low %vm1180_vm8, %vm1176_vm7  ;;  %v943_v62 = vld [vmem:[%s1119_s7 + $0x48] sm:$0xff] }
  0x30   : > { %633 = vmatpush.bf16.msra.mxu2 %v955_v15  ;;  %v309_v37 = vmul.f32 0.20019531, %v293_v26  ;;  %v310_v38 = vmul.f32 0.20019531, %v294_v27  ;;  %vm1156_vm2 = vcmp.ge.f32.partialorder %v293_v26, 0.0  ;;  %vm1160_vm3 = vcmp.ge.f32.partialorder %v294_v27, 0.0  ;;  %v960_v58 = vld [vmem:[%s1119_s7 + $0xd0] sm:$0xff]  ;;  %v951_v1 = vld [vmem:[%s1119_s7 + $0x88] sm:$0xff] }
  0x31   : > { %647 = vmatpush.bf16.msra.mxu3 %v963_v16  ;;  %vm319_vm9 = vmpackc.low %vm1160_vm3, %vm1156_vm2  ;;  %v316_v60 = vpack.c.bf16 %v312_v56, %v311_v51  ;;  %v321_v63 = vsel %vm317_vm6, %v285_v20, %v313_v54  ;;  %v959_v2 = vld [vmem:[%s1119_s7 + $0xc8] sm:$0xff]  ;;  %v322_v3 = vsel %vm318_vm10, %v286_v25, %v314_v59  ;;  %v934_v9 = vld [vmem:[%s1119_s7] sm:$0xff] }
  0x32   : > { %606 = vmatpush.bf16.msra.mxu0 %v938_v17  ;;  %v315_v55 = vpack.c.bf16 %v310_v38, %v309_v37  ;;  %v395_v5 = vunpack.c.l.b16 %v321_v63  ;;  %v396_v7 = vunpack.c.h.b16 %v321_v63  ;;  %v942_v10 = vld [vmem:[%s1119_s7 + $0x40] sm:$0xff]  ;;  %v397_v11 = vunpack.c.l.b16 %v322_v3  ;;  %v326_v35 = vld [vmem:[#allocation2 + $0x8] sm:$0xff] }
  0x33   : > { %620 = vmatpush.bf16.msra.mxu1 %v946_v18  ;;  %v324_v4 = vsel %vm320_vm11, %v288_v28, %v316_v60  ;;  %v398_v13 = vunpack.c.h.b16 %v322_v3  ;;  %v950_v15 = vld [vmem:[%s1119_s7 + $0x80] sm:$0xff] }
  0x34   : > { %634 = vmatpush.bf16.msra.mxu2 %v954_v19  ;;  %v323_v0 = vsel %vm319_vm9, %v287_v22, %v315_v55  ;;  %v401_v12 = vunpack.c.l.b16 %v324_v4  ;;  %v402_v14 = vunpack.c.h.b16 %v324_v4  ;;  %v958_v16 = vld [vmem:[%s1119_s7 + $0xc0] sm:$0xff] }
  0x35   : > { %648 = vmatpush.bf16.msra.mxu3 %v962_v21  ;;  %v399_v6 = vunpack.c.l.b16 %v323_v0  ;;  %v400_v8 = vunpack.c.h.b16 %v323_v0  ;;  %v325_v27 = vld [vmem:[#allocation2] sm:$0xff] }
  0x36   : > { %607 = vmatpush.bf16.msra.mxu0 %v937_v33  ;;  %v405_v19 = vpack.c.b16 %v401_v12, %v397_v11  ;;  %v406_v20 = vpack.c.b16 %v402_v14, %v398_v13 }
  0x37   : > { %621 = vmatpush.bf16.msra.mxu1 %v945_v34  ;;  %v403_v17 = vpack.c.b16 %v399_v6, %v395_v5  ;;  %v404_v18 = vpack.c.b16 %v400_v8, %v396_v7 }
  0x38   : > { %635 = vmatpush.bf16.msra.mxu2 %v953_v39 }
  0x39   : > { %649 = vmatpush.bf16.msra.mxu3 %v961_v40 }
  0x3a   : > { %608 = vmatpush.bf16.msra.mxu0 %v936_v52 }
  0x3b   : > { %622 = vmatpush.bf16.msra.mxu1 %v944_v53 }
  0x3c   : > { %636 = vmatpush.bf16.msra.mxu2 %v952_v57 }
  0x3d   : > { %650 = vmatpush.bf16.msra.mxu3 %v960_v58 }
  0x3e   : > { %609 = vmatpush.bf16.msra.mxu0 %v935_v61 }
  0x3f   : > { %623 = vmatpush.bf16.msra.mxu1 %v943_v62 }
  0x40   : > { %637 = vmatpush.bf16.msra.mxu2 %v951_v1 }
  0x41   : > { %651 = vmatpush.bf16.msra.mxu3 %v959_v2 }
  0x42   : > { %610 = vmatpush.bf16.msra.mxu0 %v934_v9 }
  0x43   : > { %624 = vmatpush.bf16.msra.mxu1 %v942_v10 }
  0x44   : > { %638 = vmatpush.bf16.msra.mxu2 %v950_v15 }
  0x45   : > { %652 = vmatpush.bf16.msra.mxu3 %v958_v16  ;;  %611 = vmatmul.bf16.vlgmr.msra.gmra.mxu0 %v403_v17 }
  0x46   : > { %625 = vmatmul.bf16.vlgmr.msra.gmra.mxu1 %v404_v18 }
  0x47   : > { %639 = vmatmul.bf16.vlgmr.msra.gmra.mxu2 %v405_v19 }
  0x48   : > { %653 = vmatmul.bf16.vlgmr.msra.gmra.mxu3 %v406_v20 }
  0xc2   : > { %v612_v21 = vpop.f32.mrf.mxu0 }
  0xc3   : > { %v626_v22 = vpop.f32.mrf.mxu1 }
  0xc4   : > { %v627_v23 = vadd.f32 %v626_v22, %v612_v21 }
  0xca   : > { %v640_v24 = vpop.f32.mrf.mxu2  ;;  %v614_v29 = vpop.f32.mrf.mxu0 }
  0xcb   : > { %v654_v25 = vpop.f32.mrf.mxu3  ;;  %v641_v26 = vadd.f32 %v640_v24, %v627_v23  ;;  %v628_v30 = vpop.f32.mrf.mxu1 }
  0xcc   : > { %v629_v32 = vadd.f32 %v628_v30, %v614_v29 }
  0xcd   : > { %v655_v28 = vadd.f32 %v654_v25, %v641_v26 }
  0xcf   : > { %v659_v31 = vadd.f32 %v655_v28, %v325_v27 }
  0xd1   : > { %661 = vst [vmem:[#allocation2] sm:$0xff] %v659_v31 }
  0xd2   : > { %v642_v33 = vpop.f32.mrf.mxu2 }
  0xd3   : > { %v643_v34 = vadd.f32 %v642_v33, %v629_v32  ;;  %v656_v36 = vpop.f32.mrf.mxu3 }
  0xd5   : > { %v657_v37 = vadd.f32 %v656_v36, %v643_v34  ;;  %666 = sbr.rel (%p928_p11) target bundleno = 228 (0xe4), region = 63 }
  0xd7   : > { %v660_v38 = vadd.f32 %v657_v37, %v326_v35 }
  0xd9   : > { %662 = vst [vmem:[#allocation2 + $0x8] sm:$0xff] %v660_v38 }
  0xda   : > { %v667_v39 = vld [vmem:[#allocation2] sm:$0xff] }
  0xdb   : > { %v1007_v40 = vld [vmem:[%s1240_s2] ss:$0 sm:$0xff] }
  0xdc   : > { %v673_v42 = vadd.f32 %v1007_v40, %v667_v39 }
  0xde   : > { %675 = vst [vmem:[%s1241_s3] sm:$0xff] %v673_v42 }
  0xe0   : > { %v668_v41 = vld [vmem:[#allocation2 + $0x8] sm:$0xff] }
  0xe1   : > { %v674_v43 = vadd.f32 %v1007_v40, %v668_v41 }
  0xe3   : > { %676 = vst [vmem:[%s1241_s3 + $0x8] sm:$0xff] %v674_v43 }
  0xe4 PF: > { %s13_s16 = sadd.s32 1, %s1046_s16   ;;  %s1258_s12 = smov %s1034_s13 }
  0xe5   : > { %p10_p12 = scmp.ge.s32.totalorder %s13_s16, 4   ;;  %s1259_s13 = smov %s1104_s20 }
  0xe6   : > { %s1260_s14 = smov %s1042_s15  ;;  %s1261_s15 = smov %s1263_s17 }
  0xe7   :  { %12 = sbr.rel (!%p10_p12) target bundleno = 3 (0x3), region = 104 }

// kernel: unet_forward.38
= control target key start
LH: loop header
LB: loop body
LE: loop exit
PB: predicated region body
PF: predicated region fallthrough
CT: control target
= control target key end

     0   :  { %s712_s1 = inlined_call_operand.vmem [shape: bf16[256,256], index: 1, kind: input, shape index: {}]   ;;  %s713_s0 = inlined_call_operand.vmem [shape: bf16[16,256], index: 0, kind: input, shape index: {}]   ;;  %s714_s2 = inlined_call_operand.vmem [shape: f32[1,256], index: 2, kind: input, shape index: {}]   ;;  %s715_s3 = inlined_call_operand.vmem [shape: f32[16,256], index: 3, kind: output, shape index: {}]  }
   0x1   :  { %v377_v0 = vld [vmem:[%s712_s1 + $0x70] sm:$0xf]  ;;  %v462_v1 = vld [vmem:[%s712_s1 + $0x74] sm:$0xf0]  ;;  %v461_v5 = vld [vmem:[%s712_s1 + $0x74] sm:$0xf] }
   0x2   :  { %v441_v2 = vld [vmem:[%s712_s1 + $0xf0] sm:$0xf]  ;;  %v378_v3 = vor.u32 %v462_v1, %v377_v0  ;;  %v478_v4 = vld [vmem:[%s712_s1 + $0xf4] sm:$0xf0]  ;;  %v379_v6 = vld [vmem:[%s712_s1 + $0x78] sm:$0xf0] }
   0x3   :  { %v442_v7 = vor.u32 %v478_v4, %v441_v2  ;;  %v382_v8 = vor.u32 %v461_v5, %v379_v6  ;;  %v477_v9 = vld [vmem:[%s712_s1 + $0xf4] sm:$0xf]  ;;  %v443_v10 = vld [vmem:[%s712_s1 + $0xf8] sm:$0xf0]  ;;  %v369_v11 = vld [vmem:[%s712_s1 + $0x60] sm:$0xf] }
   0x4   :  { %230 = vmatpush.bf16.msra.mxu0 %v378_v3  ;;  %v446_v12 = vor.u32 %v477_v9, %v443_v10  ;;  %v460_v13 = vld [vmem:[%s712_s1 + $0x64] sm:$0xf0]  ;;  %v433_v14 = vld [vmem:[%s712_s1 + $0xe0] sm:$0xf]  ;;  %v459_v18 = vld [vmem:[%s712_s1 + $0x64] sm:$0xf] }
   0x5   :  { %v476_v15 = vld [vmem:[%s712_s1 + $0xe4] sm:$0xf0]  ;;  %244 = vmatpush.bf16.msra.mxu1 %v442_v7  ;;  %258 = vmatpush.bf16.msra.mxu2 %v382_v8  ;;  %v370_v16 = vor.u32 %v460_v13, %v369_v11  ;;  %v371_v19 = vld [vmem:[%s712_s1 + $0x68] sm:$0xf0]  ;;  %v475_v20 = vld [vmem:[%s712_s1 + $0xe4] sm:$0xf] }
   0x6   :  { %v434_v17 = vor.u32 %v476_v15, %v433_v14  ;;  %272 = vmatpush.bf16.msra.mxu3 %v446_v12  ;;  %v374_v21 = vor.u32 %v459_v18, %v371_v19  ;;  %v435_v22 = vld [vmem:[%s712_s1 + $0xe8] sm:$0xf0]  ;;  %v361_v23 = vld [vmem:[%s712_s1 + $0x50] sm:$0xf]  ;;  %v458_v24 = vld [vmem:[%s712_s1 + $0x54] sm:$0xf0] }
   0x7   :  { %v438_v25 = vor.u32 %v475_v20, %v435_v22  ;;  %v425_v26 = vld [vmem:[%s712_s1 + $0xd0] sm:$0xf]  ;;  %v474_v27 = vld [vmem:[%s712_s1 + $0xd4] sm:$0xf0]  ;;  %v457_v28 = vld [vmem:[%s712_s1 + $0x54] sm:$0xf]  ;;  %v362_v29 = vor.u32 %v458_v24, %v361_v23 }
   0x8   :  { %231 = vmatpush.bf16.msra.mxu0 %v370_v16  ;;  %v363_v30 = vld [vmem:[%s712_s1 + $0x58] sm:$0xf0]  ;;  %v473_v31 = vld [vmem:[%s712_s1 + $0xd4] sm:$0xf]  ;;  %v426_v33 = vor.u32 %v474_v27, %v425_v26  ;;  %v353_v35 = vld [vmem:[%s712_s1 + $0x40] sm:$0xf] }
   0x9   :  { %v427_v32 = vld [vmem:[%s712_s1 + $0xd8] sm:$0xf0]  ;;  %245 = vmatpush.bf16.msra.mxu1 %v434_v17  ;;  %259 = vmatpush.bf16.msra.mxu2 %v374_v21  ;;  %v366_v34 = vor.u32 %v457_v28, %v363_v30  ;;  %v456_v36 = vld [vmem:[%s712_s1 + $0x44] sm:$0xf0]  ;;  %v417_v37 = vld [vmem:[%s712_s1 + $0xc0] sm:$0xf] }
   0xa   :  { %273 = vmatpush.bf16.msra.mxu3 %v438_v25  ;;  %v430_v38 = vor.u32 %v473_v31, %v427_v32  ;;  %v472_v39 = vld [vmem:[%s712_s1 + $0xc4] sm:$0xf0]  ;;  %v455_v40 = vld [vmem:[%s712_s1 + $0x44] sm:$0xf]  ;;  %v355_v41 = vld [vmem:[%s712_s1 + $0x48] sm:$0xf0]  ;;  %v354_v44 = vor.u32 %v456_v36, %v353_v35 }
   0xb   :  { %v471_v42 = vld [vmem:[%s712_s1 + $0xc4] sm:$0xf]  ;;  %v419_v43 = vld [vmem:[%s712_s1 + $0xc8] sm:$0xf0]  ;;  %v418_v45 = vor.u32 %v472_v39, %v417_v37  ;;  %v358_v46 = vor.u32 %v455_v40, %v355_v41  ;;  %v345_v47 = vld [vmem:[%s712_s1 + $0x30] sm:$0xf] }
   0xc   :  { %232 = vmatpush.bf16.msra.mxu0 %v362_v29  ;;  %v454_v48 = vld [vmem:[%s712_s1 + $0x34] sm:$0xf0]  ;;  %v409_v49 = vld [vmem:[%s712_s1 + $0xb0] sm:$0xf]  ;;  %v422_v50 = vor.u32 %v471_v42, %v419_v43  ;;  %v453_v52 = vld [vmem:[%s712_s1 + $0x34] sm:$0xf] }
   0xd   :  { %246 = vmatpush.bf16.msra.mxu1 %v426_v33  ;;  %260 = vmatpush.bf16.msra.mxu2 %v366_v34  ;;  %v470_v51 = vld [vmem:[%s712_s1 + $0xb4] sm:$0xf0]  ;;  %v347_v53 = vld [vmem:[%s712_s1 + $0x38] sm:$0xf0]  ;;  %v469_v54 = vld [vmem:[%s712_s1 + $0xb4] sm:$0xf]  ;;  %v346_v56 = vor.u32 %v454_v48, %v345_v47 }
   0xe   :  { %274 = vmatpush.bf16.msra.mxu3 %v430_v38  ;;  %v411_v55 = vld [vmem:[%s712_s1 + $0xb8] sm:$0xf0]  ;;  %v410_v57 = vor.u32 %v470_v51, %v409_v49  ;;  %v350_v58 = vor.u32 %v453_v52, %v347_v53  ;;  %v337_v59 = vld [vmem:[%s712_s1 + $0x20] sm:$0xf]  ;;  %v452_v60 = vld [vmem:[%s712_s1 + $0x24] sm:$0xf0] }
   0xf   :  { %v401_v61 = vld [vmem:[%s712_s1 + $0xa0] sm:$0xf]  ;;  %v414_v62 = vor.u32 %v469_v54, %v411_v55  ;;  %v468_v63 = vld [vmem:[%s712_s1 + $0xa4] sm:$0xf0]  ;;  %v451_v0 = vld [vmem:[%s712_s1 + $0x24] sm:$0xf]  ;;  %v338_v4 = vor.u32 %v452_v60, %v337_v59 }
  0x10   :  { %233 = vmatpush.bf16.msra.mxu0 %v354_v44  ;;  %v339_v1 = vld [vmem:[%s712_s1 + $0x28] sm:$0xf0]  ;;  %v467_v2 = vld [vmem:[%s712_s1 + $0xa4] sm:$0xf]  ;;  %v329_v5 = vld [vmem:[%s712_s1 + $0x10] sm:$0xf]  ;;  %v402_v7 = vor.u32 %v468_v63, %v401_v61 }
  0x11   :  { %247 = vmatpush.bf16.msra.mxu1 %v418_v45  ;;  %261 = vmatpush.bf16.msra.mxu2 %v358_v46  ;;  %v403_v3 = vld [vmem:[%s712_s1 + $0xa8] sm:$0xf0]  ;;  %v450_v6 = vld [vmem:[%s712_s1 + $0x14] sm:$0xf0]  ;;  %v342_v8 = vor.u32 %v451_v0, %v339_v1  ;;  %v393_v9 = vld [vmem:[%s712_s1 + $0x90] sm:$0xf] }
  0x12   :  { %275 = vmatpush.bf16.msra.mxu3 %v422_v50  ;;  %v466_v10 = vld [vmem:[%s712_s1 + $0x94] sm:$0xf0]  ;;  %v449_v11 = vld [vmem:[%s712_s1 + $0x14] sm:$0xf]  ;;  %v406_v12 = vor.u32 %v467_v2, %v403_v3  ;;  %v331_v13 = vld [vmem:[%s712_s1 + $0x18] sm:$0xf0]  ;;  %v330_v20 = vor.u32 %v450_v6, %v329_v5 }
  0x13   :  { %v22_v14 = vld [vmem:[%s713_s0] sm:$0xff]  ;;  %v23_v15 = vld [vmem:[%s713_s0 + $0x8] sm:$0xff]  ;;  %v465_v16 = vld [vmem:[%s712_s1 + $0x94] sm:$0xf]  ;;  %v394_v23 = vor.u32 %v466_v10, %v393_v9  ;;  %v334_v24 = vor.u32 %v449_v11, %v331_v13 }
  0x14   :  { %234 = vmatpush.bf16.msra.mxu0 %v346_v56  ;;  %v395_v17 = vld [vmem:[%s712_s1 + $0x98] sm:$0xf0]  ;;  %v24_v18 = vunpack.c.l.bf16 %v22_v14  ;;  %v26_v19 = vunpack.c.l.bf16 %v23_v15  ;;  %v25_v21 = vunpack.c.h.bf16 %v22_v14  ;;  %v27_v22 = vunpack.c.h.bf16 %v23_v15  ;;  %v321_v25 = vld [vmem:[%s712_s1] sm:$0xf]  ;;  %v448_v26 = vld [vmem:[%s712_s1 + $0x4] sm:$0xf0] }
  0x15   :  { %248 = vmatpush.bf16.msra.mxu1 %v410_v57  ;;  %262 = vmatpush.bf16.msra.mxu2 %v350_v58  ;;  %v385_v27 = vld [vmem:[%s712_s1 + $0x80] sm:$0xf]  ;;  %v398_v28 = vor.u32 %v465_v16, %v395_v17  ;;  %v464_v29 = vld [vmem:[%s712_s1 + $0x84] sm:$0xf0]  ;;  %v447_v30 = vld [vmem:[%s712_s1 + $0x4] sm:$0xf]  ;;  %v322_v36 = vor.u32 %v448_v26, %v321_v25 }
  0x16   :  { %276 = vmatpush.bf16.msra.mxu3 %v414_v62  ;;  %v323_v31 = vld [vmem:[%s712_s1 + $0x8] sm:$0xf0]  ;;  %v463_v32 = vld [vmem:[%s712_s1 + $0x84] sm:$0xf]  ;;  %v28_v34 = vmax.f32 %v24_v18, 0.0  ;;  %v30_v35 = vmax.f32 %v26_v19, 0.0  ;;  %v386_v39 = vor.u32 %v464_v29, %v385_v27 }
  0x17   :  { %v387_v33 = vld [vmem:[%s712_s1 + $0x88] sm:$0xf0]  ;;  %v29_v37 = vmax.f32 %v25_v21, 0.0  ;;  %v31_v38 = vmax.f32 %v27_v22, 0.0  ;;  %v326_v40 = vor.u32 %v447_v30, %v323_v31  ;;  %v301_v44 = vld [vmem:[%s714_s2] sm:$0x3] }
  0x18   :  { %235 = vmatpush.bf16.msra.mxu0 %v338_v4  ;;  %v390_v41 = vor.u32 %v463_v32, %v387_v33  ;;  %v32_v42 = vpack.c.bf16 %v30_v35, %v28_v34  ;;  %v303_v46 = vperm.slane %v301_v44, 0  ;;  %v304_v51 = vperm.slane %v301_v44, 1 }
  0x19   :  { %249 = vmatpush.bf16.msra.mxu1 %v402_v7  ;;  %263 = vmatpush.bf16.msra.mxu2 %v342_v8  ;;  %v33_v43 = vpack.c.bf16 %v31_v38, %v29_v37 }
  0x1a   :  { %277 = vmatpush.bf16.msra.mxu3 %v406_v12 }
  0x1c   :  { %236 = vmatpush.bf16.msra.mxu0 %v330_v20 }
  0x1d   :  { %250 = vmatpush.bf16.msra.mxu1 %v394_v23  ;;  %264 = vmatpush.bf16.msra.mxu2 %v334_v24 }
  0x1e   :  { %278 = vmatpush.bf16.msra.mxu3 %v398_v28 }
  0x20   :  { %237 = vmatpush.bf16.msra.mxu0 %v322_v36 }
  0x21   :  { %251 = vmatpush.bf16.msra.mxu1 %v386_v39  ;;  %265 = vmatpush.bf16.msra.mxu2 %v326_v40 }
  0x22   :  { %279 = vmatpush.bf16.msra.mxu3 %v390_v41 }
  0x23   :  { %238 = vmatmul.bf16.vlgmr.msra.gmra.mxu0 %v32_v42 }
  0x24   :  { %252 = vmatmul.bf16.vlgmr.msra.gmra.mxu1 %v33_v43  ;;  %266 = vmatmul.bf16.vlgmr.msra.gmra.mxu2 %v32_v42 }
  0x25   :  { %280 = vmatmul.bf16.vlgmr.msra.gmra.mxu3 %v33_v43 }
  0xa0   :  { %v239_v45 = vpop.f32.mrf.mxu0 }
  0xa1   :  { %v253_v47 = vpop.f32.mrf.mxu1 }
  0xa2   :  { %v254_v48 = vadd.f32 %v253_v47, %v239_v45 }
  0xa4   :  { %v307_v49 = vadd.f32 %v303_v46, %v254_v48 }
  0xa6   :  { %311 = vst [vmem:[%s715_s3] sm:$0xff] %v307_v49 }
  0xa7   :  { %v267_v50 = vpop.f32.mrf.mxu2 }
  0xa8   :  { %v281_v52 = vpop.f32.mrf.mxu3  ;;  %v241_v53 = vpop.f32.mrf.mxu0 }
  0xa9   :  { %v282_v54 = vadd.f32 %v281_v52, %v267_v50  ;;  %v255_v55 = vpop.f32.mrf.mxu1 }
  0xaa   :  { %v256_v56 = vadd.f32 %v255_v55, %v241_v53 }
  0xab   :  { %v308_v57 = vadd.f32 %v304_v51, %v282_v54 }
  0xac   :  { %v309_v58 = vadd.f32 %v303_v46, %v256_v56 }
  0xad   :  { %312 = vst [vmem:[%s715_s3 + $0x8] sm:$0xff] %v308_v57 }
  0xae   :  { %313 = vst [vmem:[%s715_s3 + $0x10] sm:$0xff] %v309_v58 }
  0xaf   :  { %v269_v59 = vpop.f32.mrf.mxu2 }
  0xb0   :  { %v283_v60 = vpop.f32.mrf.mxu3 }
  0xb1   :  { %v284_v61 = vadd.f32 %v283_v60, %v269_v59 }
  0xb3   :  { %v310_v62 = vadd.f32 %v304_v51, %v284_v61 }
  0xb5   :  { %314 = vst [vmem:[%s715_s3 + $0x18] sm:$0xff] %v310_v62 }

// kernel: unet_forward.41
= control target key start
LH: loop header
LB: loop body
LE: loop exit
PB: predicated region body
PF: predicated region fallthrough
CT: control target
= control target key end

     0   :  { %s753_s1 = inlined_call_operand.vmem [shape: bf16[512,128], index: 1, kind: input, shape index: {}]   ;;  %s754_s0 = inlined_call_operand.vmem [shape: bf16[32,512], index: 0, kind: input, shape index: {}]   ;;  %s755_s2 = inlined_call_operand.vmem [shape: f32[1,128], index: 2, kind: input, shape index: {}]   ;;  %s756_s3 = inlined_call_operand.vmem [shape: f32[32,128], index: 3, kind: output, shape index: {}]  }
   0x1   :  { %v572_v0 = vld [vmem:[%s753_s1 + $0x38] sm:$0xff]  ;;  %v571_v4 = vld [vmem:[%s753_s1 + $0x30] sm:$0xff]  ;;  %v570_v8 = vld [vmem:[%s753_s1 + $0x28] sm:$0xff] }
   0x2   :  { %v580_v1 = vld [vmem:[%s753_s1 + $0x78] sm:$0xff]  ;;  %330 = vmatpush.bf16.msra.mxu0 %v572_v0  ;;  %v579_v5 = vld [vmem:[%s753_s1 + $0x70] sm:$0xff]  ;;  %v578_v9 = vld [vmem:[%s753_s1 + $0x68] sm:$0xff] }
   0x3   :  { %v588_v2 = vld [vmem:[%s753_s1 + $0xb8] sm:$0xff]  ;;  %349 = vmatpush.bf16.msra.mxu1 %v580_v1  ;;  %v587_v6 = vld [vmem:[%s753_s1 + $0xb0] sm:$0xff]  ;;  %v586_v10 = vld [vmem:[%s753_s1 + $0xa8] sm:$0xff] }
   0x4   :  { %v596_v3 = vld [vmem:[%s753_s1 + $0xf8] sm:$0xff]  ;;  %368 = vmatpush.bf16.msra.mxu2 %v588_v2  ;;  %v595_v7 = vld [vmem:[%s753_s1 + $0xf0] sm:$0xff]  ;;  %v594_v11 = vld [vmem:[%s753_s1 + $0xe8] sm:$0xff] }
   0x5   :  { %387 = vmatpush.bf16.msra.mxu3 %v596_v3  ;;  %v569_v12 = vld [vmem:[%s753_s1 + $0x20] sm:$0xff]  ;;  %v568_v16 = vld [vmem:[%s753_s1 + $0x18] sm:$0xff]  ;;  %v567_v20 = vld [vmem:[%s753_s1 + $0x10] sm:$0xff] }
   0x6   :  { %331 = vmatpush.bf16.msra.mxu0 %v571_v4  ;;  %v577_v13 = vld [vmem:[%s753_s1 + $0x60] sm:$0xff]  ;;  %v576_v17 = vld [vmem:[%s753_s1 + $0x58] sm:$0xff]  ;;  %v575_v21 = vld [vmem:[%s753_s1 + $0x50] sm:$0xff] }
   0x7   :  { %350 = vmatpush.bf16.msra.mxu1 %v579_v5  ;;  %v585_v14 = vld [vmem:[%s753_s1 + $0xa0] sm:$0xff]  ;;  %v584_v18 = vld [vmem:[%s753_s1 + $0x98] sm:$0xff]  ;;  %v583_v22 = vld [vmem:[%s753_s1 + $0x90] sm:$0xff] }
   0x8   :  { %369 = vmatpush.bf16.msra.mxu2 %v587_v6  ;;  %v593_v15 = vld [vmem:[%s753_s1 + $0xe0] sm:$0xff]  ;;  %v592_v19 = vld [vmem:[%s753_s1 + $0xd8] sm:$0xff]  ;;  %v24_v24 = vld [vmem:[%s754_s0 + $0x10] sm:$0xff] }
   0x9   :  { %388 = vmatpush.bf16.msra.mxu3 %v595_v7  ;;  %v22_v23 = vld [vmem:[%s754_s0] sm:$0xff]  ;;  %v591_v25 = vld [vmem:[%s753_s1 + $0xd0] sm:$0xff]  ;;  %v23_v26 = vld [vmem:[%s754_s0 + $0x8] sm:$0xff]  ;;  %v34_v29 = vunpack.c.l.bf16 %v24_v24  ;;  %v35_v31 = vunpack.c.h.bf16 %v24_v24 }
   0xa   :  { %332 = vmatpush.bf16.msra.mxu0 %v570_v8  ;;  %v25_v27 = vld [vmem:[%s754_s0 + $0x18] sm:$0xff]  ;;  %v30_v28 = vunpack.c.l.bf16 %v22_v23  ;;  %v31_v30 = vunpack.c.h.bf16 %v22_v23  ;;  %v566_v32 = vld [vmem:[%s753_s1 + $0x8] sm:$0xff]  ;;  %v32_v34 = vunpack.c.l.bf16 %v23_v26  ;;  %v33_v36 = vunpack.c.h.bf16 %v23_v26  ;;  %v565_v44 = vld [vmem:[%s753_s1] sm:$0xff] }
   0xb   :  { %351 = vmatpush.bf16.msra.mxu1 %v578_v9  ;;  %v574_v33 = vld [vmem:[%s753_s1 + $0x48] sm:$0xff]  ;;  %v36_v35 = vunpack.c.l.bf16 %v25_v27  ;;  %v37_v37 = vunpack.c.h.bf16 %v25_v27  ;;  %v50_v41 = vmax.f32 %v34_v29, 0.0  ;;  %v51_v43 = vmax.f32 %v35_v31, 0.0  ;;  %v573_v45 = vld [vmem:[%s753_s1 + $0x40] sm:$0xff]  ;;  %v28_v57 = vld [vmem:[%s754_s0 + $0x30] sm:$0xff] }
   0xc   :  { %370 = vmatpush.bf16.msra.mxu2 %v586_v10  ;;  %v582_v38 = vld [vmem:[%s753_s1 + $0x88] sm:$0xff]  ;;  %v46_v40 = vmax.f32 %v30_v28, 0.0  ;;  %v47_v42 = vmax.f32 %v31_v30, 0.0  ;;  %v48_v46 = vmax.f32 %v32_v34, 0.0  ;;  %v49_v48 = vmax.f32 %v33_v36, 0.0  ;;  %v581_v50 = vld [vmem:[%s753_s1 + $0x80] sm:$0xff] }
   0xd   :  { %389 = vmatpush.bf16.msra.mxu3 %v594_v11  ;;  %v590_v39 = vld [vmem:[%s753_s1 + $0xc8] sm:$0xff]  ;;  %v52_v47 = vmax.f32 %v36_v35, 0.0  ;;  %v53_v49 = vmax.f32 %v37_v37, 0.0  ;;  %v589_v51 = vld [vmem:[%s753_s1 + $0xc0] sm:$0xff]  ;;  %v29_v59 = vld [vmem:[%s754_s0 + $0x38] sm:$0xff]  ;;  %v42_v61 = vunpack.c.l.bf16 %v28_v57  ;;  %v43_v63 = vunpack.c.h.bf16 %v28_v57 }
   0xe   :  { %333 = vmatpush.bf16.msra.mxu0 %v569_v12  ;;  %v62_v52 = vpack.c.bf16 %v50_v41, %v46_v40  ;;  %v63_v53 = vpack.c.bf16 %v51_v43, %v47_v42  ;;  %v26_v56 = vld [vmem:[%s754_s0 + $0x20] sm:$0xff]  ;;  %v27_v58 = vld [vmem:[%s754_s0 + $0x28] sm:$0xff]  ;;  %v44_v1 = vunpack.c.l.bf16 %v29_v59  ;;  %v45_v3 = vunpack.c.h.bf16 %v29_v59 }
   0xf   :  { %352 = vmatpush.bf16.msra.mxu1 %v577_v13  ;;  %v64_v54 = vpack.c.bf16 %v52_v47, %v48_v46  ;;  %v65_v55 = vpack.c.bf16 %v53_v49, %v49_v48  ;;  %v38_v60 = vunpack.c.l.bf16 %v26_v56  ;;  %v39_v62 = vunpack.c.h.bf16 %v26_v56 }
  0x10   :  { %371 = vmatpush.bf16.msra.mxu2 %v585_v14  ;;  %v40_v0 = vunpack.c.l.bf16 %v27_v58  ;;  %v41_v2 = vunpack.c.h.bf16 %v27_v58  ;;  %v58_v5 = vmax.f32 %v42_v61, 0.0  ;;  %v59_v7 = vmax.f32 %v43_v63, 0.0 }
  0x11   :  { %390 = vmatpush.bf16.msra.mxu3 %v593_v15  ;;  %v54_v4 = vmax.f32 %v38_v60, 0.0  ;;  %v55_v6 = vmax.f32 %v39_v62, 0.0  ;;  %v60_v9 = vmax.f32 %v44_v1, 0.0  ;;  %v61_v11 = vmax.f32 %v45_v3, 0.0 }
  0x12   :  { %334 = vmatpush.bf16.msra.mxu0 %v568_v16  ;;  %v56_v8 = vmax.f32 %v40_v0, 0.0  ;;  %v57_v10 = vmax.f32 %v41_v2, 0.0 }
  0x13   :  { %353 = vmatpush.bf16.msra.mxu1 %v576_v17  ;;  %v66_v12 = vpack.c.bf16 %v58_v5, %v54_v4  ;;  %v67_v13 = vpack.c.bf16 %v59_v7, %v55_v6 }
  0x14   :  { %372 = vmatpush.bf16.msra.mxu2 %v584_v18  ;;  %v68_v14 = vpack.c.bf16 %v60_v9, %v56_v8  ;;  %v69_v15 = vpack.c.bf16 %v61_v11, %v57_v10 }
  0x15   :  { %391 = vmatpush.bf16.msra.mxu3 %v592_v19 }
  0x16   :  { %335 = vmatpush.bf16.msra.mxu0 %v567_v20 }
  0x17   :  { %354 = vmatpush.bf16.msra.mxu1 %v575_v21 }
  0x18   :  { %373 = vmatpush.bf16.msra.mxu2 %v583_v22  ;;  %v597_v22 = vld [vmem:[%s755_s2] ss:$0 sm:$0xff] }
  0x19   :  { %392 = vmatpush.bf16.msra.mxu3 %v591_v25 }
  0x1a   :  { %336 = vmatpush.bf16.msra.mxu0 %v566_v32 }
  0x1b   :  { %355 = vmatpush.bf16.msra.mxu1 %v574_v33 }
  0x1c   :  { %374 = vmatpush.bf16.msra.mxu2 %v582_v38 }
  0x1d   :  { %393 = vmatpush.bf16.msra.mxu3 %v590_v39 }
  0x1e   :  { %337 = vmatpush.bf16.msra.mxu0 %v565_v44 }
  0x1f   :  { %356 = vmatpush.bf16.msra.mxu1 %v573_v45 }
  0x20   :  { %375 = vmatpush.bf16.msra.mxu2 %v581_v50 }
  0x21   :  { %394 = vmatpush.bf16.msra.mxu3 %v589_v51  ;;  %338 = vmatmul.bf16.vlgmr.msra.gmra.mxu0 %v62_v52 }
  0x22   :  { %357 = vmatmul.bf16.vlgmr.msra.gmra.mxu1 %v63_v53 }
  0x23   :  { %376 = vmatmul.bf16.vlgmr.msra.gmra.mxu2 %v64_v54 }
  0x24   :  { %395 = vmatmul.bf16.vlgmr.msra.gmra.mxu3 %v65_v55 }
  0x31   :  { %343 = vmatmul.bf16.gmra.mxu0 %v66_v12 }
  0x32   :  { %362 = vmatmul.bf16.gmra.mxu1 %v67_v13 }
  0x33   :  { %381 = vmatmul.bf16.gmra.mxu2 %v68_v14 }
  0x34   :  { %400 = vmatmul.bf16.gmra.mxu3 %v69_v15 }
  0x9e   :  { %v339_v16 = vpop.f32.mrf.mxu0 }
  0x9f   :  { %v358_v17 = vpop.f32.mrf.mxu1 }
  0xa0   :  { %v359_v18 = vadd.f32 %v358_v17, %v339_v16 }
  0xa6   :  { %v377_v19 = vpop.f32.mrf.mxu2  ;;  %v341_v23 = vpop.f32.mrf.mxu0 }
  0xa7   :  { %v396_v20 = vpop.f32.mrf.mxu3  ;;  %v378_v21 = vadd.f32 %v377_v19, %v359_v18  ;;  %v360_v24 = vpop.f32.mrf.mxu1 }
  0xa8   :  { %v361_v27 = vadd.f32 %v360_v24, %v341_v23 }
  0xa9   :  { %v397_v25 = vadd.f32 %v396_v20, %v378_v21 }
  0xab   :  { %v425_v26 = vadd.f32 %v597_v22, %v397_v25 }
  0xad   :  { %429 = vst [vmem:[%s756_s3] sm:$0xff] %v425_v26 }
  0xae   :  { %v379_v28 = vpop.f32.mrf.mxu2  ;;  %v344_v31 = vpop.f32.mrf.mxu0 }
  0xaf   :  { %v398_v29 = vpop.f32.mrf.mxu3  ;;  %v380_v30 = vadd.f32 %v379_v28, %v361_v27  ;;  %v363_v32 = vpop.f32.mrf.mxu1 }
  0xb0   :  { %v364_v35 = vadd.f32 %v363_v32, %v344_v31 }
  0xb1   :  { %v399_v33 = vadd.f32 %v398_v29, %v380_v30 }
  0xb3   :  { %v426_v34 = vadd.f32 %v597_v22, %v399_v33 }
  0xb5   :  { %430 = vst [vmem:[%s756_s3 + $0x8] sm:$0xff] %v426_v34 }
  0xb6   :  { %v382_v36 = vpop.f32.mrf.mxu2  ;;  %v346_v40 = vpop.f32.mrf.mxu0 }
  0xb7   :  { %v401_v37 = vpop.f32.mrf.mxu3  ;;  %v383_v38 = vadd.f32 %v382_v36, %v364_v35  ;;  %v365_v41 = vpop.f32.mrf.mxu1 }
  0xb8   :  { %v366_v43 = vadd.f32 %v365_v41, %v346_v40 }
  0xb9   :  { %v402_v39 = vadd.f32 %v401_v37, %v383_v38 }
  0xbb   :  { %v427_v42 = vadd.f32 %v597_v22, %v402_v39 }
  0xbd   :  { %431 = vst [vmem:[%s756_s3 + $0x10] sm:$0xff] %v427_v42 }
  0xbe   :  { %v384_v44 = vpop.f32.mrf.mxu2 }
  0xbf   :  { %v385_v45 = vadd.f32 %v384_v44, %v366_v43  ;;  %v403_v46 = vpop.f32.mrf.mxu3 }
  0xc1   :  { %v404_v47 = vadd.f32 %v403_v46, %v385_v45 }
  0xc3   :  { %v428_v48 = vadd.f32 %v597_v22, %v404_v47 }
  0xc5   :  { %432 = vst [vmem:[%s756_s3 + $0x18] sm:$0xff] %v428_v48 }

// kernel: unet_forward.45
= control target key start
LH: loop header
LB: loop body
LE: loop exit
PB: predicated region body
PF: predicated region fallthrough
CT: control target
= control target key end

     0   :  { %s535_s1 = inlined_call_operand.vmem [shape: bf16[256,128], index: 1, kind: input, shape index: {}]   ;;  %s536_s0 = inlined_call_operand.vmem [shape: bf16[64,256], index: 0, kind: input, shape index: {}]   ;;  %s537_s2 = inlined_call_operand.vmem [shape: f32[1,128], index: 2, kind: input, shape index: {}]   ;;  %s538_s3 = inlined_call_operand.vmem [shape: f32[64,128], index: 3, kind: output, shape index: {}]  }
   0x1   :  { %v390_v0 = vld [vmem:[%s535_s1 + $0x38] sm:$0xff]  ;;  %v389_v2 = vld [vmem:[%s535_s1 + $0x30] sm:$0xff]  ;;  %v388_v4 = vld [vmem:[%s535_s1 + $0x28] sm:$0xff] }
   0x2   :  { %v398_v1 = vld [vmem:[%s535_s1 + $0x78] sm:$0xff]  ;;  %210 = vmatpush.bf16.msra.mxu0 %v390_v0  ;;  %399 = vmatpush.bf16.msra.mxu2 %v390_v0  ;;  %v397_v3 = vld [vmem:[%s535_s1 + $0x70] sm:$0xff]  ;;  %v396_v5 = vld [vmem:[%s535_s1 + $0x68] sm:$0xff] }
   0x3   :  { %239 = vmatpush.bf16.msra.mxu1 %v398_v1  ;;  %407 = vmatpush.bf16.msra.mxu3 %v398_v1  ;;  %v387_v6 = vld [vmem:[%s535_s1 + $0x20] sm:$0xff]  ;;  %v386_v8 = vld [vmem:[%s535_s1 + $0x18] sm:$0xff]  ;;  %v385_v10 = vld [vmem:[%s535_s1 + $0x10] sm:$0xff] }
   0x4   :  { %v395_v7 = vld [vmem:[%s535_s1 + $0x60] sm:$0xff]  ;;  %v394_v9 = vld [vmem:[%s535_s1 + $0x58] sm:$0xff]  ;;  %v27_v12 = vld [vmem:[%s536_s0 + $0x8] sm:$0xff] }
   0x5   :  { %v26_v11 = vld [vmem:[%s536_s0] sm:$0xff]  ;;  %v31_v14 = vld [vmem:[%s536_s0 + $0x28] sm:$0xff]  ;;  %v393_v15 = vld [vmem:[%s535_s1 + $0x50] sm:$0xff]  ;;  %v36_v17 = vunpack.c.l.bf16 %v27_v12  ;;  %v37_v22 = vunpack.c.h.bf16 %v27_v12 }
   0x6   :  { %211 = vmatpush.bf16.msra.mxu0 %v389_v2  ;;  %400 = vmatpush.bf16.msra.mxu2 %v389_v2  ;;  %v30_v13 = vld [vmem:[%s536_s0 + $0x20] sm:$0xff]  ;;  %v34_v16 = vunpack.c.l.bf16 %v26_v11  ;;  %v44_v19 = vunpack.c.l.bf16 %v31_v14  ;;  %v384_v20 = vld [vmem:[%s535_s1 + $0x8] sm:$0xff]  ;;  %v35_v21 = vunpack.c.h.bf16 %v26_v11  ;;  %v45_v24 = vunpack.c.h.bf16 %v31_v14  ;;  %v28_v40 = vld [vmem:[%s536_s0 + $0x10] sm:$0xff] }
   0x7   :  { %240 = vmatpush.bf16.msra.mxu1 %v397_v3  ;;  %408 = vmatpush.bf16.msra.mxu3 %v397_v3  ;;  %v42_v18 = vunpack.c.l.bf16 %v30_v13  ;;  %v43_v23 = vunpack.c.h.bf16 %v30_v13  ;;  %v392_v25 = vld [vmem:[%s535_s1 + $0x48] sm:$0xff]  ;;  %v52_v27 = vmax.f32 %v36_v17, 0.0  ;;  %v383_v30 = vld [vmem:[%s535_s1] sm:$0xff]  ;;  %v53_v32 = vmax.f32 %v37_v22, 0.0  ;;  %v29_v41 = vld [vmem:[%s536_s0 + $0x18] sm:$0xff] }
   0x8   :  { %v50_v26 = vmax.f32 %v34_v16, 0.0  ;;  %v60_v29 = vmax.f32 %v44_v19, 0.0  ;;  %v51_v31 = vmax.f32 %v35_v21, 0.0  ;;  %v61_v34 = vmax.f32 %v45_v24, 0.0  ;;  %v391_v35 = vld [vmem:[%s535_s1 + $0x40] sm:$0xff]  ;;  %v32_v42 = vld [vmem:[%s536_s0 + $0x30] sm:$0xff] }
   0x9   :  { %v58_v28 = vmax.f32 %v42_v18, 0.0  ;;  %v59_v33 = vmax.f32 %v43_v23, 0.0  ;;  %v33_v43 = vld [vmem:[%s536_s0 + $0x38] sm:$0xff]  ;;  %v38_v44 = vunpack.c.l.bf16 %v28_v40  ;;  %v40_v45 = vunpack.c.l.bf16 %v29_v41  ;;  %v415_v1 = vld [vmem:[%s537_s2] ss:$0 sm:$0xff] }
   0xa   :  { %212 = vmatpush.bf16.msra.mxu0 %v388_v4  ;;  %401 = vmatpush.bf16.msra.mxu2 %v388_v4  ;;  %v66_v36 = vpack.c.bf16 %v52_v27, %v50_v26  ;;  %v67_v38 = vpack.c.bf16 %v53_v32, %v51_v31  ;;  %v46_v46 = vunpack.c.l.bf16 %v32_v42  ;;  %v48_v47 = vunpack.c.l.bf16 %v33_v43 }
   0xb   :  { %241 = vmatpush.bf16.msra.mxu1 %v396_v5  ;;  %409 = vmatpush.bf16.msra.mxu3 %v396_v5  ;;  %v70_v37 = vpack.c.bf16 %v60_v29, %v58_v28  ;;  %v71_v39 = vpack.c.bf16 %v61_v34, %v59_v33  ;;  %v39_v48 = vunpack.c.h.bf16 %v28_v40  ;;  %v41_v49 = vunpack.c.h.bf16 %v29_v41 }
   0xc   :  { %v47_v50 = vunpack.c.h.bf16 %v32_v42  ;;  %v49_v51 = vunpack.c.h.bf16 %v33_v43  ;;  %v54_v52 = vmax.f32 %v38_v44, 0.0  ;;  %v56_v53 = vmax.f32 %v40_v45, 0.0 }
   0xd   :  { %v62_v54 = vmax.f32 %v46_v46, 0.0  ;;  %v64_v55 = vmax.f32 %v48_v47, 0.0  ;;  %v55_v56 = vmax.f32 %v39_v48, 0.0  ;;  %v57_v57 = vmax.f32 %v41_v49, 0.0 }
   0xe   :  { %213 = vmatpush.bf16.msra.mxu0 %v387_v6  ;;  %402 = vmatpush.bf16.msra.mxu2 %v387_v6  ;;  %v63_v58 = vmax.f32 %v47_v50, 0.0  ;;  %v65_v59 = vmax.f32 %v49_v51, 0.0  ;;  %v68_v60 = vpack.c.bf16 %v56_v53, %v54_v52 }
   0xf   :  { %242 = vmatpush.bf16.msra.mxu1 %v395_v7  ;;  %410 = vmatpush.bf16.msra.mxu3 %v395_v7  ;;  %v72_v61 = vpack.c.bf16 %v64_v55, %v62_v54  ;;  %v69_v62 = vpack.c.bf16 %v57_v57, %v55_v56 }
  0x10   :  { %v73_v63 = vpack.c.bf16 %v65_v59, %v63_v58 }
  0x12   :  { %214 = vmatpush.bf16.msra.mxu0 %v386_v8  ;;  %403 = vmatpush.bf16.msra.mxu2 %v386_v8 }
  0x13   :  { %243 = vmatpush.bf16.msra.mxu1 %v394_v9  ;;  %411 = vmatpush.bf16.msra.mxu3 %v394_v9 }
  0x16   :  { %215 = vmatpush.bf16.msra.mxu0 %v385_v10  ;;  %404 = vmatpush.bf16.msra.mxu2 %v385_v10 }
  0x17   :  { %244 = vmatpush.bf16.msra.mxu1 %v393_v15  ;;  %412 = vmatpush.bf16.msra.mxu3 %v393_v15 }
  0x1a   :  { %216 = vmatpush.bf16.msra.mxu0 %v384_v20  ;;  %405 = vmatpush.bf16.msra.mxu2 %v384_v20 }
  0x1b   :  { %245 = vmatpush.bf16.msra.mxu1 %v392_v25  ;;  %413 = vmatpush.bf16.msra.mxu3 %v392_v25 }
  0x1e   :  { %217 = vmatpush.bf16.msra.mxu0 %v383_v30  ;;  %406 = vmatpush.bf16.msra.mxu2 %v383_v30 }
  0x1f   :  { %246 = vmatpush.bf16.msra.mxu1 %v391_v35  ;;  %414 = vmatpush.bf16.msra.mxu3 %v391_v35 }
  0x21   :  { %218 = vmatmul.bf16.vlgmr.msra.gmra.mxu0 %v66_v36  ;;  %228 = vmatmul.bf16.vlgmr.msra.gmra.mxu2 %v70_v37 }
  0x22   :  { %247 = vmatmul.bf16.vlgmr.msra.gmra.mxu1 %v67_v38  ;;  %257 = vmatmul.bf16.vlgmr.msra.gmra.mxu3 %v71_v39 }
  0x31   :  { %223 = vmatmul.bf16.gmra.mxu0 %v68_v60  ;;  %233 = vmatmul.bf16.gmra.mxu2 %v72_v61 }
  0x32   :  { %252 = vmatmul.bf16.gmra.mxu1 %v69_v62  ;;  %262 = vmatmul.bf16.gmra.mxu3 %v73_v63 }
  0x9e   :  { %v219_v0 = vpop.f32.mrf.mxu0 }
  0x9f   :  { %v248_v2 = vpop.f32.mrf.mxu1 }
  0xa0   :  { %v249_v3 = vadd.f32 %v248_v2, %v219_v0 }
  0xa2   :  { %v299_v4 = vadd.f32 %v415_v1, %v249_v3 }
  0xa4   :  { %307 = vst [vmem:[%s538_s3] sm:$0xff] %v299_v4  ;;  %v229_v5 = vpop.f32.mrf.mxu2 }
  0xa5   :  { %v258_v6 = vpop.f32.mrf.mxu3 }
  0xa6   :  { %v259_v7 = vadd.f32 %v258_v6, %v229_v5  ;;  %v221_v8 = vpop.f32.mrf.mxu0 }
  0xa7   :  { %v250_v9 = vpop.f32.mrf.mxu1 }
  0xa8   :  { %v303_v10 = vadd.f32 %v415_v1, %v259_v7  ;;  %v251_v11 = vadd.f32 %v250_v9, %v221_v8 }
  0xaa   :  { %311 = vst [vmem:[%s538_s3 + $0x20] sm:$0xff] %v303_v10  ;;  %v300_v12 = vadd.f32 %v415_v1, %v251_v11 }
  0xac   :  { %308 = vst [vmem:[%s538_s3 + $0x8] sm:$0xff] %v300_v12  ;;  %v231_v13 = vpop.f32.mrf.mxu2 }
  0xad   :  { %v260_v14 = vpop.f32.mrf.mxu3 }
  0xae   :  { %v261_v15 = vadd.f32 %v260_v14, %v231_v13  ;;  %v224_v16 = vpop.f32.mrf.mxu0 }
  0xaf   :  { %v253_v17 = vpop.f32.mrf.mxu1 }
  0xb0   :  { %v304_v18 = vadd.f32 %v415_v1, %v261_v15  ;;  %v254_v19 = vadd.f32 %v253_v17, %v224_v16 }
  0xb2   :  { %312 = vst [vmem:[%s538_s3 + $0x28] sm:$0xff] %v304_v18  ;;  %v301_v20 = vadd.f32 %v415_v1, %v254_v19 }
  0xb4   :  { %309 = vst [vmem:[%s538_s3 + $0x10] sm:$0xff] %v301_v20  ;;  %v234_v21 = vpop.f32.mrf.mxu2 }
  0xb5   :  { %v263_v22 = vpop.f32.mrf.mxu3 }
  0xb6   :  { %v264_v23 = vadd.f32 %v263_v22, %v234_v21  ;;  %v226_v24 = vpop.f32.mrf.mxu0 }
  0xb7   :  { %v255_v25 = vpop.f32.mrf.mxu1 }
  0xb8   :  { %v305_v26 = vadd.f32 %v415_v1, %v264_v23  ;;  %v256_v27 = vadd.f32 %v255_v25, %v226_v24 }
  0xba   :  { %313 = vst [vmem:[%s538_s3 + $0x30] sm:$0xff] %v305_v26  ;;  %v302_v28 = vadd.f32 %v415_v1, %v256_v27 }
  0xbc   :  { %310 = vst [vmem:[%s538_s3 + $0x18] sm:$0xff] %v302_v28  ;;  %v236_v29 = vpop.f32.mrf.mxu2 }
  0xbd   :  { %v265_v30 = vpop.f32.mrf.mxu3 }
  0xbe   :  { %v266_v31 = vadd.f32 %v265_v30, %v236_v29 }
  0xc0   :  { %v306_v32 = vadd.f32 %v415_v1, %v266_v31 }
  0xc2   :  { %314 = vst [vmem:[%s538_s3 + $0x38] sm:$0xff] %v306_v32 }

// kernel: unet_forward.48
= control target key start
LH: loop header
LB: loop body
LE: loop exit
PB: predicated region body
PF: predicated region fallthrough
CT: control target
= control target key end

     0   :  { %s677_s1 = inlined_call_operand.vmem [shape: bf16[128,128], index: 1, kind: input, shape index: {}]   ;;  %s678_s2 = inlined_call_operand.vmem [shape: f32[1,128], index: 2, kind: input, shape index: {}]   ;;  %s679_s0 = inlined_call_operand.vmem [shape: bf16[176,128], index: 0, kind: input, shape index: {}]   ;;  %s680_s3 = inlined_call_operand.vmem [shape: f32[176,128], index: 3, kind: output, shape index: {}]  }
   0x1   :  { %v427_v0 = vld [vmem:[%s677_s1 + $0x38] sm:$0xff]  ;;  %v426_v1 = vld [vmem:[%s677_s1 + $0x30] sm:$0xff]  ;;  %v425_v2 = vld [vmem:[%s677_s1 + $0x28] sm:$0xff] }
   0x2   :  { %482 = vmatpush.bf16.msra.mxu1 %v427_v0  ;;  %483 = vmatpush.bf16.msra.mxu2 %v427_v0  ;;  %v424_v3 = vld [vmem:[%s677_s1 + $0x20] sm:$0xff]  ;;  %v423_v4 = vld [vmem:[%s677_s1 + $0x18] sm:$0xff]  ;;  %v422_v5 = vld [vmem:[%s677_s1 + $0x10] sm:$0xff] }
   0x3   :  { %484 = vmatpush.bf16.msra.mxu3 %v427_v0  ;;  %203 = vmatpush.bf16.msra.mxu0 %v427_v0  ;;  %v473_v6 = vld [vmem:[%s679_s0 + $0x10] sm:$0xff]   ;;  %v476_v7 = vld [vmem:[%s679_s0 + $0x28] sm:$0xff]   ;;  %v479_v8 = vld [vmem:[%s679_s0 + $0x40] sm:$0xff]  }
   0x4   :  { %v429_v9 = vld [vmem:[%s679_s0] sm:$0xff]   ;;  %v438_v10 = vunpack.c.l.bf16 %v473_v6  ;;  %v439_v11 = vunpack.c.h.bf16 %v473_v6  ;;  %v450_v12 = vunpack.c.l.bf16 %v476_v7  ;;  %v451_v13 = vunpack.c.h.bf16 %v476_v7  ;;  %v421_v14 = vld [vmem:[%s677_s1 + $0x8] sm:$0xff]  ;;  %v474_v32 = vld [vmem:[%s679_s0 + $0x18] sm:$0xff]  }
   0x5   :  { %v462_v15 = vunpack.c.l.bf16 %v479_v8  ;;  %v463_v16 = vunpack.c.h.bf16 %v479_v8  ;;  %v430_v17 = vunpack.c.l.bf16 %v429_v9  ;;  %v431_v18 = vunpack.c.h.bf16 %v429_v9  ;;  %v420_v23 = vld [vmem:[%s677_s1] sm:$0xff]  ;;  %v477_v33 = vld [vmem:[%s679_s0 + $0x30] sm:$0xff]   ;;  %v480_v34 = vld [vmem:[%s679_s0 + $0x48] sm:$0xff]  }
   0x6   :  { %485 = vmatpush.bf16.msra.mxu1 %v426_v1  ;;  %486 = vmatpush.bf16.msra.mxu2 %v426_v1  ;;  %v88_v19 = vmax.f32 %v438_v10, 0.0  ;;  %v89_v20 = vmax.f32 %v439_v11, 0.0  ;;  %v94_v21 = vmax.f32 %v450_v12, 0.0  ;;  %v95_v22 = vmax.f32 %v451_v13, 0.0  ;;  %v472_v35 = vld [vmem:[%s679_s0 + $0x8] sm:$0xff]   ;;  %v475_v56 = vld [vmem:[%s679_s0 + $0x20] sm:$0xff]  }
   0x7   :  { %487 = vmatpush.bf16.msra.mxu3 %v426_v1  ;;  %204 = vmatpush.bf16.msra.mxu0 %v426_v1  ;;  %v100_v24 = vmax.f32 %v462_v15, 0.0  ;;  %v101_v25 = vmax.f32 %v463_v16, 0.0  ;;  %v84_v26 = vmax.f32 %v430_v17, 0.0  ;;  %v85_v27 = vmax.f32 %v431_v18, 0.0  ;;  %v478_v57 = vld [vmem:[%s679_s0 + $0x38] sm:$0xff]   ;;  %v481_v58 = vld [vmem:[%s679_s0 + $0x50] sm:$0xff]  }
   0x8   :  { %v108_v28 = vpack.c.bf16 %v89_v20, %v88_v19  ;;  %v111_v29 = vpack.c.bf16 %v95_v22, %v94_v21  ;;  %v442_v36 = vunpack.c.l.bf16 %v474_v32  ;;  %v443_v37 = vunpack.c.h.bf16 %v474_v32  ;;  %v587_v10 = vld [vmem:[%s678_s2] ss:$0 sm:$0xff] }
   0x9   :  { %v114_v30 = vpack.c.bf16 %v101_v25, %v100_v24  ;;  %v106_v31 = vpack.c.bf16 %v85_v27, %v84_v26  ;;  %v454_v38 = vunpack.c.l.bf16 %v477_v33  ;;  %v455_v39 = vunpack.c.h.bf16 %v477_v33 }
   0xa   :  { %488 = vmatpush.bf16.msra.mxu1 %v425_v2  ;;  %489 = vmatpush.bf16.msra.mxu2 %v425_v2  ;;  %v466_v40 = vunpack.c.l.bf16 %v480_v34  ;;  %v467_v41 = vunpack.c.h.bf16 %v480_v34  ;;  %v434_v42 = vunpack.c.l.bf16 %v472_v35  ;;  %v435_v43 = vunpack.c.h.bf16 %v472_v35 }
   0xb   :  { %490 = vmatpush.bf16.msra.mxu3 %v425_v2  ;;  %205 = vmatpush.bf16.msra.mxu0 %v425_v2  ;;  %v90_v44 = vmax.f32 %v442_v36, 0.0  ;;  %v91_v45 = vmax.f32 %v443_v37, 0.0  ;;  %v96_v46 = vmax.f32 %v454_v38, 0.0  ;;  %v97_v47 = vmax.f32 %v455_v39, 0.0 }
   0xc   :  { %v102_v48 = vmax.f32 %v466_v40, 0.0  ;;  %v103_v49 = vmax.f32 %v467_v41, 0.0  ;;  %v86_v50 = vmax.f32 %v434_v42, 0.0  ;;  %v87_v51 = vmax.f32 %v435_v43, 0.0 }
   0xd   :  { %v109_v52 = vpack.c.bf16 %v91_v45, %v90_v44  ;;  %v112_v53 = vpack.c.bf16 %v97_v47, %v96_v46  ;;  %v446_v59 = vunpack.c.l.bf16 %v475_v56  ;;  %v447_v60 = vunpack.c.h.bf16 %v475_v56 }
   0xe   :  { %491 = vmatpush.bf16.msra.mxu1 %v424_v3  ;;  %492 = vmatpush.bf16.msra.mxu2 %v424_v3  ;;  %v115_v54 = vpack.c.bf16 %v103_v49, %v102_v48  ;;  %v107_v55 = vpack.c.bf16 %v87_v51, %v86_v50  ;;  %v458_v61 = vunpack.c.l.bf16 %v478_v57  ;;  %v459_v62 = vunpack.c.h.bf16 %v478_v57 }
   0xf   :  { %493 = vmatpush.bf16.msra.mxu3 %v424_v3  ;;  %206 = vmatpush.bf16.msra.mxu0 %v424_v3  ;;  %v470_v63 = vunpack.c.l.bf16 %v481_v58  ;;  %v471_v0 = vunpack.c.h.bf16 %v481_v58  ;;  %v92_v1 = vmax.f32 %v446_v59, 0.0  ;;  %v93_v2 = vmax.f32 %v447_v60, 0.0 }
  0x10   :  { %v98_v3 = vmax.f32 %v458_v61, 0.0 }
  0x11   :  { %v105_v6 = vmax.f32 %v471_v0, 0.0  ;;  %v110_v7 = vpack.c.bf16 %v93_v2, %v92_v1 }
  0x12   :  { %494 = vmatpush.bf16.msra.mxu1 %v423_v4  ;;  %495 = vmatpush.bf16.msra.mxu2 %v423_v4 }
  0x13   :  { %496 = vmatpush.bf16.msra.mxu3 %v423_v4  ;;  %207 = vmatpush.bf16.msra.mxu0 %v423_v4  ;;  %v99_v4 = vmax.f32 %v459_v62, 0.0 }
  0x15   :  { %v113_v8 = vpack.c.bf16 %v99_v4, %v98_v3 }
  0x16   :  { %497 = vmatpush.bf16.msra.mxu1 %v422_v5  ;;  %498 = vmatpush.bf16.msra.mxu2 %v422_v5 }
  0x17   :  { %499 = vmatpush.bf16.msra.mxu3 %v422_v5  ;;  %208 = vmatpush.bf16.msra.mxu0 %v422_v5  ;;  %v104_v5 = vmax.f32 %v470_v63, 0.0 }
  0x19   :  { %v116_v9 = vpack.c.bf16 %v105_v6, %v104_v5 }
  0x1a   :  { %500 = vmatpush.bf16.msra.mxu1 %v421_v14  ;;  %501 = vmatpush.bf16.msra.mxu2 %v421_v14 }
  0x1b   :  { %502 = vmatpush.bf16.msra.mxu3 %v421_v14  ;;  %209 = vmatpush.bf16.msra.mxu0 %v421_v14 }
  0x1e   :  { %503 = vmatpush.bf16.msra.mxu1 %v420_v23  ;;  %504 = vmatpush.bf16.msra.mxu2 %v420_v23 }
  0x1f   :  { %505 = vmatpush.bf16.msra.mxu3 %v420_v23  ;;  %210 = vmatpush.bf16.msra.mxu0 %v420_v23 }
  0x21   :  { %221 = vmatmul.bf16.vlgmr.msra.gmra.mxu1 %v108_v28  ;;  %236 = vmatmul.bf16.vlgmr.msra.gmra.mxu2 %v111_v29 }
  0x22   :  { %251 = vmatmul.bf16.vlgmr.msra.gmra.mxu3 %v114_v30  ;;  %211 = vmatmul.bf16.vlgmr.msra.gmra.mxu0 %v106_v31 }
  0x31   :  { %226 = vmatmul.bf16.gmra.mxu1 %v109_v52  ;;  %241 = vmatmul.bf16.gmra.mxu2 %v112_v53 }
  0x32   :  { %256 = vmatmul.bf16.gmra.mxu3 %v115_v54  ;;  %216 = vmatmul.bf16.gmra.mxu0 %v107_v55 }
  0x41   :  { %231 = vmatmul.bf16.gmra.mxu1 %v110_v7  ;;  %246 = vmatmul.bf16.gmra.mxu2 %v113_v8 }
  0x42   :  { %261 = vmatmul.bf16.gmra.mxu3 %v116_v9 }
  0x9e   :  { %v222_v11 = vpop.f32.mrf.mxu1 }
  0x9f   :  { %v344_v12 = vadd.f32 %v587_v10, %v222_v11  ;;  %v212_v13 = vpop.f32.mrf.mxu0 }
  0xa0   :  { %v340_v14 = vadd.f32 %v587_v10, %v212_v13 }
  0xa1   :  { %366 = vst [vmem:[%s680_s3 + $0x20] sm:$0xff] %v344_v12 }
  0xa2   :  { %362 = vst [vmem:[%s680_s3] sm:$0xff] %v340_v14 }
  0xa4   :  { %v237_v15 = vpop.f32.mrf.mxu2 }
  0xa5   :  { %v350_v16 = vadd.f32 %v587_v10, %v237_v15  ;;  %v252_v17 = vpop.f32.mrf.mxu3 }
  0xa6   :  { %v356_v18 = vadd.f32 %v587_v10, %v252_v17  ;;  %v224_v19 = vpop.f32.mrf.mxu1 }
  0xa7   :  { %372 = vst [vmem:[%s680_s3 + $0x50] sm:$0xff] %v350_v16  ;;  %v345_v20 = vadd.f32 %v587_v10, %v224_v19  ;;  %v214_v21 = vpop.f32.mrf.mxu0 }
  0xa8   :  { %378 = vst [vmem:[%s680_s3 + $0x80] sm:$0xff] %v356_v18  ;;  %v341_v22 = vadd.f32 %v587_v10, %v214_v21 }
  0xa9   :  { %367 = vst [vmem:[%s680_s3 + $0x28] sm:$0xff] %v345_v20 }
  0xaa   :  { %363 = vst [vmem:[%s680_s3 + $0x8] sm:$0xff] %v341_v22 }
  0xac   :  { %v239_v23 = vpop.f32.mrf.mxu2 }
  0xad   :  { %v351_v24 = vadd.f32 %v587_v10, %v239_v23  ;;  %v254_v25 = vpop.f32.mrf.mxu3 }
  0xae   :  { %v357_v26 = vadd.f32 %v587_v10, %v254_v25  ;;  %v227_v27 = vpop.f32.mrf.mxu1 }
  0xaf   :  { %373 = vst [vmem:[%s680_s3 + $0x58] sm:$0xff] %v351_v24  ;;  %v346_v28 = vadd.f32 %v587_v10, %v227_v27  ;;  %v217_v29 = vpop.f32.mrf.mxu0 }
  0xb0   :  { %379 = vst [vmem:[%s680_s3 + $0x88] sm:$0xff] %v357_v26  ;;  %v342_v30 = vadd.f32 %v587_v10, %v217_v29 }
  0xb1   :  { %368 = vst [vmem:[%s680_s3 + $0x30] sm:$0xff] %v346_v28 }
  0xb2   :  { %364 = vst [vmem:[%s680_s3 + $0x10] sm:$0xff] %v342_v30 }
  0xb4   :  { %v242_v31 = vpop.f32.mrf.mxu2 }
  0xb5   :  { %v352_v32 = vadd.f32 %v587_v10, %v242_v31  ;;  %v257_v33 = vpop.f32.mrf.mxu3 }
  0xb6   :  { %v358_v34 = vadd.f32 %v587_v10, %v257_v33  ;;  %v229_v35 = vpop.f32.mrf.mxu1 }
  0xb7   :  { %374 = vst [vmem:[%s680_s3 + $0x60] sm:$0xff] %v352_v32  ;;  %v347_v36 = vadd.f32 %v587_v10, %v229_v35  ;;  %v219_v37 = vpop.f32.mrf.mxu0 }
  0xb8   :  { %380 = vst [vmem:[%s680_s3 + $0x90] sm:$0xff] %v358_v34  ;;  %v343_v38 = vadd.f32 %v587_v10, %v219_v37 }
  0xb9   :  { %369 = vst [vmem:[%s680_s3 + $0x38] sm:$0xff] %v347_v36 }
  0xba   :  { %365 = vst [vmem:[%s680_s3 + $0x18] sm:$0xff] %v343_v38 }
  0xbc   :  { %v244_v39 = vpop.f32.mrf.mxu2 }
  0xbd   :  { %v353_v40 = vadd.f32 %v587_v10, %v244_v39  ;;  %v259_v41 = vpop.f32.mrf.mxu3 }
  0xbe   :  { %v359_v42 = vadd.f32 %v587_v10, %v259_v41  ;;  %v232_v43 = vpop.f32.mrf.mxu1 }
  0xbf   :  { %375 = vst [vmem:[%s680_s3 + $0x68] sm:$0xff] %v353_v40  ;;  %v348_v44 = vadd.f32 %v587_v10, %v232_v43 }
  0xc0   :  { %381 = vst [vmem:[%s680_s3 + $0x98] sm:$0xff] %v359_v42 }
  0xc1   :  { %370 = vst [vmem:[%s680_s3 + $0x40] sm:$0xff] %v348_v44 }
  0xc4   :  { %v247_v45 = vpop.f32.mrf.mxu2 }
  0xc5   :  { %v354_v46 = vadd.f32 %v587_v10, %v247_v45  ;;  %v262_v47 = vpop.f32.mrf.mxu3 }
  0xc6   :  { %v360_v48 = vadd.f32 %v587_v10, %v262_v47  ;;  %v234_v49 = vpop.f32.mrf.mxu1 }
  0xc7   :  { %376 = vst [vmem:[%s680_s3 + $0x70] sm:$0xff] %v354_v46  ;;  %v349_v50 = vadd.f32 %v587_v10, %v234_v49 }
  0xc8   :  { %382 = vst [vmem:[%s680_s3 + $0xa0] sm:$0xff] %v360_v48 }
  0xc9   :  { %371 = vst [vmem:[%s680_s3 + $0x48] sm:$0xff] %v349_v50 }
  0xcc   :  { %v249_v51 = vpop.f32.mrf.mxu2 }
  0xcd   :  { %v355_v52 = vadd.f32 %v587_v10, %v249_v51  ;;  %v264_v53 = vpop.f32.mrf.mxu3 }
  0xce   :  { %v361_v54 = vadd.f32 %v587_v10, %v264_v53 }
  0xcf   :  { %377 = vst [vmem:[%s680_s3 + $0x78] sm:$0xff] %v355_v52 }
  0xd0   :  { %383 = vst [vmem:[%s680_s3 + $0xa8] sm:$0xff] %v361_v54 }

// kernel: unet_forward.49
= control target key start
LH: loop header
LB: loop body
LE: loop exit
PB: predicated region body
PF: predicated region fallthrough
CT: control target
= control target key end

     0   :  { %s510_s0 = inlined_call_operand.vmem [shape: f32[512,128], index: 0, kind: input, shape index: {}]   ;;  %s511_s1 = inlined_call_operand.vmem [shape: f32[8,128], index: 1, kind: output, shape index: {0}]   ;;  %s512_s2 = inlined_call_operand.vmem [shape: f32[8,128], index: 2, kind: output, shape index: {1}]  }
   0x1   :  { %v16_v0 = vld [vmem:[%s510_s0] sm:$0xff]  ;;  %v17_v1 = vld [vmem:[%s510_s0 + $0x8] sm:$0xff]  ;;  %v18_v2 = vld [vmem:[%s510_s0 + $0x10] sm:$0xff] }
   0x2   :  { %v19_v3 = vld [vmem:[%s510_s0 + $0x18] sm:$0xff]  ;;  %v81_v4 = vadd.f32 %v17_v1, %v16_v0  ;;  %v153_v5 = vmul.f32 %v16_v0, %v16_v0  ;;  %v154_v6 = vmul.f32 %v17_v1, %v17_v1  ;;  %v155_v7 = vmul.f32 %v18_v2, %v18_v2  ;;  %v20_v8 = vld [vmem:[%s510_s0 + $0x20] sm:$0xff]  ;;  %v21_v12 = vld [vmem:[%s510_s0 + $0x28] sm:$0xff] }
   0x3   :  { %v156_v10 = vmul.f32 %v19_v3, %v19_v3  ;;  %v157_v14 = vmul.f32 %v20_v8, %v20_v8  ;;  %v22_v16 = vld [vmem:[%s510_s0 + $0x30] sm:$0xff]  ;;  %v158_v18 = vmul.f32 %v21_v12, %v21_v12  ;;  %v23_v20 = vld [vmem:[%s510_s0 + $0x38] sm:$0xff]  ;;  %v24_v24 = vld [vmem:[%s510_s0 + $0x40] sm:$0xff] }
   0x4   :  { %v82_v9 = vadd.f32 %v81_v4, %v18_v2  ;;  %v217_v11 = vadd.f32 %v154_v6, %v153_v5  ;;  %v159_v22 = vmul.f32 %v22_v16, %v22_v16  ;;  %v160_v26 = vmul.f32 %v23_v20, %v23_v20  ;;  %v25_v28 = vld [vmem:[%s510_s0 + $0x48] sm:$0xff]  ;;  %v26_v32 = vld [vmem:[%s510_s0 + $0x50] sm:$0xff]  ;;  %v27_v36 = vld [vmem:[%s510_s0 + $0x58] sm:$0xff] }
   0x5   :  { %v161_v30 = vmul.f32 %v24_v24, %v24_v24  ;;  %v162_v34 = vmul.f32 %v25_v28, %v25_v28  ;;  %v163_v38 = vmul.f32 %v26_v32, %v26_v32  ;;  %v28_v40 = vld [vmem:[%s510_s0 + $0x60] sm:$0xff]  ;;  %v164_v42 = vmul.f32 %v27_v36, %v27_v36  ;;  %v29_v44 = vld [vmem:[%s510_s0 + $0x68] sm:$0xff]  ;;  %v30_v48 = vld [vmem:[%s510_s0 + $0x70] sm:$0xff] }
   0x6   :  { %v83_v13 = vadd.f32 %v82_v9, %v19_v3  ;;  %v218_v15 = vadd.f32 %v217_v11, %v155_v7  ;;  %v165_v46 = vmul.f32 %v28_v40, %v28_v40  ;;  %v166_v50 = vmul.f32 %v29_v44, %v29_v44  ;;  %v31_v52 = vld [vmem:[%s510_s0 + $0x78] sm:$0xff]  ;;  %v32_v56 = vld [vmem:[%s510_s0 + $0x80] sm:$0xff]  ;;  %v33_v60 = vld [vmem:[%s510_s0 + $0x88] sm:$0xff] }
   0x7   :  { %v167_v54 = vmul.f32 %v30_v48, %v30_v48  ;;  %v168_v58 = vmul.f32 %v31_v52, %v31_v52  ;;  %v169_v62 = vmul.f32 %v32_v56, %v32_v56  ;;  %v34_v0 = vld [vmem:[%s510_s0 + $0x90] sm:$0xff]  ;;  %v170_v2 = vmul.f32 %v33_v60, %v33_v60  ;;  %v35_v4 = vld [vmem:[%s510_s0 + $0x98] sm:$0xff] }
   0x8   :  { %v84_v17 = vadd.f32 %v83_v13, %v20_v8  ;;  %v219_v19 = vadd.f32 %v218_v15, %v156_v10  ;;  %v171_v6 = vmul.f32 %v34_v0, %v34_v0  ;;  %v36_v8 = vld [vmem:[%s510_s0 + $0xa0] sm:$0xff]  ;;  %v172_v10 = vmul.f32 %v35_v4, %v35_v4 }
   0xa   :  { %v85_v21 = vadd.f32 %v84_v17, %v21_v12  ;;  %v220_v23 = vadd.f32 %v219_v19, %v157_v14  ;;  %v37_v12 = vld [vmem:[%s510_s0 + $0xa8] sm:$0xff]  ;;  %v173_v14 = vmul.f32 %v36_v8, %v36_v8 }
   0xc   :  { %v86_v25 = vadd.f32 %v85_v21, %v22_v16  ;;  %v221_v27 = vadd.f32 %v220_v23, %v158_v18  ;;  %v38_v16 = vld [vmem:[%s510_s0 + $0xb0] sm:$0xff]  ;;  %v174_v18 = vmul.f32 %v37_v12, %v37_v12 }
   0xe   :  { %v87_v29 = vadd.f32 %v86_v25, %v23_v20  ;;  %v222_v31 = vadd.f32 %v221_v27, %v159_v22  ;;  %v39_v20 = vld [vmem:[%s510_s0 + $0xb8] sm:$0xff]  ;;  %v175_v22 = vmul.f32 %v38_v16, %v38_v16 }
  0x10   :  { %v88_v33 = vadd.f32 %v87_v29, %v24_v24  ;;  %v223_v35 = vadd.f32 %v222_v31, %v160_v26  ;;  %v40_v24 = vld [vmem:[%s510_s0 + $0xc0] sm:$0xff]  ;;  %v176_v26 = vmul.f32 %v39_v20, %v39_v20 }
  0x12   :  { %v89_v37 = vadd.f32 %v88_v33, %v25_v28  ;;  %v224_v39 = vadd.f32 %v223_v35, %v161_v30  ;;  %v41_v28 = vld [vmem:[%s510_s0 + $0xc8] sm:$0xff]  ;;  %v177_v30 = vmul.f32 %v40_v24, %v40_v24 }
  0x14   :  { %v90_v41 = vadd.f32 %v89_v37, %v26_v32  ;;  %v225_v43 = vadd.f32 %v224_v39, %v162_v34  ;;  %v42_v32 = vld [vmem:[%s510_s0 + $0xd0] sm:$0xff]  ;;  %v178_v34 = vmul.f32 %v41_v28, %v41_v28 }
  0x16   :  { %v91_v45 = vadd.f32 %v90_v41, %v27_v36  ;;  %v226_v47 = vadd.f32 %v225_v43, %v163_v38  ;;  %v43_v36 = vld [vmem:[%s510_s0 + $0xd8] sm:$0xff]  ;;  %v179_v38 = vmul.f32 %v42_v32, %v42_v32 }
  0x18   :  { %v92_v49 = vadd.f32 %v91_v45, %v28_v40  ;;  %v227_v51 = vadd.f32 %v226_v47, %v164_v42  ;;  %v44_v40 = vld [vmem:[%s510_s0 + $0xe0] sm:$0xff]  ;;  %v180_v42 = vmul.f32 %v43_v36, %v43_v36 }
  0x1a   :  { %v93_v53 = vadd.f32 %v92_v49, %v29_v44  ;;  %v228_v55 = vadd.f32 %v227_v51, %v165_v46  ;;  %v45_v44 = vld [vmem:[%s510_s0 + $0xe8] sm:$0xff]  ;;  %v181_v46 = vmul.f32 %v44_v40, %v44_v40 }
  0x1c   :  { %v94_v57 = vadd.f32 %v93_v53, %v30_v48  ;;  %v229_v59 = vadd.f32 %v228_v55, %v166_v50  ;;  %v46_v48 = vld [vmem:[%s510_s0 + $0xf0] sm:$0xff]  ;;  %v182_v50 = vmul.f32 %v45_v44, %v45_v44 }
  0x1e   :  { %v95_v61 = vadd.f32 %v94_v57, %v31_v52  ;;  %v230_v63 = vadd.f32 %v229_v59, %v167_v54  ;;  %v47_v52 = vld [vmem:[%s510_s0 + $0xf8] sm:$0xff]  ;;  %v183_v54 = vmul.f32 %v46_v48, %v46_v48 }
  0x20   :  { %v96_v1 = vadd.f32 %v95_v61, %v32_v56  ;;  %v231_v3 = vadd.f32 %v230_v63, %v168_v58  ;;  %v48_v56 = vld [vmem:[%s510_s0 + $0x100] sm:$0xff]  ;;  %v184_v58 = vmul.f32 %v47_v52, %v47_v52 }
  0x22   :  { %v97_v5 = vadd.f32 %v96_v1, %v33_v60  ;;  %v232_v7 = vadd.f32 %v231_v3, %v169_v62  ;;  %v49_v60 = vld [vmem:[%s510_s0 + $0x108] sm:$0xff]  ;;  %v185_v62 = vmul.f32 %v48_v56, %v48_v56 }
  0x24   :  { %v98_v9 = vadd.f32 %v97_v5, %v34_v0  ;;  %v233_v11 = vadd.f32 %v232_v7, %v170_v2  ;;  %v50_v0 = vld [vmem:[%s510_s0 + $0x110] sm:$0xff]  ;;  %v186_v2 = vmul.f32 %v49_v60, %v49_v60 }
  0x26   :  { %v99_v13 = vadd.f32 %v98_v9, %v35_v4  ;;  %v234_v15 = vadd.f32 %v233_v11, %v171_v6  ;;  %v51_v4 = vld [vmem:[%s510_s0 + $0x118] sm:$0xff]  ;;  %v187_v6 = vmul.f32 %v50_v0, %v50_v0 }
  0x28   :  { %v100_v17 = vadd.f32 %v99_v13, %v36_v8  ;;  %v235_v19 = vadd.f32 %v234_v15, %v172_v10  ;;  %v52_v8 = vld [vmem:[%s510_s0 + $0x120] sm:$0xff]  ;;  %v188_v10 = vmul.f32 %v51_v4, %v51_v4 }
  0x2a   :  { %v101_v21 = vadd.f32 %v100_v17, %v37_v12  ;;  %v236_v23 = vadd.f32 %v235_v19, %v173_v14  ;;  %v53_v12 = vld [vmem:[%s510_s0 + $0x128] sm:$0xff]  ;;  %v189_v14 = vmul.f32 %v52_v8, %v52_v8 }
  0x2c   :  { %v102_v25 = vadd.f32 %v101_v21, %v38_v16  ;;  %v237_v27 = vadd.f32 %v236_v23, %v174_v18  ;;  %v54_v16 = vld [vmem:[%s510_s0 + $0x130] sm:$0xff]  ;;  %v190_v18 = vmul.f32 %v53_v12, %v53_v12 }
  0x2e   :  { %v103_v29 = vadd.f32 %v102_v25, %v39_v20  ;;  %v238_v31 = vadd.f32 %v237_v27, %v175_v22  ;;  %v55_v20 = vld [vmem:[%s510_s0 + $0x138] sm:$0xff]  ;;  %v191_v22 = vmul.f32 %v54_v16, %v54_v16 }
  0x30   :  { %v104_v33 = vadd.f32 %v103_v29, %v40_v24  ;;  %v239_v35 = vadd.f32 %v238_v31, %v176_v26  ;;  %v56_v24 = vld [vmem:[%s510_s0 + $0x140] sm:$0xff]  ;;  %v192_v26 = vmul.f32 %v55_v20, %v55_v20 }
  0x32   :  { %v105_v37 = vadd.f32 %v104_v33, %v41_v28  ;;  %v240_v39 = vadd.f32 %v239_v35, %v177_v30  ;;  %v57_v28 = vld [vmem:[%s510_s0 + $0x148] sm:$0xff]  ;;  %v193_v30 = vmul.f32 %v56_v24, %v56_v24 }
  0x34   :  { %v106_v41 = vadd.f32 %v105_v37, %v42_v32  ;;  %v241_v43 = vadd.f32 %v240_v39, %v178_v34  ;;  %v58_v32 = vld [vmem:[%s510_s0 + $0x150] sm:$0xff]  ;;  %v194_v34 = vmul.f32 %v57_v28, %v57_v28 }
  0x36   :  { %v107_v45 = vadd.f32 %v106_v41, %v43_v36  ;;  %v242_v47 = vadd.f32 %v241_v43, %v179_v38  ;;  %v59_v36 = vld [vmem:[%s510_s0 + $0x158] sm:$0xff]  ;;  %v195_v38 = vmul.f32 %v58_v32, %v58_v32 }
  0x38   :  { %v108_v49 = vadd.f32 %v107_v45, %v44_v40  ;;  %v243_v51 = vadd.f32 %v242_v47, %v180_v42  ;;  %v60_v40 = vld [vmem:[%s510_s0 + $0x160] sm:$0xff]  ;;  %v196_v42 = vmul.f32 %v59_v36, %v59_v36 }
  0x3a   :  { %v109_v53 = vadd.f32 %v108_v49, %v45_v44  ;;  %v244_v55 = vadd.f32 %v243_v51, %v181_v46  ;;  %v61_v44 = vld [vmem:[%s510_s0 + $0x168] sm:$0xff]  ;;  %v197_v46 = vmul.f32 %v60_v40, %v60_v40 }
  0x3c   :  { %v110_v57 = vadd.f32 %v109_v53, %v46_v48  ;;  %v245_v59 = vadd.f32 %v244_v55, %v182_v50  ;;  %v62_v48 = vld [vmem:[%s510_s0 + $0x170] sm:$0xff]  ;;  %v198_v50 = vmul.f32 %v61_v44, %v61_v44 }
  0x3e   :  { %v111_v61 = vadd.f32 %v110_v57, %v47_v52  ;;  %v246_v63 = vadd.f32 %v245_v59, %v183_v54  ;;  %v63_v52 = vld [vmem:[%s510_s0 + $0x178] sm:$0xff]  ;;  %v199_v54 = vmul.f32 %v62_v48, %v62_v48 }
  0x40   :  { %v112_v1 = vadd.f32 %v111_v61, %v48_v56  ;;  %v247_v3 = vadd.f32 %v246_v63, %v184_v58  ;;  %v64_v56 = vld [vmem:[%s510_s0 + $0x180] sm:$0xff]  ;;  %v200_v58 = vmul.f32 %v63_v52, %v63_v52 }
  0x42   :  { %v113_v5 = vadd.f32 %v112_v1, %v49_v60  ;;  %v248_v7 = vadd.f32 %v247_v3, %v185_v62  ;;  %v65_v60 = vld [vmem:[%s510_s0 + $0x188] sm:$0xff]  ;;  %v201_v62 = vmul.f32 %v64_v56, %v64_v56 }
  0x44   :  { %v114_v9 = vadd.f32 %v113_v5, %v50_v0  ;;  %v249_v11 = vadd.f32 %v248_v7, %v186_v2  ;;  %v66_v0 = vld [vmem:[%s510_s0 + $0x190] sm:$0xff]  ;;  %v202_v2 = vmul.f32 %v65_v60, %v65_v60 }
  0x46   :  { %v115_v13 = vadd.f32 %v114_v9, %v51_v4  ;;  %v250_v15 = vadd.f32 %v249_v11, %v187_v6  ;;  %v67_v4 = vld [vmem:[%s510_s0 + $0x198] sm:$0xff]  ;;  %v203_v6 = vmul.f32 %v66_v0, %v66_v0 }
  0x48   :  { %v116_v17 = vadd.f32 %v115_v13, %v52_v8  ;;  %v251_v19 = vadd.f32 %v250_v15, %v188_v10  ;;  %v68_v8 = vld [vmem:[%s510_s0 + $0x1a0] sm:$0xff]  ;;  %v204_v10 = vmul.f32 %v67_v4, %v67_v4 }
  0x4a   :  { %v117_v21 = vadd.f32 %v116_v17, %v53_v12  ;;  %v252_v23 = vadd.f32 %v251_v19, %v189_v14  ;;  %v69_v12 = vld [vmem:[%s510_s0 + $0x1a8] sm:$0xff]  ;;  %v205_v14 = vmul.f32 %v68_v8, %v68_v8 }
  0x4c   :  { %v118_v25 = vadd.f32 %v117_v21, %v54_v16  ;;  %v253_v27 = vadd.f32 %v252_v23, %v190_v18  ;;  %v70_v16 = vld [vmem:[%s510_s0 + $0x1b0] sm:$0xff]  ;;  %v206_v18 = vmul.f32 %v69_v12, %v69_v12 }
  0x4e   :  { %v119_v29 = vadd.f32 %v118_v25, %v55_v20  ;;  %v254_v31 = vadd.f32 %v253_v27, %v191_v22  ;;  %v71_v20 = vld [vmem:[%s510_s0 + $0x1b8] sm:$0xff]  ;;  %v207_v22 = vmul.f32 %v70_v16, %v70_v16 }
  0x50   :  { %v120_v33 = vadd.f32 %v119_v29, %v56_v24  ;;  %v255_v35 = vadd.f32 %v254_v31, %v192_v26  ;;  %v72_v24 = vld [vmem:[%s510_s0 + $0x1c0] sm:$0xff]  ;;  %v208_v26 = vmul.f32 %v71_v20, %v71_v20 }
  0x52   :  { %v121_v37 = vadd.f32 %v120_v33, %v57_v28  ;;  %v256_v39 = vadd.f32 %v255_v35, %v193_v30  ;;  %v73_v28 = vld [vmem:[%s510_s0 + $0x1c8] sm:$0xff]  ;;  %v209_v30 = vmul.f32 %v72_v24, %v72_v24 }
  0x54   :  { %v122_v41 = vadd.f32 %v121_v37, %v58_v32  ;;  %v257_v43 = vadd.f32 %v256_v39, %v194_v34  ;;  %v74_v32 = vld [vmem:[%s510_s0 + $0x1d0] sm:$0xff]  ;;  %v210_v34 = vmul.f32 %v73_v28, %v73_v28 }
  0x56   :  { %v123_v45 = vadd.f32 %v122_v41, %v59_v36  ;;  %v258_v47 = vadd.f32 %v257_v43, %v195_v38  ;;  %v75_v36 = vld [vmem:[%s510_s0 + $0x1d8] sm:$0xff]  ;;  %v211_v38 = vmul.f32 %v74_v32, %v74_v32 }
  0x58   :  { %v124_v49 = vadd.f32 %v123_v45, %v60_v40  ;;  %v259_v51 = vadd.f32 %v258_v47, %v196_v42  ;;  %v76_v40 = vld [vmem:[%s510_s0 + $0x1e0] sm:$0xff]  ;;  %v212_v42 = vmul.f32 %v75_v36, %v75_v36 }
  0x5a   :  { %v125_v53 = vadd.f32 %v124_v49, %v61_v44  ;;  %v260_v55 = vadd.f32 %v259_v51, %v197_v46  ;;  %v77_v44 = vld [vmem:[%s510_s0 + $0x1e8] sm:$0xff]  ;;  %v213_v46 = vmul.f32 %v76_v40, %v76_v40 }
  0x5c   :  { %v126_v57 = vadd.f32 %v125_v53, %v62_v48  ;;  %v261_v59 = vadd.f32 %v260_v55, %v198_v50  ;;  %v78_v48 = vld [vmem:[%s510_s0 + $0x1f0] sm:$0xff]  ;;  %v214_v50 = vmul.f32 %v77_v44, %v77_v44 }
  0x5e   :  { %v127_v61 = vadd.f32 %v126_v57, %v63_v52  ;;  %v262_v63 = vadd.f32 %v261_v59, %v199_v54  ;;  %v79_v52 = vld [vmem:[%s510_s0 + $0x1f8] sm:$0xff]  ;;  %v215_v54 = vmul.f32 %v78_v48, %v78_v48 }
  0x5f   :  { %v216_v57 = vmul.f32 %v79_v52, %v79_v52 }
  0x60   :  { %v128_v1 = vadd.f32 %v127_v61, %v64_v56  ;;  %v263_v3 = vadd.f32 %v262_v63, %v200_v58 }
  0x62   :  { %v129_v5 = vadd.f32 %v128_v1, %v65_v60  ;;  %v264_v7 = vadd.f32 %v263_v3, %v201_v62 }
  0x64   :  { %v130_v9 = vadd.f32 %v129_v5, %v66_v0  ;;  %v265_v11 = vadd.f32 %v264_v7, %v202_v2 }
  0x66   :  { %v131_v13 = vadd.f32 %v130_v9, %v67_v4  ;;  %v266_v15 = vadd.f32 %v265_v11, %v203_v6 }
  0x68   :  { %v132_v17 = vadd.f32 %v131_v13, %v68_v8  ;;  %v267_v19 = vadd.f32 %v266_v15, %v204_v10 }
  0x6a   :  { %v133_v21 = vadd.f32 %v132_v17, %v69_v12  ;;  %v268_v23 = vadd.f32 %v267_v19, %v205_v14 }
  0x6c   :  { %v134_v25 = vadd.f32 %v133_v21, %v70_v16  ;;  %v269_v27 = vadd.f32 %v268_v23, %v206_v18 }
  0x6e   :  { %v135_v29 = vadd.f32 %v134_v25, %v71_v20  ;;  %v270_v31 = vadd.f32 %v269_v27, %v207_v22 }
  0x70   :  { %v136_v33 = vadd.f32 %v135_v29, %v72_v24  ;;  %v271_v35 = vadd.f32 %v270_v31, %v208_v26 }
  0x72   :  { %v137_v37 = vadd.f32 %v136_v33, %v73_v28  ;;  %v272_v39 = vadd.f32 %v271_v35, %v209_v30 }
  0x74   :  { %v138_v41 = vadd.f32 %v137_v37, %v74_v32  ;;  %v273_v43 = vadd.f32 %v272_v39, %v210_v34 }
  0x76   :  { %v139_v45 = vadd.f32 %v138_v41, %v75_v36  ;;  %v274_v47 = vadd.f32 %v273_v43, %v211_v38 }
  0x78   :  { %v140_v49 = vadd.f32 %v139_v45, %v76_v40  ;;  %v275_v51 = vadd.f32 %v274_v47, %v212_v42 }
  0x7a   :  { %v141_v53 = vadd.f32 %v140_v49, %v77_v44  ;;  %v276_v55 = vadd.f32 %v275_v51, %v213_v46 }
  0x7c   :  { %v142_v56 = vadd.f32 %v141_v53, %v78_v48  ;;  %v277_v58 = vadd.f32 %v276_v55, %v214_v50 }
  0x7e   :  { %v143_v59 = vadd.f32 %v142_v56, %v79_v52  ;;  %v278_v60 = vadd.f32 %v277_v58, %v215_v54 }
  0x80   :  { %v144_v61 = vrot.slane %v143_v59, 4  ;;  %v279_v62 = vadd.f32 %v278_v60, %v216_v57 }
  0x82   :  { %v145_v63 = vadd.f32 %v144_v61, %v143_v59  ;;  %v280_v0 = vrot.slane %v279_v62, 4 }
  0x84   :  { %v146_v1 = vrot.slane %v145_v63, 2  ;;  %v281_v2 = vadd.f32 %v280_v0, %v279_v62 }
  0x86   :  { %v147_v3 = vadd.f32 %v146_v1, %v145_v63  ;;  %v282_v4 = vrot.slane %v281_v2, 2 }
  0x88   :  { %v148_v5 = vrot.slane %v147_v3, 1  ;;  %v283_v6 = vadd.f32 %v282_v4, %v281_v2 }
  0x8a   :  { %v149_v7 = vadd.f32 %v148_v5, %v147_v3  ;;  %v284_v8 = vrot.slane %v283_v6, 1 }
  0x8c   :  { %v285_v9 = vadd.f32 %v284_v8, %v283_v6  ;;  %151 = vst [vmem:[%s511_s1] sm:$0xff] %v149_v7 }
  0x8e   :  { %287 = vst [vmem:[%s512_s2] sm:$0xff] %v285_v9 }

// kernel: unet_forward.50
= control target key start
LH: loop header
LB: loop body
LE: loop exit
PB: predicated region body
PF: predicated region fallthrough
CT: control target
= control target key end

     0   :  { %s829_s0 = inlined_call_operand.vmem [shape: f32[512,128], index: 0, kind: input, shape index: {}]   ;;  %s830_s1 = inlined_call_operand.vmem [shape: f32[1,128], index: 1, kind: input, shape index: {}]   ;;  %s831_s2 = inlined_call_operand.vmem [shape: f32[1,128], index: 2, kind: input, shape index: {}]   ;;  %s832_s3 = inlined_call_operand.vmem [shape: f32[512,128], index: 3, kind: output, shape index: {}]  }
   0x1   :  { %v14_v0 = vld [vmem:[%s829_s0] sm:$0xff]  ;;  %v15_v3 = vld [vmem:[%s829_s0 + $0x8] sm:$0xff]  ;;  %v16_v6 = vld [vmem:[%s829_s0 + $0x10] sm:$0xff] }
   0x2   :  { %v310_v1 = vld [vmem:[%s830_s1] ss:$0 sm:$0xff]  ;;  %v17_v7 = vld [vmem:[%s829_s0 + $0x18] sm:$0xff]  ;;  %v19_v12 = vld [vmem:[%s829_s0 + $0x28] sm:$0xff] }
   0x3   :  { %v315_v2 = vld [vmem:[%s831_s2] ss:$0 sm:$0xff]  ;;  %v82_v4 = vmul.f32 %v310_v1, %v14_v0  ;;  %v83_v5 = vmul.f32 %v310_v1, %v15_v3  ;;  %v84_v9 = vmul.f32 %v310_v1, %v16_v6  ;;  %v85_v10 = vmul.f32 %v310_v1, %v17_v7  ;;  %v20_v13 = vld [vmem:[%s829_s0 + $0x30] sm:$0xff]  ;;  %v21_v14 = vld [vmem:[%s829_s0 + $0x38] sm:$0xff] }
   0x4   :  { %v18_v8 = vld [vmem:[%s829_s0 + $0x20] sm:$0xff]  ;;  %v87_v17 = vmul.f32 %v310_v1, %v19_v12  ;;  %v88_v18 = vmul.f32 %v310_v1, %v20_v13  ;;  %v23_v20 = vld [vmem:[%s829_s0 + $0x48] sm:$0xff]  ;;  %v89_v23 = vmul.f32 %v310_v1, %v21_v14  ;;  %v24_v24 = vld [vmem:[%s829_s0 + $0x50] sm:$0xff] }
   0x5   :  { %v86_v11 = vmul.f32 %v310_v1, %v18_v8  ;;  %v150_v15 = vadd.f32 %v315_v2, %v82_v4  ;;  %v151_v16 = vadd.f32 %v315_v2, %v83_v5  ;;  %v22_v19 = vld [vmem:[%s829_s0 + $0x40] sm:$0xff]  ;;  %v152_v21 = vadd.f32 %v315_v2, %v84_v9  ;;  %v25_v27 = vld [vmem:[%s829_s0 + $0x58] sm:$0xff]  ;;  %v27_v33 = vld [vmem:[%s829_s0 + $0x68] sm:$0xff] }
   0x6   :  { %v153_v22 = vadd.f32 %v315_v2, %v85_v10  ;;  %v90_v26 = vmul.f32 %v310_v1, %v22_v19  ;;  %v155_v28 = vadd.f32 %v315_v2, %v87_v17  ;;  %v91_v29 = vmul.f32 %v310_v1, %v23_v20  ;;  %v26_v30 = vld [vmem:[%s829_s0 + $0x60] sm:$0xff]  ;;  %v28_v36 = vld [vmem:[%s829_s0 + $0x70] sm:$0xff]  ;;  %v29_v39 = vld [vmem:[%s829_s0 + $0x78] sm:$0xff] }
   0x7   :  { %214 = vst [vmem:[%s832_s3] sm:$0xff] %v150_v15  ;;  %v154_v25 = vadd.f32 %v315_v2, %v86_v11  ;;  %v156_v31 = vadd.f32 %v315_v2, %v88_v18  ;;  %v92_v32 = vmul.f32 %v310_v1, %v24_v24  ;;  %v157_v34 = vadd.f32 %v315_v2, %v89_v23  ;;  %v30_v42 = vld [vmem:[%s829_s0 + $0x80] sm:$0xff]  ;;  %v31_v45 = vld [vmem:[%s829_s0 + $0x88] sm:$0xff]  ;;  %v32_v48 = vld [vmem:[%s829_s0 + $0x90] sm:$0xff] }
   0x8   :  { %215 = vst [vmem:[%s832_s3 + $0x8] sm:$0xff] %v151_v16  ;;  %v93_v35 = vmul.f32 %v310_v1, %v25_v27  ;;  %v158_v37 = vadd.f32 %v315_v2, %v90_v26  ;;  %v94_v38 = vmul.f32 %v310_v1, %v26_v30  ;;  %v159_v40 = vadd.f32 %v315_v2, %v91_v29  ;;  %v33_v51 = vld [vmem:[%s829_s0 + $0x98] sm:$0xff]  ;;  %v34_v54 = vld [vmem:[%s829_s0 + $0xa0] sm:$0xff]  ;;  %v35_v57 = vld [vmem:[%s829_s0 + $0xa8] sm:$0xff] }
   0x9   :  { %216 = vst [vmem:[%s832_s3 + $0x10] sm:$0xff] %v152_v21  ;;  %v95_v41 = vmul.f32 %v310_v1, %v27_v33  ;;  %v160_v43 = vadd.f32 %v315_v2, %v92_v32  ;;  %v96_v44 = vmul.f32 %v310_v1, %v28_v36  ;;  %v97_v47 = vmul.f32 %v310_v1, %v29_v39  ;;  %v36_v60 = vld [vmem:[%s829_s0 + $0xb0] sm:$0xff]  ;;  %v37_v63 = vld [vmem:[%s829_s0 + $0xb8] sm:$0xff]  ;;  %v38_v4 = vld [vmem:[%s829_s0 + $0xc0] sm:$0xff] }
   0xa   :  { %217 = vst [vmem:[%s832_s3 + $0x18] sm:$0xff] %v153_v22  ;;  %v161_v46 = vadd.f32 %v315_v2, %v93_v35  ;;  %v162_v49 = vadd.f32 %v315_v2, %v94_v38  ;;  %v98_v50 = vmul.f32 %v310_v1, %v30_v42  ;;  %v99_v53 = vmul.f32 %v310_v1, %v31_v45  ;;  %v39_v7 = vld [vmem:[%s829_s0 + $0xc8] sm:$0xff]  ;;  %v40_v10 = vld [vmem:[%s829_s0 + $0xd0] sm:$0xff]  ;;  %v41_v13 = vld [vmem:[%s829_s0 + $0xd8] sm:$0xff] }
   0xb   :  { %218 = vst [vmem:[%s832_s3 + $0x20] sm:$0xff] %v154_v25  ;;  %v163_v52 = vadd.f32 %v315_v2, %v95_v41  ;;  %v164_v55 = vadd.f32 %v315_v2, %v96_v44  ;;  %v100_v56 = vmul.f32 %v310_v1, %v32_v48  ;;  %v165_v58 = vadd.f32 %v315_v2, %v97_v47  ;;  %v42_v16 = vld [vmem:[%s829_s0 + $0xe0] sm:$0xff]  ;;  %v43_v19 = vld [vmem:[%s829_s0 + $0xe8] sm:$0xff]  ;;  %v44_v22 = vld [vmem:[%s829_s0 + $0xf0] sm:$0xff] }
   0xc   :  { %219 = vst [vmem:[%s832_s3 + $0x28] sm:$0xff] %v155_v28  ;;  %v101_v59 = vmul.f32 %v310_v1, %v33_v51  ;;  %v166_v61 = vadd.f32 %v315_v2, %v98_v50  ;;  %v102_v62 = vmul.f32 %v310_v1, %v34_v54  ;;  %v167_v0 = vadd.f32 %v315_v2, %v99_v53  ;;  %v45_v25 = vld [vmem:[%s829_s0 + $0xf8] sm:$0xff]  ;;  %v46_v28 = vld [vmem:[%s829_s0 + $0x100] sm:$0xff]  ;;  %v51_v44 = vld [vmem:[%s829_s0 + $0x128] sm:$0xff] }
   0xd   :  { %220 = vst [vmem:[%s832_s3 + $0x30] sm:$0xff] %v156_v31  ;;  %v103_v3 = vmul.f32 %v310_v1, %v35_v57  ;;  %v168_v5 = vadd.f32 %v315_v2, %v100_v56  ;;  %v104_v6 = vmul.f32 %v310_v1, %v36_v60  ;;  %v105_v9 = vmul.f32 %v310_v1, %v37_v63  ;;  %v47_v31 = vld [vmem:[%s829_s0 + $0x108] sm:$0xff]  ;;  %v77_v41 = vld [vmem:[%s829_s0 + $0x1f8] sm:$0xff]  ;;  %v52_v47 = vld [vmem:[%s829_s0 + $0x130] sm:$0xff] }
   0xe   :  { %221 = vst [vmem:[%s832_s3 + $0x38] sm:$0xff] %v157_v34  ;;  %v169_v8 = vadd.f32 %v315_v2, %v101_v59  ;;  %v170_v11 = vadd.f32 %v315_v2, %v102_v62  ;;  %v106_v12 = vmul.f32 %v310_v1, %v38_v4  ;;  %v107_v15 = vmul.f32 %v310_v1, %v39_v7  ;;  %v48_v34 = vld [vmem:[%s829_s0 + $0x110] sm:$0xff]  ;;  %v53_v51 = vld [vmem:[%s829_s0 + $0x138] sm:$0xff]  ;;  %v54_v54 = vld [vmem:[%s829_s0 + $0x140] sm:$0xff] }
   0xf   :  { %222 = vst [vmem:[%s832_s3 + $0x40] sm:$0xff] %v158_v37  ;;  %v171_v14 = vadd.f32 %v315_v2, %v103_v3  ;;  %v172_v17 = vadd.f32 %v315_v2, %v104_v6  ;;  %v108_v18 = vmul.f32 %v310_v1, %v40_v10  ;;  %v173_v20 = vadd.f32 %v315_v2, %v105_v9  ;;  %v49_v37 = vld [vmem:[%s829_s0 + $0x118] sm:$0xff] }
  0x10   :  { %223 = vst [vmem:[%s832_s3 + $0x48] sm:$0xff] %v159_v40  ;;  %v109_v21 = vmul.f32 %v310_v1, %v41_v13  ;;  %v174_v23 = vadd.f32 %v315_v2, %v106_v12  ;;  %v110_v24 = vmul.f32 %v310_v1, %v42_v16  ;;  %v175_v26 = vadd.f32 %v315_v2, %v107_v15  ;;  %v50_v40 = vld [vmem:[%s829_s0 + $0x120] sm:$0xff] }
  0x11   :  { %224 = vst [vmem:[%s832_s3 + $0x50] sm:$0xff] %v160_v43  ;;  %v111_v27 = vmul.f32 %v310_v1, %v43_v19  ;;  %v176_v29 = vadd.f32 %v315_v2, %v108_v18  ;;  %v112_v30 = vmul.f32 %v310_v1, %v44_v22  ;;  %v113_v33 = vmul.f32 %v310_v1, %v45_v25 }
  0x12   :  { %225 = vst [vmem:[%s832_s3 + $0x58] sm:$0xff] %v161_v46  ;;  %v177_v32 = vadd.f32 %v315_v2, %v109_v21  ;;  %v178_v35 = vadd.f32 %v315_v2, %v110_v24  ;;  %v114_v36 = vmul.f32 %v310_v1, %v46_v28  ;;  %v115_v39 = vmul.f32 %v310_v1, %v47_v31 }
  0x13   :  { %226 = vst [vmem:[%s832_s3 + $0x60] sm:$0xff] %v162_v49  ;;  %v179_v38 = vadd.f32 %v315_v2, %v111_v27  ;;  %v180_v42 = vadd.f32 %v315_v2, %v112_v30  ;;  %v116_v43 = vmul.f32 %v310_v1, %v48_v34  ;;  %v181_v45 = vadd.f32 %v315_v2, %v113_v33 }
  0x14   :  { %227 = vst [vmem:[%s832_s3 + $0x68] sm:$0xff] %v163_v52  ;;  %v117_v46 = vmul.f32 %v310_v1, %v49_v37  ;;  %v145_v48 = vmul.f32 %v310_v1, %v77_v41  ;;  %v182_v49 = vadd.f32 %v315_v2, %v114_v36  ;;  %v118_v50 = vmul.f32 %v310_v1, %v50_v40  ;;  %v70_v41 = vld [vmem:[%s829_s0 + $0x1c0] sm:$0xff] }
  0x15   :  { %228 = vst [vmem:[%s832_s3 + $0x70] sm:$0xff] %v164_v55  ;;  %v183_v52 = vadd.f32 %v315_v2, %v115_v39  ;;  %v119_v53 = vmul.f32 %v310_v1, %v51_v44  ;;  %v184_v56 = vadd.f32 %v315_v2, %v116_v43  ;;  %v120_v57 = vmul.f32 %v310_v1, %v52_v47  ;;  %v71_v44 = vld [vmem:[%s829_s0 + $0x1c8] sm:$0xff]  ;;  %v72_v47 = vld [vmem:[%s829_s0 + $0x1d0] sm:$0xff] }
  0x16   :  { %229 = vst [vmem:[%s832_s3 + $0x78] sm:$0xff] %v165_v58  ;;  %v604_v55 = vadd.f32 %v315_v2, %v145_v48  ;;  %v55_v58 = vld [vmem:[%s829_s0 + $0x148] sm:$0xff]  ;;  %v185_v59 = vadd.f32 %v315_v2, %v117_v46  ;;  %v121_v60 = vmul.f32 %v310_v1, %v53_v51  ;;  %v186_v62 = vadd.f32 %v315_v2, %v118_v50  ;;  %v73_v50 = vld [vmem:[%s829_s0 + $0x1d8] sm:$0xff] }
  0x17   :  { %230 = vst [vmem:[%s832_s3 + $0x80] sm:$0xff] %v166_v61  ;;  %v56_v61 = vld [vmem:[%s829_s0 + $0x150] sm:$0xff]  ;;  %v122_v63 = vmul.f32 %v310_v1, %v54_v54  ;;  %v187_v3 = vadd.f32 %v315_v2, %v119_v53  ;;  %v123_v4 = vmul.f32 %v310_v1, %v55_v58  ;;  %v188_v6 = vadd.f32 %v315_v2, %v120_v57  ;;  %v74_v53 = vld [vmem:[%s829_s0 + $0x1e0] sm:$0xff]  ;;  %v75_v57 = vld [vmem:[%s829_s0 + $0x1e8] sm:$0xff] }
  0x18   :  { %231 = vst [vmem:[%s832_s3 + $0x88] sm:$0xff] %v167_v0  ;;  %v57_v0 = vld [vmem:[%s829_s0 + $0x158] sm:$0xff]  ;;  %v124_v7 = vmul.f32 %v310_v1, %v56_v61  ;;  %v189_v9 = vadd.f32 %v315_v2, %v121_v60  ;;  %v76_v60 = vld [vmem:[%s829_s0 + $0x1f0] sm:$0xff] }
  0x19   :  { %232 = vst [vmem:[%s832_s3 + $0x90] sm:$0xff] %v168_v5  ;;  %v58_v5 = vld [vmem:[%s829_s0 + $0x160] sm:$0xff]  ;;  %v125_v10 = vmul.f32 %v310_v1, %v57_v0  ;;  %v190_v12 = vadd.f32 %v315_v2, %v122_v63  ;;  %v191_v15 = vadd.f32 %v315_v2, %v123_v4  ;;  %v143_v0 = vmul.f32 %v310_v1, %v75_v57 }
  0x1a   :  { %233 = vst [vmem:[%s832_s3 + $0x98] sm:$0xff] %v169_v8  ;;  %v59_v8 = vld [vmem:[%s829_s0 + $0x168] sm:$0xff]  ;;  %v126_v13 = vmul.f32 %v310_v1, %v58_v5  ;;  %v192_v18 = vadd.f32 %v315_v2, %v124_v7  ;;  %v144_v4 = vmul.f32 %v310_v1, %v76_v60 }
  0x1b   :  { %234 = vst [vmem:[%s832_s3 + $0xa0] sm:$0xff] %v170_v11  ;;  %v60_v11 = vld [vmem:[%s829_s0 + $0x170] sm:$0xff]  ;;  %v127_v16 = vmul.f32 %v310_v1, %v59_v8  ;;  %v193_v21 = vadd.f32 %v315_v2, %v125_v10  ;;  %v211_v7 = vadd.f32 %v315_v2, %v143_v0 }
  0x1c   :  { %235 = vst [vmem:[%s832_s3 + $0xa8] sm:$0xff] %v171_v14  ;;  %v61_v14 = vld [vmem:[%s829_s0 + $0x178] sm:$0xff]  ;;  %v128_v19 = vmul.f32 %v310_v1, %v60_v11  ;;  %v194_v24 = vadd.f32 %v315_v2, %v126_v13 }
  0x1d   :  { %236 = vst [vmem:[%s832_s3 + $0xb0] sm:$0xff] %v172_v17  ;;  %v62_v17 = vld [vmem:[%s829_s0 + $0x180] sm:$0xff]  ;;  %v129_v22 = vmul.f32 %v310_v1, %v61_v14  ;;  %v195_v27 = vadd.f32 %v315_v2, %v127_v16 }
  0x1e   :  { %237 = vst [vmem:[%s832_s3 + $0xb8] sm:$0xff] %v173_v20  ;;  %v63_v20 = vld [vmem:[%s829_s0 + $0x188] sm:$0xff]  ;;  %v130_v25 = vmul.f32 %v310_v1, %v62_v17  ;;  %v196_v30 = vadd.f32 %v315_v2, %v128_v19 }
  0x1f   :  { %238 = vst [vmem:[%s832_s3 + $0xc0] sm:$0xff] %v174_v23  ;;  %v64_v23 = vld [vmem:[%s829_s0 + $0x190] sm:$0xff]  ;;  %v131_v28 = vmul.f32 %v310_v1, %v63_v20  ;;  %v197_v33 = vadd.f32 %v315_v2, %v129_v22 }
  0x20   :  { %239 = vst [vmem:[%s832_s3 + $0xc8] sm:$0xff] %v175_v26  ;;  %v65_v26 = vld [vmem:[%s829_s0 + $0x198] sm:$0xff]  ;;  %v132_v31 = vmul.f32 %v310_v1, %v64_v23  ;;  %v198_v36 = vadd.f32 %v315_v2, %v130_v25 }
  0x21   :  { %240 = vst [vmem:[%s832_s3 + $0xd0] sm:$0xff] %v176_v29  ;;  %v66_v29 = vld [vmem:[%s829_s0 + $0x1a0] sm:$0xff]  ;;  %v133_v34 = vmul.f32 %v310_v1, %v65_v26  ;;  %v199_v39 = vadd.f32 %v315_v2, %v131_v28 }
  0x22   :  { %241 = vst [vmem:[%s832_s3 + $0xd8] sm:$0xff] %v177_v32  ;;  %v67_v32 = vld [vmem:[%s829_s0 + $0x1a8] sm:$0xff]  ;;  %v134_v37 = vmul.f32 %v310_v1, %v66_v29 }
  0x23   :  { %242 = vst [vmem:[%s832_s3 + $0xe0] sm:$0xff] %v178_v35  ;;  %v68_v35 = vld [vmem:[%s829_s0 + $0x1b0] sm:$0xff]  ;;  %v135_v40 = vmul.f32 %v310_v1, %v67_v32 }
  0x24   :  { %243 = vst [vmem:[%s832_s3 + $0xe8] sm:$0xff] %v179_v38  ;;  %v69_v38 = vld [vmem:[%s829_s0 + $0x1b8] sm:$0xff]  ;;  %v136_v43 = vmul.f32 %v310_v1, %v68_v35  ;;  %v202_v48 = vadd.f32 %v315_v2, %v134_v37 }
  0x25   :  { %244 = vst [vmem:[%s832_s3 + $0xf0] sm:$0xff] %v180_v42  ;;  %v200_v42 = vadd.f32 %v315_v2, %v132_v31  ;;  %v137_v46 = vmul.f32 %v310_v1, %v69_v38  ;;  %v203_v51 = vadd.f32 %v315_v2, %v135_v40 }
  0x26   :  { %245 = vst [vmem:[%s832_s3 + $0xf8] sm:$0xff] %v181_v45  ;;  %v201_v45 = vadd.f32 %v315_v2, %v133_v34  ;;  %v204_v54 = vadd.f32 %v315_v2, %v136_v43 }
  0x27   :  { %246 = vst [vmem:[%s832_s3 + $0x100] sm:$0xff] %v182_v49  ;;  %v138_v49 = vmul.f32 %v310_v1, %v70_v41  ;;  %v205_v58 = vadd.f32 %v315_v2, %v137_v46 }
  0x28   :  { %247 = vst [vmem:[%s832_s3 + $0x108] sm:$0xff] %v183_v52  ;;  %v139_v52 = vmul.f32 %v310_v1, %v71_v44 }
  0x29   :  { %248 = vst [vmem:[%s832_s3 + $0x110] sm:$0xff] %v184_v56  ;;  %v140_v56 = vmul.f32 %v310_v1, %v72_v47  ;;  %v206_v61 = vadd.f32 %v315_v2, %v138_v49 }
  0x2a   :  { %249 = vst [vmem:[%s832_s3 + $0x118] sm:$0xff] %v185_v59  ;;  %v141_v59 = vmul.f32 %v310_v1, %v73_v50  ;;  %v207_v63 = vadd.f32 %v315_v2, %v139_v52 }
  0x2b   :  { %250 = vst [vmem:[%s832_s3 + $0x120] sm:$0xff] %v186_v62  ;;  %v142_v62 = vmul.f32 %v310_v1, %v74_v53  ;;  %v212_v1 = vadd.f32 %v315_v2, %v144_v4 }
  0x2c   :  { %251 = vst [vmem:[%s832_s3 + $0x128] sm:$0xff] %v187_v3  ;;  %v208_v3 = vadd.f32 %v315_v2, %v140_v56  ;;  %v209_v5 = vadd.f32 %v315_v2, %v141_v59 }
  0x2d   :  { %252 = vst [vmem:[%s832_s3 + $0x130] sm:$0xff] %v188_v6  ;;  %v210_v6 = vadd.f32 %v315_v2, %v142_v62 }
  0x2e   :  { %253 = vst [vmem:[%s832_s3 + $0x138] sm:$0xff] %v189_v9 }
  0x2f   :  { %254 = vst [vmem:[%s832_s3 + $0x140] sm:$0xff] %v190_v12 }
  0x30   :  { %255 = vst [vmem:[%s832_s3 + $0x148] sm:$0xff] %v191_v15 }
  0x31   :  { %256 = vst [vmem:[%s832_s3 + $0x150] sm:$0xff] %v192_v18 }
  0x32   :  { %257 = vst [vmem:[%s832_s3 + $0x158] sm:$0xff] %v193_v21 }
  0x33   :  { %258 = vst [vmem:[%s832_s3 + $0x160] sm:$0xff] %v194_v24 }
  0x34   :  { %259 = vst [vmem:[%s832_s3 + $0x168] sm:$0xff] %v195_v27 }
  0x35   :  { %260 = vst [vmem:[%s832_s3 + $0x170] sm:$0xff] %v196_v30 }
  0x36   :  { %261 = vst [vmem:[%s832_s3 + $0x178] sm:$0xff] %v197_v33 }
  0x37   :  { %262 = vst [vmem:[%s832_s3 + $0x180] sm:$0xff] %v198_v36 }
  0x38   :  { %263 = vst [vmem:[%s832_s3 + $0x188] sm:$0xff] %v199_v39 }
  0x39   :  { %264 = vst [vmem:[%s832_s3 + $0x190] sm:$0xff] %v200_v42 }
  0x3a   :  { %265 = vst [vmem:[%s832_s3 + $0x198] sm:$0xff] %v201_v45 }
  0x3b   :  { %266 = vst [vmem:[%s832_s3 + $0x1a0] sm:$0xff] %v202_v48 }
  0x3c   :  { %267 = vst [vmem:[%s832_s3 + $0x1a8] sm:$0xff] %v203_v51 }
  0x3d   :  { %268 = vst [vmem:[%s832_s3 + $0x1b0] sm:$0xff] %v204_v54 }
  0x3e   :  { %269 = vst [vmem:[%s832_s3 + $0x1b8] sm:$0xff] %v205_v58 }
  0x3f   :  { %270 = vst [vmem:[%s832_s3 + $0x1c0] sm:$0xff] %v206_v61 }
  0x40   :  { %271 = vst [vmem:[%s832_s3 + $0x1c8] sm:$0xff] %v207_v63 }
  0x41   :  { %272 = vst [vmem:[%s832_s3 + $0x1d0] sm:$0xff] %v208_v3 }
  0x42   :  { %273 = vst [vmem:[%s832_s3 + $0x1d8] sm:$0xff] %v209_v5 }
  0x43   :  { %274 = vst [vmem:[%s832_s3 + $0x1e0] sm:$0xff] %v210_v6 }
  0x44   :  { %275 = vst [vmem:[%s832_s3 + $0x1e8] sm:$0xff] %v211_v7 }
  0x45   :  { %276 = vst [vmem:[%s832_s3 + $0x1f0] sm:$0xff] %v212_v1 }
  0x46   :  { %277 = vst [vmem:[%s832_s3 + $0x1f8] sm:$0xff] %v604_v55 }

// kernel: tile.10
= control target key start
LH: loop header
LB: loop body
LE: loop exit
PB: predicated region body
PF: predicated region fallthrough
CT: control target
= control target key end

     0   :  { %s22_s0 = inlined_call_operand.vmem [shape: f32[4], index: 0, kind: input, shape index: {}]   ;;  %s23_s1 = inlined_call_operand.vmem [shape: f32[4,4], index: 1, kind: output, shape index: {}]  }
   0x1   :  { %v4_v0 = vld [vmem:[%s22_s0] ss:$0 sm:$0xff] }
   0x2   :  { %5 = vst [vmem:[%s23_s1] sm:$0xf] %v4_v0 }

// kernel: tile.11
= control target key start
LH: loop header
LB: loop body
LE: loop exit
PB: predicated region body
PF: predicated region fallthrough
CT: control target
= control target key end

     0   :  { %s37_s8 = smov 4   ;;  %s38_s9 = smov 8   ;;  %vm7_vm0 = vcmask 31744   ;;  %vm13_vm1 = vcmask 130144   ;;  %vm19_vm2 = vcmask 97344   ;;  %vm25_vm3 = vcmask 64544   ;;  %s55_s0 = inlined_call_operand.vmem [shape: f32[4,4], index: 0, kind: input, shape index: {}]   ;;  %s56_s1 = inlined_call_operand.vmem [shape: f32[16], index: 1, kind: output, shape index: {}]  }
   0x1   :  { %v4_v0 = vld [vmem:[%s55_s0] sm:$0xf]  ;;  %s36_s0 = smov 12  }
   0x2   :  { %5 = vst [vmem:[#allocation1] sm:$0xf] %v4_v0 }
   0x9   :  { %v10_v1 = vld [vmem:[#allocation1 + $0x3] sm:$0x1]   ;;  %v22_v2 = vld [vmem:[#allocation1 + $0x1] sm:$0x1]   ;;  %v16_v3 = vld [vmem:[#allocation1 + $0x2] sm:$0x1]  }
   0xa   :  { %11 = vrot.lane.b32.xlu0 %v10_v1, %s36_s0  ;;  %23 = vrot.lane.b32.xlu1 %v22_v2, %s37_s8  ;;  %v6_v4 = vld [vmem:[#allocation1] sm:$0x1]  }
   0xb   :  { %8 = vst.msk [vmem:[#allocation0] sm:$0x1] %vm7_vm0, %v6_v4  }
  0x12   :  { %17 = vrot.lane.b32.xlu0 %v16_v3, %s38_s9 }
  0x7c   :  { %v12_v5 = vpop.permute.xlu0 %11   ;;  %v24_v6 = vpop.permute.xlu1 %23  }
  0x7d   :  { %14 = vst.msk [vmem:[#allocation0] sm:$0x1] %vm13_vm1, %v12_v5  }
  0x84   :  { %v18_v7 = vpop.permute.xlu0 %17  }
  0x85   :  { %20 = vst.msk [vmem:[#allocation0] sm:$0x1] %vm19_vm2, %v18_v7  }
  0x86   :  { %26 = vst.msk [vmem:[#allocation0] sm:$0x1] %vm25_vm3, %v24_v6  }
  0x8d   :  { %v29_v8 = vld [vmem:[#allocation0] sm:$0x1] }
  0x8e   :  { %32 = vst [vmem:[%s56_s1] sm:$0x1] %v29_v8 }

// kernel: unet_forward.51
= control target key start
LH: loop header
LB: loop body
LE: loop exit
PB: predicated region body
PF: predicated region fallthrough
CT: control target
= control target key end

     0   :  { %s1783_s12 = smov 0   ;;  %s1785_s13 = smov 0   ;;  %s2013_s0 = inlined_call_operand.vmem [shape: bf16[1024,128], index: 0, kind: input, shape index: {}]   ;;  %s2014_s1 = inlined_call_operand.vmem [shape: bf16[128,128], index: 1, kind: input, shape index: {}]   ;;  %s2015_s2 = inlined_call_operand.vmem [shape: f32[1,128], index: 2, kind: input, shape index: {}]   ;;  %s2016_s3 = inlined_call_operand.vmem [shape: f32[1024,128], index: 3, kind: output, shape index: {}]  }
   0x1   :  { %s1787_s14 = smov 0  }
   0x2 LB: > { %s32_s15 = sadd.s32 1, %s1757_s13  ;;  %p1356_p0 = scmp.ge.s32.totalorder %s1761_s14, 1  ;;  %s1761_s14 = sphi %s1787_s14, %s13_s14   ;;  %s1757_s13 = sphi %s1785_s13, %s2018_s13   ;;  %s1753_s12 = sphi %s1783_s12, %s2017_s12  }
   0x3   : > { %p34_p1 = scmp.ge.s32.totalorder %s32_s15, 2  ;;  %p188_p2 = scmp.lt.s32.totalorder %s1761_s14, 3 }
   0x5   : > { %s2020_s15 = smov (%p34_p1, %s32_s15), 0  ;;  %p189_p3 = pnand %p1356_p0, %p188_p2 }
   0x6   : > { %s1357_s18 = sshll.u32 (!%p189_p3), %s1753_s12, 6 }
   0x7   : > { %192 = sbr.rel (%p189_p3) target bundleno = 308 (0x134), region = 32  ;;  %p230_p4 = scmp.lt.s32.totalorder (!%p189_p3), %s1357_s18, 127 }
   0xc   : > { %v1402_v0 = vld [vmem:[%s2014_s1 + $0x38] sm:$0xff]  ;;  %v1401_v1 = vld [vmem:[%s2014_s1 + $0x30] sm:$0xff]  ;;  %v1400_v2 = vld [vmem:[%s2014_s1 + $0x28] sm:$0xff]  ;;  %s2022_s18 = smov (!%p230_p4, %s1357_s18), 127 }
   0xd   : > { %679 = vmatpush.bf16.msra.mxu0 %v1402_v0  ;;  %1562 = vmatpush.bf16.msra.mxu1 %v1402_v0  ;;  %v1399_v3 = vld [vmem:[%s2014_s1 + $0x20] sm:$0xff]  ;;  %s1358_s25 = sshll.u32 %s2022_s18, 2  ;;  %v1398_v4 = vld [vmem:[%s2014_s1 + $0x18] sm:$0xff]  ;;  %v1397_v5 = vld [vmem:[%s2014_s1 + $0x10] sm:$0xff]  ;;  %s1360_s12 = sshll.u32 %s2022_s18, 3 }
   0xe   : > { %1563 = vmatpush.bf16.msra.mxu2 %v1402_v0  ;;  %1564 = vmatpush.bf16.msra.mxu3 %v1402_v0  ;;  %s1822_s30 = scalar_lea.vmem %s2013_s0, %s1358_s25  ;;  %v1396_v14 = vld [vmem:[%s2014_s1 + $0x8] sm:$0xff]  ;;  %v1395_v23 = vld [vmem:[%s2014_s1] sm:$0xff]  ;;  %s1876_s19 = scalar_lea.vmem %s2016_s3, %s1360_s12 }
   0xf   : > { %v1404_v6 = vld [vmem:[%s1822_s30] sm:$0xff]   ;;  %v1531_v32 = vld [vmem:[%s1822_s30 + $0x8] sm:$0xff]   ;;  %v1532_v56 = vld [vmem:[%s1822_s30 + $0x10] sm:$0xff]  }
  0x10   : > { %v1538_v7 = vld [vmem:[%s1822_s30 + $0x40] sm:$0xff]   ;;  %v1405_v10 = vunpack.c.l.bf16 %v1404_v6  ;;  %v1406_v11 = vunpack.c.h.bf16 %v1404_v6  ;;  %v1539_v33 = vld [vmem:[%s1822_s30 + $0x48] sm:$0xff]   ;;  %v1409_v36 = vunpack.c.l.bf16 %v1531_v32  ;;  %v1410_v37 = vunpack.c.h.bf16 %v1531_v32  ;;  %v1540_v57 = vld [vmem:[%s1822_s30 + $0x50] sm:$0xff]  }
  0x11   : > { %680 = vmatpush.bf16.msra.mxu0 %v1401_v1  ;;  %1565 = vmatpush.bf16.msra.mxu1 %v1401_v1  ;;  %v1546_v8 = vld [vmem:[%s1822_s30 + $0x80] sm:$0xff]   ;;  %v1437_v12 = vunpack.c.l.bf16 %v1538_v7  ;;  %v1438_v13 = vunpack.c.h.bf16 %v1538_v7  ;;  %v1547_v34 = vld [vmem:[%s1822_s30 + $0x88] sm:$0xff]   ;;  %v1441_v38 = vunpack.c.l.bf16 %v1539_v33  ;;  %v1442_v39 = vunpack.c.h.bf16 %v1539_v33  ;;  %v1548_v58 = vld [vmem:[%s1822_s30 + $0x90] sm:$0xff]  }
  0x12   : > { %1566 = vmatpush.bf16.msra.mxu2 %v1401_v1  ;;  %1567 = vmatpush.bf16.msra.mxu3 %v1401_v1  ;;  %v1554_v9 = vld [vmem:[%s1822_s30 + $0xc0] sm:$0xff]   ;;  %v1469_v15 = vunpack.c.l.bf16 %v1546_v8  ;;  %v1470_v16 = vunpack.c.h.bf16 %v1546_v8  ;;  %v455_v19 = vmax.f32 %v1405_v10, 0.0  ;;  %v456_v20 = vmax.f32 %v1406_v11, 0.0  ;;  %v1555_v35 = vld [vmem:[%s1822_s30 + $0xc8] sm:$0xff]   ;;  %v1556_v59 = vld [vmem:[%s1822_s30 + $0xd0] sm:$0xff]  }
  0x13   : > { %v1501_v17 = vunpack.c.l.bf16 %v1554_v9  ;;  %v1502_v18 = vunpack.c.h.bf16 %v1554_v9  ;;  %v471_v21 = vmax.f32 %v1437_v12, 0.0  ;;  %v472_v22 = vmax.f32 %v1438_v13, 0.0 }
  0x14   : > { %v487_v24 = vmax.f32 %v1469_v15, 0.0  ;;  %v488_v25 = vmax.f32 %v1470_v16, 0.0  ;;  %v519_v28 = vpack.c.bf16 %v456_v20, %v455_v19  ;;  %v1473_v40 = vunpack.c.l.bf16 %v1547_v34  ;;  %v1533_v16 = vld [vmem:[%s1822_s30 + $0x18] sm:$0xff]  }
  0x15   : > { %681 = vmatpush.bf16.msra.mxu0 %v1400_v2  ;;  %1568 = vmatpush.bf16.msra.mxu1 %v1400_v2  ;;  %v503_v26 = vmax.f32 %v1501_v17, 0.0  ;;  %v504_v27 = vmax.f32 %v1502_v18, 0.0  ;;  %v527_v29 = vpack.c.bf16 %v472_v22, %v471_v21  ;;  %v1474_v41 = vunpack.c.h.bf16 %v1547_v34  ;;  %v1541_v17 = vld [vmem:[%s1822_s30 + $0x58] sm:$0xff]  }
  0x16   : > { %1569 = vmatpush.bf16.msra.mxu2 %v1400_v2  ;;  %1570 = vmatpush.bf16.msra.mxu3 %v1400_v2  ;;  %v535_v30 = vpack.c.bf16 %v488_v25, %v487_v24  ;;  %v1505_v42 = vunpack.c.l.bf16 %v1555_v35  ;;  %v1506_v43 = vunpack.c.h.bf16 %v1555_v35  ;;  %v457_v44 = vmax.f32 %v1409_v36, 0.0  ;;  %v1549_v18 = vld [vmem:[%s1822_s30 + $0x98] sm:$0xff]  }
  0x17   : > { %v543_v31 = vpack.c.bf16 %v504_v27, %v503_v26  ;;  %v458_v45 = vmax.f32 %v1410_v37, 0.0  ;;  %v473_v46 = vmax.f32 %v1441_v38, 0.0  ;;  %v474_v47 = vmax.f32 %v1442_v39, 0.0  ;;  %v1557_v19 = vld [vmem:[%s1822_s30 + $0xd8] sm:$0xff]  }
  0x18   : > { %v489_v48 = vmax.f32 %v1473_v40, 0.0  ;;  %v490_v49 = vmax.f32 %v1474_v41, 0.0  ;;  %v505_v50 = vmax.f32 %v1505_v42, 0.0  ;;  %v506_v51 = vmax.f32 %v1506_v43, 0.0  ;;  %v1534_v40 = vld [vmem:[%s1822_s30 + $0x20] sm:$0xff]  }
  0x19   : > { %682 = vmatpush.bf16.msra.mxu0 %v1399_v3  ;;  %1571 = vmatpush.bf16.msra.mxu1 %v1399_v3  ;;  %v520_v52 = vpack.c.bf16 %v458_v45, %v457_v44  ;;  %v528_v53 = vpack.c.bf16 %v474_v47, %v473_v46  ;;  %v1413_v60 = vunpack.c.l.bf16 %v1532_v56  ;;  %v1414_v61 = vunpack.c.h.bf16 %v1532_v56  ;;  %v1542_v41 = vld [vmem:[%s1822_s30 + $0x60] sm:$0xff]  }
  0x1a   : > { %1572 = vmatpush.bf16.msra.mxu2 %v1399_v3  ;;  %1573 = vmatpush.bf16.msra.mxu3 %v1399_v3  ;;  %v536_v54 = vpack.c.bf16 %v490_v49, %v489_v48  ;;  %v544_v55 = vpack.c.bf16 %v506_v51, %v505_v50  ;;  %v1445_v62 = vunpack.c.l.bf16 %v1540_v57  ;;  %v1446_v63 = vunpack.c.h.bf16 %v1540_v57  ;;  %v1550_v42 = vld [vmem:[%s1822_s30 + $0xa0] sm:$0xff]  }
  0x1b   : > { %v1477_v0 = vunpack.c.l.bf16 %v1548_v58  ;;  %v1478_v1 = vunpack.c.h.bf16 %v1548_v58  ;;  %v1509_v2 = vunpack.c.l.bf16 %v1556_v59  ;;  %v1510_v3 = vunpack.c.h.bf16 %v1556_v59  ;;  %v1558_v43 = vld [vmem:[%s1822_s30 + $0xe0] sm:$0xff]  }
  0x1c   : > { %v475_v6 = vmax.f32 %v1445_v62, 0.0  ;;  %v476_v7 = vmax.f32 %v1446_v63, 0.0  ;;  %v1417_v20 = vunpack.c.l.bf16 %v1533_v16  ;;  %v1418_v21 = vunpack.c.h.bf16 %v1533_v16 }
  0x1d   : > { %683 = vmatpush.bf16.msra.mxu0 %v1398_v4  ;;  %1574 = vmatpush.bf16.msra.mxu1 %v1398_v4  ;;  %v491_v8 = vmax.f32 %v1477_v0, 0.0  ;;  %v492_v9 = vmax.f32 %v1478_v1, 0.0  ;;  %v507_v10 = vmax.f32 %v1509_v2, 0.0  ;;  %v508_v11 = vmax.f32 %v1510_v3, 0.0  ;;  %v1535_v0 = vld [vmem:[%s1822_s30 + $0x28] sm:$0xff]  }
  0x1e   : > { %1575 = vmatpush.bf16.msra.mxu2 %v1398_v4  ;;  %1576 = vmatpush.bf16.msra.mxu3 %v1398_v4  ;;  %v459_v4 = vmax.f32 %v1413_v60, 0.0  ;;  %v529_v13 = vpack.c.bf16 %v476_v7, %v475_v6  ;;  %v1449_v22 = vunpack.c.l.bf16 %v1541_v17  ;;  %v1481_v24 = vunpack.c.l.bf16 %v1549_v18  ;;  %v1543_v1 = vld [vmem:[%s1822_s30 + $0x68] sm:$0xff]  }
  0x1f   : > { %v545_v15 = vpack.c.bf16 %v508_v11, %v507_v10  ;;  %v1482_v25 = vunpack.c.h.bf16 %v1549_v18  ;;  %v1513_v26 = vunpack.c.l.bf16 %v1557_v19  ;;  %v1514_v27 = vunpack.c.h.bf16 %v1557_v19  ;;  %v1551_v2 = vld [vmem:[%s1822_s30 + $0xa8] sm:$0xff]  }
  0x20   : > { %v493_v32 = vmax.f32 %v1481_v24, 0.0  ;;  %v1421_v44 = vunpack.c.l.bf16 %v1534_v40  ;;  %v1422_v45 = vunpack.c.h.bf16 %v1534_v40  ;;  %v1453_v46 = vunpack.c.l.bf16 %v1542_v41  ;;  %v1559_v3 = vld [vmem:[%s1822_s30 + $0xe8] sm:$0xff]   ;;  %v1536_v24 = vld [vmem:[%s1822_s30 + $0x30] sm:$0xff]  }
  0x21   : > { %684 = vmatpush.bf16.msra.mxu0 %v1397_v5  ;;  %1577 = vmatpush.bf16.msra.mxu1 %v1397_v5  ;;  %v494_v33 = vmax.f32 %v1482_v25, 0.0  ;;  %v509_v34 = vmax.f32 %v1513_v26, 0.0  ;;  %v510_v35 = vmax.f32 %v1514_v27, 0.0  ;;  %v1454_v47 = vunpack.c.h.bf16 %v1542_v41  ;;  %v1544_v25 = vld [vmem:[%s1822_s30 + $0x70] sm:$0xff]  }
  0x22   : > { %1578 = vmatpush.bf16.msra.mxu2 %v1397_v5  ;;  %1579 = vmatpush.bf16.msra.mxu3 %v1397_v5  ;;  %v460_v5 = vmax.f32 %v1414_v61, 0.0  ;;  %v1485_v48 = vunpack.c.l.bf16 %v1550_v42  ;;  %v1486_v49 = vunpack.c.h.bf16 %v1550_v42  ;;  %v1517_v50 = vunpack.c.l.bf16 %v1558_v43  ;;  %v1552_v26 = vld [vmem:[%s1822_s30 + $0xb0] sm:$0xff]  }
  0x23   : > { %v538_v38 = vpack.c.bf16 %v494_v33, %v493_v32  ;;  %v546_v39 = vpack.c.bf16 %v510_v35, %v509_v34  ;;  %v1518_v51 = vunpack.c.h.bf16 %v1558_v43  ;;  %v1457_v6 = vunpack.c.l.bf16 %v1543_v1  ;;  %v1560_v27 = vld [vmem:[%s1822_s30 + $0xf0] sm:$0xff]  }
  0x24   : > { %v521_v12 = vpack.c.bf16 %v460_v5, %v459_v4  ;;  %v495_v56 = vmax.f32 %v1485_v48, 0.0  ;;  %v496_v57 = vmax.f32 %v1486_v49, 0.0  ;;  %v511_v58 = vmax.f32 %v1517_v50, 0.0  ;;  %v1537_v48 = vld [vmem:[%s1822_s30 + $0x38] sm:$0xff]  }
  0x25   : > { %685 = vmatpush.bf16.msra.mxu0 %v1396_v14  ;;  %1580 = vmatpush.bf16.msra.mxu1 %v1396_v14  ;;  %v512_v59 = vmax.f32 %v1518_v51, 0.0  ;;  %v1425_v4 = vunpack.c.l.bf16 %v1535_v0  ;;  %v1426_v5 = vunpack.c.h.bf16 %v1535_v0  ;;  %v1458_v7 = vunpack.c.h.bf16 %v1543_v1  ;;  %v1545_v49 = vld [vmem:[%s1822_s30 + $0x78] sm:$0xff]  }
  0x26   : > { %1581 = vmatpush.bf16.msra.mxu2 %v1396_v14  ;;  %1582 = vmatpush.bf16.msra.mxu3 %v1396_v14  ;;  %v537_v14 = vpack.c.bf16 %v492_v9, %v491_v8  ;;  %v539_v62 = vpack.c.bf16 %v496_v57, %v495_v56  ;;  %v1489_v8 = vunpack.c.l.bf16 %v1551_v2  ;;  %v1490_v9 = vunpack.c.h.bf16 %v1551_v2  ;;  %v1553_v50 = vld [vmem:[%s1822_s30 + $0xb8] sm:$0xff]  }
  0x27   : > { %v547_v63 = vpack.c.bf16 %v512_v59, %v511_v58  ;;  %v1521_v10 = vunpack.c.l.bf16 %v1559_v3  ;;  %v1522_v11 = vunpack.c.h.bf16 %v1559_v3  ;;  %v1493_v32 = vunpack.c.l.bf16 %v1552_v26  ;;  %v1561_v51 = vld [vmem:[%s1822_s30 + $0xf8] sm:$0xff]  }
  0x28   : > { %v497_v16 = vmax.f32 %v1489_v8, 0.0  ;;  %v1494_v33 = vunpack.c.h.bf16 %v1552_v26  ;;  %v1525_v34 = vunpack.c.l.bf16 %v1560_v27  ;;  %v1526_v35 = vunpack.c.h.bf16 %v1560_v27  ;;  %v1868_v8 = vld [vmem:[%s2015_s2] ss:$0 sm:$0xff] }
  0x29   : > { %686 = vmatpush.bf16.msra.mxu0 %v1395_v23  ;;  %1583 = vmatpush.bf16.msra.mxu1 %v1395_v23  ;;  %v513_v18 = vmax.f32 %v1521_v10, 0.0  ;;  %v514_v19 = vmax.f32 %v1522_v11, 0.0  ;;  %v499_v40 = vmax.f32 %v1493_v32, 0.0  ;;  %v1497_v56 = vunpack.c.l.bf16 %v1553_v50 }
  0x2a   : > { %1584 = vmatpush.bf16.msra.mxu2 %v1395_v23  ;;  %1585 = vmatpush.bf16.msra.mxu3 %v1395_v23  ;;  %v1450_v23 = vunpack.c.h.bf16 %v1541_v17  ;;  %v498_v17 = vmax.f32 %v1490_v9, 0.0  ;;  %v500_v41 = vmax.f32 %v1494_v33, 0.0  ;;  %v515_v42 = vmax.f32 %v1525_v34, 0.0 }
  0x2b   : > { %v516_v43 = vmax.f32 %v1526_v35, 0.0  ;;  %v1498_v57 = vunpack.c.h.bf16 %v1553_v50  ;;  %v1529_v58 = vunpack.c.l.bf16 %v1561_v51  ;;  %v1530_v59 = vunpack.c.h.bf16 %v1561_v51 }
  0x2c   : > { %687 = vmatmul.bf16.vlgmr.msra.gmra.mxu0 %v519_v28  ;;  %727 = vmatmul.bf16.vlgmr.msra.gmra.mxu1 %v527_v29  ;;  %v461_v28 = vmax.f32 %v1417_v20, 0.0  ;;  %v462_v29 = vmax.f32 %v1418_v21, 0.0  ;;  %v501_v0 = vmax.f32 %v1497_v56, 0.0 }
  0x2d   : > { %767 = vmatmul.bf16.vlgmr.msra.gmra.mxu2 %v535_v30  ;;  %807 = vmatmul.bf16.vlgmr.msra.gmra.mxu3 %v543_v31  ;;  %v477_v30 = vmax.f32 %v1449_v22, 0.0  ;;  %v478_v31 = vmax.f32 %v1450_v23, 0.0  ;;  %v540_v22 = vpack.c.bf16 %v498_v17, %v497_v16  ;;  %v548_v23 = vpack.c.bf16 %v514_v19, %v513_v18 }
  0x2e   : > { %v522_v36 = vpack.c.bf16 %v462_v29, %v461_v28  ;;  %v1429_v28 = vunpack.c.l.bf16 %v1536_v24  ;;  %v1430_v29 = vunpack.c.h.bf16 %v1536_v24  ;;  %v502_v1 = vmax.f32 %v1498_v57, 0.0 }
  0x2f   : > { %v530_v37 = vpack.c.bf16 %v478_v31, %v477_v30  ;;  %v1461_v30 = vunpack.c.l.bf16 %v1544_v25  ;;  %v1462_v31 = vunpack.c.h.bf16 %v1544_v25  ;;  %v517_v2 = vmax.f32 %v1529_v58, 0.0 }
  0x30   : > { %v518_v3 = vmax.f32 %v1530_v59, 0.0 }
  0x3c   : > { %692 = vmatmul.bf16.gmra.mxu0 %v520_v52  ;;  %732 = vmatmul.bf16.gmra.mxu1 %v528_v53  ;;  %v463_v52 = vmax.f32 %v1421_v44, 0.0  ;;  %v464_v53 = vmax.f32 %v1422_v45, 0.0 }
  0x3d   : > { %772 = vmatmul.bf16.gmra.mxu2 %v536_v54  ;;  %812 = vmatmul.bf16.gmra.mxu3 %v544_v55  ;;  %v479_v54 = vmax.f32 %v1453_v46, 0.0  ;;  %v480_v55 = vmax.f32 %v1454_v47, 0.0  ;;  %v541_v46 = vpack.c.bf16 %v500_v41, %v499_v40  ;;  %v549_v47 = vpack.c.bf16 %v516_v43, %v515_v42 }
  0x3e   : > { %v523_v60 = vpack.c.bf16 %v464_v53, %v463_v52  ;;  %v1433_v52 = vunpack.c.l.bf16 %v1537_v48  ;;  %v1434_v53 = vunpack.c.h.bf16 %v1537_v48 }
  0x3f   : > { %v531_v61 = vpack.c.bf16 %v480_v55, %v479_v54  ;;  %v1465_v54 = vunpack.c.l.bf16 %v1545_v49  ;;  %v1466_v55 = vunpack.c.h.bf16 %v1545_v49 }
  0x4c   : > { %697 = vmatmul.bf16.gmra.mxu0 %v521_v12  ;;  %737 = vmatmul.bf16.gmra.mxu1 %v529_v13  ;;  %v465_v12 = vmax.f32 %v1425_v4, 0.0  ;;  %v466_v13 = vmax.f32 %v1426_v5, 0.0 }
  0x4d   : > { %777 = vmatmul.bf16.gmra.mxu2 %v537_v14  ;;  %817 = vmatmul.bf16.gmra.mxu3 %v545_v15  ;;  %v481_v14 = vmax.f32 %v1457_v6, 0.0  ;;  %v482_v15 = vmax.f32 %v1458_v7, 0.0  ;;  %v542_v6 = vpack.c.bf16 %v502_v1, %v501_v0  ;;  %v550_v7 = vpack.c.bf16 %v518_v3, %v517_v2 }
  0x4e   : > { %v524_v20 = vpack.c.bf16 %v466_v13, %v465_v12 }
  0x4f   : > { %v532_v21 = vpack.c.bf16 %v482_v15, %v481_v14 }
  0x5c   : > { %702 = vmatmul.bf16.gmra.mxu0 %v522_v36  ;;  %742 = vmatmul.bf16.gmra.mxu1 %v530_v37  ;;  %v467_v36 = vmax.f32 %v1429_v28, 0.0  ;;  %v468_v37 = vmax.f32 %v1430_v29, 0.0 }
  0x5d   : > { %782 = vmatmul.bf16.gmra.mxu2 %v538_v38  ;;  %822 = vmatmul.bf16.gmra.mxu3 %v546_v39  ;;  %v483_v38 = vmax.f32 %v1461_v30, 0.0  ;;  %v484_v39 = vmax.f32 %v1462_v31, 0.0 }
  0x5e   : > { %v525_v44 = vpack.c.bf16 %v468_v37, %v467_v36 }
  0x5f   : > { %v533_v45 = vpack.c.bf16 %v484_v39, %v483_v38 }
  0x6c   : > { %707 = vmatmul.bf16.gmra.mxu0 %v523_v60  ;;  %747 = vmatmul.bf16.gmra.mxu1 %v531_v61  ;;  %v469_v60 = vmax.f32 %v1433_v52, 0.0  ;;  %v470_v61 = vmax.f32 %v1434_v53, 0.0 }
  0x6d   : > { %787 = vmatmul.bf16.gmra.mxu2 %v539_v62  ;;  %827 = vmatmul.bf16.gmra.mxu3 %v547_v63  ;;  %v485_v62 = vmax.f32 %v1465_v54, 0.0  ;;  %v486_v63 = vmax.f32 %v1466_v55, 0.0 }
  0x6e   : > { %v526_v4 = vpack.c.bf16 %v470_v61, %v469_v60 }
  0x6f   : > { %v534_v5 = vpack.c.bf16 %v486_v63, %v485_v62 }
  0x7c   : > { %712 = vmatmul.bf16.gmra.mxu0 %v524_v20  ;;  %752 = vmatmul.bf16.gmra.mxu1 %v532_v21 }
  0x7d   : > { %792 = vmatmul.bf16.gmra.mxu2 %v540_v22  ;;  %832 = vmatmul.bf16.gmra.mxu3 %v548_v23 }
  0x8c   : > { %717 = vmatmul.bf16.gmra.mxu0 %v525_v44  ;;  %757 = vmatmul.bf16.gmra.mxu1 %v533_v45 }
  0x8d   : > { %797 = vmatmul.bf16.gmra.mxu2 %v541_v46  ;;  %837 = vmatmul.bf16.gmra.mxu3 %v549_v47 }
  0x9c   : > { %722 = vmatmul.bf16.gmra.mxu0 %v526_v4  ;;  %762 = vmatmul.bf16.gmra.mxu1 %v534_v5 }
  0x9d   : > { %802 = vmatmul.bf16.gmra.mxu2 %v542_v6  ;;  %842 = vmatmul.bf16.gmra.mxu3 %v550_v7 }
  0xa9   : > { %v688_v9 = vpop.f32.mrf.mxu0  ;;  %v728_v10 = vpop.f32.mrf.mxu1 }
  0xaa   : > { %v1047_v11 = vadd.f32 %v1868_v8, %v688_v9  ;;  %v1063_v12 = vadd.f32 %v1868_v8, %v728_v10 }
  0xac   : > { %1611 = vtanh.f32 %v1047_v11 }
  0xad   : > { %1613 = vtanh.f32 %v1063_v12 }
  0xb0   : > { %v768_v13 = vpop.f32.mrf.mxu2  ;;  %v808_v14 = vpop.f32.mrf.mxu3 }
  0xb1   : > { %v1079_v15 = vadd.f32 %v1868_v8, %v768_v13  ;;  %v1095_v16 = vadd.f32 %v1868_v8, %v808_v14  ;;  %v690_v17 = vpop.f32.mrf.mxu0  ;;  %v730_v18 = vpop.f32.mrf.mxu1 }
  0xb2   : > { %v1612_v19 = vpop.eup %1611  ;;  %v1048_v20 = vadd.f32 %v1868_v8, %v690_v17  ;;  %v1064_v21 = vadd.f32 %v1868_v8, %v730_v18 }
  0xb3   : > { %v1614_v22 = vpop.eup %1613  ;;  %1175 = vst [vmem:[%s1876_s19] sm:$0xff] %v1612_v19  ;;  %1615 = vtanh.f32 %v1079_v15 }
  0xb4   : > { %1191 = vst [vmem:[%s1876_s19 + $0x80] sm:$0xff] %v1614_v22  ;;  %1617 = vtanh.f32 %v1095_v16 }
  0xb5   : > { %1619 = vtanh.f32 %v1048_v20 }
  0xb6   : > { %1621 = vtanh.f32 %v1064_v21 }
  0xb8   : > { %v770_v23 = vpop.f32.mrf.mxu2  ;;  %v810_v24 = vpop.f32.mrf.mxu3 }
  0xb9   : > { %v1616_v25 = vpop.eup %1615  ;;  %v1080_v26 = vadd.f32 %v1868_v8, %v770_v23  ;;  %v1096_v27 = vadd.f32 %v1868_v8, %v810_v24  ;;  %v693_v28 = vpop.f32.mrf.mxu0 }
  0xba   : > { %v733_v29 = vpop.f32.mrf.mxu1  ;;  %v1618_v30 = vpop.eup %1617  ;;  %1207 = vst [vmem:[%s1876_s19 + $0x100] sm:$0xff] %v1616_v25  ;;  %v1049_v31 = vadd.f32 %v1868_v8, %v693_v28 }
  0xbb   : > { %v1065_v32 = vadd.f32 %v1868_v8, %v733_v29  ;;  %v1620_v33 = vpop.eup %1619  ;;  %1223 = vst [vmem:[%s1876_s19 + $0x180] sm:$0xff] %v1618_v30  ;;  %1623 = vtanh.f32 %v1080_v26 }
  0xbc   : > { %v1622_v34 = vpop.eup %1621  ;;  %1176 = vst [vmem:[%s1876_s19 + $0x8] sm:$0xff] %v1620_v33  ;;  %1625 = vtanh.f32 %v1096_v27 }
  0xbd   : > { %1192 = vst [vmem:[%s1876_s19 + $0x88] sm:$0xff] %v1622_v34  ;;  %1627 = vtanh.f32 %v1049_v31 }
  0xbe   : > { %1629 = vtanh.f32 %v1065_v32 }
  0xc0   : > { %v773_v35 = vpop.f32.mrf.mxu2  ;;  %v813_v36 = vpop.f32.mrf.mxu3 }
  0xc1   : > { %v1624_v37 = vpop.eup %1623  ;;  %v1081_v38 = vadd.f32 %v1868_v8, %v773_v35  ;;  %v1097_v39 = vadd.f32 %v1868_v8, %v813_v36  ;;  %v695_v40 = vpop.f32.mrf.mxu0 }
  0xc2   : > { %v735_v41 = vpop.f32.mrf.mxu1  ;;  %v1626_v42 = vpop.eup %1625  ;;  %1208 = vst [vmem:[%s1876_s19 + $0x108] sm:$0xff] %v1624_v37  ;;  %v1050_v43 = vadd.f32 %v1868_v8, %v695_v40 }
  0xc3   : > { %v1066_v44 = vadd.f32 %v1868_v8, %v735_v41  ;;  %v1628_v45 = vpop.eup %1627  ;;  %1224 = vst [vmem:[%s1876_s19 + $0x188] sm:$0xff] %v1626_v42  ;;  %1631 = vtanh.f32 %v1081_v38 }
  0xc4   : > { %v1630_v46 = vpop.eup %1629  ;;  %1177 = vst [vmem:[%s1876_s19 + $0x10] sm:$0xff] %v1628_v45  ;;  %1633 = vtanh.f32 %v1097_v39 }
  0xc5   : > { %1193 = vst [vmem:[%s1876_s19 + $0x90] sm:$0xff] %v1630_v46  ;;  %1635 = vtanh.f32 %v1050_v43 }
  0xc6   : > { %1637 = vtanh.f32 %v1066_v44 }
  0xc8   : > { %v775_v47 = vpop.f32.mrf.mxu2  ;;  %v815_v48 = vpop.f32.mrf.mxu3 }
  0xc9   : > { %v1632_v49 = vpop.eup %1631  ;;  %v1082_v50 = vadd.f32 %v1868_v8, %v775_v47  ;;  %v1098_v51 = vadd.f32 %v1868_v8, %v815_v48  ;;  %v698_v52 = vpop.f32.mrf.mxu0 }
  0xca   : > { %v738_v53 = vpop.f32.mrf.mxu1  ;;  %v1634_v54 = vpop.eup %1633  ;;  %1209 = vst [vmem:[%s1876_s19 + $0x110] sm:$0xff] %v1632_v49  ;;  %v1051_v55 = vadd.f32 %v1868_v8, %v698_v52 }
  0xcb   : > { %v1067_v56 = vadd.f32 %v1868_v8, %v738_v53  ;;  %v1636_v57 = vpop.eup %1635  ;;  %1225 = vst [vmem:[%s1876_s19 + $0x190] sm:$0xff] %v1634_v54  ;;  %1639 = vtanh.f32 %v1082_v50 }
  0xcc   : > { %v1638_v58 = vpop.eup %1637  ;;  %1178 = vst [vmem:[%s1876_s19 + $0x18] sm:$0xff] %v1636_v57  ;;  %1641 = vtanh.f32 %v1098_v51 }
  0xcd   : > { %1194 = vst [vmem:[%s1876_s19 + $0x98] sm:$0xff] %v1638_v58  ;;  %1643 = vtanh.f32 %v1051_v55 }
  0xce   : > { %1645 = vtanh.f32 %v1067_v56 }
  0xd0   : > { %v778_v59 = vpop.f32.mrf.mxu2  ;;  %v818_v60 = vpop.f32.mrf.mxu3 }
  0xd1   : > { %v1640_v61 = vpop.eup %1639  ;;  %v1083_v62 = vadd.f32 %v1868_v8, %v778_v59  ;;  %v1099_v63 = vadd.f32 %v1868_v8, %v818_v60  ;;  %v700_v0 = vpop.f32.mrf.mxu0 }
  0xd2   : > { %v740_v1 = vpop.f32.mrf.mxu1  ;;  %v1642_v2 = vpop.eup %1641  ;;  %1210 = vst [vmem:[%s1876_s19 + $0x118] sm:$0xff] %v1640_v61  ;;  %v1052_v3 = vadd.f32 %v1868_v8, %v700_v0 }
  0xd3   : > { %v1068_v4 = vadd.f32 %v1868_v8, %v740_v1  ;;  %v1644_v5 = vpop.eup %1643  ;;  %1226 = vst [vmem:[%s1876_s19 + $0x198] sm:$0xff] %v1642_v2  ;;  %1647 = vtanh.f32 %v1083_v62 }
  0xd4   : > { %v1646_v6 = vpop.eup %1645  ;;  %1179 = vst [vmem:[%s1876_s19 + $0x20] sm:$0xff] %v1644_v5  ;;  %1649 = vtanh.f32 %v1099_v63 }
  0xd5   : > { %1195 = vst [vmem:[%s1876_s19 + $0xa0] sm:$0xff] %v1646_v6  ;;  %1651 = vtanh.f32 %v1052_v3 }
  0xd6   : > { %1653 = vtanh.f32 %v1068_v4 }
  0xd8   : > { %v780_v7 = vpop.f32.mrf.mxu2  ;;  %v820_v9 = vpop.f32.mrf.mxu3 }
  0xd9   : > { %v1648_v10 = vpop.eup %1647  ;;  %v1084_v11 = vadd.f32 %v1868_v8, %v780_v7  ;;  %v1100_v12 = vadd.f32 %v1868_v8, %v820_v9  ;;  %v703_v13 = vpop.f32.mrf.mxu0 }
  0xda   : > { %v743_v14 = vpop.f32.mrf.mxu1  ;;  %v1650_v15 = vpop.eup %1649  ;;  %1211 = vst [vmem:[%s1876_s19 + $0x120] sm:$0xff] %v1648_v10  ;;  %v1053_v16 = vadd.f32 %v1868_v8, %v703_v13 }
  0xdb   : > { %v1069_v17 = vadd.f32 %v1868_v8, %v743_v14  ;;  %v1652_v18 = vpop.eup %1651  ;;  %1227 = vst [vmem:[%s1876_s19 + $0x1a0] sm:$0xff] %v1650_v15  ;;  %1655 = vtanh.f32 %v1084_v11 }
  0xdc   : > { %v1654_v19 = vpop.eup %1653  ;;  %1180 = vst [vmem:[%s1876_s19 + $0x28] sm:$0xff] %v1652_v18  ;;  %1657 = vtanh.f32 %v1100_v12 }
  0xdd   : > { %1196 = vst [vmem:[%s1876_s19 + $0xa8] sm:$0xff] %v1654_v19  ;;  %1659 = vtanh.f32 %v1053_v16 }
  0xde   : > { %1661 = vtanh.f32 %v1069_v17 }
  0xe0   : > { %v783_v20 = vpop.f32.mrf.mxu2  ;;  %v823_v21 = vpop.f32.mrf.mxu3 }
  0xe1   : > { %v1656_v22 = vpop.eup %1655  ;;  %v1085_v23 = vadd.f32 %v1868_v8, %v783_v20  ;;  %v1101_v24 = vadd.f32 %v1868_v8, %v823_v21  ;;  %v705_v25 = vpop.f32.mrf.mxu0 }
  0xe2   : > { %v745_v26 = vpop.f32.mrf.mxu1  ;;  %v1658_v27 = vpop.eup %1657  ;;  %1212 = vst [vmem:[%s1876_s19 + $0x128] sm:$0xff] %v1656_v22  ;;  %v1054_v28 = vadd.f32 %v1868_v8, %v705_v25 }
  0xe3   : > { %v1070_v29 = vadd.f32 %v1868_v8, %v745_v26  ;;  %v1660_v30 = vpop.eup %1659  ;;  %1228 = vst [vmem:[%s1876_s19 + $0x1a8] sm:$0xff] %v1658_v27  ;;  %1663 = vtanh.f32 %v1085_v23 }
  0xe4   : > { %v1662_v31 = vpop.eup %1661  ;;  %1181 = vst [vmem:[%s1876_s19 + $0x30] sm:$0xff] %v1660_v30  ;;  %1665 = vtanh.f32 %v1101_v24 }
  0xe5   : > { %1197 = vst [vmem:[%s1876_s19 + $0xb0] sm:$0xff] %v1662_v31  ;;  %1667 = vtanh.f32 %v1054_v28 }
  0xe6   : > { %1669 = vtanh.f32 %v1070_v29 }
  0xe8   : > { %v785_v32 = vpop.f32.mrf.mxu2  ;;  %v825_v33 = vpop.f32.mrf.mxu3 }
  0xe9   : > { %v1664_v34 = vpop.eup %1663  ;;  %v1086_v35 = vadd.f32 %v1868_v8, %v785_v32  ;;  %v1102_v36 = vadd.f32 %v1868_v8, %v825_v33  ;;  %v708_v37 = vpop.f32.mrf.mxu0 }
  0xea   : > { %v748_v38 = vpop.f32.mrf.mxu1  ;;  %v1666_v39 = vpop.eup %1665  ;;  %1213 = vst [vmem:[%s1876_s19 + $0x130] sm:$0xff] %v1664_v34  ;;  %v1055_v40 = vadd.f32 %v1868_v8, %v708_v37 }
  0xeb   : > { %v1071_v41 = vadd.f32 %v1868_v8, %v748_v38  ;;  %v1668_v42 = vpop.eup %1667  ;;  %1229 = vst [vmem:[%s1876_s19 + $0x1b0] sm:$0xff] %v1666_v39  ;;  %1671 = vtanh.f32 %v1086_v35 }
  0xec   : > { %v1670_v43 = vpop.eup %1669  ;;  %1182 = vst [vmem:[%s1876_s19 + $0x38] sm:$0xff] %v1668_v42  ;;  %1673 = vtanh.f32 %v1102_v36 }
  0xed   : > { %1198 = vst [vmem:[%s1876_s19 + $0xb8] sm:$0xff] %v1670_v43  ;;  %1675 = vtanh.f32 %v1055_v40 }
  0xee   : > { %1677 = vtanh.f32 %v1071_v41 }
  0xf0   : > { %v788_v44 = vpop.f32.mrf.mxu2  ;;  %v828_v45 = vpop.f32.mrf.mxu3 }
  0xf1   : > { %v1672_v46 = vpop.eup %1671  ;;  %v1087_v47 = vadd.f32 %v1868_v8, %v788_v44  ;;  %v1103_v48 = vadd.f32 %v1868_v8, %v828_v45  ;;  %v710_v49 = vpop.f32.mrf.mxu0 }
  0xf2   : > { %v750_v50 = vpop.f32.mrf.mxu1  ;;  %v1674_v51 = vpop.eup %1673  ;;  %1214 = vst [vmem:[%s1876_s19 + $0x138] sm:$0xff] %v1672_v46  ;;  %v1056_v52 = vadd.f32 %v1868_v8, %v710_v49 }
  0xf3   : > { %v1072_v53 = vadd.f32 %v1868_v8, %v750_v50  ;;  %v1676_v54 = vpop.eup %1675  ;;  %1230 = vst [vmem:[%s1876_s19 + $0x1b8] sm:$0xff] %v1674_v51  ;;  %1679 = vtanh.f32 %v1087_v47 }
  0xf4   : > { %v1678_v55 = vpop.eup %1677  ;;  %1183 = vst [vmem:[%s1876_s19 + $0x40] sm:$0xff] %v1676_v54  ;;  %1681 = vtanh.f32 %v1103_v48 }
  0xf5   : > { %1199 = vst [vmem:[%s1876_s19 + $0xc0] sm:$0xff] %v1678_v55  ;;  %1683 = vtanh.f32 %v1056_v52 }
  0xf6   : > { %1685 = vtanh.f32 %v1072_v53 }
  0xf8   : > { %v790_v56 = vpop.f32.mrf.mxu2  ;;  %v830_v57 = vpop.f32.mrf.mxu3 }
  0xf9   : > { %v1680_v58 = vpop.eup %1679  ;;  %v1088_v59 = vadd.f32 %v1868_v8, %v790_v56  ;;  %v1104_v60 = vadd.f32 %v1868_v8, %v830_v57  ;;  %v713_v61 = vpop.f32.mrf.mxu0 }
  0xfa   : > { %v753_v62 = vpop.f32.mrf.mxu1  ;;  %v1682_v63 = vpop.eup %1681  ;;  %1215 = vst [vmem:[%s1876_s19 + $0x140] sm:$0xff] %v1680_v58  ;;  %v1057_v0 = vadd.f32 %v1868_v8, %v713_v61 }
  0xfb   : > { %v1073_v1 = vadd.f32 %v1868_v8, %v753_v62  ;;  %v1684_v2 = vpop.eup %1683  ;;  %1231 = vst [vmem:[%s1876_s19 + $0x1c0] sm:$0xff] %v1682_v63  ;;  %1687 = vtanh.f32 %v1088_v59 }
  0xfc   : > { %v1686_v3 = vpop.eup %1685  ;;  %1184 = vst [vmem:[%s1876_s19 + $0x48] sm:$0xff] %v1684_v2  ;;  %1689 = vtanh.f32 %v1104_v60 }
  0xfd   : > { %1200 = vst [vmem:[%s1876_s19 + $0xc8] sm:$0xff] %v1686_v3  ;;  %1691 = vtanh.f32 %v1057_v0 }
  0xfe   : > { %1693 = vtanh.f32 %v1073_v1 }
 0x100   : > { %v793_v4 = vpop.f32.mrf.mxu2  ;;  %v833_v5 = vpop.f32.mrf.mxu3 }
 0x101   : > { %v1688_v6 = vpop.eup %1687  ;;  %v1089_v7 = vadd.f32 %v1868_v8, %v793_v4  ;;  %v1105_v9 = vadd.f32 %v1868_v8, %v833_v5  ;;  %v715_v10 = vpop.f32.mrf.mxu0 }
 0x102   : > { %v755_v11 = vpop.f32.mrf.mxu1  ;;  %v1690_v12 = vpop.eup %1689  ;;  %1216 = vst [vmem:[%s1876_s19 + $0x148] sm:$0xff] %v1688_v6  ;;  %v1058_v13 = vadd.f32 %v1868_v8, %v715_v10 }
 0x103   : > { %v1074_v14 = vadd.f32 %v1868_v8, %v755_v11  ;;  %v1692_v15 = vpop.eup %1691  ;;  %1232 = vst [vmem:[%s1876_s19 + $0x1c8] sm:$0xff] %v1690_v12  ;;  %1695 = vtanh.f32 %v1089_v7 }
 0x104   : > { %v1694_v16 = vpop.eup %1693  ;;  %1185 = vst [vmem:[%s1876_s19 + $0x50] sm:$0xff] %v1692_v15  ;;  %1697 = vtanh.f32 %v1105_v9 }
 0x105   : > { %1201 = vst [vmem:[%s1876_s19 + $0xd0] sm:$0xff] %v1694_v16  ;;  %1699 = vtanh.f32 %v1058_v13 }
 0x106   : > { %1701 = vtanh.f32 %v1074_v14 }
 0x108   : > { %v795_v17 = vpop.f32.mrf.mxu2  ;;  %v835_v18 = vpop.f32.mrf.mxu3 }
 0x109   : > { %v1696_v19 = vpop.eup %1695  ;;  %v1090_v20 = vadd.f32 %v1868_v8, %v795_v17  ;;  %v1106_v21 = vadd.f32 %v1868_v8, %v835_v18  ;;  %v718_v22 = vpop.f32.mrf.mxu0 }
 0x10a   : > { %v758_v23 = vpop.f32.mrf.mxu1  ;;  %v1698_v24 = vpop.eup %1697  ;;  %1217 = vst [vmem:[%s1876_s19 + $0x150] sm:$0xff] %v1696_v19  ;;  %v1059_v25 = vadd.f32 %v1868_v8, %v718_v22 }
 0x10b   : > { %v1075_v26 = vadd.f32 %v1868_v8, %v758_v23  ;;  %v1700_v27 = vpop.eup %1699  ;;  %1233 = vst [vmem:[%s1876_s19 + $0x1d0] sm:$0xff] %v1698_v24  ;;  %1703 = vtanh.f32 %v1090_v20 }
 0x10c   : > { %v1702_v28 = vpop.eup %1701  ;;  %1186 = vst [vmem:[%s1876_s19 + $0x58] sm:$0xff] %v1700_v27  ;;  %1705 = vtanh.f32 %v1106_v21 }
 0x10d   : > { %1202 = vst [vmem:[%s1876_s19 + $0xd8] sm:$0xff] %v1702_v28  ;;  %1707 = vtanh.f32 %v1059_v25 }
 0x10e   : > { %1709 = vtanh.f32 %v1075_v26 }
 0x110   : > { %v798_v29 = vpop.f32.mrf.mxu2  ;;  %v838_v30 = vpop.f32.mrf.mxu3 }
 0x111   : > { %v1704_v31 = vpop.eup %1703  ;;  %v1091_v32 = vadd.f32 %v1868_v8, %v798_v29  ;;  %v1107_v33 = vadd.f32 %v1868_v8, %v838_v30  ;;  %v720_v34 = vpop.f32.mrf.mxu0 }
 0x112   : > { %v760_v35 = vpop.f32.mrf.mxu1  ;;  %v1706_v36 = vpop.eup %1705  ;;  %1218 = vst [vmem:[%s1876_s19 + $0x158] sm:$0xff] %v1704_v31  ;;  %v1060_v37 = vadd.f32 %v1868_v8, %v720_v34 }
 0x113   : > { %v1076_v38 = vadd.f32 %v1868_v8, %v760_v35  ;;  %v1708_v39 = vpop.eup %1707  ;;  %1234 = vst [vmem:[%s1876_s19 + $0x1d8] sm:$0xff] %v1706_v36  ;;  %1711 = vtanh.f32 %v1091_v32 }
 0x114   : > { %v1710_v40 = vpop.eup %1709  ;;  %1187 = vst [vmem:[%s1876_s19 + $0x60] sm:$0xff] %v1708_v39  ;;  %1713 = vtanh.f32 %v1107_v33 }
 0x115   : > { %1203 = vst [vmem:[%s1876_s19 + $0xe0] sm:$0xff] %v1710_v40  ;;  %1715 = vtanh.f32 %v1060_v37 }
 0x116   : > { %1717 = vtanh.f32 %v1076_v38 }
 0x118   : > { %v800_v41 = vpop.f32.mrf.mxu2  ;;  %v840_v42 = vpop.f32.mrf.mxu3 }
 0x119   : > { %v1712_v43 = vpop.eup %1711  ;;  %v1092_v44 = vadd.f32 %v1868_v8, %v800_v41  ;;  %v1108_v45 = vadd.f32 %v1868_v8, %v840_v42  ;;  %v723_v46 = vpop.f32.mrf.mxu0 }
 0x11a   : > { %v763_v47 = vpop.f32.mrf.mxu1  ;;  %v1714_v48 = vpop.eup %1713  ;;  %1219 = vst [vmem:[%s1876_s19 + $0x160] sm:$0xff] %v1712_v43  ;;  %v1061_v49 = vadd.f32 %v1868_v8, %v723_v46 }
 0x11b   : > { %v1077_v50 = vadd.f32 %v1868_v8, %v763_v47  ;;  %v1716_v51 = vpop.eup %1715  ;;  %1235 = vst [vmem:[%s1876_s19 + $0x1e0] sm:$0xff] %v1714_v48  ;;  %1719 = vtanh.f32 %v1092_v44 }
 0x11c   : > { %v1718_v52 = vpop.eup %1717  ;;  %1188 = vst [vmem:[%s1876_s19 + $0x68] sm:$0xff] %v1716_v51  ;;  %1721 = vtanh.f32 %v1108_v45 }
 0x11d   : > { %1204 = vst [vmem:[%s1876_s19 + $0xe8] sm:$0xff] %v1718_v52  ;;  %1723 = vtanh.f32 %v1061_v49 }
 0x11e   : > { %1725 = vtanh.f32 %v1077_v50 }
 0x120   : > { %v803_v53 = vpop.f32.mrf.mxu2  ;;  %v843_v54 = vpop.f32.mrf.mxu3 }
 0x121   : > { %v1720_v55 = vpop.eup %1719  ;;  %v1093_v56 = vadd.f32 %v1868_v8, %v803_v53  ;;  %v1109_v57 = vadd.f32 %v1868_v8, %v843_v54  ;;  %v725_v58 = vpop.f32.mrf.mxu0 }
 0x122   : > { %v765_v59 = vpop.f32.mrf.mxu1  ;;  %v1722_v60 = vpop.eup %1721  ;;  %1220 = vst [vmem:[%s1876_s19 + $0x168] sm:$0xff] %v1720_v55  ;;  %v1062_v61 = vadd.f32 %v1868_v8, %v725_v58 }
 0x123   : > { %v1078_v62 = vadd.f32 %v1868_v8, %v765_v59  ;;  %v1724_v63 = vpop.eup %1723  ;;  %1236 = vst [vmem:[%s1876_s19 + $0x1e8] sm:$0xff] %v1722_v60  ;;  %1727 = vtanh.f32 %v1093_v56 }
 0x124   : > { %v1726_v0 = vpop.eup %1725  ;;  %1189 = vst [vmem:[%s1876_s19 + $0x70] sm:$0xff] %v1724_v63  ;;  %1729 = vtanh.f32 %v1109_v57 }
 0x125   : > { %1205 = vst [vmem:[%s1876_s19 + $0xf0] sm:$0xff] %v1726_v0  ;;  %1731 = vtanh.f32 %v1062_v61 }
 0x126   : > { %1733 = vtanh.f32 %v1078_v62 }
 0x128   : > { %v805_v1 = vpop.f32.mrf.mxu2  ;;  %v845_v2 = vpop.f32.mrf.mxu3 }
 0x129   : > { %v1728_v3 = vpop.eup %1727  ;;  %v1094_v4 = vadd.f32 %v1868_v8, %v805_v1  ;;  %v1110_v5 = vadd.f32 %v1868_v8, %v845_v2 }
 0x12a   : > { %v1730_v6 = vpop.eup %1729  ;;  %1221 = vst [vmem:[%s1876_s19 + $0x170] sm:$0xff] %v1728_v3 }
 0x12b   : > { %v1732_v7 = vpop.eup %1731  ;;  %1237 = vst [vmem:[%s1876_s19 + $0x1f0] sm:$0xff] %v1730_v6  ;;  %1735 = vtanh.f32 %v1094_v4 }
 0x12c   : > { %v1734_v9 = vpop.eup %1733  ;;  %1190 = vst [vmem:[%s1876_s19 + $0x78] sm:$0xff] %v1732_v7  ;;  %1737 = vtanh.f32 %v1110_v5 }
 0x12d   : > { %1206 = vst [vmem:[%s1876_s19 + $0xf8] sm:$0xff] %v1734_v9 }
 0x131   : > { %v1736_v10 = vpop.eup %1735 }
 0x132   : > { %v1738_v11 = vpop.eup %1737  ;;  %1222 = vst [vmem:[%s1876_s19 + $0x178] sm:$0xff] %v1736_v10 }
 0x133   : > { %1238 = vst [vmem:[%s1876_s19 + $0x1f8] sm:$0xff] %v1738_v11 }
 0x134 PF: > { %s13_s14 = sadd.s32 1, %s1761_s14   ;;  %s2017_s12 = smov %s1757_s13 }
 0x135   : > { %p10_p5 = scmp.ge.s32.totalorder %s13_s14, 4   ;;  %s2018_s13 = smov %s2020_s15 }
 0x137   :  { %12 = sbr.rel (!%p10_p5) target bundleno = 2 (0x2), region = 76 }

</bundles_post_ra>
